<compile_context>
chip_gen: v7x
topology: tpu7x:2x2x1
jax: 0.10.0
libtpu: 0.0.40
codegen_flags: <defaults>
</compile_context>

<pallas_src>
import functools

import jax
import jax.numpy as jnp
from jax import lax
from jax.experimental import pallas as pl
from jax.experimental.pallas import tpu as pltpu


def _round_up(x, m):
    return ((x + m - 1) // m) * m


# ---------------------------------------------------------------------------
# Kernel: zero-padded dense 3x3 conv with folded weights, planar NCHW tiles.
# ---------------------------------------------------------------------------
def _make_kernel(cin, cout, th, wp, wstrip):
    """Build the kernel body for static (Cin, Cout, TH, Wp, Wstrip)."""
    nk = 9 * cin * cout

    def kernel(xp_ref, top_ref, bot_ref, k_ref, b_ref, o_ref, tap_ref):
        # xp_ref:  (1, Cin, TH, Wp)      row tile of the column-padded input
        # top_ref: (1, 1, Cin, 1, Wp)    input row just above the tile (zeros at top)
        # bot_ref: (1, 1, Cin, 1, Wp)    input row just below the tile (zeros at bottom)
        # k_ref:   SMEM (9*Cin*Cout,)    folded weights, idx = ((dh*3+dw)*Cin+ci)*Cout+co
        # b_ref:   SMEM (Cout,)          folded bias
        # o_ref:   (1, Cout, TH, Wp)     output row tile
        # tap_ref: VMEM (3*Cin, TH, Wp+128) row-shifted tap slabs (scratch)
        f32 = jnp.float32

        # Zero the 128-lane tail of the tap scratch every step (it is only read
        # into output columns that the wrapper slices off, but keep it finite /
        # deterministic).  Must NOT be gated on program_id==0: both grid axes
        # are "parallel", so scratch persistence is per-core.
        tap_ref[:, :, pl.ds(wp, 128)] = jnp.zeros((3 * cin, th, 128), f32)

        # Build the three row-shifted, lane-aligned tap slabs per input channel.
        # All big stores are lane-aligned (offset 0); the only sublane-crossing
        # copies are the two (TH-1)-row shifted strips per channel (~3% of the
        # per-step work, on vld/vst/XLU slots which have slack).
        for ci in range(cin):
            base = 3 * ci
            # dh = 1 : rows r (center)
            tap_ref[base + 1, :, pl.ds(0, wp)] = xp_ref[0, ci]
            # dh = 0 : rows r-1 (row 0 <- halo row above the tile)
            tap_ref[base + 0, pl.ds(0, 1), pl.ds(0, wp)] = top_ref[0, 0, ci]
            tap_ref[base + 0, pl.ds(1, th - 1), pl.ds(0, wp)] = (
                xp_ref[0, ci, pl.ds(0, th - 1), :])
            # dh = 2 : rows r+1 (row TH-1 <- halo row below the tile)
            tap_ref[base + 2, pl.ds(0, th - 1), pl.ds(0, wp)] = (
                xp_ref[0, ci, pl.ds(1, th - 1), :])
            tap_ref[base + 2, pl.ds(th - 1, 1), pl.ds(0, wp)] = bot_ref[0, 0, ci]

        # Hoist every SMEM scalar read out of the unrolled FMA sequence
        # (one sld per weight per grid step).
        kv = [k_ref[i] for i in range(nk)]
        bv = [b_ref[c] for c in range(cout)]

        # Folded 3x3 conv as a VPU stencil: co outermost, one live accumulator
        # per W strip (no accumulator spills); taps re-read from VMEM per co.
        # NOTE: bf16 multiplies (v6e/v7x) or a stacked-tap MXU matmul (v5e /
        # large Cin*Cout) would go here; kept f32 to match the reference.
        for ws in range(0, wp, wstrip):
            wlen = min(wstrip, wp - ws)
            for co in range(cout):
                acc = jnp.full((th, wlen), bv[co], f32)
                for ci in range(cin):
                    for dh in range(3):
                        row = 3 * ci + dh
                        for dw in range(3):
                            tap = tap_ref[row, :, pl.ds(ws + dw, wlen)]
                            acc = acc + kv[((dh * 3 + dw) * cin + ci) * cout + co] * tap
                # Lane-dense, 128-aligned store of one output-channel strip.
                o_ref[0, co, :, pl.ds(ws, wlen)] = acc

    return kernel


# ---------------------------------------------------------------------------
# Weight folding (exact; mirrors the module's rep_params()).
# ---------------------------------------------------------------------------
def _fold_params(params, seq_type):
    """Fold the 1x1 conv into the 3x3 conv -> (k_eff (9,Cin,Out), b_eff (Out,))."""
    if seq_type == "conv1x1-conv3x3":
        k0, b0, k1, b1 = params            # (Cin,Mid), (Mid,), (9,Mid,Out), (Out,)
        k_eff = jnp.einsum("cm,tmo->tco", k0, k1)
        b_eff = b1 + jnp.einsum("m,tmo->o", b0, k1)
    else:                                  # depthwise scale*mask branches
        k0, b0, w9, bias = params          # (Cin,Out), (Out,), (9,Out), (Out,)
        k_eff = k0[None, :, :] * w9[:, None, :]
        b_eff = bias + b0 * jnp.sum(w9, axis=0)
    return k_eff.astype(jnp.float32), b_eff.astype(jnp.float32)


# ---------------------------------------------------------------------------
# Generation-aware tiling plan.
# ---------------------------------------------------------------------------
def _plan(n, cin, cout, h, w, tile_rows=None):
    wp = _round_up(w + 2, 128)             # padded width: zero border + lane padding
    try:
        vmem_bytes = int(pltpu.get_tpu_info().vmem_capacity_bytes)
    except Exception:
        vmem_bytes = 64 * 1024 * 1024      # conservative (v7x) fallback

    def footprint(th_):
        # double-buffered in + out blocks, halo blocks, tap scratch (bytes).
        return 4 * (2 * cin * th_ * wp + 2 * cout * th_ * wp
                    + 4 * cin * wp + 3 * cin * th_ * (wp + 128))

    if tile_rows is None:
        budget = int(0.4 * vmem_bytes)
        h8 = _round_up(h, 8)
        best = None
        for cand in range(8, min(256, h8) + 1, 8):
            if footprint(cand) > budget:
                break
            key = (_round_up(h, cand), -cand)   # minimize padded rows, prefer larger TH
            if best is None or key < best[1]:
                best = (cand, key)
        th = best[0] if best is not None else 8
        # v7x megacore: keep >= ~8 grid steps so both TensorCores stay busy.
        while n * pl.cdiv(h, th) < 8 and th > 8:
            th = max(8, ((th // 2) // 8) * 8)
    else:
        th = int(tile_rows)
        assert th >= 8 and th % 8 == 0, "tile_rows must be a multiple of 8"

    hp = _round_up(h, th)
    nt = hp // th
    # W strip so the single live (TH, Wstrip) f32 accumulator stays <= ~16 vregs.
    wstrip = min(wp, max(128, ((16 * 1024) // th) // 128 * 128))
    vmem_limit = int(min(0.9 * vmem_bytes, max(2 * footprint(th), 16 * 2 ** 20)))
    return th, hp, nt, wp, wstrip, vmem_limit


# ---------------------------------------------------------------------------
# pallas_call wrapper.
# ---------------------------------------------------------------------------
@functools.partial(jax.jit,
                   static_argnames=("th", "hp", "nt", "wp", "wstrip", "vmem_limit"))
def _seqconv_impl(x, k_flat, b_eff, *, th, hp, nt, wp, wstrip, vmem_limit):
    n, cin, h, w = x.shape
    cout = b_eff.shape[0]
    f32 = jnp.float32

    # Column/row padded planar input: column 0 and columns W+1.. are the conv's
    # zero border (and lane padding); rows H.. are the bottom zero border.
    xp = jnp.zeros((n, cin, hp, wp), f32).at[:, :, :h, 1:w + 1].set(x.astype(f32))

    # Halo rows for each row tile, pre-gathered so all BlockSpecs stay Blocked:
    #   top[:, i] = padded-input row i*TH - 1  (zeros for the first tile)
    #   bot[:, i] = padded-input row (i+1)*TH  (zeros for the last tile)
    zrow = jnp.zeros((n, 1, cin, 1, wp), f32)
    if nt > 1:
        top_rows = jnp.transpose(xp[:, :, th - 1::th, :][:, :, :nt - 1, :],
                                 (0, 2, 1, 3))[:, :, :, None, :]
        bot_rows = jnp.transpose(xp[:, :, th::th, :], (0, 2, 1, 3))[:, :, :, None, :]
        top = jnp.concatenate([zrow, top_rows], axis=1)    # (N, nt, Cin, 1, Wp)
        bot = jnp.concatenate([bot_rows, zrow], axis=1)    # (N, nt, Cin, 1, Wp)
    else:
        top, bot = zrow, zrow

    kernel = _make_kernel(cin, cout, th, wp, wstrip)
    out = pl.pallas_call(
        kernel,
        out_shape=jax.ShapeDtypeStruct((n, cout, hp, wp), f32),
        grid_spec=pltpu.PrefetchScalarGridSpec(
            num_scalar_prefetch=0,
            grid=(n, nt),
            in_specs=[
                pl.BlockSpec((1, cin, th, wp), lambda b, i: (b, 0, i, 0)),
                pl.BlockSpec((1, 1, cin, 1, wp), lambda b, i: (b, i, 0, 0, 0)),
                pl.BlockSpec((1, 1, cin, 1, wp), lambda b, i: (b, i, 0, 0, 0)),
                pl.BlockSpec(memory_space=pltpu.MemorySpace.SMEM),  # folded weights
                pl.BlockSpec(memory_space=pltpu.MemorySpace.SMEM),  # folded bias
            ],
            out_specs=pl.BlockSpec((1, cout, th, wp), lambda b, i: (b, 0, i, 0)),
            scratch_shapes=[pltpu.VMEM((3 * cin, th, wp + 128), f32)],
        ),
        compiler_params=pltpu.CompilerParams(
            # Independent (batch, row-tile) work items -> megacore sharding.
            dimension_semantics=("parallel", "parallel"),
            vmem_limit_bytes=vmem_limit,
        ),
        cost_estimate=pl.CostEstimate(
            flops=2 * n * hp * wp * 9 * cin * cout,
            transcendentals=0,
            bytes_accessed=4 * (n * hp * wp * (cin + cout)
                                + 2 * n * nt * cin * wp + 9 * cin * cout + cout),
        ),
    )(xp, top, bot, k_flat, b_eff)

    # Layout plumbing only: drop the padded rows / columns.
    return out[:, :, :h, :w]


def seq_conv3x3(x, params, seq_type, tile_rows=None):
    """SeqConv3x3 forward.  x: (N, Cin, H, W) float32 (NCHW, PyTorch layout)."""
    x = jnp.asarray(x, jnp.float32)
    n, cin, h, w = x.shape
    k_eff, b_eff = _fold_params(params, seq_type)
    cout = int(k_eff.shape[2])
    th, hp, nt, wp, wstrip, vmem_limit = _plan(n, cin, cout, h, w, tile_rows)
    return _seqconv_impl(x, k_eff.reshape(-1), b_eff,
                         th=th, hp=hp, nt=nt, wp=wp, wstrip=wstrip,
                         vmem_limit=vmem_limit)


# ---------------------------------------------------------------------------
# Pure-JAX reference mirroring the (unfolded) PyTorch forward, NCHW.
# ---------------------------------------------------------------------------
def reference(x, params, seq_type):
    n, cin, h, w = x.shape
    if seq_type == "conv1x1-conv3x3":
        k0, b0, k1, b1 = params
        mid, out = k0.shape[1], k1.shape[2]
        y0 = jnp.einsum("nchw,cm->nmhw", x, k0) + b0[None, :, None, None]
        y0p = jnp.broadcast_to(b0[None, :, None, None], (n, mid, h + 2, w + 2))
        y0p = y0p.at[:, :, 1:h + 1, 1:w + 1].set(y0)     # border == b0, like PyTorch
        wgt = jnp.transpose(k1.reshape(3, 3, mid, out), (3, 2, 0, 1))   # OIHW
        y1 = lax.conv_general_dilated(
            y0p, wgt, (1, 1), "VALID",
            dimension_numbers=("NCHW", "OIHW", "NCHW")) + b1[None, :, None, None]
    else:
        k0, b0, w9, bias = params
        out = k0.shape[1]
        y0 = jnp.einsum("nchw,co->nohw", x, k0) + b0[None, :, None, None]
        y0p = jnp.broadcast_to(b0[None, :, None, None], (n, out, h + 2, w + 2))
        y0p = y0p.at[:, :, 1:h + 1, 1:w + 1].set(y0)
        wgt = jnp.transpose(w9.reshape(3, 3, out), (2, 0, 1))[:, None, :, :]  # (Out,1,3,3)
        y1 = lax.conv_general_dilated(
            y0p, wgt, (1, 1), "VALID",
            dimension_numbers=("NCHW", "OIHW", "NCHW"),
            feature_group_count=out) + bias[None, :, None, None]
    return y1


if __name__ == "__main__":
    key = jax.random.PRNGKey(0)
    n, cin, h, w = 2, 4, 16, 16
    out_planes, depth_multiplier = 8, 2
    mid = out_planes * depth_multiplier
    ks = jax.random.split(key, 10)
    x = jax.random.normal(ks[0], (n, cin, h, w), jnp.float32)

    # ---- branch 1: 'conv1x1-conv3x3' ----
    # Weight layout vs torch: k0 = conv0.weight[:, :, 0, 0].T -> (Cin, Mid);
    # k1 = conv1.weight transposed to (kh*3+kw, Mid, Out).
    k0 = jax.random.normal(ks[1], (cin, mid), jnp.float32) * 0.1
    b0 = jax.random.normal(ks[2], (mid,), jnp.float32) * 0.1
    k1 = jax.random.normal(ks[3], (9, mid, out_planes), jnp.float32) * 0.1
    b1 = jax.random.normal(ks[4], (out_planes,), jnp.float32) * 0.1
    p1 = (k0, b0, k1, b1)

    out1 = seq_conv3x3(x, p1, "conv1x1-conv3x3")
    jax.block_until_ready(out1)
    ref1 = reference(x, p1, "conv1x1-conv3x3")
    assert out1.shape == (n, out_planes, h, w)
    assert jnp.allclose(out1, ref1, atol=1e-4, rtol=1e-4), "conv1x1-conv3x3 mismatch"

    # ---- branch 2: 'conv1x1-sobelx' (depthwise scale*mask conv) ----
    # sobely / laplacian / subBlur only change the constant mask below (glue).
    k0s = jax.random.normal(ks[5], (cin, out_planes), jnp.float32) * 0.1
    b0s = jax.random.normal(ks[6], (out_planes,), jnp.float32) * 0.1
    scale = jax.random.normal(ks[7], (out_planes,), jnp.float32) * 0.001
    bias = jax.random.normal(ks[8], (out_planes,), jnp.float32) * 0.001
    sobelx = jnp.array([[1.0, 0.0, -1.0],
                        [2.0, 0.0, -2.0],
                        [1.0, 0.0, -1.0]], jnp.float32)
    w9 = sobelx.reshape(9, 1) * scale.reshape(1, out_planes)   # (9, Out) = scale * mask
    p2 = (k0s, b0s, w9, bias)

    out2 = seq_conv3x3(x, p2, "conv1x1-sobelx")
    jax.block_until_ready(out2)
    ref2 = reference(x, p2, "conv1x1-sobelx")
    assert out2.shape == (n, out_planes, h, w)
    assert jnp.allclose(out2, ref2, atol=1e-4, rtol=1e-4), "conv1x1-sobelx mismatch"

    print("KERNEL_OK")
</pallas_src>

<mosaic_0001>
module attributes {stable_mosaic.version = 11 : i64} {
  func.func @kernel(%arg0: i32, %arg1: i32, %arg2: memref<1x4x8x128xf32, #tpu.memory_space<vmem>>, %arg3: memref<1x1x4x1x128xf32, #tpu.memory_space<vmem>>, %arg4: memref<1x1x4x1x128xf32, #tpu.memory_space<vmem>>, %arg5: memref<288xf32, #tpu.memory_space<smem>>, %arg6: memref<8xf32, #tpu.memory_space<smem>>, %arg7: memref<1x8x8x128xf32, #tpu.memory_space<vmem>>, %arg8: memref<12x8x256xf32, #tpu.memory_space<vmem>>) attributes {dimension_semantics = [#tpu.dimension_semantics<parallel>, #tpu.dimension_semantics<parallel>], iteration_bounds = array<i64: 2, 2>, scalar_prefetch = 0 : i64, scratch_operands = 1 : i64, tpu.core_type = #tpu.core_type<tc>, window_params = [{transform_indices = @transform_0, window_bounds = array<i64: 1, 4, 8, 128>}, {transform_indices = @transform_1, window_bounds = array<i64: 1, 1, 4, 1, 128>}, {transform_indices = @transform_2, window_bounds = array<i64: 1, 1, 4, 1, 128>}, {transform_indices = @transform_3, window_bounds = array<i64: 288>}, {transform_indices = @transform_4, window_bounds = array<i64: 8>}, {transform_indices = @transform_5, window_bounds = array<i64: 1, 8, 8, 128>}]} {
    %cst = arith.constant 0.000000e+00 : f32
    %0 = vector.broadcast %cst : f32 to vector<12x8x128xf32>
    %c0 = arith.constant 0 : index
    %c0_0 = arith.constant 0 : index
    %c128 = arith.constant 128 : index
    %1 = vector.load %arg8[%c0, %c0_0, %c128] : memref<12x8x256xf32, #tpu.memory_space<vmem>>, vector<12x8x128xf32>
    tpu.vector_store %arg8[%c0, %c0_0, %c128], %0 {strides = array<i32>} : memref<12x8x256xf32, #tpu.memory_space<vmem>>, vector<12x8x128xf32>,
    %c0_1 = arith.constant 0 : index
    %c0_2 = arith.constant 0 : index
    %c0_3 = arith.constant 0 : index
    %c0_4 = arith.constant 0 : index
    %2 = vector.load %arg2[%c0_1, %c0_2, %c0_3, %c0_4] : memref<1x4x8x128xf32, #tpu.memory_space<vmem>>, vector<1x1x8x128xf32>
    %3 = vector.shape_cast %2 : vector<1x1x8x128xf32> to vector<8x128xf32>
    %c1 = arith.constant 1 : index
    %c0_5 = arith.constant 0 : index
    %c0_6 = arith.constant 0 : index
    %4 = vector.load %arg8[%c1, %c0_5, %c0_6] : memref<12x8x256xf32, #tpu.memory_space<vmem>>, vector<1x8x128xf32>
    %5 = vector.shape_cast %4 : vector<1x8x128xf32> to vector<8x128xf32>
    %6 = vector.shape_cast %3 : vector<8x128xf32> to vector<1x8x128xf32>
    tpu.vector_store %arg8[%c1, %c0_5, %c0_6], %6 {strides = array<i32>} : memref<12x8x256xf32, #tpu.memory_space<vmem>>, vector<1x8x128xf32>,
    %c0_7 = arith.constant 0 : index
    %c0_8 = arith.constant 0 : index
    %c0_9 = arith.constant 0 : index
    %c0_10 = arith.constant 0 : index
    %c0_11 = arith.constant 0 : index
    %7 = vector.load %arg3[%c0_7, %c0_8, %c0_9, %c0_10, %c0_11] : memref<1x1x4x1x128xf32, #tpu.memory_space<vmem>>, vector<1x1x1x1x128xf32>
    %8 = vector.shape_cast %7 : vector<1x1x1x1x128xf32> to vector<1x128xf32>
    %c0_12 = arith.constant 0 : index
    %c0_13 = arith.constant 0 : index
    %c0_14 = arith.constant 0 : index
    %9 = vector.load %arg8[%c0_12, %c0_13, %c0_14] : memref<12x8x256xf32, #tpu.memory_space<vmem>>, vector<1x1x128xf32>
    %10 = vector.shape_cast %9 : vector<1x1x128xf32> to vector<1x128xf32>
    %11 = vector.shape_cast %8 : vector<1x128xf32> to vector<1x1x128xf32>
    tpu.vector_store %arg8[%c0_12, %c0_13, %c0_14], %11 {strides = array<i32>} : memref<12x8x256xf32, #tpu.memory_space<vmem>>, vector<1x1x128xf32>,
    %c0_15 = arith.constant 0 : index
    %c0_16 = arith.constant 0 : index
    %c0_17 = arith.constant 0 : index
    %c0_18 = arith.constant 0 : index
    %12 = vector.load %arg2[%c0_15, %c0_16, %c0_17, %c0_18] : memref<1x4x8x128xf32, #tpu.memory_space<vmem>>, vector<1x1x7x128xf32>
    %13 = vector.shape_cast %12 : vector<1x1x7x128xf32> to vector<7x128xf32>
    %c0_19 = arith.constant 0 : index
    %c1_20 = arith.constant 1 : index
    %c0_21 = arith.constant 0 : index
    %14 = vector.load %arg8[%c0_19, %c1_20, %c0_21] : memref<12x8x256xf32, #tpu.memory_space<vmem>>, vector<1x7x128xf32>
    %15 = vector.shape_cast %14 : vector<1x7x128xf32> to vector<7x128xf32>
    %16 = vector.shape_cast %13 : vector<7x128xf32> to vector<1x7x128xf32>
    tpu.vector_store %arg8[%c0_19, %c1_20, %c0_21], %16 {strides = array<i32>} : memref<12x8x256xf32, #tpu.memory_space<vmem>>, vector<1x7x128xf32>,
    %c0_22 = arith.constant 0 : index
    %c0_23 = arith.constant 0 : index
    %c1_24 = arith.constant 1 : index
    %c0_25 = arith.constant 0 : index
    %17 = vector.load %arg2[%c0_22, %c0_23, %c1_24, %c0_25] : memref<1x4x8x128xf32, #tpu.memory_space<vmem>>, vector<1x1x7x128xf32>
    %18 = vector.shape_cast %17 : vector<1x1x7x128xf32> to vector<7x128xf32>
    %c2 = arith.constant 2 : index
    %c0_26 = arith.constant 0 : index
    %c0_27 = arith.constant 0 : index
    %19 = vector.load %arg8[%c2, %c0_26, %c0_27] : memref<12x8x256xf32, #tpu.memory_space<vmem>>, vector<1x7x128xf32>
    %20 = vector.shape_cast %19 : vector<1x7x128xf32> to vector<7x128xf32>
    %21 = vector.shape_cast %18 : vector<7x128xf32> to vector<1x7x128xf32>
    tpu.vector_store %arg8[%c2, %c0_26, %c0_27], %21 {strides = array<i32>} : memref<12x8x256xf32, #tpu.memory_space<vmem>>, vector<1x7x128xf32>,
    %c0_28 = arith.constant 0 : index
    %c0_29 = arith.constant 0 : index
    %c0_30 = arith.constant 0 : index
    %c0_31 = arith.constant 0 : index
    %c0_32 = arith.constant 0 : index
    %22 = vector.load %arg4[%c0_28, %c0_29, %c0_30, %c0_31, %c0_32] : memref<1x1x4x1x128xf32, #tpu.memory_space<vmem>>, vector<1x1x1x1x128xf32>
    %23 = vector.shape_cast %22 : vector<1x1x1x1x128xf32> to vector<1x128xf32>
    %c2_33 = arith.constant 2 : index
    %c7 = arith.constant 7 : index
    %c0_34 = arith.constant 0 : index
    %24 = vector.load %arg8[%c2_33, %c7, %c0_34] : memref<12x8x256xf32, #tpu.memory_space<vmem>>, vector<1x1x128xf32>
    %25 = vector.shape_cast %24 : vector<1x1x128xf32> to vector<1x128xf32>
    %26 = vector.shape_cast %23 : vector<1x128xf32> to vector<1x1x128xf32>
    tpu.vector_store %arg8[%c2_33, %c7, %c0_34], %26 {strides = array<i32>} : memref<12x8x256xf32, #tpu.memory_space<vmem>>, vector<1x1x128xf32>,
    %c0_35 = arith.constant 0 : index
    %c1_36 = arith.constant 1 : index
    %c0_37 = arith.constant 0 : index
    %c0_38 = arith.constant 0 : index
    %27 = vector.load %arg2[%c0_35, %c1_36, %c0_37, %c0_38] : memref<1x4x8x128xf32, #tpu.memory_space<vmem>>, vector<1x1x8x128xf32>
    %28 = vector.shape_cast %27 : vector<1x1x8x128xf32> to vector<8x128xf32>
    %c4 = arith.constant 4 : index
    %c0_39 = arith.constant 0 : index
    %c0_40 = arith.constant 0 : index
    %29 = vector.load %arg8[%c4, %c0_39, %c0_40] : memref<12x8x256xf32, #tpu.memory_space<vmem>>, vector<1x8x128xf32>
    %30 = vector.shape_cast %29 : vector<1x8x128xf32> to vector<8x128xf32>
    %31 = vector.shape_cast %28 : vector<8x128xf32> to vector<1x8x128xf32>
    tpu.vector_store %arg8[%c4, %c0_39, %c0_40], %31 {strides = array<i32>} : memref<12x8x256xf32, #tpu.memory_space<vmem>>, vector<1x8x128xf32>,
    %c0_41 = arith.constant 0 : index
    %c0_42 = arith.constant 0 : index
    %c1_43 = arith.constant 1 : index
    %c0_44 = arith.constant 0 : index
    %c0_45 = arith.constant 0 : index
    %32 = vector.load %arg3[%c0_41, %c0_42, %c1_43, %c0_44, %c0_45] : memref<1x1x4x1x128xf32, #tpu.memory_space<vmem>>, vector<1x1x1x1x128xf32>
    %33 = vector.shape_cast %32 : vector<1x1x1x1x128xf32> to vector<1x128xf32>
    %c3 = arith.constant 3 : index
    %c0_46 = arith.constant 0 : index
    %c0_47 = arith.constant 0 : index
    %34 = vector.load %arg8[%c3, %c0_46, %c0_47] : memref<12x8x256xf32, #tpu.memory_space<vmem>>, vector<1x1x128xf32>
    %35 = vector.shape_cast %34 : vector<1x1x128xf32> to vector<1x128xf32>
    %36 = vector.shape_cast %33 : vector<1x128xf32> to vector<1x1x128xf32>
    tpu.vector_store %arg8[%c3, %c0_46, %c0_47], %36 {strides = array<i32>} : memref<12x8x256xf32, #tpu.memory_space<vmem>>, vector<1x1x128xf32>,
    %c0_48 = arith.constant 0 : index
    %c1_49 = arith.constant 1 : index
    %c0_50 = arith.constant 0 : index
    %c0_51 = arith.constant 0 : index
    %37 = vector.load %arg2[%c0_48, %c1_49, %c0_50, %c0_51] : memref<1x4x8x128xf32, #tpu.memory_space<vmem>>, vector<1x1x7x128xf32>
    %38 = vector.shape_cast %37 : vector<1x1x7x128xf32> to vector<7x128xf32>
    %c3_52 = arith.constant 3 : index
    %c1_53 = arith.constant 1 : index
    %c0_54 = arith.constant 0 : index
    %39 = vector.load %arg8[%c3_52, %c1_53, %c0_54] : memref<12x8x256xf32, #tpu.memory_space<vmem>>, vector<1x7x128xf32>
    %40 = vector.shape_cast %39 : vector<1x7x128xf32> to vector<7x128xf32>
    %41 = vector.shape_cast %38 : vector<7x128xf32> to vector<1x7x128xf32>
    tpu.vector_store %arg8[%c3_52, %c1_53, %c0_54], %41 {strides = array<i32>} : memref<12x8x256xf32, #tpu.memory_space<vmem>>, vector<1x7x128xf32>,
    %c0_55 = arith.constant 0 : index
    %c1_56 = arith.constant 1 : index
    %c1_57 = arith.constant 1 : index
    %c0_58 = arith.constant 0 : index
    %42 = vector.load %arg2[%c0_55, %c1_56, %c1_57, %c0_58] : memref<1x4x8x128xf32, #tpu.memory_space<vmem>>, vector<1x1x7x128xf32>
    %43 = vector.shape_cast %42 : vector<1x1x7x128xf32> to vector<7x128xf32>
    %c5 = arith.constant 5 : index
    %c0_59 = arith.constant 0 : index
    %c0_60 = arith.constant 0 : index
    %44 = vector.load %arg8[%c5, %c0_59, %c0_60] : memref<12x8x256xf32, #tpu.memory_space<vmem>>, vector<1x7x128xf32>
    %45 = vector.shape_cast %44 : vector<1x7x128xf32> to vector<7x128xf32>
    %46 = vector.shape_cast %43 : vector<7x128xf32> to vector<1x7x128xf32>
    tpu.vector_store %arg8[%c5, %c0_59, %c0_60], %46 {strides = array<i32>} : memref<12x8x256xf32, #tpu.memory_space<vmem>>, vector<1x7x128xf32>,
    %c0_61 = arith.constant 0 : index
    %c0_62 = arith.constant 0 : index
    %c1_63 = arith.constant 1 : index
    %c0_64 = arith.constant 0 : index
    %c0_65 = arith.constant 0 : index
    %47 = vector.load %arg4[%c0_61, %c0_62, %c1_63, %c0_64, %c0_65] : memref<1x1x4x1x128xf32, #tpu.memory_space<vmem>>, vector<1x1x1x1x128xf32>
    %48 = vector.shape_cast %47 : vector<1x1x1x1x128xf32> to vector<1x128xf32>
    %c5_66 = arith.constant 5 : index
    %c7_67 = arith.constant 7 : index
    %c0_68 = arith.constant 0 : index
    %49 = vector.load %arg8[%c5_66, %c7_67, %c0_68] : memref<12x8x256xf32, #tpu.memory_space<vmem>>, vector<1x1x128xf32>
    %50 = vector.shape_cast %49 : vector<1x1x128xf32> to vector<1x128xf32>
    %51 = vector.shape_cast %48 : vector<1x128xf32> to vector<1x1x128xf32>
    tpu.vector_store %arg8[%c5_66, %c7_67, %c0_68], %51 {strides = array<i32>} : memref<12x8x256xf32, #tpu.memory_space<vmem>>, vector<1x1x128xf32>,
    %c0_69 = arith.constant 0 : index
    %c2_70 = arith.constant 2 : index
    %c0_71 = arith.constant 0 : index
    %c0_72 = arith.constant 0 : index
    %52 = vector.load %arg2[%c0_69, %c2_70, %c0_71, %c0_72] : memref<1x4x8x128xf32, #tpu.memory_space<vmem>>, vector<1x1x8x128xf32>
    %53 = vector.shape_cast %52 : vector<1x1x8x128xf32> to vector<8x128xf32>
    %c7_73 = arith.constant 7 : index
    %c0_74 = arith.constant 0 : index
    %c0_75 = arith.constant 0 : index
    %54 = vector.load %arg8[%c7_73, %c0_74, %c0_75] : memref<12x8x256xf32, #tpu.memory_space<vmem>>, vector<1x8x128xf32>
    %55 = vector.shape_cast %54 : vector<1x8x128xf32> to vector<8x128xf32>
    %56 = vector.shape_cast %53 : vector<8x128xf32> to vector<1x8x128xf32>
    tpu.vector_store %arg8[%c7_73, %c0_74, %c0_75], %56 {strides = array<i32>} : memref<12x8x256xf32, #tpu.memory_space<vmem>>, vector<1x8x128xf32>,
    %c0_76 = arith.constant 0 : index
    %c0_77 = arith.constant 0 : index
    %c2_78 = arith.constant 2 : index
    %c0_79 = arith.constant 0 : index
    %c0_80 = arith.constant 0 : index
    %57 = vector.load %arg3[%c0_76, %c0_77, %c2_78, %c0_79, %c0_80] : memref<1x1x4x1x128xf32, #tpu.memory_space<vmem>>, vector<1x1x1x1x128xf32>
    %58 = vector.shape_cast %57 : vector<1x1x1x1x128xf32> to vector<1x128xf32>
    %c6 = arith.constant 6 : index
    %c0_81 = arith.constant 0 : index
    %c0_82 = arith.constant 0 : index
    %59 = vector.load %arg8[%c6, %c0_81, %c0_82] : memref<12x8x256xf32, #tpu.memory_space<vmem>>, vector<1x1x128xf32>
    %60 = vector.shape_cast %59 : vector<1x1x128xf32> to vector<1x128xf32>
    %61 = vector.shape_cast %58 : vector<1x128xf32> to vector<1x1x128xf32>
    tpu.vector_store %arg8[%c6, %c0_81, %c0_82], %61 {strides = array<i32>} : memref<12x8x256xf32, #tpu.memory_space<vmem>>, vector<1x1x128xf32>,
    %c0_83 = arith.constant 0 : index
    %c2_84 = arith.constant 2 : index
    %c0_85 = arith.constant 0 : index
    %c0_86 = arith.constant 0 : index
    %62 = vector.load %arg2[%c0_83, %c2_84, %c0_85, %c0_86] : memref<1x4x8x128xf32, #tpu.memory_space<vmem>>, vector<1x1x7x128xf32>
    %63 = vector.shape_cast %62 : vector<1x1x7x128xf32> to vector<7x128xf32>
    %c6_87 = arith.constant 6 : index
    %c1_88 = arith.constant 1 : index
    %c0_89 = arith.constant 0 : index
    %64 = vector.load %arg8[%c6_87, %c1_88, %c0_89] : memref<12x8x256xf32, #tpu.memory_space<vmem>>, vector<1x7x128xf32>
    %65 = vector.shape_cast %64 : vector<1x7x128xf32> to vector<7x128xf32>
    %66 = vector.shape_cast %63 : vector<7x128xf32> to vector<1x7x128xf32>
    tpu.vector_store %arg8[%c6_87, %c1_88, %c0_89], %66 {strides = array<i32>} : memref<12x8x256xf32, #tpu.memory_space<vmem>>, vector<1x7x128xf32>,
    %c0_90 = arith.constant 0 : index
    %c2_91 = arith.constant 2 : index
    %c1_92 = arith.constant 1 : index
    %c0_93 = arith.constant 0 : index
    %67 = vector.load %arg2[%c0_90, %c2_91, %c1_92, %c0_93] : memref<1x4x8x128xf32, #tpu.memory_space<vmem>>, vector<1x1x7x128xf32>
    %68 = vector.shape_cast %67 : vector<1x1x7x128xf32> to vector<7x128xf32>
    %c8 = arith.constant 8 : index
    %c0_94 = arith.constant 0 : index
    %c0_95 = arith.constant 0 : index
    %69 = vector.load %arg8[%c8, %c0_94, %c0_95] : memref<12x8x256xf32, #tpu.memory_space<vmem>>, vector<1x7x128xf32>
    %70 = vector.shape_cast %69 : vector<1x7x128xf32> to vector<7x128xf32>
    %71 = vector.shape_cast %68 : vector<7x128xf32> to vector<1x7x128xf32>
    tpu.vector_store %arg8[%c8, %c0_94, %c0_95], %71 {strides = array<i32>} : memref<12x8x256xf32, #tpu.memory_space<vmem>>, vector<1x7x128xf32>,
    %c0_96 = arith.constant 0 : index
    %c0_97 = arith.constant 0 : index
    %c2_98 = arith.constant 2 : index
    %c0_99 = arith.constant 0 : index
    %c0_100 = arith.constant 0 : index
    %72 = vector.load %arg4[%c0_96, %c0_97, %c2_98, %c0_99, %c0_100] : memref<1x1x4x1x128xf32, #tpu.memory_space<vmem>>, vector<1x1x1x1x128xf32>
    %73 = vector.shape_cast %72 : vector<1x1x1x1x128xf32> to vector<1x128xf32>
    %c8_101 = arith.constant 8 : index
    %c7_102 = arith.constant 7 : index
    %c0_103 = arith.constant 0 : index
    %74 = vector.load %arg8[%c8_101, %c7_102, %c0_103] : memref<12x8x256xf32, #tpu.memory_space<vmem>>, vector<1x1x128xf32>
    %75 = vector.shape_cast %74 : vector<1x1x128xf32> to vector<1x128xf32>
    %76 = vector.shape_cast %73 : vector<1x128xf32> to vector<1x1x128xf32>
    tpu.vector_store %arg8[%c8_101, %c7_102, %c0_103], %76 {strides = array<i32>} : memref<12x8x256xf32, #tpu.memory_space<vmem>>, vector<1x1x128xf32>,
    %c0_104 = arith.constant 0 : index
    %c3_105 = arith.constant 3 : index
    %c0_106 = arith.constant 0 : index
    %c0_107 = arith.constant 0 : index
    %77 = vector.load %arg2[%c0_104, %c3_105, %c0_106, %c0_107] : memref<1x4x8x128xf32, #tpu.memory_space<vmem>>, vector<1x1x8x128xf32>
    %78 = vector.shape_cast %77 : vector<1x1x8x128xf32> to vector<8x128xf32>
    %c10 = arith.constant 10 : index
    %c0_108 = arith.constant 0 : index
    %c0_109 = arith.constant 0 : index
    %79 = vector.load %arg8[%c10, %c0_108, %c0_109] : memref<12x8x256xf32, #tpu.memory_space<vmem>>, vector<1x8x128xf32>
    %80 = vector.shape_cast %79 : vector<1x8x128xf32> to vector<8x128xf32>
    %81 = vector.shape_cast %78 : vector<8x128xf32> to vector<1x8x128xf32>
    tpu.vector_store %arg8[%c10, %c0_108, %c0_109], %81 {strides = array<i32>} : memref<12x8x256xf32, #tpu.memory_space<vmem>>, vector<1x8x128xf32>,
    %c0_110 = arith.constant 0 : index
    %c0_111 = arith.constant 0 : index
    %c3_112 = arith.constant 3 : index
    %c0_113 = arith.constant 0 : index
    %c0_114 = arith.constant 0 : index
    %82 = vector.load %arg3[%c0_110, %c0_111, %c3_112, %c0_113, %c0_114] : memref<1x1x4x1x128xf32, #tpu.memory_space<vmem>>, vector<1x1x1x1x128xf32>
    %83 = vector.shape_cast %82 : vector<1x1x1x1x128xf32> to vector<1x128xf32>
    %c9 = arith.constant 9 : index
    %c0_115 = arith.constant 0 : index
    %c0_116 = arith.constant 0 : index
    %84 = vector.load %arg8[%c9, %c0_115, %c0_116] : memref<12x8x256xf32, #tpu.memory_space<vmem>>, vector<1x1x128xf32>
    %85 = vector.shape_cast %84 : vector<1x1x128xf32> to vector<1x128xf32>
    %86 = vector.shape_cast %83 : vector<1x128xf32> to vector<1x1x128xf32>
    tpu.vector_store %arg8[%c9, %c0_115, %c0_116], %86 {strides = array<i32>} : memref<12x8x256xf32, #tpu.memory_space<vmem>>, vector<1x1x128xf32>,
    %c0_117 = arith.constant 0 : index
    %c3_118 = arith.constant 3 : index
    %c0_119 = arith.constant 0 : index
    %c0_120 = arith.constant 0 : index
    %87 = vector.load %arg2[%c0_117, %c3_118, %c0_119, %c0_120] : memref<1x4x8x128xf32, #tpu.memory_space<vmem>>, vector<1x1x7x128xf32>
    %88 = vector.shape_cast %87 : vector<1x1x7x128xf32> to vector<7x128xf32>
    %c9_121 = arith.constant 9 : index
    %c1_122 = arith.constant 1 : index
    %c0_123 = arith.constant 0 : index
    %89 = vector.load %arg8[%c9_121, %c1_122, %c0_123] : memref<12x8x256xf32, #tpu.memory_space<vmem>>, vector<1x7x128xf32>
    %90 = vector.shape_cast %89 : vector<1x7x128xf32> to vector<7x128xf32>
    %91 = vector.shape_cast %88 : vector<7x128xf32> to vector<1x7x128xf32>
    tpu.vector_store %arg8[%c9_121, %c1_122, %c0_123], %91 {strides = array<i32>} : memref<12x8x256xf32, #tpu.memory_space<vmem>>, vector<1x7x128xf32>,
    %c0_124 = arith.constant 0 : index
    %c3_125 = arith.constant 3 : index
    %c1_126 = arith.constant 1 : index
    %c0_127 = arith.constant 0 : index
    %92 = vector.load %arg2[%c0_124, %c3_125, %c1_126, %c0_127] : memref<1x4x8x128xf32, #tpu.memory_space<vmem>>, vector<1x1x7x128xf32>
    %93 = vector.shape_cast %92 : vector<1x1x7x128xf32> to vector<7x128xf32>
    %c11 = arith.constant 11 : index
    %c0_128 = arith.constant 0 : index
    %c0_129 = arith.constant 0 : index
    %94 = vector.load %arg8[%c11, %c0_128, %c0_129] : memref<12x8x256xf32, #tpu.memory_space<vmem>>, vector<1x7x128xf32>
    %95 = vector.shape_cast %94 : vector<1x7x128xf32> to vector<7x128xf32>
    %96 = vector.shape_cast %93 : vector<7x128xf32> to vector<1x7x128xf32>
    tpu.vector_store %arg8[%c11, %c0_128, %c0_129], %96 {strides = array<i32>} : memref<12x8x256xf32, #tpu.memory_space<vmem>>, vector<1x7x128xf32>,
    %c0_130 = arith.constant 0 : index
    %c0_131 = arith.constant 0 : index
    %c3_132 = arith.constant 3 : index
    %c0_133 = arith.constant 0 : index
    %c0_134 = arith.constant 0 : index
    %97 = vector.load %arg4[%c0_130, %c0_131, %c3_132, %c0_133, %c0_134] : memref<1x1x4x1x128xf32, #tpu.memory_space<vmem>>, vector<1x1x1x1x128xf32>
    %98 = vector.shape_cast %97 : vector<1x1x1x1x128xf32> to vector<1x128xf32>
    %c11_135 = arith.constant 11 : index
    %c7_136 = arith.constant 7 : index
    %c0_137 = arith.constant 0 : index
    %99 = vector.load %arg8[%c11_135, %c7_136, %c0_137] : memref<12x8x256xf32, #tpu.memory_space<vmem>>, vector<1x1x128xf32>
    %100 = vector.shape_cast %99 : vector<1x1x128xf32> to vector<1x128xf32>
    %101 = vector.shape_cast %98 : vector<1x128xf32> to vector<1x1x128xf32>
    tpu.vector_store %arg8[%c11_135, %c7_136, %c0_137], %101 {strides = array<i32>} : memref<12x8x256xf32, #tpu.memory_space<vmem>>, vector<1x1x128xf32>,
    %c0_138 = arith.constant 0 : index
    %102 = memref.load %arg5[%c0_138] : memref<288xf32, #tpu.memory_space<smem>>
    %c1_139 = arith.constant 1 : index
    %103 = memref.load %arg5[%c1_139] : memref<288xf32, #tpu.memory_space<smem>>
    %c2_140 = arith.constant 2 : index
    %104 = memref.load %arg5[%c2_140] : memref<288xf32, #tpu.memory_space<smem>>
    %c3_141 = arith.constant 3 : index
    %105 = memref.load %arg5[%c3_141] : memref<288xf32, #tpu.memory_space<smem>>
    %c4_142 = arith.constant 4 : index
    %106 = memref.load %arg5[%c4_142] : memref<288xf32, #tpu.memory_space<smem>>
    %c5_143 = arith.constant 5 : index
    %107 = memref.load %arg5[%c5_143] : memref<288xf32, #tpu.memory_space<smem>>
    %c6_144 = arith.constant 6 : index
    %108 = memref.load %arg5[%c6_144] : memref<288xf32, #tpu.memory_space<smem>>
    %c7_145 = arith.constant 7 : index
    %109 = memref.load %arg5[%c7_145] : memref<288xf32, #tpu.memory_space<smem>>
    %c8_146 = arith.constant 8 : index
    %110 = memref.load %arg5[%c8_146] : memref<288xf32, #tpu.memory_space<smem>>
    %c9_147 = arith.constant 9 : index
    %111 = memref.load %arg5[%c9_147] : memref<288xf32, #tpu.memory_space<smem>>
    %c10_148 = arith.constant 10 : index
    %112 = memref.load %arg5[%c10_148] : memref<288xf32, #tpu.memory_space<smem>>
    %c11_149 = arith.constant 11 : index
    %113 = memref.load %arg5[%c11_149] : memref<288xf32, #tpu.memory_space<smem>>
    %c12 = arith.constant 12 : index
    %114 = memref.load %arg5[%c12] : memref<288xf32, #tpu.memory_space<smem>>
    %c13 = arith.constant 13 : index
    %115 = memref.load %arg5[%c13] : memref<288xf32, #tpu.memory_space<smem>>
    %c14 = arith.constant 14 : index
    %116 = memref.load %arg5[%c14] : memref<288xf32, #tpu.memory_space<smem>>
    %c15 = arith.constant 15 : index
    %117 = memref.load %arg5[%c15] : memref<288xf32, #tpu.memory_space<smem>>
    %c16 = arith.constant 16 : index
    %118 = memref.load %arg5[%c16] : memref<288xf32, #tpu.memory_space<smem>>
    %c17 = arith.constant 17 : index
    %119 = memref.load %arg5[%c17] : memref<288xf32, #tpu.memory_space<smem>>
    %c18 = arith.constant 18 : index
    %120 = memref.load %arg5[%c18] : memref<288xf32, #tpu.memory_space<smem>>
    %c19 = arith.constant 19 : index
    %121 = memref.load %arg5[%c19] : memref<288xf32, #tpu.memory_space<smem>>
    %c20 = arith.constant 20 : index
    %122 = memref.load %arg5[%c20] : memref<288xf32, #tpu.memory_space<smem>>
    %c21 = arith.constant 21 : index
    %123 = memref.load %arg5[%c21] : memref<288xf32, #tpu.memory_space<smem>>
    %c22 = arith.constant 22 : index
    %124 = memref.load %arg5[%c22] : memref<288xf32, #tpu.memory_space<smem>>
    %c23 = arith.constant 23 : index
    %125 = memref.load %arg5[%c23] : memref<288xf32, #tpu.memory_space<smem>>
    %c24 = arith.constant 24 : index
    %126 = memref.load %arg5[%c24] : memref<288xf32, #tpu.memory_space<smem>>
    %c25 = arith.constant 25 : index
    %127 = memref.load %arg5[%c25] : memref<288xf32, #tpu.memory_space<smem>>
    %c26 = arith.constant 26 : index
    %128 = memref.load %arg5[%c26] : memref<288xf32, #tpu.memory_space<smem>>
    %c27 = arith.constant 27 : index
    %129 = memref.load %arg5[%c27] : memref<288xf32, #tpu.memory_space<smem>>
    %c28 = arith.constant 28 : index
    %130 = memref.load %arg5[%c28] : memref<288xf32, #tpu.memory_space<smem>>
    %c29 = arith.constant 29 : index
    %131 = memref.load %arg5[%c29] : memref<288xf32, #tpu.memory_space<smem>>
    %c30 = arith.constant 30 : index
    %132 = memref.load %arg5[%c30] : memref<288xf32, #tpu.memory_space<smem>>
    %c31 = arith.constant 31 : index
    %133 = memref.load %arg5[%c31] : memref<288xf32, #tpu.memory_space<smem>>
    %c32 = arith.constant 32 : index
    %134 = memref.load %arg5[%c32] : memref<288xf32, #tpu.memory_space<smem>>
    %c33 = arith.constant 33 : index
    %135 = memref.load %arg5[%c33] : memref<288xf32, #tpu.memory_space<smem>>
    %c34 = arith.constant 34 : index
    %136 = memref.load %arg5[%c34] : memref<288xf32, #tpu.memory_space<smem>>
    %c35 = arith.constant 35 : index
    %137 = memref.load %arg5[%c35] : memref<288xf32, #tpu.memory_space<smem>>
    %c36 = arith.constant 36 : index
    %138 = memref.load %arg5[%c36] : memref<288xf32, #tpu.memory_space<smem>>
    %c37 = arith.constant 37 : index
    %139 = memref.load %arg5[%c37] : memref<288xf32, #tpu.memory_space<smem>>
    %c38 = arith.constant 38 : index
    %140 = memref.load %arg5[%c38] : memref<288xf32, #tpu.memory_space<smem>>
    %c39 = arith.constant 39 : index
    %141 = memref.load %arg5[%c39] : memref<288xf32, #tpu.memory_space<smem>>
    %c40 = arith.constant 40 : index
    %142 = memref.load %arg5[%c40] : memref<288xf32, #tpu.memory_space<smem>>
    %c41 = arith.constant 41 : index
    %143 = memref.load %arg5[%c41] : memref<288xf32, #tpu.memory_space<smem>>
    %c42 = arith.constant 42 : index
    %144 = memref.load %arg5[%c42] : memref<288xf32, #tpu.memory_space<smem>>
    %c43 = arith.constant 43 : index
    %145 = memref.load %arg5[%c43] : memref<288xf32, #tpu.memory_space<smem>>
    %c44 = arith.constant 44 : index
    %146 = memref.load %arg5[%c44] : memref<288xf32, #tpu.memory_space<smem>>
    %c45 = arith.constant 45 : index
    %147 = memref.load %arg5[%c45] : memref<288xf32, #tpu.memory_space<smem>>
    %c46 = arith.constant 46 : index
    %148 = memref.load %arg5[%c46] : memref<288xf32, #tpu.memory_space<smem>>
    %c47 = arith.constant 47 : index
    %149 = memref.load %arg5[%c47] : memref<288xf32, #tpu.memory_space<smem>>
    %c48 = arith.constant 48 : index
    %150 = memref.load %arg5[%c48] : memref<288xf32, #tpu.memory_space<smem>>
    %c49 = arith.constant 49 : index
    %151 = memref.load %arg5[%c49] : memref<288xf32, #tpu.memory_space<smem>>
    %c50 = arith.constant 50 : index
    %152 = memref.load %arg5[%c50] : memref<288xf32, #tpu.memory_space<smem>>
    %c51 = arith.constant 51 : index
    %153 = memref.load %arg5[%c51] : memref<288xf32, #tpu.memory_space<smem>>
    %c52 = arith.constant 52 : index
    %154 = memref.load %arg5[%c52] : memref<288xf32, #tpu.memory_space<smem>>
    %c53 = arith.constant 53 : index
    %155 = memref.load %arg5[%c53] : memref<288xf32, #tpu.memory_space<smem>>
    %c54 = arith.constant 54 : index
    %156 = memref.load %arg5[%c54] : memref<288xf32, #tpu.memory_space<smem>>
    %c55 = arith.constant 55 : index
    %157 = memref.load %arg5[%c55] : memref<288xf32, #tpu.memory_space<smem>>
    %c56 = arith.constant 56 : index
    %158 = memref.load %arg5[%c56] : memref<288xf32, #tpu.memory_space<smem>>
    %c57 = arith.constant 57 : index
    %159 = memref.load %arg5[%c57] : memref<288xf32, #tpu.memory_space<smem>>
    %c58 = arith.constant 58 : index
    %160 = memref.load %arg5[%c58] : memref<288xf32, #tpu.memory_space<smem>>
    %c59 = arith.constant 59 : index
    %161 = memref.load %arg5[%c59] : memref<288xf32, #tpu.memory_space<smem>>
    %c60 = arith.constant 60 : index
    %162 = memref.load %arg5[%c60] : memref<288xf32, #tpu.memory_space<smem>>
    %c61 = arith.constant 61 : index
    %163 = memref.load %arg5[%c61] : memref<288xf32, #tpu.memory_space<smem>>
    %c62 = arith.constant 62 : index
    %164 = memref.load %arg5[%c62] : memref<288xf32, #tpu.memory_space<smem>>
    %c63 = arith.constant 63 : index
    %165 = memref.load %arg5[%c63] : memref<288xf32, #tpu.memory_space<smem>>
    %c64 = arith.constant 64 : index
    %166 = memref.load %arg5[%c64] : memref<288xf32, #tpu.memory_space<smem>>
    %c65 = arith.constant 65 : index
    %167 = memref.load %arg5[%c65] : memref<288xf32, #tpu.memory_space<smem>>
    %c66 = arith.constant 66 : index
    %168 = memref.load %arg5[%c66] : memref<288xf32, #tpu.memory_space<smem>>
    %c67 = arith.constant 67 : index
    %169 = memref.load %arg5[%c67] : memref<288xf32, #tpu.memory_space<smem>>
    %c68 = arith.constant 68 : index
    %170 = memref.load %arg5[%c68] : memref<288xf32, #tpu.memory_space<smem>>
    %c69 = arith.constant 69 : index
    %171 = memref.load %arg5[%c69] : memref<288xf32, #tpu.memory_space<smem>>
    %c70 = arith.constant 70 : index
    %172 = memref.load %arg5[%c70] : memref<288xf32, #tpu.memory_space<smem>>
    %c71 = arith.constant 71 : index
    %173 = memref.load %arg5[%c71] : memref<288xf32, #tpu.memory_space<smem>>
    %c72 = arith.constant 72 : index
    %174 = memref.load %arg5[%c72] : memref<288xf32, #tpu.memory_space<smem>>
    %c73 = arith.constant 73 : index
    %175 = memref.load %arg5[%c73] : memref<288xf32, #tpu.memory_space<smem>>
    %c74 = arith.constant 74 : index
    %176 = memref.load %arg5[%c74] : memref<288xf32, #tpu.memory_space<smem>>
    %c75 = arith.constant 75 : index
    %177 = memref.load %arg5[%c75] : memref<288xf32, #tpu.memory_space<smem>>
    %c76 = arith.constant 76 : index
    %178 = memref.load %arg5[%c76] : memref<288xf32, #tpu.memory_space<smem>>
    %c77 = arith.constant 77 : index
    %179 = memref.load %arg5[%c77] : memref<288xf32, #tpu.memory_space<smem>>
    %c78 = arith.constant 78 : index
    %180 = memref.load %arg5[%c78] : memref<288xf32, #tpu.memory_space<smem>>
    %c79 = arith.constant 79 : index
    %181 = memref.load %arg5[%c79] : memref<288xf32, #tpu.memory_space<smem>>
    %c80 = arith.constant 80 : index
    %182 = memref.load %arg5[%c80] : memref<288xf32, #tpu.memory_space<smem>>
    %c81 = arith.constant 81 : index
    %183 = memref.load %arg5[%c81] : memref<288xf32, #tpu.memory_space<smem>>
    %c82 = arith.constant 82 : index
    %184 = memref.load %arg5[%c82] : memref<288xf32, #tpu.memory_space<smem>>
    %c83 = arith.constant 83 : index
    %185 = memref.load %arg5[%c83] : memref<288xf32, #tpu.memory_space<smem>>
    %c84 = arith.constant 84 : index
    %186 = memref.load %arg5[%c84] : memref<288xf32, #tpu.memory_space<smem>>
    %c85 = arith.constant 85 : index
    %187 = memref.load %arg5[%c85] : memref<288xf32, #tpu.memory_space<smem>>
    %c86 = arith.constant 86 : index
    %188 = memref.load %arg5[%c86] : memref<288xf32, #tpu.memory_space<smem>>
    %c87 = arith.constant 87 : index
    %189 = memref.load %arg5[%c87] : memref<288xf32, #tpu.memory_space<smem>>
    %c88 = arith.constant 88 : index
    %190 = memref.load %arg5[%c88] : memref<288xf32, #tpu.memory_space<smem>>
    %c89 = arith.constant 89 : index
    %191 = memref.load %arg5[%c89] : memref<288xf32, #tpu.memory_space<smem>>
    %c90 = arith.constant 90 : index
    %192 = memref.load %arg5[%c90] : memref<288xf32, #tpu.memory_space<smem>>
    %c91 = arith.constant 91 : index
    %193 = memref.load %arg5[%c91] : memref<288xf32, #tpu.memory_space<smem>>
    %c92 = arith.constant 92 : index
    %194 = memref.load %arg5[%c92] : memref<288xf32, #tpu.memory_space<smem>>
    %c93 = arith.constant 93 : index
    %195 = memref.load %arg5[%c93] : memref<288xf32, #tpu.memory_space<smem>>
    %c94 = arith.constant 94 : index
    %196 = memref.load %arg5[%c94] : memref<288xf32, #tpu.memory_space<smem>>
    %c95 = arith.constant 95 : index
    %197 = memref.load %arg5[%c95] : memref<288xf32, #tpu.memory_space<smem>>
    %c96 = arith.constant 96 : index
    %198 = memref.load %arg5[%c96] : memref<288xf32, #tpu.memory_space<smem>>
    %c97 = arith.constant 97 : index
    %199 = memref.load %arg5[%c97] : memref<288xf32, #tpu.memory_space<smem>>
    %c98 = arith.constant 98 : index
    %200 = memref.load %arg5[%c98] : memref<288xf32, #tpu.memory_space<smem>>
    %c99 = arith.constant 99 : index
    %201 = memref.load %arg5[%c99] : memref<288xf32, #tpu.memory_space<smem>>
    %c100 = arith.constant 100 : index
    %202 = memref.load %arg5[%c100] : memref<288xf32, #tpu.memory_space<smem>>
    %c101 = arith.constant 101 : index
    %203 = memref.load %arg5[%c101] : memref<288xf32, #tpu.memory_space<smem>>
    %c102 = arith.constant 102 : index
    %204 = memref.load %arg5[%c102] : memref<288xf32, #tpu.memory_space<smem>>
    %c103 = arith.constant 103 : index
    %205 = memref.load %arg5[%c103] : memref<288xf32, #tpu.memory_space<smem>>
    %c104 = arith.constant 104 : index
    %206 = memref.load %arg5[%c104] : memref<288xf32, #tpu.memory_space<smem>>
    %c105 = arith.constant 105 : index
    %207 = memref.load %arg5[%c105] : memref<288xf32, #tpu.memory_space<smem>>
    %c106 = arith.constant 106 : index
    %208 = memref.load %arg5[%c106] : memref<288xf32, #tpu.memory_space<smem>>
    %c107 = arith.constant 107 : index
    %209 = memref.load %arg5[%c107] : memref<288xf32, #tpu.memory_space<smem>>
    %c108 = arith.constant 108 : index
    %210 = memref.load %arg5[%c108] : memref<288xf32, #tpu.memory_space<smem>>
    %c109 = arith.constant 109 : index
    %211 = memref.load %arg5[%c109] : memref<288xf32, #tpu.memory_space<smem>>
    %c110 = arith.constant 110 : index
    %212 = memref.load %arg5[%c110] : memref<288xf32, #tpu.memory_space<smem>>
    %c111 = arith.constant 111 : index
    %213 = memref.load %arg5[%c111] : memref<288xf32, #tpu.memory_space<smem>>
    %c112 = arith.constant 112 : index
    %214 = memref.load %arg5[%c112] : memref<288xf32, #tpu.memory_space<smem>>
    %c113 = arith.constant 113 : index
    %215 = memref.load %arg5[%c113] : memref<288xf32, #tpu.memory_space<smem>>
    %c114 = arith.constant 114 : index
    %216 = memref.load %arg5[%c114] : memref<288xf32, #tpu.memory_space<smem>>
    %c115 = arith.constant 115 : index
    %217 = memref.load %arg5[%c115] : memref<288xf32, #tpu.memory_space<smem>>
    %c116 = arith.constant 116 : index
    %218 = memref.load %arg5[%c116] : memref<288xf32, #tpu.memory_space<smem>>
    %c117 = arith.constant 117 : index
    %219 = memref.load %arg5[%c117] : memref<288xf32, #tpu.memory_space<smem>>
    %c118 = arith.constant 118 : index
    %220 = memref.load %arg5[%c118] : memref<288xf32, #tpu.memory_space<smem>>
    %c119 = arith.constant 119 : index
    %221 = memref.load %arg5[%c119] : memref<288xf32, #tpu.memory_space<smem>>
    %c120 = arith.constant 120 : index
    %222 = memref.load %arg5[%c120] : memref<288xf32, #tpu.memory_space<smem>>
    %c121 = arith.constant 121 : index
    %223 = memref.load %arg5[%c121] : memref<288xf32, #tpu.memory_space<smem>>
    %c122 = arith.constant 122 : index
    %224 = memref.load %arg5[%c122] : memref<288xf32, #tpu.memory_space<smem>>
    %c123 = arith.constant 123 : index
    %225 = memref.load %arg5[%c123] : memref<288xf32, #tpu.memory_space<smem>>
    %c124 = arith.constant 124 : index
    %226 = memref.load %arg5[%c124] : memref<288xf32, #tpu.memory_space<smem>>
    %c125 = arith.constant 125 : index
    %227 = memref.load %arg5[%c125] : memref<288xf32, #tpu.memory_space<smem>>
    %c126 = arith.constant 126 : index
    %228 = memref.load %arg5[%c126] : memref<288xf32, #tpu.memory_space<smem>>
    %c127 = arith.constant 127 : index
    %229 = memref.load %arg5[%c127] : memref<288xf32, #tpu.memory_space<smem>>
    %c128_150 = arith.constant 128 : index
    %230 = memref.load %arg5[%c128_150] : memref<288xf32, #tpu.memory_space<smem>>
    %c129 = arith.constant 129 : index
    %231 = memref.load %arg5[%c129] : memref<288xf32, #tpu.memory_space<smem>>
    %c130 = arith.constant 130 : index
    %232 = memref.load %arg5[%c130] : memref<288xf32, #tpu.memory_space<smem>>
    %c131 = arith.constant 131 : index
    %233 = memref.load %arg5[%c131] : memref<288xf32, #tpu.memory_space<smem>>
    %c132 = arith.constant 132 : index
    %234 = memref.load %arg5[%c132] : memref<288xf32, #tpu.memory_space<smem>>
    %c133 = arith.constant 133 : index
    %235 = memref.load %arg5[%c133] : memref<288xf32, #tpu.memory_space<smem>>
    %c134 = arith.constant 134 : index
    %236 = memref.load %arg5[%c134] : memref<288xf32, #tpu.memory_space<smem>>
    %c135 = arith.constant 135 : index
    %237 = memref.load %arg5[%c135] : memref<288xf32, #tpu.memory_space<smem>>
    %c136 = arith.constant 136 : index
    %238 = memref.load %arg5[%c136] : memref<288xf32, #tpu.memory_space<smem>>
    %c137 = arith.constant 137 : index
    %239 = memref.load %arg5[%c137] : memref<288xf32, #tpu.memory_space<smem>>
    %c138 = arith.constant 138 : index
    %240 = memref.load %arg5[%c138] : memref<288xf32, #tpu.memory_space<smem>>
    %c139 = arith.constant 139 : index
    %241 = memref.load %arg5[%c139] : memref<288xf32, #tpu.memory_space<smem>>
    %c140 = arith.constant 140 : index
    %242 = memref.load %arg5[%c140] : memref<288xf32, #tpu.memory_space<smem>>
    %c141 = arith.constant 141 : index
    %243 = memref.load %arg5[%c141] : memref<288xf32, #tpu.memory_space<smem>>
    %c142 = arith.constant 142 : index
    %244 = memref.load %arg5[%c142] : memref<288xf32, #tpu.memory_space<smem>>
    %c143 = arith.constant 143 : index
    %245 = memref.load %arg5[%c143] : memref<288xf32, #tpu.memory_space<smem>>
    %c144 = arith.constant 144 : index
    %246 = memref.load %arg5[%c144] : memref<288xf32, #tpu.memory_space<smem>>
    %c145 = arith.constant 145 : index
    %247 = memref.load %arg5[%c145] : memref<288xf32, #tpu.memory_space<smem>>
    %c146 = arith.constant 146 : index
    %248 = memref.load %arg5[%c146] : memref<288xf32, #tpu.memory_space<smem>>
    %c147 = arith.constant 147 : index
    %249 = memref.load %arg5[%c147] : memref<288xf32, #tpu.memory_space<smem>>
    %c148 = arith.constant 148 : index
    %250 = memref.load %arg5[%c148] : memref<288xf32, #tpu.memory_space<smem>>
    %c149 = arith.constant 149 : index
    %251 = memref.load %arg5[%c149] : memref<288xf32, #tpu.memory_space<smem>>
    %c150 = arith.constant 150 : index
    %252 = memref.load %arg5[%c150] : memref<288xf32, #tpu.memory_space<smem>>
    %c151 = arith.constant 151 : index
    %253 = memref.load %arg5[%c151] : memref<288xf32, #tpu.memory_space<smem>>
    %c152 = arith.constant 152 : index
    %254 = memref.load %arg5[%c152] : memref<288xf32, #tpu.memory_space<smem>>
    %c153 = arith.constant 153 : index
    %255 = memref.load %arg5[%c153] : memref<288xf32, #tpu.memory_space<smem>>
    %c154 = arith.constant 154 : index
    %256 = memref.load %arg5[%c154] : memref<288xf32, #tpu.memory_space<smem>>
    %c155 = arith.constant 155 : index
    %257 = memref.load %arg5[%c155] : memref<288xf32, #tpu.memory_space<smem>>
    %c156 = arith.constant 156 : index
    %258 = memref.load %arg5[%c156] : memref<288xf32, #tpu.memory_space<smem>>
    %c157 = arith.constant 157 : index
    %259 = memref.load %arg5[%c157] : memref<288xf32, #tpu.memory_space<smem>>
    %c158 = arith.constant 158 : index
    %260 = memref.load %arg5[%c158] : memref<288xf32, #tpu.memory_space<smem>>
    %c159 = arith.constant 159 : index
    %261 = memref.load %arg5[%c159] : memref<288xf32, #tpu.memory_space<smem>>
    %c160 = arith.constant 160 : index
    %262 = memref.load %arg5[%c160] : memref<288xf32, #tpu.memory_space<smem>>
    %c161 = arith.constant 161 : index
    %263 = memref.load %arg5[%c161] : memref<288xf32, #tpu.memory_space<smem>>
    %c162 = arith.constant 162 : index
    %264 = memref.load %arg5[%c162] : memref<288xf32, #tpu.memory_space<smem>>
    %c163 = arith.constant 163 : index
    %265 = memref.load %arg5[%c163] : memref<288xf32, #tpu.memory_space<smem>>
    %c164 = arith.constant 164 : index
    %266 = memref.load %arg5[%c164] : memref<288xf32, #tpu.memory_space<smem>>
    %c165 = arith.constant 165 : index
    %267 = memref.load %arg5[%c165] : memref<288xf32, #tpu.memory_space<smem>>
    %c166 = arith.constant 166 : index
    %268 = memref.load %arg5[%c166] : memref<288xf32, #tpu.memory_space<smem>>
    %c167 = arith.constant 167 : index
    %269 = memref.load %arg5[%c167] : memref<288xf32, #tpu.memory_space<smem>>
    %c168 = arith.constant 168 : index
    %270 = memref.load %arg5[%c168] : memref<288xf32, #tpu.memory_space<smem>>
    %c169 = arith.constant 169 : index
    %271 = memref.load %arg5[%c169] : memref<288xf32, #tpu.memory_space<smem>>
    %c170 = arith.constant 170 : index
    %272 = memref.load %arg5[%c170] : memref<288xf32, #tpu.memory_space<smem>>
    %c171 = arith.constant 171 : index
    %273 = memref.load %arg5[%c171] : memref<288xf32, #tpu.memory_space<smem>>
    %c172 = arith.constant 172 : index
    %274 = memref.load %arg5[%c172] : memref<288xf32, #tpu.memory_space<smem>>
    %c173 = arith.constant 173 : index
    %275 = memref.load %arg5[%c173] : memref<288xf32, #tpu.memory_space<smem>>
    %c174 = arith.constant 174 : index
    %276 = memref.load %arg5[%c174] : memref<288xf32, #tpu.memory_space<smem>>
    %c175 = arith.constant 175 : index
    %277 = memref.load %arg5[%c175] : memref<288xf32, #tpu.memory_space<smem>>
    %c176 = arith.constant 176 : index
    %278 = memref.load %arg5[%c176] : memref<288xf32, #tpu.memory_space<smem>>
    %c177 = arith.constant 177 : index
    %279 = memref.load %arg5[%c177] : memref<288xf32, #tpu.memory_space<smem>>
    %c178 = arith.constant 178 : index
    %280 = memref.load %arg5[%c178] : memref<288xf32, #tpu.memory_space<smem>>
    %c179 = arith.constant 179 : index
    %281 = memref.load %arg5[%c179] : memref<288xf32, #tpu.memory_space<smem>>
    %c180 = arith.constant 180 : index
    %282 = memref.load %arg5[%c180] : memref<288xf32, #tpu.memory_space<smem>>
    %c181 = arith.constant 181 : index
    %283 = memref.load %arg5[%c181] : memref<288xf32, #tpu.memory_space<smem>>
    %c182 = arith.constant 182 : index
    %284 = memref.load %arg5[%c182] : memref<288xf32, #tpu.memory_space<smem>>
    %c183 = arith.constant 183 : index
    %285 = memref.load %arg5[%c183] : memref<288xf32, #tpu.memory_space<smem>>
    %c184 = arith.constant 184 : index
    %286 = memref.load %arg5[%c184] : memref<288xf32, #tpu.memory_space<smem>>
    %c185 = arith.constant 185 : index
    %287 = memref.load %arg5[%c185] : memref<288xf32, #tpu.memory_space<smem>>
    %c186 = arith.constant 186 : index
    %288 = memref.load %arg5[%c186] : memref<288xf32, #tpu.memory_space<smem>>
    %c187 = arith.constant 187 : index
    %289 = memref.load %arg5[%c187] : memref<288xf32, #tpu.memory_space<smem>>
    %c188 = arith.constant 188 : index
    %290 = memref.load %arg5[%c188] : memref<288xf32, #tpu.memory_space<smem>>
    %c189 = arith.constant 189 : index
    %291 = memref.load %arg5[%c189] : memref<288xf32, #tpu.memory_space<smem>>
    %c190 = arith.constant 190 : index
    %292 = memref.load %arg5[%c190] : memref<288xf32, #tpu.memory_space<smem>>
    %c191 = arith.constant 191 : index
    %293 = memref.load %arg5[%c191] : memref<288xf32, #tpu.memory_space<smem>>
    %c192 = arith.constant 192 : index
    %294 = memref.load %arg5[%c192] : memref<288xf32, #tpu.memory_space<smem>>
    %c193 = arith.constant 193 : index
    %295 = memref.load %arg5[%c193] : memref<288xf32, #tpu.memory_space<smem>>
    %c194 = arith.constant 194 : index
    %296 = memref.load %arg5[%c194] : memref<288xf32, #tpu.memory_space<smem>>
    %c195 = arith.constant 195 : index
    %297 = memref.load %arg5[%c195] : memref<288xf32, #tpu.memory_space<smem>>
    %c196 = arith.constant 196 : index
    %298 = memref.load %arg5[%c196] : memref<288xf32, #tpu.memory_space<smem>>
    %c197 = arith.constant 197 : index
    %299 = memref.load %arg5[%c197] : memref<288xf32, #tpu.memory_space<smem>>
    %c198 = arith.constant 198 : index
    %300 = memref.load %arg5[%c198] : memref<288xf32, #tpu.memory_space<smem>>
    %c199 = arith.constant 199 : index
    %301 = memref.load %arg5[%c199] : memref<288xf32, #tpu.memory_space<smem>>
    %c200 = arith.constant 200 : index
    %302 = memref.load %arg5[%c200] : memref<288xf32, #tpu.memory_space<smem>>
    %c201 = arith.constant 201 : index
    %303 = memref.load %arg5[%c201] : memref<288xf32, #tpu.memory_space<smem>>
    %c202 = arith.constant 202 : index
    %304 = memref.load %arg5[%c202] : memref<288xf32, #tpu.memory_space<smem>>
    %c203 = arith.constant 203 : index
    %305 = memref.load %arg5[%c203] : memref<288xf32, #tpu.memory_space<smem>>
    %c204 = arith.constant 204 : index
    %306 = memref.load %arg5[%c204] : memref<288xf32, #tpu.memory_space<smem>>
    %c205 = arith.constant 205 : index
    %307 = memref.load %arg5[%c205] : memref<288xf32, #tpu.memory_space<smem>>
    %c206 = arith.constant 206 : index
    %308 = memref.load %arg5[%c206] : memref<288xf32, #tpu.memory_space<smem>>
    %c207 = arith.constant 207 : index
    %309 = memref.load %arg5[%c207] : memref<288xf32, #tpu.memory_space<smem>>
    %c208 = arith.constant 208 : index
    %310 = memref.load %arg5[%c208] : memref<288xf32, #tpu.memory_space<smem>>
    %c209 = arith.constant 209 : index
    %311 = memref.load %arg5[%c209] : memref<288xf32, #tpu.memory_space<smem>>
    %c210 = arith.constant 210 : index
    %312 = memref.load %arg5[%c210] : memref<288xf32, #tpu.memory_space<smem>>
    %c211 = arith.constant 211 : index
    %313 = memref.load %arg5[%c211] : memref<288xf32, #tpu.memory_space<smem>>
    %c212 = arith.constant 212 : index
    %314 = memref.load %arg5[%c212] : memref<288xf32, #tpu.memory_space<smem>>
    %c213 = arith.constant 213 : index
    %315 = memref.load %arg5[%c213] : memref<288xf32, #tpu.memory_space<smem>>
    %c214 = arith.constant 214 : index
    %316 = memref.load %arg5[%c214] : memref<288xf32, #tpu.memory_space<smem>>
    %c215 = arith.constant 215 : index
    %317 = memref.load %arg5[%c215] : memref<288xf32, #tpu.memory_space<smem>>
    %c216 = arith.constant 216 : index
    %318 = memref.load %arg5[%c216] : memref<288xf32, #tpu.memory_space<smem>>
    %c217 = arith.constant 217 : index
    %319 = memref.load %arg5[%c217] : memref<288xf32, #tpu.memory_space<smem>>
    %c218 = arith.constant 218 : index
    %320 = memref.load %arg5[%c218] : memref<288xf32, #tpu.memory_space<smem>>
    %c219 = arith.constant 219 : index
    %321 = memref.load %arg5[%c219] : memref<288xf32, #tpu.memory_space<smem>>
    %c220 = arith.constant 220 : index
    %322 = memref.load %arg5[%c220] : memref<288xf32, #tpu.memory_space<smem>>
    %c221 = arith.constant 221 : index
    %323 = memref.load %arg5[%c221] : memref<288xf32, #tpu.memory_space<smem>>
    %c222 = arith.constant 222 : index
    %324 = memref.load %arg5[%c222] : memref<288xf32, #tpu.memory_space<smem>>
    %c223 = arith.constant 223 : index
    %325 = memref.load %arg5[%c223] : memref<288xf32, #tpu.memory_space<smem>>
    %c224 = arith.constant 224 : index
    %326 = memref.load %arg5[%c224] : memref<288xf32, #tpu.memory_space<smem>>
    %c225 = arith.constant 225 : index
    %327 = memref.load %arg5[%c225] : memref<288xf32, #tpu.memory_space<smem>>
    %c226 = arith.constant 226 : index
    %328 = memref.load %arg5[%c226] : memref<288xf32, #tpu.memory_space<smem>>
    %c227 = arith.constant 227 : index
    %329 = memref.load %arg5[%c227] : memref<288xf32, #tpu.memory_space<smem>>
    %c228 = arith.constant 228 : index
    %330 = memref.load %arg5[%c228] : memref<288xf32, #tpu.memory_space<smem>>
    %c229 = arith.constant 229 : index
    %331 = memref.load %arg5[%c229] : memref<288xf32, #tpu.memory_space<smem>>
    %c230 = arith.constant 230 : index
    %332 = memref.load %arg5[%c230] : memref<288xf32, #tpu.memory_space<smem>>
    %c231 = arith.constant 231 : index
    %333 = memref.load %arg5[%c231] : memref<288xf32, #tpu.memory_space<smem>>
    %c232 = arith.constant 232 : index
    %334 = memref.load %arg5[%c232] : memref<288xf32, #tpu.memory_space<smem>>
    %c233 = arith.constant 233 : index
    %335 = memref.load %arg5[%c233] : memref<288xf32, #tpu.memory_space<smem>>
    %c234 = arith.constant 234 : index
    %336 = memref.load %arg5[%c234] : memref<288xf32, #tpu.memory_space<smem>>
    %c235 = arith.constant 235 : index
    %337 = memref.load %arg5[%c235] : memref<288xf32, #tpu.memory_space<smem>>
    %c236 = arith.constant 236 : index
    %338 = memref.load %arg5[%c236] : memref<288xf32, #tpu.memory_space<smem>>
    %c237 = arith.constant 237 : index
    %339 = memref.load %arg5[%c237] : memref<288xf32, #tpu.memory_space<smem>>
    %c238 = arith.constant 238 : index
    %340 = memref.load %arg5[%c238] : memref<288xf32, #tpu.memory_space<smem>>
    %c239 = arith.constant 239 : index
    %341 = memref.load %arg5[%c239] : memref<288xf32, #tpu.memory_space<smem>>
    %c240 = arith.constant 240 : index
    %342 = memref.load %arg5[%c240] : memref<288xf32, #tpu.memory_space<smem>>
    %c241 = arith.constant 241 : index
    %343 = memref.load %arg5[%c241] : memref<288xf32, #tpu.memory_space<smem>>
    %c242 = arith.constant 242 : index
    %344 = memref.load %arg5[%c242] : memref<288xf32, #tpu.memory_space<smem>>
    %c243 = arith.constant 243 : index
    %345 = memref.load %arg5[%c243] : memref<288xf32, #tpu.memory_space<smem>>
    %c244 = arith.constant 244 : index
    %346 = memref.load %arg5[%c244] : memref<288xf32, #tpu.memory_space<smem>>
    %c245 = arith.constant 245 : index
    %347 = memref.load %arg5[%c245] : memref<288xf32, #tpu.memory_space<smem>>
    %c246 = arith.constant 246 : index
    %348 = memref.load %arg5[%c246] : memref<288xf32, #tpu.memory_space<smem>>
    %c247 = arith.constant 247 : index
    %349 = memref.load %arg5[%c247] : memref<288xf32, #tpu.memory_space<smem>>
    %c248 = arith.constant 248 : index
    %350 = memref.load %arg5[%c248] : memref<288xf32, #tpu.memory_space<smem>>
    %c249 = arith.constant 249 : index
    %351 = memref.load %arg5[%c249] : memref<288xf32, #tpu.memory_space<smem>>
    %c250 = arith.constant 250 : index
    %352 = memref.load %arg5[%c250] : memref<288xf32, #tpu.memory_space<smem>>
    %c251 = arith.constant 251 : index
    %353 = memref.load %arg5[%c251] : memref<288xf32, #tpu.memory_space<smem>>
    %c252 = arith.constant 252 : index
    %354 = memref.load %arg5[%c252] : memref<288xf32, #tpu.memory_space<smem>>
    %c253 = arith.constant 253 : index
    %355 = memref.load %arg5[%c253] : memref<288xf32, #tpu.memory_space<smem>>
    %c254 = arith.constant 254 : index
    %356 = memref.load %arg5[%c254] : memref<288xf32, #tpu.memory_space<smem>>
    %c255 = arith.constant 255 : index
    %357 = memref.load %arg5[%c255] : memref<288xf32, #tpu.memory_space<smem>>
    %c256 = arith.constant 256 : index
    %358 = memref.load %arg5[%c256] : memref<288xf32, #tpu.memory_space<smem>>
    %c257 = arith.constant 257 : index
    %359 = memref.load %arg5[%c257] : memref<288xf32, #tpu.memory_space<smem>>
    %c258 = arith.constant 258 : index
    %360 = memref.load %arg5[%c258] : memref<288xf32, #tpu.memory_space<smem>>
    %c259 = arith.constant 259 : index
    %361 = memref.load %arg5[%c259] : memref<288xf32, #tpu.memory_space<smem>>
    %c260 = arith.constant 260 : index
    %362 = memref.load %arg5[%c260] : memref<288xf32, #tpu.memory_space<smem>>
    %c261 = arith.constant 261 : index
    %363 = memref.load %arg5[%c261] : memref<288xf32, #tpu.memory_space<smem>>
    %c262 = arith.constant 262 : index
    %364 = memref.load %arg5[%c262] : memref<288xf32, #tpu.memory_space<smem>>
    %c263 = arith.constant 263 : index
    %365 = memref.load %arg5[%c263] : memref<288xf32, #tpu.memory_space<smem>>
    %c264 = arith.constant 264 : index
    %366 = memref.load %arg5[%c264] : memref<288xf32, #tpu.memory_space<smem>>
    %c265 = arith.constant 265 : index
    %367 = memref.load %arg5[%c265] : memref<288xf32, #tpu.memory_space<smem>>
    %c266 = arith.constant 266 : index
    %368 = memref.load %arg5[%c266] : memref<288xf32, #tpu.memory_space<smem>>
    %c267 = arith.constant 267 : index
    %369 = memref.load %arg5[%c267] : memref<288xf32, #tpu.memory_space<smem>>
    %c268 = arith.constant 268 : index
    %370 = memref.load %arg5[%c268] : memref<288xf32, #tpu.memory_space<smem>>
    %c269 = arith.constant 269 : index
    %371 = memref.load %arg5[%c269] : memref<288xf32, #tpu.memory_space<smem>>
    %c270 = arith.constant 270 : index
    %372 = memref.load %arg5[%c270] : memref<288xf32, #tpu.memory_space<smem>>
    %c271 = arith.constant 271 : index
    %373 = memref.load %arg5[%c271] : memref<288xf32, #tpu.memory_space<smem>>
    %c272 = arith.constant 272 : index
    %374 = memref.load %arg5[%c272] : memref<288xf32, #tpu.memory_space<smem>>
    %c273 = arith.constant 273 : index
    %375 = memref.load %arg5[%c273] : memref<288xf32, #tpu.memory_space<smem>>
    %c274 = arith.constant 274 : index
    %376 = memref.load %arg5[%c274] : memref<288xf32, #tpu.memory_space<smem>>
    %c275 = arith.constant 275 : index
    %377 = memref.load %arg5[%c275] : memref<288xf32, #tpu.memory_space<smem>>
    %c276 = arith.constant 276 : index
    %378 = memref.load %arg5[%c276] : memref<288xf32, #tpu.memory_space<smem>>
    %c277 = arith.constant 277 : index
    %379 = memref.load %arg5[%c277] : memref<288xf32, #tpu.memory_space<smem>>
    %c278 = arith.constant 278 : index
    %380 = memref.load %arg5[%c278] : memref<288xf32, #tpu.memory_space<smem>>
    %c279 = arith.constant 279 : index
    %381 = memref.load %arg5[%c279] : memref<288xf32, #tpu.memory_space<smem>>
    %c280 = arith.constant 280 : index
    %382 = memref.load %arg5[%c280] : memref<288xf32, #tpu.memory_space<smem>>
    %c281 = arith.constant 281 : index
    %383 = memref.load %arg5[%c281] : memref<288xf32, #tpu.memory_space<smem>>
    %c282 = arith.constant 282 : index
    %384 = memref.load %arg5[%c282] : memref<288xf32, #tpu.memory_space<smem>>
    %c283 = arith.constant 283 : index
    %385 = memref.load %arg5[%c283] : memref<288xf32, #tpu.memory_space<smem>>
    %c284 = arith.constant 284 : index
    %386 = memref.load %arg5[%c284] : memref<288xf32, #tpu.memory_space<smem>>
    %c285 = arith.constant 285 : index
    %387 = memref.load %arg5[%c285] : memref<288xf32, #tpu.memory_space<smem>>
    %c286 = arith.constant 286 : index
    %388 = memref.load %arg5[%c286] : memref<288xf32, #tpu.memory_space<smem>>
    %c287 = arith.constant 287 : index
    %389 = memref.load %arg5[%c287] : memref<288xf32, #tpu.memory_space<smem>>
    %c0_151 = arith.constant 0 : index
    %390 = memref.load %arg6[%c0_151] : memref<8xf32, #tpu.memory_space<smem>>
    %c1_152 = arith.constant 1 : index
    %391 = memref.load %arg6[%c1_152] : memref<8xf32, #tpu.memory_space<smem>>
    %c2_153 = arith.constant 2 : index
    %392 = memref.load %arg6[%c2_153] : memref<8xf32, #tpu.memory_space<smem>>
    %c3_154 = arith.constant 3 : index
    %393 = memref.load %arg6[%c3_154] : memref<8xf32, #tpu.memory_space<smem>>
    %c4_155 = arith.constant 4 : index
    %394 = memref.load %arg6[%c4_155] : memref<8xf32, #tpu.memory_space<smem>>
    %c5_156 = arith.constant 5 : index
    %395 = memref.load %arg6[%c5_156] : memref<8xf32, #tpu.memory_space<smem>>
    %c6_157 = arith.constant 6 : index
    %396 = memref.load %arg6[%c6_157] : memref<8xf32, #tpu.memory_space<smem>>
    %c7_158 = arith.constant 7 : index
    %397 = memref.load %arg6[%c7_158] : memref<8xf32, #tpu.memory_space<smem>>
    %398 = vector.broadcast %390 : f32 to vector<8x128xf32>
    %c0_159 = arith.constant 0 : index
    %c0_160 = arith.constant 0 : index
    %c0_161 = arith.constant 0 : index
    %399 = vector.load %arg8[%c0_159, %c0_160, %c0_161] : memref<12x8x256xf32, #tpu.memory_space<vmem>>, vector<1x8x128xf32>
    %400 = vector.shape_cast %399 : vector<1x8x128xf32> to vector<8x128xf32>
    %401 = vector.broadcast %102 : f32 to vector<8x128xf32>
    %402 = arith.mulf %401, %400 : vector<8x128xf32>
    %403 = arith.addf %398, %402 : vector<8x128xf32>
    %c0_162 = arith.constant 0 : index
    %c0_163 = arith.constant 0 : index
    %c1_164 = arith.constant 1 : index
    %404 = vector.load %arg8[%c0_162, %c0_163, %c1_164] : memref<12x8x256xf32, #tpu.memory_space<vmem>>, vector<1x8x128xf32>
    %405 = vector.shape_cast %404 : vector<1x8x128xf32> to vector<8x128xf32>
    %406 = vector.broadcast %134 : f32 to vector<8x128xf32>
    %407 = arith.mulf %406, %405 : vector<8x128xf32>
    %408 = arith.addf %403, %407 : vector<8x128xf32>
    %c0_165 = arith.constant 0 : index
    %c0_166 = arith.constant 0 : index
    %c2_167 = arith.constant 2 : index
    %409 = vector.load %arg8[%c0_165, %c0_166, %c2_167] : memref<12x8x256xf32, #tpu.memory_space<vmem>>, vector<1x8x128xf32>
    %410 = vector.shape_cast %409 : vector<1x8x128xf32> to vector<8x128xf32>
    %411 = vector.broadcast %166 : f32 to vector<8x128xf32>
    %412 = arith.mulf %411, %410 : vector<8x128xf32>
    %413 = arith.addf %408, %412 : vector<8x128xf32>
    %c1_168 = arith.constant 1 : index
    %c0_169 = arith.constant 0 : index
    %c0_170 = arith.constant 0 : index
    %414 = vector.load %arg8[%c1_168, %c0_169, %c0_170] : memref<12x8x256xf32, #tpu.memory_space<vmem>>, vector<1x8x128xf32>
    %415 = vector.shape_cast %414 : vector<1x8x128xf32> to vector<8x128xf32>
    %416 = vector.broadcast %198 : f32 to vector<8x128xf32>
    %417 = arith.mulf %416, %415 : vector<8x128xf32>
    %418 = arith.addf %413, %417 : vector<8x128xf32>
    %c1_171 = arith.constant 1 : index
    %c0_172 = arith.constant 0 : index
    %c1_173 = arith.constant 1 : index
    %419 = vector.load %arg8[%c1_171, %c0_172, %c1_173] : memref<12x8x256xf32, #tpu.memory_space<vmem>>, vector<1x8x128xf32>
    %420 = vector.shape_cast %419 : vector<1x8x128xf32> to vector<8x128xf32>
    %421 = vector.broadcast %230 : f32 to vector<8x128xf32>
    %422 = arith.mulf %421, %420 : vector<8x128xf32>
    %423 = arith.addf %418, %422 : vector<8x128xf32>
    %c1_174 = arith.constant 1 : index
    %c0_175 = arith.constant 0 : index
    %c2_176 = arith.constant 2 : index
    %424 = vector.load %arg8[%c1_174, %c0_175, %c2_176] : memref<12x8x256xf32, #tpu.memory_space<vmem>>, vector<1x8x128xf32>
    %425 = vector.shape_cast %424 : vector<1x8x128xf32> to vector<8x128xf32>
    %426 = vector.broadcast %262 : f32 to vector<8x128xf32>
    %427 = arith.mulf %426, %425 : vector<8x128xf32>
    %428 = arith.addf %423, %427 : vector<8x128xf32>
    %c2_177 = arith.constant 2 : index
    %c0_178 = arith.constant 0 : index
    %c0_179 = arith.constant 0 : index
    %429 = vector.load %arg8[%c2_177, %c0_178, %c0_179] : memref<12x8x256xf32, #tpu.memory_space<vmem>>, vector<1x8x128xf32>
    %430 = vector.shape_cast %429 : vector<1x8x128xf32> to vector<8x128xf32>
    %431 = vector.broadcast %294 : f32 to vector<8x128xf32>
    %432 = arith.mulf %431, %430 : vector<8x128xf32>
    %433 = arith.addf %428, %432 : vector<8x128xf32>
    %c2_180 = arith.constant 2 : index
    %c0_181 = arith.constant 0 : index
    %c1_182 = arith.constant 1 : index
    %434 = vector.load %arg8[%c2_180, %c0_181, %c1_182] : memref<12x8x256xf32, #tpu.memory_space<vmem>>, vector<1x8x128xf32>
    %435 = vector.shape_cast %434 : vector<1x8x128xf32> to vector<8x128xf32>
    %436 = vector.broadcast %326 : f32 to vector<8x128xf32>
    %437 = arith.mulf %436, %435 : vector<8x128xf32>
    %438 = arith.addf %433, %437 : vector<8x128xf32>
    %c2_183 = arith.constant 2 : index
    %c0_184 = arith.constant 0 : index
    %c2_185 = arith.constant 2 : index
    %439 = vector.load %arg8[%c2_183, %c0_184, %c2_185] : memref<12x8x256xf32, #tpu.memory_space<vmem>>, vector<1x8x128xf32>
    %440 = vector.shape_cast %439 : vector<1x8x128xf32> to vector<8x128xf32>
    %441 = vector.broadcast %358 : f32 to vector<8x128xf32>
    %442 = arith.mulf %441, %440 : vector<8x128xf32>
    %443 = arith.addf %438, %442 : vector<8x128xf32>
    %c3_186 = arith.constant 3 : index
    %c0_187 = arith.constant 0 : index
    %c0_188 = arith.constant 0 : index
    %444 = vector.load %arg8[%c3_186, %c0_187, %c0_188] : memref<12x8x256xf32, #tpu.memory_space<vmem>>, vector<1x8x128xf32>
    %445 = vector.shape_cast %444 : vector<1x8x128xf32> to vector<8x128xf32>
    %446 = vector.broadcast %110 : f32 to vector<8x128xf32>
    %447 = arith.mulf %446, %445 : vector<8x128xf32>
    %448 = arith.addf %443, %447 : vector<8x128xf32>
    %c3_189 = arith.constant 3 : index
    %c0_190 = arith.constant 0 : index
    %c1_191 = arith.constant 1 : index
    %449 = vector.load %arg8[%c3_189, %c0_190, %c1_191] : memref<12x8x256xf32, #tpu.memory_space<vmem>>, vector<1x8x128xf32>
    %450 = vector.shape_cast %449 : vector<1x8x128xf32> to vector<8x128xf32>
    %451 = vector.broadcast %142 : f32 to vector<8x128xf32>
    %452 = arith.mulf %451, %450 : vector<8x128xf32>
    %453 = arith.addf %448, %452 : vector<8x128xf32>
    %c3_192 = arith.constant 3 : index
    %c0_193 = arith.constant 0 : index
    %c2_194 = arith.constant 2 : index
    %454 = vector.load %arg8[%c3_192, %c0_193, %c2_194] : memref<12x8x256xf32, #tpu.memory_space<vmem>>, vector<1x8x128xf32>
    %455 = vector.shape_cast %454 : vector<1x8x128xf32> to vector<8x128xf32>
    %456 = vector.broadcast %174 : f32 to vector<8x128xf32>
    %457 = arith.mulf %456, %455 : vector<8x128xf32>
    %458 = arith.addf %453, %457 : vector<8x128xf32>
    %c4_195 = arith.constant 4 : index
    %c0_196 = arith.constant 0 : index
    %c0_197 = arith.constant 0 : index
    %459 = vector.load %arg8[%c4_195, %c0_196, %c0_197] : memref<12x8x256xf32, #tpu.memory_space<vmem>>, vector<1x8x128xf32>
    %460 = vector.shape_cast %459 : vector<1x8x128xf32> to vector<8x128xf32>
    %461 = vector.broadcast %206 : f32 to vector<8x128xf32>
    %462 = arith.mulf %461, %460 : vector<8x128xf32>
    %463 = arith.addf %458, %462 : vector<8x128xf32>
    %c4_198 = arith.constant 4 : index
    %c0_199 = arith.constant 0 : index
    %c1_200 = arith.constant 1 : index
    %464 = vector.load %arg8[%c4_198, %c0_199, %c1_200] : memref<12x8x256xf32, #tpu.memory_space<vmem>>, vector<1x8x128xf32>
    %465 = vector.shape_cast %464 : vector<1x8x128xf32> to vector<8x128xf32>
    %466 = vector.broadcast %238 : f32 to vector<8x128xf32>
    %467 = arith.mulf %466, %465 : vector<8x128xf32>
    %468 = arith.addf %463, %467 : vector<8x128xf32>
    %c4_201 = arith.constant 4 : index
    %c0_202 = arith.constant 0 : index
    %c2_203 = arith.constant 2 : index
    %469 = vector.load %arg8[%c4_201, %c0_202, %c2_203] : memref<12x8x256xf32, #tpu.memory_space<vmem>>, vector<1x8x128xf32>
    %470 = vector.shape_cast %469 : vector<1x8x128xf32> to vector<8x128xf32>
    %471 = vector.broadcast %270 : f32 to vector<8x128xf32>
    %472 = arith.mulf %471, %470 : vector<8x128xf32>
    %473 = arith.addf %468, %472 : vector<8x128xf32>
    %c5_204 = arith.constant 5 : index
    %c0_205 = arith.constant 0 : index
    %c0_206 = arith.constant 0 : index
    %474 = vector.load %arg8[%c5_204, %c0_205, %c0_206] : memref<12x8x256xf32, #tpu.memory_space<vmem>>, vector<1x8x128xf32>
    %475 = vector.shape_cast %474 : vector<1x8x128xf32> to vector<8x128xf32>
    %476 = vector.broadcast %302 : f32 to vector<8x128xf32>
    %477 = arith.mulf %476, %475 : vector<8x128xf32>
    %478 = arith.addf %473, %477 : vector<8x128xf32>
    %c5_207 = arith.constant 5 : index
    %c0_208 = arith.constant 0 : index
    %c1_209 = arith.constant 1 : index
    %479 = vector.load %arg8[%c5_207, %c0_208, %c1_209] : memref<12x8x256xf32, #tpu.memory_space<vmem>>, vector<1x8x128xf32>
    %480 = vector.shape_cast %479 : vector<1x8x128xf32> to vector<8x128xf32>
    %481 = vector.broadcast %334 : f32 to vector<8x128xf32>
    %482 = arith.mulf %481, %480 : vector<8x128xf32>
    %483 = arith.addf %478, %482 : vector<8x128xf32>
    %c5_210 = arith.constant 5 : index
    %c0_211 = arith.constant 0 : index
    %c2_212 = arith.constant 2 : index
    %484 = vector.load %arg8[%c5_210, %c0_211, %c2_212] : memref<12x8x256xf32, #tpu.memory_space<vmem>>, vector<1x8x128xf32>
    %485 = vector.shape_cast %484 : vector<1x8x128xf32> to vector<8x128xf32>
    %486 = vector.broadcast %366 : f32 to vector<8x128xf32>
    %487 = arith.mulf %486, %485 : vector<8x128xf32>
    %488 = arith.addf %483, %487 : vector<8x128xf32>
    %c6_213 = arith.constant 6 : index
    %c0_214 = arith.constant 0 : index
    %c0_215 = arith.constant 0 : index
    %489 = vector.load %arg8[%c6_213, %c0_214, %c0_215] : memref<12x8x256xf32, #tpu.memory_space<vmem>>, vector<1x8x128xf32>
    %490 = vector.shape_cast %489 : vector<1x8x128xf32> to vector<8x128xf32>
    %491 = vector.broadcast %118 : f32 to vector<8x128xf32>
    %492 = arith.mulf %491, %490 : vector<8x128xf32>
    %493 = arith.addf %488, %492 : vector<8x128xf32>
    %c6_216 = arith.constant 6 : index
    %c0_217 = arith.constant 0 : index
    %c1_218 = arith.constant 1 : index
    %494 = vector.load %arg8[%c6_216, %c0_217, %c1_218] : memref<12x8x256xf32, #tpu.memory_space<vmem>>, vector<1x8x128xf32>
    %495 = vector.shape_cast %494 : vector<1x8x128xf32> to vector<8x128xf32>
    %496 = vector.broadcast %150 : f32 to vector<8x128xf32>
    %497 = arith.mulf %496, %495 : vector<8x128xf32>
    %498 = arith.addf %493, %497 : vector<8x128xf32>
    %c6_219 = arith.constant 6 : index
    %c0_220 = arith.constant 0 : index
    %c2_221 = arith.constant 2 : index
    %499 = vector.load %arg8[%c6_219, %c0_220, %c2_221] : memref<12x8x256xf32, #tpu.memory_space<vmem>>, vector<1x8x128xf32>
    %500 = vector.shape_cast %499 : vector<1x8x128xf32> to vector<8x128xf32>
    %501 = vector.broadcast %182 : f32 to vector<8x128xf32>
    %502 = arith.mulf %501, %500 : vector<8x128xf32>
    %503 = arith.addf %498, %502 : vector<8x128xf32>
    %c7_222 = arith.constant 7 : index
    %c0_223 = arith.constant 0 : index
    %c0_224 = arith.constant 0 : index
    %504 = vector.load %arg8[%c7_222, %c0_223, %c0_224] : memref<12x8x256xf32, #tpu.memory_space<vmem>>, vector<1x8x128xf32>
    %505 = vector.shape_cast %504 : vector<1x8x128xf32> to vector<8x128xf32>
    %506 = vector.broadcast %214 : f32 to vector<8x128xf32>
    %507 = arith.mulf %506, %505 : vector<8x128xf32>
    %508 = arith.addf %503, %507 : vector<8x128xf32>
    %c7_225 = arith.constant 7 : index
    %c0_226 = arith.constant 0 : index
    %c1_227 = arith.constant 1 : index
    %509 = vector.load %arg8[%c7_225, %c0_226, %c1_227] : memref<12x8x256xf32, #tpu.memory_space<vmem>>, vector<1x8x128xf32>
    %510 = vector.shape_cast %509 : vector<1x8x128xf32> to vector<8x128xf32>
    %511 = vector.broadcast %246 : f32 to vector<8x128xf32>
    %512 = arith.mulf %511, %510 : vector<8x128xf32>
    %513 = arith.addf %508, %512 : vector<8x128xf32>
    %c7_228 = arith.constant 7 : index
    %c0_229 = arith.constant 0 : index
    %c2_230 = arith.constant 2 : index
    %514 = vector.load %arg8[%c7_228, %c0_229, %c2_230] : memref<12x8x256xf32, #tpu.memory_space<vmem>>, vector<1x8x128xf32>
    %515 = vector.shape_cast %514 : vector<1x8x128xf32> to vector<8x128xf32>
    %516 = vector.broadcast %278 : f32 to vector<8x128xf32>
    %517 = arith.mulf %516, %515 : vector<8x128xf32>
    %518 = arith.addf %513, %517 : vector<8x128xf32>
    %c8_231 = arith.constant 8 : index
    %c0_232 = arith.constant 0 : index
    %c0_233 = arith.constant 0 : index
    %519 = vector.load %arg8[%c8_231, %c0_232, %c0_233] : memref<12x8x256xf32, #tpu.memory_space<vmem>>, vector<1x8x128xf32>
    %520 = vector.shape_cast %519 : vector<1x8x128xf32> to vector<8x128xf32>
    %521 = vector.broadcast %310 : f32 to vector<8x128xf32>
    %522 = arith.mulf %521, %520 : vector<8x128xf32>
    %523 = arith.addf %518, %522 : vector<8x128xf32>
    %c8_234 = arith.constant 8 : index
    %c0_235 = arith.constant 0 : index
    %c1_236 = arith.constant 1 : index
    %524 = vector.load %arg8[%c8_234, %c0_235, %c1_236] : memref<12x8x256xf32, #tpu.memory_space<vmem>>, vector<1x8x128xf32>
    %525 = vector.shape_cast %524 : vector<1x8x128xf32> to vector<8x128xf32>
    %526 = vector.broadcast %342 : f32 to vector<8x128xf32>
    %527 = arith.mulf %526, %525 : vector<8x128xf32>
    %528 = arith.addf %523, %527 : vector<8x128xf32>
    %c8_237 = arith.constant 8 : index
    %c0_238 = arith.constant 0 : index
    %c2_239 = arith.constant 2 : index
    %529 = vector.load %arg8[%c8_237, %c0_238, %c2_239] : memref<12x8x256xf32, #tpu.memory_space<vmem>>, vector<1x8x128xf32>
    %530 = vector.shape_cast %529 : vector<1x8x128xf32> to vector<8x128xf32>
    %531 = vector.broadcast %374 : f32 to vector<8x128xf32>
    %532 = arith.mulf %531, %530 : vector<8x128xf32>
    %533 = arith.addf %528, %532 : vector<8x128xf32>
    %c9_240 = arith.constant 9 : index
    %c0_241 = arith.constant 0 : index
    %c0_242 = arith.constant 0 : index
    %534 = vector.load %arg8[%c9_240, %c0_241, %c0_242] : memref<12x8x256xf32, #tpu.memory_space<vmem>>, vector<1x8x128xf32>
    %535 = vector.shape_cast %534 : vector<1x8x128xf32> to vector<8x128xf32>
    %536 = vector.broadcast %126 : f32 to vector<8x128xf32>
    %537 = arith.mulf %536, %535 : vector<8x128xf32>
    %538 = arith.addf %533, %537 : vector<8x128xf32>
    %c9_243 = arith.constant 9 : index
    %c0_244 = arith.constant 0 : index
    %c1_245 = arith.constant 1 : index
    %539 = vector.load %arg8[%c9_243, %c0_244, %c1_245] : memref<12x8x256xf32, #tpu.memory_space<vmem>>, vector<1x8x128xf32>
    %540 = vector.shape_cast %539 : vector<1x8x128xf32> to vector<8x128xf32>
    %541 = vector.broadcast %158 : f32 to vector<8x128xf32>
    %542 = arith.mulf %541, %540 : vector<8x128xf32>
    %543 = arith.addf %538, %542 : vector<8x128xf32>
    %c9_246 = arith.constant 9 : index
    %c0_247 = arith.constant 0 : index
    %c2_248 = arith.constant 2 : index
    %544 = vector.load %arg8[%c9_246, %c0_247, %c2_248] : memref<12x8x256xf32, #tpu.memory_space<vmem>>, vector<1x8x128xf32>
    %545 = vector.shape_cast %544 : vector<1x8x128xf32> to vector<8x128xf32>
    %546 = vector.broadcast %190 : f32 to vector<8x128xf32>
    %547 = arith.mulf %546, %545 : vector<8x128xf32>
    %548 = arith.addf %543, %547 : vector<8x128xf32>
    %c10_249 = arith.constant 10 : index
    %c0_250 = arith.constant 0 : index
    %c0_251 = arith.constant 0 : index
    %549 = vector.load %arg8[%c10_249, %c0_250, %c0_251] : memref<12x8x256xf32, #tpu.memory_space<vmem>>, vector<1x8x128xf32>
    %550 = vector.shape_cast %549 : vector<1x8x128xf32> to vector<8x128xf32>
    %551 = vector.broadcast %222 : f32 to vector<8x128xf32>
    %552 = arith.mulf %551, %550 : vector<8x128xf32>
    %553 = arith.addf %548, %552 : vector<8x128xf32>
    %c10_252 = arith.constant 10 : index
    %c0_253 = arith.constant 0 : index
    %c1_254 = arith.constant 1 : index
    %554 = vector.load %arg8[%c10_252, %c0_253, %c1_254] : memref<12x8x256xf32, #tpu.memory_space<vmem>>, vector<1x8x128xf32>
    %555 = vector.shape_cast %554 : vector<1x8x128xf32> to vector<8x128xf32>
    %556 = vector.broadcast %254 : f32 to vector<8x128xf32>
    %557 = arith.mulf %556, %555 : vector<8x128xf32>
    %558 = arith.addf %553, %557 : vector<8x128xf32>
    %c10_255 = arith.constant 10 : index
    %c0_256 = arith.constant 0 : index
    %c2_257 = arith.constant 2 : index
    %559 = vector.load %arg8[%c10_255, %c0_256, %c2_257] : memref<12x8x256xf32, #tpu.memory_space<vmem>>, vector<1x8x128xf32>
    %560 = vector.shape_cast %559 : vector<1x8x128xf32> to vector<8x128xf32>
    %561 = vector.broadcast %286 : f32 to vector<8x128xf32>
    %562 = arith.mulf %561, %560 : vector<8x128xf32>
    %563 = arith.addf %558, %562 : vector<8x128xf32>
    %c11_258 = arith.constant 11 : index
    %c0_259 = arith.constant 0 : index
    %c0_260 = arith.constant 0 : index
    %564 = vector.load %arg8[%c11_258, %c0_259, %c0_260] : memref<12x8x256xf32, #tpu.memory_space<vmem>>, vector<1x8x128xf32>
    %565 = vector.shape_cast %564 : vector<1x8x128xf32> to vector<8x128xf32>
    %566 = vector.broadcast %318 : f32 to vector<8x128xf32>
    %567 = arith.mulf %566, %565 : vector<8x128xf32>
    %568 = arith.addf %563, %567 : vector<8x128xf32>
    %c11_261 = arith.constant 11 : index
    %c0_262 = arith.constant 0 : index
    %c1_263 = arith.constant 1 : index
    %569 = vector.load %arg8[%c11_261, %c0_262, %c1_263] : memref<12x8x256xf32, #tpu.memory_space<vmem>>, vector<1x8x128xf32>
    %570 = vector.shape_cast %569 : vector<1x8x128xf32> to vector<8x128xf32>
    %571 = vector.broadcast %350 : f32 to vector<8x128xf32>
    %572 = arith.mulf %571, %570 : vector<8x128xf32>
    %573 = arith.addf %568, %572 : vector<8x128xf32>
    %c11_264 = arith.constant 11 : index
    %c0_265 = arith.constant 0 : index
    %c2_266 = arith.constant 2 : index
    %574 = vector.load %arg8[%c11_264, %c0_265, %c2_266] : memref<12x8x256xf32, #tpu.memory_space<vmem>>, vector<1x8x128xf32>
    %575 = vector.shape_cast %574 : vector<1x8x128xf32> to vector<8x128xf32>
    %576 = vector.broadcast %382 : f32 to vector<8x128xf32>
    %577 = arith.mulf %576, %575 : vector<8x128xf32>
    %578 = arith.addf %573, %577 : vector<8x128xf32>
    %c0_267 = arith.constant 0 : index
    %c0_268 = arith.constant 0 : index
    %c0_269 = arith.constant 0 : index
    %c0_270 = arith.constant 0 : index
    %579 = vector.load %arg7[%c0_267, %c0_268, %c0_269, %c0_270] : memref<1x8x8x128xf32, #tpu.memory_space<vmem>>, vector<1x1x8x128xf32>
    %580 = vector.shape_cast %579 : vector<1x1x8x128xf32> to vector<8x128xf32>
    %581 = vector.shape_cast %578 : vector<8x128xf32> to vector<1x1x8x128xf32>
    tpu.vector_store %arg7[%c0_267, %c0_268, %c0_269, %c0_270], %581 {strides = array<i32>} : memref<1x8x8x128xf32, #tpu.memory_space<vmem>>, vector<1x1x8x128xf32>,
    %582 = vector.broadcast %391 : f32 to vector<8x128xf32>
    %c0_271 = arith.constant 0 : index
    %c0_272 = arith.constant 0 : index
    %c0_273 = arith.constant 0 : index
    %583 = vector.load %arg8[%c0_271, %c0_272, %c0_273] : memref<12x8x256xf32, #tpu.memory_space<vmem>>, vector<1x8x128xf32>
    %584 = vector.shape_cast %583 : vector<1x8x128xf32> to vector<8x128xf32>
    %585 = vector.broadcast %103 : f32 to vector<8x128xf32>
    %586 = arith.mulf %585, %584 : vector<8x128xf32>
    %587 = arith.addf %582, %586 : vector<8x128xf32>
    %c0_274 = arith.constant 0 : index
    %c0_275 = arith.constant 0 : index
    %c1_276 = arith.constant 1 : index
    %588 = vector.load %arg8[%c0_274, %c0_275, %c1_276] : memref<12x8x256xf32, #tpu.memory_space<vmem>>, vector<1x8x128xf32>
    %589 = vector.shape_cast %588 : vector<1x8x128xf32> to vector<8x128xf32>
    %590 = vector.broadcast %135 : f32 to vector<8x128xf32>
    %591 = arith.mulf %590, %589 : vector<8x128xf32>
    %592 = arith.addf %587, %591 : vector<8x128xf32>
    %c0_277 = arith.constant 0 : index
    %c0_278 = arith.constant 0 : index
    %c2_279 = arith.constant 2 : index
    %593 = vector.load %arg8[%c0_277, %c0_278, %c2_279] : memref<12x8x256xf32, #tpu.memory_space<vmem>>, vector<1x8x128xf32>
    %594 = vector.shape_cast %593 : vector<1x8x128xf32> to vector<8x128xf32>
    %595 = vector.broadcast %167 : f32 to vector<8x128xf32>
    %596 = arith.mulf %595, %594 : vector<8x128xf32>
    %597 = arith.addf %592, %596 : vector<8x128xf32>
    %c1_280 = arith.constant 1 : index
    %c0_281 = arith.constant 0 : index
    %c0_282 = arith.constant 0 : index
    %598 = vector.load %arg8[%c1_280, %c0_281, %c0_282] : memref<12x8x256xf32, #tpu.memory_space<vmem>>, vector<1x8x128xf32>
    %599 = vector.shape_cast %598 : vector<1x8x128xf32> to vector<8x128xf32>
    %600 = vector.broadcast %199 : f32 to vector<8x128xf32>
    %601 = arith.mulf %600, %599 : vector<8x128xf32>
    %602 = arith.addf %597, %601 : vector<8x128xf32>
    %c1_283 = arith.constant 1 : index
    %c0_284 = arith.constant 0 : index
    %c1_285 = arith.constant 1 : index
    %603 = vector.load %arg8[%c1_283, %c0_284, %c1_285] : memref<12x8x256xf32, #tpu.memory_space<vmem>>, vector<1x8x128xf32>
    %604 = vector.shape_cast %603 : vector<1x8x128xf32> to vector<8x128xf32>
    %605 = vector.broadcast %231 : f32 to vector<8x128xf32>
    %606 = arith.mulf %605, %604 : vector<8x128xf32>
    %607 = arith.addf %602, %606 : vector<8x128xf32>
    %c1_286 = arith.constant 1 : index
    %c0_287 = arith.constant 0 : index
    %c2_288 = arith.constant 2 : index
    %608 = vector.load %arg8[%c1_286, %c0_287, %c2_288] : memref<12x8x256xf32, #tpu.memory_space<vmem>>, vector<1x8x128xf32>
    %609 = vector.shape_cast %608 : vector<1x8x128xf32> to vector<8x128xf32>
    %610 = vector.broadcast %263 : f32 to vector<8x128xf32>
    %611 = arith.mulf %610, %609 : vector<8x128xf32>
    %612 = arith.addf %607, %611 : vector<8x128xf32>
    %c2_289 = arith.constant 2 : index
    %c0_290 = arith.constant 0 : index
    %c0_291 = arith.constant 0 : index
    %613 = vector.load %arg8[%c2_289, %c0_290, %c0_291] : memref<12x8x256xf32, #tpu.memory_space<vmem>>, vector<1x8x128xf32>
    %614 = vector.shape_cast %613 : vector<1x8x128xf32> to vector<8x128xf32>
    %615 = vector.broadcast %295 : f32 to vector<8x128xf32>
    %616 = arith.mulf %615, %614 : vector<8x128xf32>
    %617 = arith.addf %612, %616 : vector<8x128xf32>
    %c2_292 = arith.constant 2 : index
    %c0_293 = arith.constant 0 : index
    %c1_294 = arith.constant 1 : index
    %618 = vector.load %arg8[%c2_292, %c0_293, %c1_294] : memref<12x8x256xf32, #tpu.memory_space<vmem>>, vector<1x8x128xf32>
    %619 = vector.shape_cast %618 : vector<1x8x128xf32> to vector<8x128xf32>
    %620 = vector.broadcast %327 : f32 to vector<8x128xf32>
    %621 = arith.mulf %620, %619 : vector<8x128xf32>
    %622 = arith.addf %617, %621 : vector<8x128xf32>
    %c2_295 = arith.constant 2 : index
    %c0_296 = arith.constant 0 : index
    %c2_297 = arith.constant 2 : index
    %623 = vector.load %arg8[%c2_295, %c0_296, %c2_297] : memref<12x8x256xf32, #tpu.memory_space<vmem>>, vector<1x8x128xf32>
    %624 = vector.shape_cast %623 : vector<1x8x128xf32> to vector<8x128xf32>
    %625 = vector.broadcast %359 : f32 to vector<8x128xf32>
    %626 = arith.mulf %625, %624 : vector<8x128xf32>
    %627 = arith.addf %622, %626 : vector<8x128xf32>
    %c3_298 = arith.constant 3 : index
    %c0_299 = arith.constant 0 : index
    %c0_300 = arith.constant 0 : index
    %628 = vector.load %arg8[%c3_298, %c0_299, %c0_300] : memref<12x8x256xf32, #tpu.memory_space<vmem>>, vector<1x8x128xf32>
    %629 = vector.shape_cast %628 : vector<1x8x128xf32> to vector<8x128xf32>
    %630 = vector.broadcast %111 : f32 to vector<8x128xf32>
    %631 = arith.mulf %630, %629 : vector<8x128xf32>
    %632 = arith.addf %627, %631 : vector<8x128xf32>
    %c3_301 = arith.constant 3 : index
    %c0_302 = arith.constant 0 : index
    %c1_303 = arith.constant 1 : index
    %633 = vector.load %arg8[%c3_301, %c0_302, %c1_303] : memref<12x8x256xf32, #tpu.memory_space<vmem>>, vector<1x8x128xf32>
    %634 = vector.shape_cast %633 : vector<1x8x128xf32> to vector<8x128xf32>
    %635 = vector.broadcast %143 : f32 to vector<8x128xf32>
    %636 = arith.mulf %635, %634 : vector<8x128xf32>
    %637 = arith.addf %632, %636 : vector<8x128xf32>
    %c3_304 = arith.constant 3 : index
    %c0_305 = arith.constant 0 : index
    %c2_306 = arith.constant 2 : index
    %638 = vector.load %arg8[%c3_304, %c0_305, %c2_306] : memref<12x8x256xf32, #tpu.memory_space<vmem>>, vector<1x8x128xf32>
    %639 = vector.shape_cast %638 : vector<1x8x128xf32> to vector<8x128xf32>
    %640 = vector.broadcast %175 : f32 to vector<8x128xf32>
    %641 = arith.mulf %640, %639 : vector<8x128xf32>
    %642 = arith.addf %637, %641 : vector<8x128xf32>
    %c4_307 = arith.constant 4 : index
    %c0_308 = arith.constant 0 : index
    %c0_309 = arith.constant 0 : index
    %643 = vector.load %arg8[%c4_307, %c0_308, %c0_309] : memref<12x8x256xf32, #tpu.memory_space<vmem>>, vector<1x8x128xf32>
    %644 = vector.shape_cast %643 : vector<1x8x128xf32> to vector<8x128xf32>
    %645 = vector.broadcast %207 : f32 to vector<8x128xf32>
    %646 = arith.mulf %645, %644 : vector<8x128xf32>
    %647 = arith.addf %642, %646 : vector<8x128xf32>
    %c4_310 = arith.constant 4 : index
    %c0_311 = arith.constant 0 : index
    %c1_312 = arith.constant 1 : index
    %648 = vector.load %arg8[%c4_310, %c0_311, %c1_312] : memref<12x8x256xf32, #tpu.memory_space<vmem>>, vector<1x8x128xf32>
    %649 = vector.shape_cast %648 : vector<1x8x128xf32> to vector<8x128xf32>
    %650 = vector.broadcast %239 : f32 to vector<8x128xf32>
    %651 = arith.mulf %650, %649 : vector<8x128xf32>
    %652 = arith.addf %647, %651 : vector<8x128xf32>
    %c4_313 = arith.constant 4 : index
    %c0_314 = arith.constant 0 : index
    %c2_315 = arith.constant 2 : index
    %653 = vector.load %arg8[%c4_313, %c0_314, %c2_315] : memref<12x8x256xf32, #tpu.memory_space<vmem>>, vector<1x8x128xf32>
    %654 = vector.shape_cast %653 : vector<1x8x128xf32> to vector<8x128xf32>
    %655 = vector.broadcast %271 : f32 to vector<8x128xf32>
    %656 = arith.mulf %655, %654 : vector<8x128xf32>
    %657 = arith.addf %652, %656 : vector<8x128xf32>
    %c5_316 = arith.constant 5 : index
    %c0_317 = arith.constant 0 : index
    %c0_318 = arith.constant 0 : index
    %658 = vector.load %arg8[%c5_316, %c0_317, %c0_318] : memref<12x8x256xf32, #tpu.memory_space<vmem>>, vector<1x8x128xf32>
    %659 = vector.shape_cast %658 : vector<1x8x128xf32> to vector<8x128xf32>
    %660 = vector.broadcast %303 : f32 to vector<8x128xf32>
    %661 = arith.mulf %660, %659 : vector<8x128xf32>
    %662 = arith.addf %657, %661 : vector<8x128xf32>
    %c5_319 = arith.constant 5 : index
    %c0_320 = arith.constant 0 : index
    %c1_321 = arith.constant 1 : index
    %663 = vector.load %arg8[%c5_319, %c0_320, %c1_321] : memref<12x8x256xf32, #tpu.memory_space<vmem>>, vector<1x8x128xf32>
    %664 = vector.shape_cast %663 : vector<1x8x128xf32> to vector<8x128xf32>
    %665 = vector.broadcast %335 : f32 to vector<8x128xf32>
    %666 = arith.mulf %665, %664 : vector<8x128xf32>
    %667 = arith.addf %662, %666 : vector<8x128xf32>
    %c5_322 = arith.constant 5 : index
    %c0_323 = arith.constant 0 : index
    %c2_324 = arith.constant 2 : index
    %668 = vector.load %arg8[%c5_322, %c0_323, %c2_324] : memref<12x8x256xf32, #tpu.memory_space<vmem>>, vector<1x8x128xf32>
    %669 = vector.shape_cast %668 : vector<1x8x128xf32> to vector<8x128xf32>
    %670 = vector.broadcast %367 : f32 to vector<8x128xf32>
    %671 = arith.mulf %670, %669 : vector<8x128xf32>
    %672 = arith.addf %667, %671 : vector<8x128xf32>
    %c6_325 = arith.constant 6 : index
    %c0_326 = arith.constant 0 : index
    %c0_327 = arith.constant 0 : index
    %673 = vector.load %arg8[%c6_325, %c0_326, %c0_327] : memref<12x8x256xf32, #tpu.memory_space<vmem>>, vector<1x8x128xf32>
    %674 = vector.shape_cast %673 : vector<1x8x128xf32> to vector<8x128xf32>
    %675 = vector.broadcast %119 : f32 to vector<8x128xf32>
    %676 = arith.mulf %675, %674 : vector<8x128xf32>
    %677 = arith.addf %672, %676 : vector<8x128xf32>
    %c6_328 = arith.constant 6 : index
    %c0_329 = arith.constant 0 : index
    %c1_330 = arith.constant 1 : index
    %678 = vector.load %arg8[%c6_328, %c0_329, %c1_330] : memref<12x8x256xf32, #tpu.memory_space<vmem>>, vector<1x8x128xf32>
    %679 = vector.shape_cast %678 : vector<1x8x128xf32> to vector<8x128xf32>
    %680 = vector.broadcast %151 : f32 to vector<8x128xf32>
    %681 = arith.mulf %680, %679 : vector<8x128xf32>
    %682 = arith.addf %677, %681 : vector<8x128xf32>
    %c6_331 = arith.constant 6 : index
    %c0_332 = arith.constant 0 : index
    %c2_333 = arith.constant 2 : index
    %683 = vector.load %arg8[%c6_331, %c0_332, %c2_333] : memref<12x8x256xf32, #tpu.memory_space<vmem>>, vector<1x8x128xf32>
    %684 = vector.shape_cast %683 : vector<1x8x128xf32> to vector<8x128xf32>
    %685 = vector.broadcast %183 : f32 to vector<8x128xf32>
    %686 = arith.mulf %685, %684 : vector<8x128xf32>
    %687 = arith.addf %682, %686 : vector<8x128xf32>
    %c7_334 = arith.constant 7 : index
    %c0_335 = arith.constant 0 : index
    %c0_336 = arith.constant 0 : index
    %688 = vector.load %arg8[%c7_334, %c0_335, %c0_336] : memref<12x8x256xf32, #tpu.memory_space<vmem>>, vector<1x8x128xf32>
    %689 = vector.shape_cast %688 : vector<1x8x128xf32> to vector<8x128xf32>
    %690 = vector.broadcast %215 : f32 to vector<8x128xf32>
    %691 = arith.mulf %690, %689 : vector<8x128xf32>
    %692 = arith.addf %687, %691 : vector<8x128xf32>
    %c7_337 = arith.constant 7 : index
    %c0_338 = arith.constant 0 : index
    %c1_339 = arith.constant 1 : index
    %693 = vector.load %arg8[%c7_337, %c0_338, %c1_339] : memref<12x8x256xf32, #tpu.memory_space<vmem>>, vector<1x8x128xf32>
    %694 = vector.shape_cast %693 : vector<1x8x128xf32> to vector<8x128xf32>
    %695 = vector.broadcast %247 : f32 to vector<8x128xf32>
    %696 = arith.mulf %695, %694 : vector<8x128xf32>
    %697 = arith.addf %692, %696 : vector<8x128xf32>
    %c7_340 = arith.constant 7 : index
    %c0_341 = arith.constant 0 : index
    %c2_342 = arith.constant 2 : index
    %698 = vector.load %arg8[%c7_340, %c0_341, %c2_342] : memref<12x8x256xf32, #tpu.memory_space<vmem>>, vector<1x8x128xf32>
    %699 = vector.shape_cast %698 : vector<1x8x128xf32> to vector<8x128xf32>
    %700 = vector.broadcast %279 : f32 to vector<8x128xf32>
    %701 = arith.mulf %700, %699 : vector<8x128xf32>
    %702 = arith.addf %697, %701 : vector<8x128xf32>
    %c8_343 = arith.constant 8 : index
    %c0_344 = arith.constant 0 : index
    %c0_345 = arith.constant 0 : index
    %703 = vector.load %arg8[%c8_343, %c0_344, %c0_345] : memref<12x8x256xf32, #tpu.memory_space<vmem>>, vector<1x8x128xf32>
    %704 = vector.shape_cast %703 : vector<1x8x128xf32> to vector<8x128xf32>
    %705 = vector.broadcast %311 : f32 to vector<8x128xf32>
    %706 = arith.mulf %705, %704 : vector<8x128xf32>
    %707 = arith.addf %702, %706 : vector<8x128xf32>
    %c8_346 = arith.constant 8 : index
    %c0_347 = arith.constant 0 : index
    %c1_348 = arith.constant 1 : index
    %708 = vector.load %arg8[%c8_346, %c0_347, %c1_348] : memref<12x8x256xf32, #tpu.memory_space<vmem>>, vector<1x8x128xf32>
    %709 = vector.shape_cast %708 : vector<1x8x128xf32> to vector<8x128xf32>
    %710 = vector.broadcast %343 : f32 to vector<8x128xf32>
    %711 = arith.mulf %710, %709 : vector<8x128xf32>
    %712 = arith.addf %707, %711 : vector<8x128xf32>
    %c8_349 = arith.constant 8 : index
    %c0_350 = arith.constant 0 : index
    %c2_351 = arith.constant 2 : index
    %713 = vector.load %arg8[%c8_349, %c0_350, %c2_351] : memref<12x8x256xf32, #tpu.memory_space<vmem>>, vector<1x8x128xf32>
    %714 = vector.shape_cast %713 : vector<1x8x128xf32> to vector<8x128xf32>
    %715 = vector.broadcast %375 : f32 to vector<8x128xf32>
    %716 = arith.mulf %715, %714 : vector<8x128xf32>
    %717 = arith.addf %712, %716 : vector<8x128xf32>
    %c9_352 = arith.constant 9 : index
    %c0_353 = arith.constant 0 : index
    %c0_354 = arith.constant 0 : index
    %718 = vector.load %arg8[%c9_352, %c0_353, %c0_354] : memref<12x8x256xf32, #tpu.memory_space<vmem>>, vector<1x8x128xf32>
    %719 = vector.shape_cast %718 : vector<1x8x128xf32> to vector<8x128xf32>
    %720 = vector.broadcast %127 : f32 to vector<8x128xf32>
    %721 = arith.mulf %720, %719 : vector<8x128xf32>
    %722 = arith.addf %717, %721 : vector<8x128xf32>
    %c9_355 = arith.constant 9 : index
    %c0_356 = arith.constant 0 : index
    %c1_357 = arith.constant 1 : index
    %723 = vector.load %arg8[%c9_355, %c0_356, %c1_357] : memref<12x8x256xf32, #tpu.memory_space<vmem>>, vector<1x8x128xf32>
    %724 = vector.shape_cast %723 : vector<1x8x128xf32> to vector<8x128xf32>
    %725 = vector.broadcast %159 : f32 to vector<8x128xf32>
    %726 = arith.mulf %725, %724 : vector<8x128xf32>
    %727 = arith.addf %722, %726 : vector<8x128xf32>
    %c9_358 = arith.constant 9 : index
    %c0_359 = arith.constant 0 : index
    %c2_360 = arith.constant 2 : index
    %728 = vector.load %arg8[%c9_358, %c0_359, %c2_360] : memref<12x8x256xf32, #tpu.memory_space<vmem>>, vector<1x8x128xf32>
    %729 = vector.shape_cast %728 : vector<1x8x128xf32> to vector<8x128xf32>
    %730 = vector.broadcast %191 : f32 to vector<8x128xf32>
    %731 = arith.mulf %730, %729 : vector<8x128xf32>
    %732 = arith.addf %727, %731 : vector<8x128xf32>
    %c10_361 = arith.constant 10 : index
    %c0_362 = arith.constant 0 : index
    %c0_363 = arith.constant 0 : index
    %733 = vector.load %arg8[%c10_361, %c0_362, %c0_363] : memref<12x8x256xf32, #tpu.memory_space<vmem>>, vector<1x8x128xf32>
    %734 = vector.shape_cast %733 : vector<1x8x128xf32> to vector<8x128xf32>
    %735 = vector.broadcast %223 : f32 to vector<8x128xf32>
    %736 = arith.mulf %735, %734 : vector<8x128xf32>
    %737 = arith.addf %732, %736 : vector<8x128xf32>
    %c10_364 = arith.constant 10 : index
    %c0_365 = arith.constant 0 : index
    %c1_366 = arith.constant 1 : index
    %738 = vector.load %arg8[%c10_364, %c0_365, %c1_366] : memref<12x8x256xf32, #tpu.memory_space<vmem>>, vector<1x8x128xf32>
    %739 = vector.shape_cast %738 : vector<1x8x128xf32> to vector<8x128xf32>
    %740 = vector.broadcast %255 : f32 to vector<8x128xf32>
    %741 = arith.mulf %740, %739 : vector<8x128xf32>
    %742 = arith.addf %737, %741 : vector<8x128xf32>
    %c10_367 = arith.constant 10 : index
    %c0_368 = arith.constant 0 : index
    %c2_369 = arith.constant 2 : index
    %743 = vector.load %arg8[%c10_367, %c0_368, %c2_369] : memref<12x8x256xf32, #tpu.memory_space<vmem>>, vector<1x8x128xf32>
    %744 = vector.shape_cast %743 : vector<1x8x128xf32> to vector<8x128xf32>
    %745 = vector.broadcast %287 : f32 to vector<8x128xf32>
    %746 = arith.mulf %745, %744 : vector<8x128xf32>
    %747 = arith.addf %742, %746 : vector<8x128xf32>
    %c11_370 = arith.constant 11 : index
    %c0_371 = arith.constant 0 : index
    %c0_372 = arith.constant 0 : index
    %748 = vector.load %arg8[%c11_370, %c0_371, %c0_372] : memref<12x8x256xf32, #tpu.memory_space<vmem>>, vector<1x8x128xf32>
    %749 = vector.shape_cast %748 : vector<1x8x128xf32> to vector<8x128xf32>
    %750 = vector.broadcast %319 : f32 to vector<8x128xf32>
    %751 = arith.mulf %750, %749 : vector<8x128xf32>
    %752 = arith.addf %747, %751 : vector<8x128xf32>
    %c11_373 = arith.constant 11 : index
    %c0_374 = arith.constant 0 : index
    %c1_375 = arith.constant 1 : index
    %753 = vector.load %arg8[%c11_373, %c0_374, %c1_375] : memref<12x8x256xf32, #tpu.memory_space<vmem>>, vector<1x8x128xf32>
    %754 = vector.shape_cast %753 : vector<1x8x128xf32> to vector<8x128xf32>
    %755 = vector.broadcast %351 : f32 to vector<8x128xf32>
    %756 = arith.mulf %755, %754 : vector<8x128xf32>
    %757 = arith.addf %752, %756 : vector<8x128xf32>
    %c11_376 = arith.constant 11 : index
    %c0_377 = arith.constant 0 : index
    %c2_378 = arith.constant 2 : index
    %758 = vector.load %arg8[%c11_376, %c0_377, %c2_378] : memref<12x8x256xf32, #tpu.memory_space<vmem>>, vector<1x8x128xf32>
    %759 = vector.shape_cast %758 : vector<1x8x128xf32> to vector<8x128xf32>
    %760 = vector.broadcast %383 : f32 to vector<8x128xf32>
    %761 = arith.mulf %760, %759 : vector<8x128xf32>
    %762 = arith.addf %757, %761 : vector<8x128xf32>
    %c0_379 = arith.constant 0 : index
    %c1_380 = arith.constant 1 : index
    %c0_381 = arith.constant 0 : index
    %c0_382 = arith.constant 0 : index
    %763 = vector.load %arg7[%c0_379, %c1_380, %c0_381, %c0_382] : memref<1x8x8x128xf32, #tpu.memory_space<vmem>>, vector<1x1x8x128xf32>
    %764 = vector.shape_cast %763 : vector<1x1x8x128xf32> to vector<8x128xf32>
    %765 = vector.shape_cast %762 : vector<8x128xf32> to vector<1x1x8x128xf32>
    tpu.vector_store %arg7[%c0_379, %c1_380, %c0_381, %c0_382], %765 {strides = array<i32>} : memref<1x8x8x128xf32, #tpu.memory_space<vmem>>, vector<1x1x8x128xf32>,
    %766 = vector.broadcast %392 : f32 to vector<8x128xf32>
    %c0_383 = arith.constant 0 : index
    %c0_384 = arith.constant 0 : index
    %c0_385 = arith.constant 0 : index
    %767 = vector.load %arg8[%c0_383, %c0_384, %c0_385] : memref<12x8x256xf32, #tpu.memory_space<vmem>>, vector<1x8x128xf32>
    %768 = vector.shape_cast %767 : vector<1x8x128xf32> to vector<8x128xf32>
    %769 = vector.broadcast %104 : f32 to vector<8x128xf32>
    %770 = arith.mulf %769, %768 : vector<8x128xf32>
    %771 = arith.addf %766, %770 : vector<8x128xf32>
    %c0_386 = arith.constant 0 : index
    %c0_387 = arith.constant 0 : index
    %c1_388 = arith.constant 1 : index
    %772 = vector.load %arg8[%c0_386, %c0_387, %c1_388] : memref<12x8x256xf32, #tpu.memory_space<vmem>>, vector<1x8x128xf32>
    %773 = vector.shape_cast %772 : vector<1x8x128xf32> to vector<8x128xf32>
    %774 = vector.broadcast %136 : f32 to vector<8x128xf32>
    %775 = arith.mulf %774, %773 : vector<8x128xf32>
    %776 = arith.addf %771, %775 : vector<8x128xf32>
    %c0_389 = arith.constant 0 : index
    %c0_390 = arith.constant 0 : index
    %c2_391 = arith.constant 2 : index
    %777 = vector.load %arg8[%c0_389, %c0_390, %c2_391] : memref<12x8x256xf32, #tpu.memory_space<vmem>>, vector<1x8x128xf32>
    %778 = vector.shape_cast %777 : vector<1x8x128xf32> to vector<8x128xf32>
    %779 = vector.broadcast %168 : f32 to vector<8x128xf32>
    %780 = arith.mulf %779, %778 : vector<8x128xf32>
    %781 = arith.addf %776, %780 : vector<8x128xf32>
    %c1_392 = arith.constant 1 : index
    %c0_393 = arith.constant 0 : index
    %c0_394 = arith.constant 0 : index
    %782 = vector.load %arg8[%c1_392, %c0_393, %c0_394] : memref<12x8x256xf32, #tpu.memory_space<vmem>>, vector<1x8x128xf32>
    %783 = vector.shape_cast %782 : vector<1x8x128xf32> to vector<8x128xf32>
    %784 = vector.broadcast %200 : f32 to vector<8x128xf32>
    %785 = arith.mulf %784, %783 : vector<8x128xf32>
    %786 = arith.addf %781, %785 : vector<8x128xf32>
    %c1_395 = arith.constant 1 : index
    %c0_396 = arith.constant 0 : index
    %c1_397 = arith.constant 1 : index
    %787 = vector.load %arg8[%c1_395, %c0_396, %c1_397] : memref<12x8x256xf32, #tpu.memory_space<vmem>>, vector<1x8x128xf32>
    %788 = vector.shape_cast %787 : vector<1x8x128xf32> to vector<8x128xf32>
    %789 = vector.broadcast %232 : f32 to vector<8x128xf32>
    %790 = arith.mulf %789, %788 : vector<8x128xf32>
    %791 = arith.addf %786, %790 : vector<8x128xf32>
    %c1_398 = arith.constant 1 : index
    %c0_399 = arith.constant 0 : index
    %c2_400 = arith.constant 2 : index
    %792 = vector.load %arg8[%c1_398, %c0_399, %c2_400] : memref<12x8x256xf32, #tpu.memory_space<vmem>>, vector<1x8x128xf32>
    %793 = vector.shape_cast %792 : vector<1x8x128xf32> to vector<8x128xf32>
    %794 = vector.broadcast %264 : f32 to vector<8x128xf32>
    %795 = arith.mulf %794, %793 : vector<8x128xf32>
    %796 = arith.addf %791, %795 : vector<8x128xf32>
    %c2_401 = arith.constant 2 : index
    %c0_402 = arith.constant 0 : index
    %c0_403 = arith.constant 0 : index
    %797 = vector.load %arg8[%c2_401, %c0_402, %c0_403] : memref<12x8x256xf32, #tpu.memory_space<vmem>>, vector<1x8x128xf32>
    %798 = vector.shape_cast %797 : vector<1x8x128xf32> to vector<8x128xf32>
    %799 = vector.broadcast %296 : f32 to vector<8x128xf32>
    %800 = arith.mulf %799, %798 : vector<8x128xf32>
    %801 = arith.addf %796, %800 : vector<8x128xf32>
    %c2_404 = arith.constant 2 : index
    %c0_405 = arith.constant 0 : index
    %c1_406 = arith.constant 1 : index
    %802 = vector.load %arg8[%c2_404, %c0_405, %c1_406] : memref<12x8x256xf32, #tpu.memory_space<vmem>>, vector<1x8x128xf32>
    %803 = vector.shape_cast %802 : vector<1x8x128xf32> to vector<8x128xf32>
    %804 = vector.broadcast %328 : f32 to vector<8x128xf32>
    %805 = arith.mulf %804, %803 : vector<8x128xf32>
    %806 = arith.addf %801, %805 : vector<8x128xf32>
    %c2_407 = arith.constant 2 : index
    %c0_408 = arith.constant 0 : index
    %c2_409 = arith.constant 2 : index
    %807 = vector.load %arg8[%c2_407, %c0_408, %c2_409] : memref<12x8x256xf32, #tpu.memory_space<vmem>>, vector<1x8x128xf32>
    %808 = vector.shape_cast %807 : vector<1x8x128xf32> to vector<8x128xf32>
    %809 = vector.broadcast %360 : f32 to vector<8x128xf32>
    %810 = arith.mulf %809, %808 : vector<8x128xf32>
    %811 = arith.addf %806, %810 : vector<8x128xf32>
    %c3_410 = arith.constant 3 : index
    %c0_411 = arith.constant 0 : index
    %c0_412 = arith.constant 0 : index
    %812 = vector.load %arg8[%c3_410, %c0_411, %c0_412] : memref<12x8x256xf32, #tpu.memory_space<vmem>>, vector<1x8x128xf32>
    %813 = vector.shape_cast %812 : vector<1x8x128xf32> to vector<8x128xf32>
    %814 = vector.broadcast %112 : f32 to vector<8x128xf32>
    %815 = arith.mulf %814, %813 : vector<8x128xf32>
    %816 = arith.addf %811, %815 : vector<8x128xf32>
    %c3_413 = arith.constant 3 : index
    %c0_414 = arith.constant 0 : index
    %c1_415 = arith.constant 1 : index
    %817 = vector.load %arg8[%c3_413, %c0_414, %c1_415] : memref<12x8x256xf32, #tpu.memory_space<vmem>>, vector<1x8x128xf32>
    %818 = vector.shape_cast %817 : vector<1x8x128xf32> to vector<8x128xf32>
    %819 = vector.broadcast %144 : f32 to vector<8x128xf32>
    %820 = arith.mulf %819, %818 : vector<8x128xf32>
    %821 = arith.addf %816, %820 : vector<8x128xf32>
    %c3_416 = arith.constant 3 : index
    %c0_417 = arith.constant 0 : index
    %c2_418 = arith.constant 2 : index
    %822 = vector.load %arg8[%c3_416, %c0_417, %c2_418] : memref<12x8x256xf32, #tpu.memory_space<vmem>>, vector<1x8x128xf32>
    %823 = vector.shape_cast %822 : vector<1x8x128xf32> to vector<8x128xf32>
    %824 = vector.broadcast %176 : f32 to vector<8x128xf32>
    %825 = arith.mulf %824, %823 : vector<8x128xf32>
    %826 = arith.addf %821, %825 : vector<8x128xf32>
    %c4_419 = arith.constant 4 : index
    %c0_420 = arith.constant 0 : index
    %c0_421 = arith.constant 0 : index
    %827 = vector.load %arg8[%c4_419, %c0_420, %c0_421] : memref<12x8x256xf32, #tpu.memory_space<vmem>>, vector<1x8x128xf32>
    %828 = vector.shape_cast %827 : vector<1x8x128xf32> to vector<8x128xf32>
    %829 = vector.broadcast %208 : f32 to vector<8x128xf32>
    %830 = arith.mulf %829, %828 : vector<8x128xf32>
    %831 = arith.addf %826, %830 : vector<8x128xf32>
    %c4_422 = arith.constant 4 : index
    %c0_423 = arith.constant 0 : index
    %c1_424 = arith.constant 1 : index
    %832 = vector.load %arg8[%c4_422, %c0_423, %c1_424] : memref<12x8x256xf32, #tpu.memory_space<vmem>>, vector<1x8x128xf32>
    %833 = vector.shape_cast %832 : vector<1x8x128xf32> to vector<8x128xf32>
    %834 = vector.broadcast %240 : f32 to vector<8x128xf32>
    %835 = arith.mulf %834, %833 : vector<8x128xf32>
    %836 = arith.addf %831, %835 : vector<8x128xf32>
    %c4_425 = arith.constant 4 : index
    %c0_426 = arith.constant 0 : index
    %c2_427 = arith.constant 2 : index
    %837 = vector.load %arg8[%c4_425, %c0_426, %c2_427] : memref<12x8x256xf32, #tpu.memory_space<vmem>>, vector<1x8x128xf32>
    %838 = vector.shape_cast %837 : vector<1x8x128xf32> to vector<8x128xf32>
    %839 = vector.broadcast %272 : f32 to vector<8x128xf32>
    %840 = arith.mulf %839, %838 : vector<8x128xf32>
    %841 = arith.addf %836, %840 : vector<8x128xf32>
    %c5_428 = arith.constant 5 : index
    %c0_429 = arith.constant 0 : index
    %c0_430 = arith.constant 0 : index
    %842 = vector.load %arg8[%c5_428, %c0_429, %c0_430] : memref<12x8x256xf32, #tpu.memory_space<vmem>>, vector<1x8x128xf32>
    %843 = vector.shape_cast %842 : vector<1x8x128xf32> to vector<8x128xf32>
    %844 = vector.broadcast %304 : f32 to vector<8x128xf32>
    %845 = arith.mulf %844, %843 : vector<8x128xf32>
    %846 = arith.addf %841, %845 : vector<8x128xf32>
    %c5_431 = arith.constant 5 : index
    %c0_432 = arith.constant 0 : index
    %c1_433 = arith.constant 1 : index
    %847 = vector.load %arg8[%c5_431, %c0_432, %c1_433] : memref<12x8x256xf32, #tpu.memory_space<vmem>>, vector<1x8x128xf32>
    %848 = vector.shape_cast %847 : vector<1x8x128xf32> to vector<8x128xf32>
    %849 = vector.broadcast %336 : f32 to vector<8x128xf32>
    %850 = arith.mulf %849, %848 : vector<8x128xf32>
    %851 = arith.addf %846, %850 : vector<8x128xf32>
    %c5_434 = arith.constant 5 : index
    %c0_435 = arith.constant 0 : index
    %c2_436 = arith.constant 2 : index
    %852 = vector.load %arg8[%c5_434, %c0_435, %c2_436] : memref<12x8x256xf32, #tpu.memory_space<vmem>>, vector<1x8x128xf32>
    %853 = vector.shape_cast %852 : vector<1x8x128xf32> to vector<8x128xf32>
    %854 = vector.broadcast %368 : f32 to vector<8x128xf32>
    %855 = arith.mulf %854, %853 : vector<8x128xf32>
    %856 = arith.addf %851, %855 : vector<8x128xf32>
    %c6_437 = arith.constant 6 : index
    %c0_438 = arith.constant 0 : index
    %c0_439 = arith.constant 0 : index
    %857 = vector.load %arg8[%c6_437, %c0_438, %c0_439] : memref<12x8x256xf32, #tpu.memory_space<vmem>>, vector<1x8x128xf32>
    %858 = vector.shape_cast %857 : vector<1x8x128xf32> to vector<8x128xf32>
    %859 = vector.broadcast %120 : f32 to vector<8x128xf32>
    %860 = arith.mulf %859, %858 : vector<8x128xf32>
    %861 = arith.addf %856, %860 : vector<8x128xf32>
    %c6_440 = arith.constant 6 : index
    %c0_441 = arith.constant 0 : index
    %c1_442 = arith.constant 1 : index
    %862 = vector.load %arg8[%c6_440, %c0_441, %c1_442] : memref<12x8x256xf32, #tpu.memory_space<vmem>>, vector<1x8x128xf32>
    %863 = vector.shape_cast %862 : vector<1x8x128xf32> to vector<8x128xf32>
    %864 = vector.broadcast %152 : f32 to vector<8x128xf32>
    %865 = arith.mulf %864, %863 : vector<8x128xf32>
    %866 = arith.addf %861, %865 : vector<8x128xf32>
    %c6_443 = arith.constant 6 : index
    %c0_444 = arith.constant 0 : index
    %c2_445 = arith.constant 2 : index
    %867 = vector.load %arg8[%c6_443, %c0_444, %c2_445] : memref<12x8x256xf32, #tpu.memory_space<vmem>>, vector<1x8x128xf32>
    %868 = vector.shape_cast %867 : vector<1x8x128xf32> to vector<8x128xf32>
    %869 = vector.broadcast %184 : f32 to vector<8x128xf32>
    %870 = arith.mulf %869, %868 : vector<8x128xf32>
    %871 = arith.addf %866, %870 : vector<8x128xf32>
    %c7_446 = arith.constant 7 : index
    %c0_447 = arith.constant 0 : index
    %c0_448 = arith.constant 0 : index
    %872 = vector.load %arg8[%c7_446, %c0_447, %c0_448] : memref<12x8x256xf32, #tpu.memory_space<vmem>>, vector<1x8x128xf32>
    %873 = vector.shape_cast %872 : vector<1x8x128xf32> to vector<8x128xf32>
    %874 = vector.broadcast %216 : f32 to vector<8x128xf32>
    %875 = arith.mulf %874, %873 : vector<8x128xf32>
    %876 = arith.addf %871, %875 : vector<8x128xf32>
    %c7_449 = arith.constant 7 : index
    %c0_450 = arith.constant 0 : index
    %c1_451 = arith.constant 1 : index
    %877 = vector.load %arg8[%c7_449, %c0_450, %c1_451] : memref<12x8x256xf32, #tpu.memory_space<vmem>>, vector<1x8x128xf32>
    %878 = vector.shape_cast %877 : vector<1x8x128xf32> to vector<8x128xf32>
    %879 = vector.broadcast %248 : f32 to vector<8x128xf32>
    %880 = arith.mulf %879, %878 : vector<8x128xf32>
    %881 = arith.addf %876, %880 : vector<8x128xf32>
    %c7_452 = arith.constant 7 : index
    %c0_453 = arith.constant 0 : index
    %c2_454 = arith.constant 2 : index
    %882 = vector.load %arg8[%c7_452, %c0_453, %c2_454] : memref<12x8x256xf32, #tpu.memory_space<vmem>>, vector<1x8x128xf32>
    %883 = vector.shape_cast %882 : vector<1x8x128xf32> to vector<8x128xf32>
    %884 = vector.broadcast %280 : f32 to vector<8x128xf32>
    %885 = arith.mulf %884, %883 : vector<8x128xf32>
    %886 = arith.addf %881, %885 : vector<8x128xf32>
    %c8_455 = arith.constant 8 : index
    %c0_456 = arith.constant 0 : index
    %c0_457 = arith.constant 0 : index
    %887 = vector.load %arg8[%c8_455, %c0_456, %c0_457] : memref<12x8x256xf32, #tpu.memory_space<vmem>>, vector<1x8x128xf32>
    %888 = vector.shape_cast %887 : vector<1x8x128xf32> to vector<8x128xf32>
    %889 = vector.broadcast %312 : f32 to vector<8x128xf32>
    %890 = arith.mulf %889, %888 : vector<8x128xf32>
    %891 = arith.addf %886, %890 : vector<8x128xf32>
    %c8_458 = arith.constant 8 : index
    %c0_459 = arith.constant 0 : index
    %c1_460 = arith.constant 1 : index
    %892 = vector.load %arg8[%c8_458, %c0_459, %c1_460] : memref<12x8x256xf32, #tpu.memory_space<vmem>>, vector<1x8x128xf32>
    %893 = vector.shape_cast %892 : vector<1x8x128xf32> to vector<8x128xf32>
    %894 = vector.broadcast %344 : f32 to vector<8x128xf32>
    %895 = arith.mulf %894, %893 : vector<8x128xf32>
    %896 = arith.addf %891, %895 : vector<8x128xf32>
    %c8_461 = arith.constant 8 : index
    %c0_462 = arith.constant 0 : index
    %c2_463 = arith.constant 2 : index
    %897 = vector.load %arg8[%c8_461, %c0_462, %c2_463] : memref<12x8x256xf32, #tpu.memory_space<vmem>>, vector<1x8x128xf32>
    %898 = vector.shape_cast %897 : vector<1x8x128xf32> to vector<8x128xf32>
    %899 = vector.broadcast %376 : f32 to vector<8x128xf32>
    %900 = arith.mulf %899, %898 : vector<8x128xf32>
    %901 = arith.addf %896, %900 : vector<8x128xf32>
    %c9_464 = arith.constant 9 : index
    %c0_465 = arith.constant 0 : index
    %c0_466 = arith.constant 0 : index
    %902 = vector.load %arg8[%c9_464, %c0_465, %c0_466] : memref<12x8x256xf32, #tpu.memory_space<vmem>>, vector<1x8x128xf32>
    %903 = vector.shape_cast %902 : vector<1x8x128xf32> to vector<8x128xf32>
    %904 = vector.broadcast %128 : f32 to vector<8x128xf32>
    %905 = arith.mulf %904, %903 : vector<8x128xf32>
    %906 = arith.addf %901, %905 : vector<8x128xf32>
    %c9_467 = arith.constant 9 : index
    %c0_468 = arith.constant 0 : index
    %c1_469 = arith.constant 1 : index
    %907 = vector.load %arg8[%c9_467, %c0_468, %c1_469] : memref<12x8x256xf32, #tpu.memory_space<vmem>>, vector<1x8x128xf32>
    %908 = vector.shape_cast %907 : vector<1x8x128xf32> to vector<8x128xf32>
    %909 = vector.broadcast %160 : f32 to vector<8x128xf32>
    %910 = arith.mulf %909, %908 : vector<8x128xf32>
    %911 = arith.addf %906, %910 : vector<8x128xf32>
    %c9_470 = arith.constant 9 : index
    %c0_471 = arith.constant 0 : index
    %c2_472 = arith.constant 2 : index
    %912 = vector.load %arg8[%c9_470, %c0_471, %c2_472] : memref<12x8x256xf32, #tpu.memory_space<vmem>>, vector<1x8x128xf32>
    %913 = vector.shape_cast %912 : vector<1x8x128xf32> to vector<8x128xf32>
    %914 = vector.broadcast %192 : f32 to vector<8x128xf32>
    %915 = arith.mulf %914, %913 : vector<8x128xf32>
    %916 = arith.addf %911, %915 : vector<8x128xf32>
    %c10_473 = arith.constant 10 : index
    %c0_474 = arith.constant 0 : index
    %c0_475 = arith.constant 0 : index
    %917 = vector.load %arg8[%c10_473, %c0_474, %c0_475] : memref<12x8x256xf32, #tpu.memory_space<vmem>>, vector<1x8x128xf32>
    %918 = vector.shape_cast %917 : vector<1x8x128xf32> to vector<8x128xf32>
    %919 = vector.broadcast %224 : f32 to vector<8x128xf32>
    %920 = arith.mulf %919, %918 : vector<8x128xf32>
    %921 = arith.addf %916, %920 : vector<8x128xf32>
    %c10_476 = arith.constant 10 : index
    %c0_477 = arith.constant 0 : index
    %c1_478 = arith.constant 1 : index
    %922 = vector.load %arg8[%c10_476, %c0_477, %c1_478] : memref<12x8x256xf32, #tpu.memory_space<vmem>>, vector<1x8x128xf32>
    %923 = vector.shape_cast %922 : vector<1x8x128xf32> to vector<8x128xf32>
    %924 = vector.broadcast %256 : f32 to vector<8x128xf32>
    %925 = arith.mulf %924, %923 : vector<8x128xf32>
    %926 = arith.addf %921, %925 : vector<8x128xf32>
    %c10_479 = arith.constant 10 : index
    %c0_480 = arith.constant 0 : index
    %c2_481 = arith.constant 2 : index
    %927 = vector.load %arg8[%c10_479, %c0_480, %c2_481] : memref<12x8x256xf32, #tpu.memory_space<vmem>>, vector<1x8x128xf32>
    %928 = vector.shape_cast %927 : vector<1x8x128xf32> to vector<8x128xf32>
    %929 = vector.broadcast %288 : f32 to vector<8x128xf32>
    %930 = arith.mulf %929, %928 : vector<8x128xf32>
    %931 = arith.addf %926, %930 : vector<8x128xf32>
    %c11_482 = arith.constant 11 : index
    %c0_483 = arith.constant 0 : index
    %c0_484 = arith.constant 0 : index
    %932 = vector.load %arg8[%c11_482, %c0_483, %c0_484] : memref<12x8x256xf32, #tpu.memory_space<vmem>>, vector<1x8x128xf32>
    %933 = vector.shape_cast %932 : vector<1x8x128xf32> to vector<8x128xf32>
    %934 = vector.broadcast %320 : f32 to vector<8x128xf32>
    %935 = arith.mulf %934, %933 : vector<8x128xf32>
    %936 = arith.addf %931, %935 : vector<8x128xf32>
    %c11_485 = arith.constant 11 : index
    %c0_486 = arith.constant 0 : index
    %c1_487 = arith.constant 1 : index
    %937 = vector.load %arg8[%c11_485, %c0_486, %c1_487] : memref<12x8x256xf32, #tpu.memory_space<vmem>>, vector<1x8x128xf32>
    %938 = vector.shape_cast %937 : vector<1x8x128xf32> to vector<8x128xf32>
    %939 = vector.broadcast %352 : f32 to vector<8x128xf32>
    %940 = arith.mulf %939, %938 : vector<8x128xf32>
    %941 = arith.addf %936, %940 : vector<8x128xf32>
    %c11_488 = arith.constant 11 : index
    %c0_489 = arith.constant 0 : index
    %c2_490 = arith.constant 2 : index
    %942 = vector.load %arg8[%c11_488, %c0_489, %c2_490] : memref<12x8x256xf32, #tpu.memory_space<vmem>>, vector<1x8x128xf32>
    %943 = vector.shape_cast %942 : vector<1x8x128xf32> to vector<8x128xf32>
    %944 = vector.broadcast %384 : f32 to vector<8x128xf32>
    %945 = arith.mulf %944, %943 : vector<8x128xf32>
    %946 = arith.addf %941, %945 : vector<8x128xf32>
    %c0_491 = arith.constant 0 : index
    %c2_492 = arith.constant 2 : index
    %c0_493 = arith.constant 0 : index
    %c0_494 = arith.constant 0 : index
    %947 = vector.load %arg7[%c0_491, %c2_492, %c0_493, %c0_494] : memref<1x8x8x128xf32, #tpu.memory_space<vmem>>, vector<1x1x8x128xf32>
    %948 = vector.shape_cast %947 : vector<1x1x8x128xf32> to vector<8x128xf32>
    %949 = vector.shape_cast %946 : vector<8x128xf32> to vector<1x1x8x128xf32>
    tpu.vector_store %arg7[%c0_491, %c2_492, %c0_493, %c0_494], %949 {strides = array<i32>} : memref<1x8x8x128xf32, #tpu.memory_space<vmem>>, vector<1x1x8x128xf32>,
    %950 = vector.broadcast %393 : f32 to vector<8x128xf32>
    %c0_495 = arith.constant 0 : index
    %c0_496 = arith.constant 0 : index
    %c0_497 = arith.constant 0 : index
    %951 = vector.load %arg8[%c0_495, %c0_496, %c0_497] : memref<12x8x256xf32, #tpu.memory_space<vmem>>, vector<1x8x128xf32>
    %952 = vector.shape_cast %951 : vector<1x8x128xf32> to vector<8x128xf32>
    %953 = vector.broadcast %105 : f32 to vector<8x128xf32>
    %954 = arith.mulf %953, %952 : vector<8x128xf32>
    %955 = arith.addf %950, %954 : vector<8x128xf32>
    %c0_498 = arith.constant 0 : index
    %c0_499 = arith.constant 0 : index
    %c1_500 = arith.constant 1 : index
    %956 = vector.load %arg8[%c0_498, %c0_499, %c1_500] : memref<12x8x256xf32, #tpu.memory_space<vmem>>, vector<1x8x128xf32>
    %957 = vector.shape_cast %956 : vector<1x8x128xf32> to vector<8x128xf32>
    %958 = vector.broadcast %137 : f32 to vector<8x128xf32>
    %959 = arith.mulf %958, %957 : vector<8x128xf32>
    %960 = arith.addf %955, %959 : vector<8x128xf32>
    %c0_501 = arith.constant 0 : index
    %c0_502 = arith.constant 0 : index
    %c2_503 = arith.constant 2 : index
    %961 = vector.load %arg8[%c0_501, %c0_502, %c2_503] : memref<12x8x256xf32, #tpu.memory_space<vmem>>, vector<1x8x128xf32>
    %962 = vector.shape_cast %961 : vector<1x8x128xf32> to vector<8x128xf32>
    %963 = vector.broadcast %169 : f32 to vector<8x128xf32>
    %964 = arith.mulf %963, %962 : vector<8x128xf32>
    %965 = arith.addf %960, %964 : vector<8x128xf32>
    %c1_504 = arith.constant 1 : index
    %c0_505 = arith.constant 0 : index
    %c0_506 = arith.constant 0 : index
    %966 = vector.load %arg8[%c1_504, %c0_505, %c0_506] : memref<12x8x256xf32, #tpu.memory_space<vmem>>, vector<1x8x128xf32>
    %967 = vector.shape_cast %966 : vector<1x8x128xf32> to vector<8x128xf32>
    %968 = vector.broadcast %201 : f32 to vector<8x128xf32>
    %969 = arith.mulf %968, %967 : vector<8x128xf32>
    %970 = arith.addf %965, %969 : vector<8x128xf32>
    %c1_507 = arith.constant 1 : index
    %c0_508 = arith.constant 0 : index
    %c1_509 = arith.constant 1 : index
    %971 = vector.load %arg8[%c1_507, %c0_508, %c1_509] : memref<12x8x256xf32, #tpu.memory_space<vmem>>, vector<1x8x128xf32>
    %972 = vector.shape_cast %971 : vector<1x8x128xf32> to vector<8x128xf32>
    %973 = vector.broadcast %233 : f32 to vector<8x128xf32>
    %974 = arith.mulf %973, %972 : vector<8x128xf32>
    %975 = arith.addf %970, %974 : vector<8x128xf32>
    %c1_510 = arith.constant 1 : index
    %c0_511 = arith.constant 0 : index
    %c2_512 = arith.constant 2 : index
    %976 = vector.load %arg8[%c1_510, %c0_511, %c2_512] : memref<12x8x256xf32, #tpu.memory_space<vmem>>, vector<1x8x128xf32>
    %977 = vector.shape_cast %976 : vector<1x8x128xf32> to vector<8x128xf32>
    %978 = vector.broadcast %265 : f32 to vector<8x128xf32>
    %979 = arith.mulf %978, %977 : vector<8x128xf32>
    %980 = arith.addf %975, %979 : vector<8x128xf32>
    %c2_513 = arith.constant 2 : index
    %c0_514 = arith.constant 0 : index
    %c0_515 = arith.constant 0 : index
    %981 = vector.load %arg8[%c2_513, %c0_514, %c0_515] : memref<12x8x256xf32, #tpu.memory_space<vmem>>, vector<1x8x128xf32>
    %982 = vector.shape_cast %981 : vector<1x8x128xf32> to vector<8x128xf32>
    %983 = vector.broadcast %297 : f32 to vector<8x128xf32>
    %984 = arith.mulf %983, %982 : vector<8x128xf32>
    %985 = arith.addf %980, %984 : vector<8x128xf32>
    %c2_516 = arith.constant 2 : index
    %c0_517 = arith.constant 0 : index
    %c1_518 = arith.constant 1 : index
    %986 = vector.load %arg8[%c2_516, %c0_517, %c1_518] : memref<12x8x256xf32, #tpu.memory_space<vmem>>, vector<1x8x128xf32>
    %987 = vector.shape_cast %986 : vector<1x8x128xf32> to vector<8x128xf32>
    %988 = vector.broadcast %329 : f32 to vector<8x128xf32>
    %989 = arith.mulf %988, %987 : vector<8x128xf32>
    %990 = arith.addf %985, %989 : vector<8x128xf32>
    %c2_519 = arith.constant 2 : index
    %c0_520 = arith.constant 0 : index
    %c2_521 = arith.constant 2 : index
    %991 = vector.load %arg8[%c2_519, %c0_520, %c2_521] : memref<12x8x256xf32, #tpu.memory_space<vmem>>, vector<1x8x128xf32>
    %992 = vector.shape_cast %991 : vector<1x8x128xf32> to vector<8x128xf32>
    %993 = vector.broadcast %361 : f32 to vector<8x128xf32>
    %994 = arith.mulf %993, %992 : vector<8x128xf32>
    %995 = arith.addf %990, %994 : vector<8x128xf32>
    %c3_522 = arith.constant 3 : index
    %c0_523 = arith.constant 0 : index
    %c0_524 = arith.constant 0 : index
    %996 = vector.load %arg8[%c3_522, %c0_523, %c0_524] : memref<12x8x256xf32, #tpu.memory_space<vmem>>, vector<1x8x128xf32>
    %997 = vector.shape_cast %996 : vector<1x8x128xf32> to vector<8x128xf32>
    %998 = vector.broadcast %113 : f32 to vector<8x128xf32>
    %999 = arith.mulf %998, %997 : vector<8x128xf32>
    %1000 = arith.addf %995, %999 : vector<8x128xf32>
    %c3_525 = arith.constant 3 : index
    %c0_526 = arith.constant 0 : index
    %c1_527 = arith.constant 1 : index
    %1001 = vector.load %arg8[%c3_525, %c0_526, %c1_527] : memref<12x8x256xf32, #tpu.memory_space<vmem>>, vector<1x8x128xf32>
    %1002 = vector.shape_cast %1001 : vector<1x8x128xf32> to vector<8x128xf32>
    %1003 = vector.broadcast %145 : f32 to vector<8x128xf32>
    %1004 = arith.mulf %1003, %1002 : vector<8x128xf32>
    %1005 = arith.addf %1000, %1004 : vector<8x128xf32>
    %c3_528 = arith.constant 3 : index
    %c0_529 = arith.constant 0 : index
    %c2_530 = arith.constant 2 : index
    %1006 = vector.load %arg8[%c3_528, %c0_529, %c2_530] : memref<12x8x256xf32, #tpu.memory_space<vmem>>, vector<1x8x128xf32>
    %1007 = vector.shape_cast %1006 : vector<1x8x128xf32> to vector<8x128xf32>
    %1008 = vector.broadcast %177 : f32 to vector<8x128xf32>
    %1009 = arith.mulf %1008, %1007 : vector<8x128xf32>
    %1010 = arith.addf %1005, %1009 : vector<8x128xf32>
    %c4_531 = arith.constant 4 : index
    %c0_532 = arith.constant 0 : index
    %c0_533 = arith.constant 0 : index
    %1011 = vector.load %arg8[%c4_531, %c0_532, %c0_533] : memref<12x8x256xf32, #tpu.memory_space<vmem>>, vector<1x8x128xf32>
    %1012 = vector.shape_cast %1011 : vector<1x8x128xf32> to vector<8x128xf32>
    %1013 = vector.broadcast %209 : f32 to vector<8x128xf32>
    %1014 = arith.mulf %1013, %1012 : vector<8x128xf32>
    %1015 = arith.addf %1010, %1014 : vector<8x128xf32>
    %c4_534 = arith.constant 4 : index
    %c0_535 = arith.constant 0 : index
    %c1_536 = arith.constant 1 : index
    %1016 = vector.load %arg8[%c4_534, %c0_535, %c1_536] : memref<12x8x256xf32, #tpu.memory_space<vmem>>, vector<1x8x128xf32>
    %1017 = vector.shape_cast %1016 : vector<1x8x128xf32> to vector<8x128xf32>
    %1018 = vector.broadcast %241 : f32 to vector<8x128xf32>
    %1019 = arith.mulf %1018, %1017 : vector<8x128xf32>
    %1020 = arith.addf %1015, %1019 : vector<8x128xf32>
    %c4_537 = arith.constant 4 : index
    %c0_538 = arith.constant 0 : index
    %c2_539 = arith.constant 2 : index
    %1021 = vector.load %arg8[%c4_537, %c0_538, %c2_539] : memref<12x8x256xf32, #tpu.memory_space<vmem>>, vector<1x8x128xf32>
    %1022 = vector.shape_cast %1021 : vector<1x8x128xf32> to vector<8x128xf32>
    %1023 = vector.broadcast %273 : f32 to vector<8x128xf32>
    %1024 = arith.mulf %1023, %1022 : vector<8x128xf32>
    %1025 = arith.addf %1020, %1024 : vector<8x128xf32>
    %c5_540 = arith.constant 5 : index
    %c0_541 = arith.constant 0 : index
    %c0_542 = arith.constant 0 : index
    %1026 = vector.load %arg8[%c5_540, %c0_541, %c0_542] : memref<12x8x256xf32, #tpu.memory_space<vmem>>, vector<1x8x128xf32>
    %1027 = vector.shape_cast %1026 : vector<1x8x128xf32> to vector<8x128xf32>
    %1028 = vector.broadcast %305 : f32 to vector<8x128xf32>
    %1029 = arith.mulf %1028, %1027 : vector<8x128xf32>
    %1030 = arith.addf %1025, %1029 : vector<8x128xf32>
    %c5_543 = arith.constant 5 : index
    %c0_544 = arith.constant 0 : index
    %c1_545 = arith.constant 1 : index
    %1031 = vector.load %arg8[%c5_543, %c0_544, %c1_545] : memref<12x8x256xf32, #tpu.memory_space<vmem>>, vector<1x8x128xf32>
    %1032 = vector.shape_cast %1031 : vector<1x8x128xf32> to vector<8x128xf32>
    %1033 = vector.broadcast %337 : f32 to vector<8x128xf32>
    %1034 = arith.mulf %1033, %1032 : vector<8x128xf32>
    %1035 = arith.addf %1030, %1034 : vector<8x128xf32>
    %c5_546 = arith.constant 5 : index
    %c0_547 = arith.constant 0 : index
    %c2_548 = arith.constant 2 : index
    %1036 = vector.load %arg8[%c5_546, %c0_547, %c2_548] : memref<12x8x256xf32, #tpu.memory_space<vmem>>, vector<1x8x128xf32>
    %1037 = vector.shape_cast %1036 : vector<1x8x128xf32> to vector<8x128xf32>
    %1038 = vector.broadcast %369 : f32 to vector<8x128xf32>
    %1039 = arith.mulf %1038, %1037 : vector<8x128xf32>
    %1040 = arith.addf %1035, %1039 : vector<8x128xf32>
    %c6_549 = arith.constant 6 : index
    %c0_550 = arith.constant 0 : index
    %c0_551 = arith.constant 0 : index
    %1041 = vector.load %arg8[%c6_549, %c0_550, %c0_551] : memref<12x8x256xf32, #tpu.memory_space<vmem>>, vector<1x8x128xf32>
    %1042 = vector.shape_cast %1041 : vector<1x8x128xf32> to vector<8x128xf32>
    %1043 = vector.broadcast %121 : f32 to vector<8x128xf32>
    %1044 = arith.mulf %1043, %1042 : vector<8x128xf32>
    %1045 = arith.addf %1040, %1044 : vector<8x128xf32>
    %c6_552 = arith.constant 6 : index
    %c0_553 = arith.constant 0 : index
    %c1_554 = arith.constant 1 : index
    %1046 = vector.load %arg8[%c6_552, %c0_553, %c1_554] : memref<12x8x256xf32, #tpu.memory_space<vmem>>, vector<1x8x128xf32>
    %1047 = vector.shape_cast %1046 : vector<1x8x128xf32> to vector<8x128xf32>
    %1048 = vector.broadcast %153 : f32 to vector<8x128xf32>
    %1049 = arith.mulf %1048, %1047 : vector<8x128xf32>
    %1050 = arith.addf %1045, %1049 : vector<8x128xf32>
    %c6_555 = arith.constant 6 : index
    %c0_556 = arith.constant 0 : index
    %c2_557 = arith.constant 2 : index
    %1051 = vector.load %arg8[%c6_555, %c0_556, %c2_557] : memref<12x8x256xf32, #tpu.memory_space<vmem>>, vector<1x8x128xf32>
    %1052 = vector.shape_cast %1051 : vector<1x8x128xf32> to vector<8x128xf32>
    %1053 = vector.broadcast %185 : f32 to vector<8x128xf32>
    %1054 = arith.mulf %1053, %1052 : vector<8x128xf32>
    %1055 = arith.addf %1050, %1054 : vector<8x128xf32>
    %c7_558 = arith.constant 7 : index
    %c0_559 = arith.constant 0 : index
    %c0_560 = arith.constant 0 : index
    %1056 = vector.load %arg8[%c7_558, %c0_559, %c0_560] : memref<12x8x256xf32, #tpu.memory_space<vmem>>, vector<1x8x128xf32>
    %1057 = vector.shape_cast %1056 : vector<1x8x128xf32> to vector<8x128xf32>
    %1058 = vector.broadcast %217 : f32 to vector<8x128xf32>
    %1059 = arith.mulf %1058, %1057 : vector<8x128xf32>
    %1060 = arith.addf %1055, %1059 : vector<8x128xf32>
    %c7_561 = arith.constant 7 : index
    %c0_562 = arith.constant 0 : index
    %c1_563 = arith.constant 1 : index
    %1061 = vector.load %arg8[%c7_561, %c0_562, %c1_563] : memref<12x8x256xf32, #tpu.memory_space<vmem>>, vector<1x8x128xf32>
    %1062 = vector.shape_cast %1061 : vector<1x8x128xf32> to vector<8x128xf32>
    %1063 = vector.broadcast %249 : f32 to vector<8x128xf32>
    %1064 = arith.mulf %1063, %1062 : vector<8x128xf32>
    %1065 = arith.addf %1060, %1064 : vector<8x128xf32>
    %c7_564 = arith.constant 7 : index
    %c0_565 = arith.constant 0 : index
    %c2_566 = arith.constant 2 : index
    %1066 = vector.load %arg8[%c7_564, %c0_565, %c2_566] : memref<12x8x256xf32, #tpu.memory_space<vmem>>, vector<1x8x128xf32>
    %1067 = vector.shape_cast %1066 : vector<1x8x128xf32> to vector<8x128xf32>
    %1068 = vector.broadcast %281 : f32 to vector<8x128xf32>
    %1069 = arith.mulf %1068, %1067 : vector<8x128xf32>
    %1070 = arith.addf %1065, %1069 : vector<8x128xf32>
    %c8_567 = arith.constant 8 : index
    %c0_568 = arith.constant 0 : index
    %c0_569 = arith.constant 0 : index
    %1071 = vector.load %arg8[%c8_567, %c0_568, %c0_569] : memref<12x8x256xf32, #tpu.memory_space<vmem>>, vector<1x8x128xf32>
    %1072 = vector.shape_cast %1071 : vector<1x8x128xf32> to vector<8x128xf32>
    %1073 = vector.broadcast %313 : f32 to vector<8x128xf32>
    %1074 = arith.mulf %1073, %1072 : vector<8x128xf32>
    %1075 = arith.addf %1070, %1074 : vector<8x128xf32>
    %c8_570 = arith.constant 8 : index
    %c0_571 = arith.constant 0 : index
    %c1_572 = arith.constant 1 : index
    %1076 = vector.load %arg8[%c8_570, %c0_571, %c1_572] : memref<12x8x256xf32, #tpu.memory_space<vmem>>, vector<1x8x128xf32>
    %1077 = vector.shape_cast %1076 : vector<1x8x128xf32> to vector<8x128xf32>
    %1078 = vector.broadcast %345 : f32 to vector<8x128xf32>
    %1079 = arith.mulf %1078, %1077 : vector<8x128xf32>
    %1080 = arith.addf %1075, %1079 : vector<8x128xf32>
    %c8_573 = arith.constant 8 : index
    %c0_574 = arith.constant 0 : index
    %c2_575 = arith.constant 2 : index
    %1081 = vector.load %arg8[%c8_573, %c0_574, %c2_575] : memref<12x8x256xf32, #tpu.memory_space<vmem>>, vector<1x8x128xf32>
    %1082 = vector.shape_cast %1081 : vector<1x8x128xf32> to vector<8x128xf32>
    %1083 = vector.broadcast %377 : f32 to vector<8x128xf32>
    %1084 = arith.mulf %1083, %1082 : vector<8x128xf32>
    %1085 = arith.addf %1080, %1084 : vector<8x128xf32>
    %c9_576 = arith.constant 9 : index
    %c0_577 = arith.constant 0 : index
    %c0_578 = arith.constant 0 : index
    %1086 = vector.load %arg8[%c9_576, %c0_577, %c0_578] : memref<12x8x256xf32, #tpu.memory_space<vmem>>, vector<1x8x128xf32>
    %1087 = vector.shape_cast %1086 : vector<1x8x128xf32> to vector<8x128xf32>
    %1088 = vector.broadcast %129 : f32 to vector<8x128xf32>
    %1089 = arith.mulf %1088, %1087 : vector<8x128xf32>
    %1090 = arith.addf %1085, %1089 : vector<8x128xf32>
    %c9_579 = arith.constant 9 : index
    %c0_580 = arith.constant 0 : index
    %c1_581 = arith.constant 1 : index
    %1091 = vector.load %arg8[%c9_579, %c0_580, %c1_581] : memref<12x8x256xf32, #tpu.memory_space<vmem>>, vector<1x8x128xf32>
    %1092 = vector.shape_cast %1091 : vector<1x8x128xf32> to vector<8x128xf32>
    %1093 = vector.broadcast %161 : f32 to vector<8x128xf32>
    %1094 = arith.mulf %1093, %1092 : vector<8x128xf32>
    %1095 = arith.addf %1090, %1094 : vector<8x128xf32>
    %c9_582 = arith.constant 9 : index
    %c0_583 = arith.constant 0 : index
    %c2_584 = arith.constant 2 : index
    %1096 = vector.load %arg8[%c9_582, %c0_583, %c2_584] : memref<12x8x256xf32, #tpu.memory_space<vmem>>, vector<1x8x128xf32>
    %1097 = vector.shape_cast %1096 : vector<1x8x128xf32> to vector<8x128xf32>
    %1098 = vector.broadcast %193 : f32 to vector<8x128xf32>
    %1099 = arith.mulf %1098, %1097 : vector<8x128xf32>
    %1100 = arith.addf %1095, %1099 : vector<8x128xf32>
    %c10_585 = arith.constant 10 : index
    %c0_586 = arith.constant 0 : index
    %c0_587 = arith.constant 0 : index
    %1101 = vector.load %arg8[%c10_585, %c0_586, %c0_587] : memref<12x8x256xf32, #tpu.memory_space<vmem>>, vector<1x8x128xf32>
    %1102 = vector.shape_cast %1101 : vector<1x8x128xf32> to vector<8x128xf32>
    %1103 = vector.broadcast %225 : f32 to vector<8x128xf32>
    %1104 = arith.mulf %1103, %1102 : vector<8x128xf32>
    %1105 = arith.addf %1100, %1104 : vector<8x128xf32>
    %c10_588 = arith.constant 10 : index
    %c0_589 = arith.constant 0 : index
    %c1_590 = arith.constant 1 : index
    %1106 = vector.load %arg8[%c10_588, %c0_589, %c1_590] : memref<12x8x256xf32, #tpu.memory_space<vmem>>, vector<1x8x128xf32>
    %1107 = vector.shape_cast %1106 : vector<1x8x128xf32> to vector<8x128xf32>
    %1108 = vector.broadcast %257 : f32 to vector<8x128xf32>
    %1109 = arith.mulf %1108, %1107 : vector<8x128xf32>
    %1110 = arith.addf %1105, %1109 : vector<8x128xf32>
    %c10_591 = arith.constant 10 : index
    %c0_592 = arith.constant 0 : index
    %c2_593 = arith.constant 2 : index
    %1111 = vector.load %arg8[%c10_591, %c0_592, %c2_593] : memref<12x8x256xf32, #tpu.memory_space<vmem>>, vector<1x8x128xf32>
    %1112 = vector.shape_cast %1111 : vector<1x8x128xf32> to vector<8x128xf32>
    %1113 = vector.broadcast %289 : f32 to vector<8x128xf32>
    %1114 = arith.mulf %1113, %1112 : vector<8x128xf32>
    %1115 = arith.addf %1110, %1114 : vector<8x128xf32>
    %c11_594 = arith.constant 11 : index
    %c0_595 = arith.constant 0 : index
    %c0_596 = arith.constant 0 : index
    %1116 = vector.load %arg8[%c11_594, %c0_595, %c0_596] : memref<12x8x256xf32, #tpu.memory_space<vmem>>, vector<1x8x128xf32>
    %1117 = vector.shape_cast %1116 : vector<1x8x128xf32> to vector<8x128xf32>
    %1118 = vector.broadcast %321 : f32 to vector<8x128xf32>
    %1119 = arith.mulf %1118, %1117 : vector<8x128xf32>
    %1120 = arith.addf %1115, %1119 : vector<8x128xf32>
    %c11_597 = arith.constant 11 : index
    %c0_598 = arith.constant 0 : index
    %c1_599 = arith.constant 1 : index
    %1121 = vector.load %arg8[%c11_597, %c0_598, %c1_599] : memref<12x8x256xf32, #tpu.memory_space<vmem>>, vector<1x8x128xf32>
    %1122 = vector.shape_cast %1121 : vector<1x8x128xf32> to vector<8x128xf32>
    %1123 = vector.broadcast %353 : f32 to vector<8x128xf32>
    %1124 = arith.mulf %1123, %1122 : vector<8x128xf32>
    %1125 = arith.addf %1120, %1124 : vector<8x128xf32>
    %c11_600 = arith.constant 11 : index
    %c0_601 = arith.constant 0 : index
    %c2_602 = arith.constant 2 : index
    %1126 = vector.load %arg8[%c11_600, %c0_601, %c2_602] : memref<12x8x256xf32, #tpu.memory_space<vmem>>, vector<1x8x128xf32>
    %1127 = vector.shape_cast %1126 : vector<1x8x128xf32> to vector<8x128xf32>
    %1128 = vector.broadcast %385 : f32 to vector<8x128xf32>
    %1129 = arith.mulf %1128, %1127 : vector<8x128xf32>
    %1130 = arith.addf %1125, %1129 : vector<8x128xf32>
    %c0_603 = arith.constant 0 : index
    %c3_604 = arith.constant 3 : index
    %c0_605 = arith.constant 0 : index
    %c0_606 = arith.constant 0 : index
    %1131 = vector.load %arg7[%c0_603, %c3_604, %c0_605, %c0_606] : memref<1x8x8x128xf32, #tpu.memory_space<vmem>>, vector<1x1x8x128xf32>
    %1132 = vector.shape_cast %1131 : vector<1x1x8x128xf32> to vector<8x128xf32>
    %1133 = vector.shape_cast %1130 : vector<8x128xf32> to vector<1x1x8x128xf32>
    tpu.vector_store %arg7[%c0_603, %c3_604, %c0_605, %c0_606], %1133 {strides = array<i32>} : memref<1x8x8x128xf32, #tpu.memory_space<vmem>>, vector<1x1x8x128xf32>,
    %1134 = vector.broadcast %394 : f32 to vector<8x128xf32>
    %c0_607 = arith.constant 0 : index
    %c0_608 = arith.constant 0 : index
    %c0_609 = arith.constant 0 : index
    %1135 = vector.load %arg8[%c0_607, %c0_608, %c0_609] : memref<12x8x256xf32, #tpu.memory_space<vmem>>, vector<1x8x128xf32>
    %1136 = vector.shape_cast %1135 : vector<1x8x128xf32> to vector<8x128xf32>
    %1137 = vector.broadcast %106 : f32 to vector<8x128xf32>
    %1138 = arith.mulf %1137, %1136 : vector<8x128xf32>
    %1139 = arith.addf %1134, %1138 : vector<8x128xf32>
    %c0_610 = arith.constant 0 : index
    %c0_611 = arith.constant 0 : index
    %c1_612 = arith.constant 1 : index
    %1140 = vector.load %arg8[%c0_610, %c0_611, %c1_612] : memref<12x8x256xf32, #tpu.memory_space<vmem>>, vector<1x8x128xf32>
    %1141 = vector.shape_cast %1140 : vector<1x8x128xf32> to vector<8x128xf32>
    %1142 = vector.broadcast %138 : f32 to vector<8x128xf32>
    %1143 = arith.mulf %1142, %1141 : vector<8x128xf32>
    %1144 = arith.addf %1139, %1143 : vector<8x128xf32>
    %c0_613 = arith.constant 0 : index
    %c0_614 = arith.constant 0 : index
    %c2_615 = arith.constant 2 : index
    %1145 = vector.load %arg8[%c0_613, %c0_614, %c2_615] : memref<12x8x256xf32, #tpu.memory_space<vmem>>, vector<1x8x128xf32>
    %1146 = vector.shape_cast %1145 : vector<1x8x128xf32> to vector<8x128xf32>
    %1147 = vector.broadcast %170 : f32 to vector<8x128xf32>
    %1148 = arith.mulf %1147, %1146 : vector<8x128xf32>
    %1149 = arith.addf %1144, %1148 : vector<8x128xf32>
    %c1_616 = arith.constant 1 : index
    %c0_617 = arith.constant 0 : index
    %c0_618 = arith.constant 0 : index
    %1150 = vector.load %arg8[%c1_616, %c0_617, %c0_618] : memref<12x8x256xf32, #tpu.memory_space<vmem>>, vector<1x8x128xf32>
    %1151 = vector.shape_cast %1150 : vector<1x8x128xf32> to vector<8x128xf32>
    %1152 = vector.broadcast %202 : f32 to vector<8x128xf32>
    %1153 = arith.mulf %1152, %1151 : vector<8x128xf32>
    %1154 = arith.addf %1149, %1153 : vector<8x128xf32>
    %c1_619 = arith.constant 1 : index
    %c0_620 = arith.constant 0 : index
    %c1_621 = arith.constant 1 : index
    %1155 = vector.load %arg8[%c1_619, %c0_620, %c1_621] : memref<12x8x256xf32, #tpu.memory_space<vmem>>, vector<1x8x128xf32>
    %1156 = vector.shape_cast %1155 : vector<1x8x128xf32> to vector<8x128xf32>
    %1157 = vector.broadcast %234 : f32 to vector<8x128xf32>
    %1158 = arith.mulf %1157, %1156 : vector<8x128xf32>
    %1159 = arith.addf %1154, %1158 : vector<8x128xf32>
    %c1_622 = arith.constant 1 : index
    %c0_623 = arith.constant 0 : index
    %c2_624 = arith.constant 2 : index
    %1160 = vector.load %arg8[%c1_622, %c0_623, %c2_624] : memref<12x8x256xf32, #tpu.memory_space<vmem>>, vector<1x8x128xf32>
    %1161 = vector.shape_cast %1160 : vector<1x8x128xf32> to vector<8x128xf32>
    %1162 = vector.broadcast %266 : f32 to vector<8x128xf32>
    %1163 = arith.mulf %1162, %1161 : vector<8x128xf32>
    %1164 = arith.addf %1159, %1163 : vector<8x128xf32>
    %c2_625 = arith.constant 2 : index
    %c0_626 = arith.constant 0 : index
    %c0_627 = arith.constant 0 : index
    %1165 = vector.load %arg8[%c2_625, %c0_626, %c0_627] : memref<12x8x256xf32, #tpu.memory_space<vmem>>, vector<1x8x128xf32>
    %1166 = vector.shape_cast %1165 : vector<1x8x128xf32> to vector<8x128xf32>
    %1167 = vector.broadcast %298 : f32 to vector<8x128xf32>
    %1168 = arith.mulf %1167, %1166 : vector<8x128xf32>
    %1169 = arith.addf %1164, %1168 : vector<8x128xf32>
    %c2_628 = arith.constant 2 : index
    %c0_629 = arith.constant 0 : index
    %c1_630 = arith.constant 1 : index
    %1170 = vector.load %arg8[%c2_628, %c0_629, %c1_630] : memref<12x8x256xf32, #tpu.memory_space<vmem>>, vector<1x8x128xf32>
    %1171 = vector.shape_cast %1170 : vector<1x8x128xf32> to vector<8x128xf32>
    %1172 = vector.broadcast %330 : f32 to vector<8x128xf32>
    %1173 = arith.mulf %1172, %1171 : vector<8x128xf32>
    %1174 = arith.addf %1169, %1173 : vector<8x128xf32>
    %c2_631 = arith.constant 2 : index
    %c0_632 = arith.constant 0 : index
    %c2_633 = arith.constant 2 : index
    %1175 = vector.load %arg8[%c2_631, %c0_632, %c2_633] : memref<12x8x256xf32, #tpu.memory_space<vmem>>, vector<1x8x128xf32>
    %1176 = vector.shape_cast %1175 : vector<1x8x128xf32> to vector<8x128xf32>
    %1177 = vector.broadcast %362 : f32 to vector<8x128xf32>
    %1178 = arith.mulf %1177, %1176 : vector<8x128xf32>
    %1179 = arith.addf %1174, %1178 : vector<8x128xf32>
    %c3_634 = arith.constant 3 : index
    %c0_635 = arith.constant 0 : index
    %c0_636 = arith.constant 0 : index
    %1180 = vector.load %arg8[%c3_634, %c0_635, %c0_636] : memref<12x8x256xf32, #tpu.memory_space<vmem>>, vector<1x8x128xf32>
    %1181 = vector.shape_cast %1180 : vector<1x8x128xf32> to vector<8x128xf32>
    %1182 = vector.broadcast %114 : f32 to vector<8x128xf32>
    %1183 = arith.mulf %1182, %1181 : vector<8x128xf32>
    %1184 = arith.addf %1179, %1183 : vector<8x128xf32>
    %c3_637 = arith.constant 3 : index
    %c0_638 = arith.constant 0 : index
    %c1_639 = arith.constant 1 : index
    %1185 = vector.load %arg8[%c3_637, %c0_638, %c1_639] : memref<12x8x256xf32, #tpu.memory_space<vmem>>, vector<1x8x128xf32>
    %1186 = vector.shape_cast %1185 : vector<1x8x128xf32> to vector<8x128xf32>
    %1187 = vector.broadcast %146 : f32 to vector<8x128xf32>
    %1188 = arith.mulf %1187, %1186 : vector<8x128xf32>
    %1189 = arith.addf %1184, %1188 : vector<8x128xf32>
    %c3_640 = arith.constant 3 : index
    %c0_641 = arith.constant 0 : index
    %c2_642 = arith.constant 2 : index
    %1190 = vector.load %arg8[%c3_640, %c0_641, %c2_642] : memref<12x8x256xf32, #tpu.memory_space<vmem>>, vector<1x8x128xf32>
    %1191 = vector.shape_cast %1190 : vector<1x8x128xf32> to vector<8x128xf32>
    %1192 = vector.broadcast %178 : f32 to vector<8x128xf32>
    %1193 = arith.mulf %1192, %1191 : vector<8x128xf32>
    %1194 = arith.addf %1189, %1193 : vector<8x128xf32>
    %c4_643 = arith.constant 4 : index
    %c0_644 = arith.constant 0 : index
    %c0_645 = arith.constant 0 : index
    %1195 = vector.load %arg8[%c4_643, %c0_644, %c0_645] : memref<12x8x256xf32, #tpu.memory_space<vmem>>, vector<1x8x128xf32>
    %1196 = vector.shape_cast %1195 : vector<1x8x128xf32> to vector<8x128xf32>
    %1197 = vector.broadcast %210 : f32 to vector<8x128xf32>
    %1198 = arith.mulf %1197, %1196 : vector<8x128xf32>
    %1199 = arith.addf %1194, %1198 : vector<8x128xf32>
    %c4_646 = arith.constant 4 : index
    %c0_647 = arith.constant 0 : index
    %c1_648 = arith.constant 1 : index
    %1200 = vector.load %arg8[%c4_646, %c0_647, %c1_648] : memref<12x8x256xf32, #tpu.memory_space<vmem>>, vector<1x8x128xf32>
    %1201 = vector.shape_cast %1200 : vector<1x8x128xf32> to vector<8x128xf32>
    %1202 = vector.broadcast %242 : f32 to vector<8x128xf32>
    %1203 = arith.mulf %1202, %1201 : vector<8x128xf32>
    %1204 = arith.addf %1199, %1203 : vector<8x128xf32>
    %c4_649 = arith.constant 4 : index
    %c0_650 = arith.constant 0 : index
    %c2_651 = arith.constant 2 : index
    %1205 = vector.load %arg8[%c4_649, %c0_650, %c2_651] : memref<12x8x256xf32, #tpu.memory_space<vmem>>, vector<1x8x128xf32>
    %1206 = vector.shape_cast %1205 : vector<1x8x128xf32> to vector<8x128xf32>
    %1207 = vector.broadcast %274 : f32 to vector<8x128xf32>
    %1208 = arith.mulf %1207, %1206 : vector<8x128xf32>
    %1209 = arith.addf %1204, %1208 : vector<8x128xf32>
    %c5_652 = arith.constant 5 : index
    %c0_653 = arith.constant 0 : index
    %c0_654 = arith.constant 0 : index
    %1210 = vector.load %arg8[%c5_652, %c0_653, %c0_654] : memref<12x8x256xf32, #tpu.memory_space<vmem>>, vector<1x8x128xf32>
    %1211 = vector.shape_cast %1210 : vector<1x8x128xf32> to vector<8x128xf32>
    %1212 = vector.broadcast %306 : f32 to vector<8x128xf32>
    %1213 = arith.mulf %1212, %1211 : vector<8x128xf32>
    %1214 = arith.addf %1209, %1213 : vector<8x128xf32>
    %c5_655 = arith.constant 5 : index
    %c0_656 = arith.constant 0 : index
    %c1_657 = arith.constant 1 : index
    %1215 = vector.load %arg8[%c5_655, %c0_656, %c1_657] : memref<12x8x256xf32, #tpu.memory_space<vmem>>, vector<1x8x128xf32>
    %1216 = vector.shape_cast %1215 : vector<1x8x128xf32> to vector<8x128xf32>
    %1217 = vector.broadcast %338 : f32 to vector<8x128xf32>
    %1218 = arith.mulf %1217, %1216 : vector<8x128xf32>
    %1219 = arith.addf %1214, %1218 : vector<8x128xf32>
    %c5_658 = arith.constant 5 : index
    %c0_659 = arith.constant 0 : index
    %c2_660 = arith.constant 2 : index
    %1220 = vector.load %arg8[%c5_658, %c0_659, %c2_660] : memref<12x8x256xf32, #tpu.memory_space<vmem>>, vector<1x8x128xf32>
    %1221 = vector.shape_cast %1220 : vector<1x8x128xf32> to vector<8x128xf32>
    %1222 = vector.broadcast %370 : f32 to vector<8x128xf32>
    %1223 = arith.mulf %1222, %1221 : vector<8x128xf32>
    %1224 = arith.addf %1219, %1223 : vector<8x128xf32>
    %c6_661 = arith.constant 6 : index
    %c0_662 = arith.constant 0 : index
    %c0_663 = arith.constant 0 : index
    %1225 = vector.load %arg8[%c6_661, %c0_662, %c0_663] : memref<12x8x256xf32, #tpu.memory_space<vmem>>, vector<1x8x128xf32>
    %1226 = vector.shape_cast %1225 : vector<1x8x128xf32> to vector<8x128xf32>
    %1227 = vector.broadcast %122 : f32 to vector<8x128xf32>
    %1228 = arith.mulf %1227, %1226 : vector<8x128xf32>
    %1229 = arith.addf %1224, %1228 : vector<8x128xf32>
    %c6_664 = arith.constant 6 : index
    %c0_665 = arith.constant 0 : index
    %c1_666 = arith.constant 1 : index
    %1230 = vector.load %arg8[%c6_664, %c0_665, %c1_666] : memref<12x8x256xf32, #tpu.memory_space<vmem>>, vector<1x8x128xf32>
    %1231 = vector.shape_cast %1230 : vector<1x8x128xf32> to vector<8x128xf32>
    %1232 = vector.broadcast %154 : f32 to vector<8x128xf32>
    %1233 = arith.mulf %1232, %1231 : vector<8x128xf32>
    %1234 = arith.addf %1229, %1233 : vector<8x128xf32>
    %c6_667 = arith.constant 6 : index
    %c0_668 = arith.constant 0 : index
    %c2_669 = arith.constant 2 : index
    %1235 = vector.load %arg8[%c6_667, %c0_668, %c2_669] : memref<12x8x256xf32, #tpu.memory_space<vmem>>, vector<1x8x128xf32>
    %1236 = vector.shape_cast %1235 : vector<1x8x128xf32> to vector<8x128xf32>
    %1237 = vector.broadcast %186 : f32 to vector<8x128xf32>
    %1238 = arith.mulf %1237, %1236 : vector<8x128xf32>
    %1239 = arith.addf %1234, %1238 : vector<8x128xf32>
    %c7_670 = arith.constant 7 : index
    %c0_671 = arith.constant 0 : index
    %c0_672 = arith.constant 0 : index
    %1240 = vector.load %arg8[%c7_670, %c0_671, %c0_672] : memref<12x8x256xf32, #tpu.memory_space<vmem>>, vector<1x8x128xf32>
    %1241 = vector.shape_cast %1240 : vector<1x8x128xf32> to vector<8x128xf32>
    %1242 = vector.broadcast %218 : f32 to vector<8x128xf32>
    %1243 = arith.mulf %1242, %1241 : vector<8x128xf32>
    %1244 = arith.addf %1239, %1243 : vector<8x128xf32>
    %c7_673 = arith.constant 7 : index
    %c0_674 = arith.constant 0 : index
    %c1_675 = arith.constant 1 : index
    %1245 = vector.load %arg8[%c7_673, %c0_674, %c1_675] : memref<12x8x256xf32, #tpu.memory_space<vmem>>, vector<1x8x128xf32>
    %1246 = vector.shape_cast %1245 : vector<1x8x128xf32> to vector<8x128xf32>
    %1247 = vector.broadcast %250 : f32 to vector<8x128xf32>
    %1248 = arith.mulf %1247, %1246 : vector<8x128xf32>
    %1249 = arith.addf %1244, %1248 : vector<8x128xf32>
    %c7_676 = arith.constant 7 : index
    %c0_677 = arith.constant 0 : index
    %c2_678 = arith.constant 2 : index
    %1250 = vector.load %arg8[%c7_676, %c0_677, %c2_678] : memref<12x8x256xf32, #tpu.memory_space<vmem>>, vector<1x8x128xf32>
    %1251 = vector.shape_cast %1250 : vector<1x8x128xf32> to vector<8x128xf32>
    %1252 = vector.broadcast %282 : f32 to vector<8x128xf32>
    %1253 = arith.mulf %1252, %1251 : vector<8x128xf32>
    %1254 = arith.addf %1249, %1253 : vector<8x128xf32>
    %c8_679 = arith.constant 8 : index
    %c0_680 = arith.constant 0 : index
    %c0_681 = arith.constant 0 : index
    %1255 = vector.load %arg8[%c8_679, %c0_680, %c0_681] : memref<12x8x256xf32, #tpu.memory_space<vmem>>, vector<1x8x128xf32>
    %1256 = vector.shape_cast %1255 : vector<1x8x128xf32> to vector<8x128xf32>
    %1257 = vector.broadcast %314 : f32 to vector<8x128xf32>
    %1258 = arith.mulf %1257, %1256 : vector<8x128xf32>
    %1259 = arith.addf %1254, %1258 : vector<8x128xf32>
    %c8_682 = arith.constant 8 : index
    %c0_683 = arith.constant 0 : index
    %c1_684 = arith.constant 1 : index
    %1260 = vector.load %arg8[%c8_682, %c0_683, %c1_684] : memref<12x8x256xf32, #tpu.memory_space<vmem>>, vector<1x8x128xf32>
    %1261 = vector.shape_cast %1260 : vector<1x8x128xf32> to vector<8x128xf32>
    %1262 = vector.broadcast %346 : f32 to vector<8x128xf32>
    %1263 = arith.mulf %1262, %1261 : vector<8x128xf32>
    %1264 = arith.addf %1259, %1263 : vector<8x128xf32>
    %c8_685 = arith.constant 8 : index
    %c0_686 = arith.constant 0 : index
    %c2_687 = arith.constant 2 : index
    %1265 = vector.load %arg8[%c8_685, %c0_686, %c2_687] : memref<12x8x256xf32, #tpu.memory_space<vmem>>, vector<1x8x128xf32>
    %1266 = vector.shape_cast %1265 : vector<1x8x128xf32> to vector<8x128xf32>
    %1267 = vector.broadcast %378 : f32 to vector<8x128xf32>
    %1268 = arith.mulf %1267, %1266 : vector<8x128xf32>
    %1269 = arith.addf %1264, %1268 : vector<8x128xf32>
    %c9_688 = arith.constant 9 : index
    %c0_689 = arith.constant 0 : index
    %c0_690 = arith.constant 0 : index
    %1270 = vector.load %arg8[%c9_688, %c0_689, %c0_690] : memref<12x8x256xf32, #tpu.memory_space<vmem>>, vector<1x8x128xf32>
    %1271 = vector.shape_cast %1270 : vector<1x8x128xf32> to vector<8x128xf32>
    %1272 = vector.broadcast %130 : f32 to vector<8x128xf32>
    %1273 = arith.mulf %1272, %1271 : vector<8x128xf32>
    %1274 = arith.addf %1269, %1273 : vector<8x128xf32>
    %c9_691 = arith.constant 9 : index
    %c0_692 = arith.constant 0 : index
    %c1_693 = arith.constant 1 : index
    %1275 = vector.load %arg8[%c9_691, %c0_692, %c1_693] : memref<12x8x256xf32, #tpu.memory_space<vmem>>, vector<1x8x128xf32>
    %1276 = vector.shape_cast %1275 : vector<1x8x128xf32> to vector<8x128xf32>
    %1277 = vector.broadcast %162 : f32 to vector<8x128xf32>
    %1278 = arith.mulf %1277, %1276 : vector<8x128xf32>
    %1279 = arith.addf %1274, %1278 : vector<8x128xf32>
    %c9_694 = arith.constant 9 : index
    %c0_695 = arith.constant 0 : index
    %c2_696 = arith.constant 2 : index
    %1280 = vector.load %arg8[%c9_694, %c0_695, %c2_696] : memref<12x8x256xf32, #tpu.memory_space<vmem>>, vector<1x8x128xf32>
    %1281 = vector.shape_cast %1280 : vector<1x8x128xf32> to vector<8x128xf32>
    %1282 = vector.broadcast %194 : f32 to vector<8x128xf32>
    %1283 = arith.mulf %1282, %1281 : vector<8x128xf32>
    %1284 = arith.addf %1279, %1283 : vector<8x128xf32>
    %c10_697 = arith.constant 10 : index
    %c0_698 = arith.constant 0 : index
    %c0_699 = arith.constant 0 : index
    %1285 = vector.load %arg8[%c10_697, %c0_698, %c0_699] : memref<12x8x256xf32, #tpu.memory_space<vmem>>, vector<1x8x128xf32>
    %1286 = vector.shape_cast %1285 : vector<1x8x128xf32> to vector<8x128xf32>
    %1287 = vector.broadcast %226 : f32 to vector<8x128xf32>
    %1288 = arith.mulf %1287, %1286 : vector<8x128xf32>
    %1289 = arith.addf %1284, %1288 : vector<8x128xf32>
    %c10_700 = arith.constant 10 : index
    %c0_701 = arith.constant 0 : index
    %c1_702 = arith.constant 1 : index
    %1290 = vector.load %arg8[%c10_700, %c0_701, %c1_702] : memref<12x8x256xf32, #tpu.memory_space<vmem>>, vector<1x8x128xf32>
    %1291 = vector.shape_cast %1290 : vector<1x8x128xf32> to vector<8x128xf32>
    %1292 = vector.broadcast %258 : f32 to vector<8x128xf32>
    %1293 = arith.mulf %1292, %1291 : vector<8x128xf32>
    %1294 = arith.addf %1289, %1293 : vector<8x128xf32>
    %c10_703 = arith.constant 10 : index
    %c0_704 = arith.constant 0 : index
    %c2_705 = arith.constant 2 : index
    %1295 = vector.load %arg8[%c10_703, %c0_704, %c2_705] : memref<12x8x256xf32, #tpu.memory_space<vmem>>, vector<1x8x128xf32>
    %1296 = vector.shape_cast %1295 : vector<1x8x128xf32> to vector<8x128xf32>
    %1297 = vector.broadcast %290 : f32 to vector<8x128xf32>
    %1298 = arith.mulf %1297, %1296 : vector<8x128xf32>
    %1299 = arith.addf %1294, %1298 : vector<8x128xf32>
    %c11_706 = arith.constant 11 : index
    %c0_707 = arith.constant 0 : index
    %c0_708 = arith.constant 0 : index
    %1300 = vector.load %arg8[%c11_706, %c0_707, %c0_708] : memref<12x8x256xf32, #tpu.memory_space<vmem>>, vector<1x8x128xf32>
    %1301 = vector.shape_cast %1300 : vector<1x8x128xf32> to vector<8x128xf32>
    %1302 = vector.broadcast %322 : f32 to vector<8x128xf32>
    %1303 = arith.mulf %1302, %1301 : vector<8x128xf32>
    %1304 = arith.addf %1299, %1303 : vector<8x128xf32>
    %c11_709 = arith.constant 11 : index
    %c0_710 = arith.constant 0 : index
    %c1_711 = arith.constant 1 : index
    %1305 = vector.load %arg8[%c11_709, %c0_710, %c1_711] : memref<12x8x256xf32, #tpu.memory_space<vmem>>, vector<1x8x128xf32>
    %1306 = vector.shape_cast %1305 : vector<1x8x128xf32> to vector<8x128xf32>
    %1307 = vector.broadcast %354 : f32 to vector<8x128xf32>
    %1308 = arith.mulf %1307, %1306 : vector<8x128xf32>
    %1309 = arith.addf %1304, %1308 : vector<8x128xf32>
    %c11_712 = arith.constant 11 : index
    %c0_713 = arith.constant 0 : index
    %c2_714 = arith.constant 2 : index
    %1310 = vector.load %arg8[%c11_712, %c0_713, %c2_714] : memref<12x8x256xf32, #tpu.memory_space<vmem>>, vector<1x8x128xf32>
    %1311 = vector.shape_cast %1310 : vector<1x8x128xf32> to vector<8x128xf32>
    %1312 = vector.broadcast %386 : f32 to vector<8x128xf32>
    %1313 = arith.mulf %1312, %1311 : vector<8x128xf32>
    %1314 = arith.addf %1309, %1313 : vector<8x128xf32>
    %c0_715 = arith.constant 0 : index
    %c4_716 = arith.constant 4 : index
    %c0_717 = arith.constant 0 : index
    %c0_718 = arith.constant 0 : index
    %1315 = vector.load %arg7[%c0_715, %c4_716, %c0_717, %c0_718] : memref<1x8x8x128xf32, #tpu.memory_space<vmem>>, vector<1x1x8x128xf32>
    %1316 = vector.shape_cast %1315 : vector<1x1x8x128xf32> to vector<8x128xf32>
    %1317 = vector.shape_cast %1314 : vector<8x128xf32> to vector<1x1x8x128xf32>
    tpu.vector_store %arg7[%c0_715, %c4_716, %c0_717, %c0_718], %1317 {strides = array<i32>} : memref<1x8x8x128xf32, #tpu.memory_space<vmem>>, vector<1x1x8x128xf32>,
    %1318 = vector.broadcast %395 : f32 to vector<8x128xf32>
    %c0_719 = arith.constant 0 : index
    %c0_720 = arith.constant 0 : index
    %c0_721 = arith.constant 0 : index
    %1319 = vector.load %arg8[%c0_719, %c0_720, %c0_721] : memref<12x8x256xf32, #tpu.memory_space<vmem>>, vector<1x8x128xf32>
    %1320 = vector.shape_cast %1319 : vector<1x8x128xf32> to vector<8x128xf32>
    %1321 = vector.broadcast %107 : f32 to vector<8x128xf32>
    %1322 = arith.mulf %1321, %1320 : vector<8x128xf32>
    %1323 = arith.addf %1318, %1322 : vector<8x128xf32>
    %c0_722 = arith.constant 0 : index
    %c0_723 = arith.constant 0 : index
    %c1_724 = arith.constant 1 : index
    %1324 = vector.load %arg8[%c0_722, %c0_723, %c1_724] : memref<12x8x256xf32, #tpu.memory_space<vmem>>, vector<1x8x128xf32>
    %1325 = vector.shape_cast %1324 : vector<1x8x128xf32> to vector<8x128xf32>
    %1326 = vector.broadcast %139 : f32 to vector<8x128xf32>
    %1327 = arith.mulf %1326, %1325 : vector<8x128xf32>
    %1328 = arith.addf %1323, %1327 : vector<8x128xf32>
    %c0_725 = arith.constant 0 : index
    %c0_726 = arith.constant 0 : index
    %c2_727 = arith.constant 2 : index
    %1329 = vector.load %arg8[%c0_725, %c0_726, %c2_727] : memref<12x8x256xf32, #tpu.memory_space<vmem>>, vector<1x8x128xf32>
    %1330 = vector.shape_cast %1329 : vector<1x8x128xf32> to vector<8x128xf32>
    %1331 = vector.broadcast %171 : f32 to vector<8x128xf32>
    %1332 = arith.mulf %1331, %1330 : vector<8x128xf32>
    %1333 = arith.addf %1328, %1332 : vector<8x128xf32>
    %c1_728 = arith.constant 1 : index
    %c0_729 = arith.constant 0 : index
    %c0_730 = arith.constant 0 : index
    %1334 = vector.load %arg8[%c1_728, %c0_729, %c0_730] : memref<12x8x256xf32, #tpu.memory_space<vmem>>, vector<1x8x128xf32>
    %1335 = vector.shape_cast %1334 : vector<1x8x128xf32> to vector<8x128xf32>
    %1336 = vector.broadcast %203 : f32 to vector<8x128xf32>
    %1337 = arith.mulf %1336, %1335 : vector<8x128xf32>
    %1338 = arith.addf %1333, %1337 : vector<8x128xf32>
    %c1_731 = arith.constant 1 : index
    %c0_732 = arith.constant 0 : index
    %c1_733 = arith.constant 1 : index
    %1339 = vector.load %arg8[%c1_731, %c0_732, %c1_733] : memref<12x8x256xf32, #tpu.memory_space<vmem>>, vector<1x8x128xf32>
    %1340 = vector.shape_cast %1339 : vector<1x8x128xf32> to vector<8x128xf32>
    %1341 = vector.broadcast %235 : f32 to vector<8x128xf32>
    %1342 = arith.mulf %1341, %1340 : vector<8x128xf32>
    %1343 = arith.addf %1338, %1342 : vector<8x128xf32>
    %c1_734 = arith.constant 1 : index
    %c0_735 = arith.constant 0 : index
    %c2_736 = arith.constant 2 : index
    %1344 = vector.load %arg8[%c1_734, %c0_735, %c2_736] : memref<12x8x256xf32, #tpu.memory_space<vmem>>, vector<1x8x128xf32>
    %1345 = vector.shape_cast %1344 : vector<1x8x128xf32> to vector<8x128xf32>
    %1346 = vector.broadcast %267 : f32 to vector<8x128xf32>
    %1347 = arith.mulf %1346, %1345 : vector<8x128xf32>
    %1348 = arith.addf %1343, %1347 : vector<8x128xf32>
    %c2_737 = arith.constant 2 : index
    %c0_738 = arith.constant 0 : index
    %c0_739 = arith.constant 0 : index
    %1349 = vector.load %arg8[%c2_737, %c0_738, %c0_739] : memref<12x8x256xf32, #tpu.memory_space<vmem>>, vector<1x8x128xf32>
    %1350 = vector.shape_cast %1349 : vector<1x8x128xf32> to vector<8x128xf32>
    %1351 = vector.broadcast %299 : f32 to vector<8x128xf32>
    %1352 = arith.mulf %1351, %1350 : vector<8x128xf32>
    %1353 = arith.addf %1348, %1352 : vector<8x128xf32>
    %c2_740 = arith.constant 2 : index
    %c0_741 = arith.constant 0 : index
    %c1_742 = arith.constant 1 : index
    %1354 = vector.load %arg8[%c2_740, %c0_741, %c1_742] : memref<12x8x256xf32, #tpu.memory_space<vmem>>, vector<1x8x128xf32>
    %1355 = vector.shape_cast %1354 : vector<1x8x128xf32> to vector<8x128xf32>
    %1356 = vector.broadcast %331 : f32 to vector<8x128xf32>
    %1357 = arith.mulf %1356, %1355 : vector<8x128xf32>
    %1358 = arith.addf %1353, %1357 : vector<8x128xf32>
    %c2_743 = arith.constant 2 : index
    %c0_744 = arith.constant 0 : index
    %c2_745 = arith.constant 2 : index
    %1359 = vector.load %arg8[%c2_743, %c0_744, %c2_745] : memref<12x8x256xf32, #tpu.memory_space<vmem>>, vector<1x8x128xf32>
    %1360 = vector.shape_cast %1359 : vector<1x8x128xf32> to vector<8x128xf32>
    %1361 = vector.broadcast %363 : f32 to vector<8x128xf32>
    %1362 = arith.mulf %1361, %1360 : vector<8x128xf32>
    %1363 = arith.addf %1358, %1362 : vector<8x128xf32>
    %c3_746 = arith.constant 3 : index
    %c0_747 = arith.constant 0 : index
    %c0_748 = arith.constant 0 : index
    %1364 = vector.load %arg8[%c3_746, %c0_747, %c0_748] : memref<12x8x256xf32, #tpu.memory_space<vmem>>, vector<1x8x128xf32>
    %1365 = vector.shape_cast %1364 : vector<1x8x128xf32> to vector<8x128xf32>
    %1366 = vector.broadcast %115 : f32 to vector<8x128xf32>
    %1367 = arith.mulf %1366, %1365 : vector<8x128xf32>
    %1368 = arith.addf %1363, %1367 : vector<8x128xf32>
    %c3_749 = arith.constant 3 : index
    %c0_750 = arith.constant 0 : index
    %c1_751 = arith.constant 1 : index
    %1369 = vector.load %arg8[%c3_749, %c0_750, %c1_751] : memref<12x8x256xf32, #tpu.memory_space<vmem>>, vector<1x8x128xf32>
    %1370 = vector.shape_cast %1369 : vector<1x8x128xf32> to vector<8x128xf32>
    %1371 = vector.broadcast %147 : f32 to vector<8x128xf32>
    %1372 = arith.mulf %1371, %1370 : vector<8x128xf32>
    %1373 = arith.addf %1368, %1372 : vector<8x128xf32>
    %c3_752 = arith.constant 3 : index
    %c0_753 = arith.constant 0 : index
    %c2_754 = arith.constant 2 : index
    %1374 = vector.load %arg8[%c3_752, %c0_753, %c2_754] : memref<12x8x256xf32, #tpu.memory_space<vmem>>, vector<1x8x128xf32>
    %1375 = vector.shape_cast %1374 : vector<1x8x128xf32> to vector<8x128xf32>
    %1376 = vector.broadcast %179 : f32 to vector<8x128xf32>
    %1377 = arith.mulf %1376, %1375 : vector<8x128xf32>
    %1378 = arith.addf %1373, %1377 : vector<8x128xf32>
    %c4_755 = arith.constant 4 : index
    %c0_756 = arith.constant 0 : index
    %c0_757 = arith.constant 0 : index
    %1379 = vector.load %arg8[%c4_755, %c0_756, %c0_757] : memref<12x8x256xf32, #tpu.memory_space<vmem>>, vector<1x8x128xf32>
    %1380 = vector.shape_cast %1379 : vector<1x8x128xf32> to vector<8x128xf32>
    %1381 = vector.broadcast %211 : f32 to vector<8x128xf32>
    %1382 = arith.mulf %1381, %1380 : vector<8x128xf32>
    %1383 = arith.addf %1378, %1382 : vector<8x128xf32>
    %c4_758 = arith.constant 4 : index
    %c0_759 = arith.constant 0 : index
    %c1_760 = arith.constant 1 : index
    %1384 = vector.load %arg8[%c4_758, %c0_759, %c1_760] : memref<12x8x256xf32, #tpu.memory_space<vmem>>, vector<1x8x128xf32>
    %1385 = vector.shape_cast %1384 : vector<1x8x128xf32> to vector<8x128xf32>
    %1386 = vector.broadcast %243 : f32 to vector<8x128xf32>
    %1387 = arith.mulf %1386, %1385 : vector<8x128xf32>
    %1388 = arith.addf %1383, %1387 : vector<8x128xf32>
    %c4_761 = arith.constant 4 : index
    %c0_762 = arith.constant 0 : index
    %c2_763 = arith.constant 2 : index
    %1389 = vector.load %arg8[%c4_761, %c0_762, %c2_763] : memref<12x8x256xf32, #tpu.memory_space<vmem>>, vector<1x8x128xf32>
    %1390 = vector.shape_cast %1389 : vector<1x8x128xf32> to vector<8x128xf32>
    %1391 = vector.broadcast %275 : f32 to vector<8x128xf32>
    %1392 = arith.mulf %1391, %1390 : vector<8x128xf32>
    %1393 = arith.addf %1388, %1392 : vector<8x128xf32>
    %c5_764 = arith.constant 5 : index
    %c0_765 = arith.constant 0 : index
    %c0_766 = arith.constant 0 : index
    %1394 = vector.load %arg8[%c5_764, %c0_765, %c0_766] : memref<12x8x256xf32, #tpu.memory_space<vmem>>, vector<1x8x128xf32>
    %1395 = vector.shape_cast %1394 : vector<1x8x128xf32> to vector<8x128xf32>
    %1396 = vector.broadcast %307 : f32 to vector<8x128xf32>
    %1397 = arith.mulf %1396, %1395 : vector<8x128xf32>
    %1398 = arith.addf %1393, %1397 : vector<8x128xf32>
    %c5_767 = arith.constant 5 : index
    %c0_768 = arith.constant 0 : index
    %c1_769 = arith.constant 1 : index
    %1399 = vector.load %arg8[%c5_767, %c0_768, %c1_769] : memref<12x8x256xf32, #tpu.memory_space<vmem>>, vector<1x8x128xf32>
    %1400 = vector.shape_cast %1399 : vector<1x8x128xf32> to vector<8x128xf32>
    %1401 = vector.broadcast %339 : f32 to vector<8x128xf32>
    %1402 = arith.mulf %1401, %1400 : vector<8x128xf32>
    %1403 = arith.addf %1398, %1402 : vector<8x128xf32>
    %c5_770 = arith.constant 5 : index
    %c0_771 = arith.constant 0 : index
    %c2_772 = arith.constant 2 : index
    %1404 = vector.load %arg8[%c5_770, %c0_771, %c2_772] : memref<12x8x256xf32, #tpu.memory_space<vmem>>, vector<1x8x128xf32>
    %1405 = vector.shape_cast %1404 : vector<1x8x128xf32> to vector<8x128xf32>
    %1406 = vector.broadcast %371 : f32 to vector<8x128xf32>
    %1407 = arith.mulf %1406, %1405 : vector<8x128xf32>
    %1408 = arith.addf %1403, %1407 : vector<8x128xf32>
    %c6_773 = arith.constant 6 : index
    %c0_774 = arith.constant 0 : index
    %c0_775 = arith.constant 0 : index
    %1409 = vector.load %arg8[%c6_773, %c0_774, %c0_775] : memref<12x8x256xf32, #tpu.memory_space<vmem>>, vector<1x8x128xf32>
    %1410 = vector.shape_cast %1409 : vector<1x8x128xf32> to vector<8x128xf32>
    %1411 = vector.broadcast %123 : f32 to vector<8x128xf32>
    %1412 = arith.mulf %1411, %1410 : vector<8x128xf32>
    %1413 = arith.addf %1408, %1412 : vector<8x128xf32>
    %c6_776 = arith.constant 6 : index
    %c0_777 = arith.constant 0 : index
    %c1_778 = arith.constant 1 : index
    %1414 = vector.load %arg8[%c6_776, %c0_777, %c1_778] : memref<12x8x256xf32, #tpu.memory_space<vmem>>, vector<1x8x128xf32>
    %1415 = vector.shape_cast %1414 : vector<1x8x128xf32> to vector<8x128xf32>
    %1416 = vector.broadcast %155 : f32 to vector<8x128xf32>
    %1417 = arith.mulf %1416, %1415 : vector<8x128xf32>
    %1418 = arith.addf %1413, %1417 : vector<8x128xf32>
    %c6_779 = arith.constant 6 : index
    %c0_780 = arith.constant 0 : index
    %c2_781 = arith.constant 2 : index
    %1419 = vector.load %arg8[%c6_779, %c0_780, %c2_781] : memref<12x8x256xf32, #tpu.memory_space<vmem>>, vector<1x8x128xf32>
    %1420 = vector.shape_cast %1419 : vector<1x8x128xf32> to vector<8x128xf32>
    %1421 = vector.broadcast %187 : f32 to vector<8x128xf32>
    %1422 = arith.mulf %1421, %1420 : vector<8x128xf32>
    %1423 = arith.addf %1418, %1422 : vector<8x128xf32>
    %c7_782 = arith.constant 7 : index
    %c0_783 = arith.constant 0 : index
    %c0_784 = arith.constant 0 : index
    %1424 = vector.load %arg8[%c7_782, %c0_783, %c0_784] : memref<12x8x256xf32, #tpu.memory_space<vmem>>, vector<1x8x128xf32>
    %1425 = vector.shape_cast %1424 : vector<1x8x128xf32> to vector<8x128xf32>
    %1426 = vector.broadcast %219 : f32 to vector<8x128xf32>
    %1427 = arith.mulf %1426, %1425 : vector<8x128xf32>
    %1428 = arith.addf %1423, %1427 : vector<8x128xf32>
    %c7_785 = arith.constant 7 : index
    %c0_786 = arith.constant 0 : index
    %c1_787 = arith.constant 1 : index
    %1429 = vector.load %arg8[%c7_785, %c0_786, %c1_787] : memref<12x8x256xf32, #tpu.memory_space<vmem>>, vector<1x8x128xf32>
    %1430 = vector.shape_cast %1429 : vector<1x8x128xf32> to vector<8x128xf32>
    %1431 = vector.broadcast %251 : f32 to vector<8x128xf32>
    %1432 = arith.mulf %1431, %1430 : vector<8x128xf32>
    %1433 = arith.addf %1428, %1432 : vector<8x128xf32>
    %c7_788 = arith.constant 7 : index
    %c0_789 = arith.constant 0 : index
    %c2_790 = arith.constant 2 : index
    %1434 = vector.load %arg8[%c7_788, %c0_789, %c2_790] : memref<12x8x256xf32, #tpu.memory_space<vmem>>, vector<1x8x128xf32>
    %1435 = vector.shape_cast %1434 : vector<1x8x128xf32> to vector<8x128xf32>
    %1436 = vector.broadcast %283 : f32 to vector<8x128xf32>
    %1437 = arith.mulf %1436, %1435 : vector<8x128xf32>
    %1438 = arith.addf %1433, %1437 : vector<8x128xf32>
    %c8_791 = arith.constant 8 : index
    %c0_792 = arith.constant 0 : index
    %c0_793 = arith.constant 0 : index
    %1439 = vector.load %arg8[%c8_791, %c0_792, %c0_793] : memref<12x8x256xf32, #tpu.memory_space<vmem>>, vector<1x8x128xf32>
    %1440 = vector.shape_cast %1439 : vector<1x8x128xf32> to vector<8x128xf32>
    %1441 = vector.broadcast %315 : f32 to vector<8x128xf32>
    %1442 = arith.mulf %1441, %1440 : vector<8x128xf32>
    %1443 = arith.addf %1438, %1442 : vector<8x128xf32>
    %c8_794 = arith.constant 8 : index
    %c0_795 = arith.constant 0 : index
    %c1_796 = arith.constant 1 : index
    %1444 = vector.load %arg8[%c8_794, %c0_795, %c1_796] : memref<12x8x256xf32, #tpu.memory_space<vmem>>, vector<1x8x128xf32>
    %1445 = vector.shape_cast %1444 : vector<1x8x128xf32> to vector<8x128xf32>
    %1446 = vector.broadcast %347 : f32 to vector<8x128xf32>
    %1447 = arith.mulf %1446, %1445 : vector<8x128xf32>
    %1448 = arith.addf %1443, %1447 : vector<8x128xf32>
    %c8_797 = arith.constant 8 : index
    %c0_798 = arith.constant 0 : index
    %c2_799 = arith.constant 2 : index
    %1449 = vector.load %arg8[%c8_797, %c0_798, %c2_799] : memref<12x8x256xf32, #tpu.memory_space<vmem>>, vector<1x8x128xf32>
    %1450 = vector.shape_cast %1449 : vector<1x8x128xf32> to vector<8x128xf32>
    %1451 = vector.broadcast %379 : f32 to vector<8x128xf32>
    %1452 = arith.mulf %1451, %1450 : vector<8x128xf32>
    %1453 = arith.addf %1448, %1452 : vector<8x128xf32>
    %c9_800 = arith.constant 9 : index
    %c0_801 = arith.constant 0 : index
    %c0_802 = arith.constant 0 : index
    %1454 = vector.load %arg8[%c9_800, %c0_801, %c0_802] : memref<12x8x256xf32, #tpu.memory_space<vmem>>, vector<1x8x128xf32>
    %1455 = vector.shape_cast %1454 : vector<1x8x128xf32> to vector<8x128xf32>
    %1456 = vector.broadcast %131 : f32 to vector<8x128xf32>
    %1457 = arith.mulf %1456, %1455 : vector<8x128xf32>
    %1458 = arith.addf %1453, %1457 : vector<8x128xf32>
    %c9_803 = arith.constant 9 : index
    %c0_804 = arith.constant 0 : index
    %c1_805 = arith.constant 1 : index
    %1459 = vector.load %arg8[%c9_803, %c0_804, %c1_805] : memref<12x8x256xf32, #tpu.memory_space<vmem>>, vector<1x8x128xf32>
    %1460 = vector.shape_cast %1459 : vector<1x8x128xf32> to vector<8x128xf32>
    %1461 = vector.broadcast %163 : f32 to vector<8x128xf32>
    %1462 = arith.mulf %1461, %1460 : vector<8x128xf32>
    %1463 = arith.addf %1458, %1462 : vector<8x128xf32>
    %c9_806 = arith.constant 9 : index
    %c0_807 = arith.constant 0 : index
    %c2_808 = arith.constant 2 : index
    %1464 = vector.load %arg8[%c9_806, %c0_807, %c2_808] : memref<12x8x256xf32, #tpu.memory_space<vmem>>, vector<1x8x128xf32>
    %1465 = vector.shape_cast %1464 : vector<1x8x128xf32> to vector<8x128xf32>
    %1466 = vector.broadcast %195 : f32 to vector<8x128xf32>
    %1467 = arith.mulf %1466, %1465 : vector<8x128xf32>
    %1468 = arith.addf %1463, %1467 : vector<8x128xf32>
    %c10_809 = arith.constant 10 : index
    %c0_810 = arith.constant 0 : index
    %c0_811 = arith.constant 0 : index
    %1469 = vector.load %arg8[%c10_809, %c0_810, %c0_811] : memref<12x8x256xf32, #tpu.memory_space<vmem>>, vector<1x8x128xf32>
    %1470 = vector.shape_cast %1469 : vector<1x8x128xf32> to vector<8x128xf32>
    %1471 = vector.broadcast %227 : f32 to vector<8x128xf32>
    %1472 = arith.mulf %1471, %1470 : vector<8x128xf32>
    %1473 = arith.addf %1468, %1472 : vector<8x128xf32>
    %c10_812 = arith.constant 10 : index
    %c0_813 = arith.constant 0 : index
    %c1_814 = arith.constant 1 : index
    %1474 = vector.load %arg8[%c10_812, %c0_813, %c1_814] : memref<12x8x256xf32, #tpu.memory_space<vmem>>, vector<1x8x128xf32>
    %1475 = vector.shape_cast %1474 : vector<1x8x128xf32> to vector<8x128xf32>
    %1476 = vector.broadcast %259 : f32 to vector<8x128xf32>
    %1477 = arith.mulf %1476, %1475 : vector<8x128xf32>
    %1478 = arith.addf %1473, %1477 : vector<8x128xf32>
    %c10_815 = arith.constant 10 : index
    %c0_816 = arith.constant 0 : index
    %c2_817 = arith.constant 2 : index
    %1479 = vector.load %arg8[%c10_815, %c0_816, %c2_817] : memref<12x8x256xf32, #tpu.memory_space<vmem>>, vector<1x8x128xf32>
    %1480 = vector.shape_cast %1479 : vector<1x8x128xf32> to vector<8x128xf32>
    %1481 = vector.broadcast %291 : f32 to vector<8x128xf32>
    %1482 = arith.mulf %1481, %1480 : vector<8x128xf32>
    %1483 = arith.addf %1478, %1482 : vector<8x128xf32>
    %c11_818 = arith.constant 11 : index
    %c0_819 = arith.constant 0 : index
    %c0_820 = arith.constant 0 : index
    %1484 = vector.load %arg8[%c11_818, %c0_819, %c0_820] : memref<12x8x256xf32, #tpu.memory_space<vmem>>, vector<1x8x128xf32>
    %1485 = vector.shape_cast %1484 : vector<1x8x128xf32> to vector<8x128xf32>
    %1486 = vector.broadcast %323 : f32 to vector<8x128xf32>
    %1487 = arith.mulf %1486, %1485 : vector<8x128xf32>
    %1488 = arith.addf %1483, %1487 : vector<8x128xf32>
    %c11_821 = arith.constant 11 : index
    %c0_822 = arith.constant 0 : index
    %c1_823 = arith.constant 1 : index
    %1489 = vector.load %arg8[%c11_821, %c0_822, %c1_823] : memref<12x8x256xf32, #tpu.memory_space<vmem>>, vector<1x8x128xf32>
    %1490 = vector.shape_cast %1489 : vector<1x8x128xf32> to vector<8x128xf32>
    %1491 = vector.broadcast %355 : f32 to vector<8x128xf32>
    %1492 = arith.mulf %1491, %1490 : vector<8x128xf32>
    %1493 = arith.addf %1488, %1492 : vector<8x128xf32>
    %c11_824 = arith.constant 11 : index
    %c0_825 = arith.constant 0 : index
    %c2_826 = arith.constant 2 : index
    %1494 = vector.load %arg8[%c11_824, %c0_825, %c2_826] : memref<12x8x256xf32, #tpu.memory_space<vmem>>, vector<1x8x128xf32>
    %1495 = vector.shape_cast %1494 : vector<1x8x128xf32> to vector<8x128xf32>
    %1496 = vector.broadcast %387 : f32 to vector<8x128xf32>
    %1497 = arith.mulf %1496, %1495 : vector<8x128xf32>
    %1498 = arith.addf %1493, %1497 : vector<8x128xf32>
    %c0_827 = arith.constant 0 : index
    %c5_828 = arith.constant 5 : index
    %c0_829 = arith.constant 0 : index
    %c0_830 = arith.constant 0 : index
    %1499 = vector.load %arg7[%c0_827, %c5_828, %c0_829, %c0_830] : memref<1x8x8x128xf32, #tpu.memory_space<vmem>>, vector<1x1x8x128xf32>
    %1500 = vector.shape_cast %1499 : vector<1x1x8x128xf32> to vector<8x128xf32>
    %1501 = vector.shape_cast %1498 : vector<8x128xf32> to vector<1x1x8x128xf32>
    tpu.vector_store %arg7[%c0_827, %c5_828, %c0_829, %c0_830], %1501 {strides = array<i32>} : memref<1x8x8x128xf32, #tpu.memory_space<vmem>>, vector<1x1x8x128xf32>,
    %1502 = vector.broadcast %396 : f32 to vector<8x128xf32>
    %c0_831 = arith.constant 0 : index
    %c0_832 = arith.constant 0 : index
    %c0_833 = arith.constant 0 : index
    %1503 = vector.load %arg8[%c0_831, %c0_832, %c0_833] : memref<12x8x256xf32, #tpu.memory_space<vmem>>, vector<1x8x128xf32>
    %1504 = vector.shape_cast %1503 : vector<1x8x128xf32> to vector<8x128xf32>
    %1505 = vector.broadcast %108 : f32 to vector<8x128xf32>
    %1506 = arith.mulf %1505, %1504 : vector<8x128xf32>
    %1507 = arith.addf %1502, %1506 : vector<8x128xf32>
    %c0_834 = arith.constant 0 : index
    %c0_835 = arith.constant 0 : index
    %c1_836 = arith.constant 1 : index
    %1508 = vector.load %arg8[%c0_834, %c0_835, %c1_836] : memref<12x8x256xf32, #tpu.memory_space<vmem>>, vector<1x8x128xf32>
    %1509 = vector.shape_cast %1508 : vector<1x8x128xf32> to vector<8x128xf32>
    %1510 = vector.broadcast %140 : f32 to vector<8x128xf32>
    %1511 = arith.mulf %1510, %1509 : vector<8x128xf32>
    %1512 = arith.addf %1507, %1511 : vector<8x128xf32>
    %c0_837 = arith.constant 0 : index
    %c0_838 = arith.constant 0 : index
    %c2_839 = arith.constant 2 : index
    %1513 = vector.load %arg8[%c0_837, %c0_838, %c2_839] : memref<12x8x256xf32, #tpu.memory_space<vmem>>, vector<1x8x128xf32>
    %1514 = vector.shape_cast %1513 : vector<1x8x128xf32> to vector<8x128xf32>
    %1515 = vector.broadcast %172 : f32 to vector<8x128xf32>
    %1516 = arith.mulf %1515, %1514 : vector<8x128xf32>
    %1517 = arith.addf %1512, %1516 : vector<8x128xf32>
    %c1_840 = arith.constant 1 : index
    %c0_841 = arith.constant 0 : index
    %c0_842 = arith.constant 0 : index
    %1518 = vector.load %arg8[%c1_840, %c0_841, %c0_842] : memref<12x8x256xf32, #tpu.memory_space<vmem>>, vector<1x8x128xf32>
    %1519 = vector.shape_cast %1518 : vector<1x8x128xf32> to vector<8x128xf32>
    %1520 = vector.broadcast %204 : f32 to vector<8x128xf32>
    %1521 = arith.mulf %1520, %1519 : vector<8x128xf32>
    %1522 = arith.addf %1517, %1521 : vector<8x128xf32>
    %c1_843 = arith.constant 1 : index
    %c0_844 = arith.constant 0 : index
    %c1_845 = arith.constant 1 : index
    %1523 = vector.load %arg8[%c1_843, %c0_844, %c1_845] : memref<12x8x256xf32, #tpu.memory_space<vmem>>, vector<1x8x128xf32>
    %1524 = vector.shape_cast %1523 : vector<1x8x128xf32> to vector<8x128xf32>
    %1525 = vector.broadcast %236 : f32 to vector<8x128xf32>
    %1526 = arith.mulf %1525, %1524 : vector<8x128xf32>
    %1527 = arith.addf %1522, %1526 : vector<8x128xf32>
    %c1_846 = arith.constant 1 : index
    %c0_847 = arith.constant 0 : index
    %c2_848 = arith.constant 2 : index
    %1528 = vector.load %arg8[%c1_846, %c0_847, %c2_848] : memref<12x8x256xf32, #tpu.memory_space<vmem>>, vector<1x8x128xf32>
    %1529 = vector.shape_cast %1528 : vector<1x8x128xf32> to vector<8x128xf32>
    %1530 = vector.broadcast %268 : f32 to vector<8x128xf32>
    %1531 = arith.mulf %1530, %1529 : vector<8x128xf32>
    %1532 = arith.addf %1527, %1531 : vector<8x128xf32>
    %c2_849 = arith.constant 2 : index
    %c0_850 = arith.constant 0 : index
    %c0_851 = arith.constant 0 : index
    %1533 = vector.load %arg8[%c2_849, %c0_850, %c0_851] : memref<12x8x256xf32, #tpu.memory_space<vmem>>, vector<1x8x128xf32>
    %1534 = vector.shape_cast %1533 : vector<1x8x128xf32> to vector<8x128xf32>
    %1535 = vector.broadcast %300 : f32 to vector<8x128xf32>
    %1536 = arith.mulf %1535, %1534 : vector<8x128xf32>
    %1537 = arith.addf %1532, %1536 : vector<8x128xf32>
    %c2_852 = arith.constant 2 : index
    %c0_853 = arith.constant 0 : index
    %c1_854 = arith.constant 1 : index
    %1538 = vector.load %arg8[%c2_852, %c0_853, %c1_854] : memref<12x8x256xf32, #tpu.memory_space<vmem>>, vector<1x8x128xf32>
    %1539 = vector.shape_cast %1538 : vector<1x8x128xf32> to vector<8x128xf32>
    %1540 = vector.broadcast %332 : f32 to vector<8x128xf32>
    %1541 = arith.mulf %1540, %1539 : vector<8x128xf32>
    %1542 = arith.addf %1537, %1541 : vector<8x128xf32>
    %c2_855 = arith.constant 2 : index
    %c0_856 = arith.constant 0 : index
    %c2_857 = arith.constant 2 : index
    %1543 = vector.load %arg8[%c2_855, %c0_856, %c2_857] : memref<12x8x256xf32, #tpu.memory_space<vmem>>, vector<1x8x128xf32>
    %1544 = vector.shape_cast %1543 : vector<1x8x128xf32> to vector<8x128xf32>
    %1545 = vector.broadcast %364 : f32 to vector<8x128xf32>
    %1546 = arith.mulf %1545, %1544 : vector<8x128xf32>
    %1547 = arith.addf %1542, %1546 : vector<8x128xf32>
    %c3_858 = arith.constant 3 : index
    %c0_859 = arith.constant 0 : index
    %c0_860 = arith.constant 0 : index
    %1548 = vector.load %arg8[%c3_858, %c0_859, %c0_860] : memref<12x8x256xf32, #tpu.memory_space<vmem>>, vector<1x8x128xf32>
    %1549 = vector.shape_cast %1548 : vector<1x8x128xf32> to vector<8x128xf32>
    %1550 = vector.broadcast %116 : f32 to vector<8x128xf32>
    %1551 = arith.mulf %1550, %1549 : vector<8x128xf32>
    %1552 = arith.addf %1547, %1551 : vector<8x128xf32>
    %c3_861 = arith.constant 3 : index
    %c0_862 = arith.constant 0 : index
    %c1_863 = arith.constant 1 : index
    %1553 = vector.load %arg8[%c3_861, %c0_862, %c1_863] : memref<12x8x256xf32, #tpu.memory_space<vmem>>, vector<1x8x128xf32>
    %1554 = vector.shape_cast %1553 : vector<1x8x128xf32> to vector<8x128xf32>
    %1555 = vector.broadcast %148 : f32 to vector<8x128xf32>
    %1556 = arith.mulf %1555, %1554 : vector<8x128xf32>
    %1557 = arith.addf %1552, %1556 : vector<8x128xf32>
    %c3_864 = arith.constant 3 : index
    %c0_865 = arith.constant 0 : index
    %c2_866 = arith.constant 2 : index
    %1558 = vector.load %arg8[%c3_864, %c0_865, %c2_866] : memref<12x8x256xf32, #tpu.memory_space<vmem>>, vector<1x8x128xf32>
    %1559 = vector.shape_cast %1558 : vector<1x8x128xf32> to vector<8x128xf32>
    %1560 = vector.broadcast %180 : f32 to vector<8x128xf32>
    %1561 = arith.mulf %1560, %1559 : vector<8x128xf32>
    %1562 = arith.addf %1557, %1561 : vector<8x128xf32>
    %c4_867 = arith.constant 4 : index
    %c0_868 = arith.constant 0 : index
    %c0_869 = arith.constant 0 : index
    %1563 = vector.load %arg8[%c4_867, %c0_868, %c0_869] : memref<12x8x256xf32, #tpu.memory_space<vmem>>, vector<1x8x128xf32>
    %1564 = vector.shape_cast %1563 : vector<1x8x128xf32> to vector<8x128xf32>
    %1565 = vector.broadcast %212 : f32 to vector<8x128xf32>
    %1566 = arith.mulf %1565, %1564 : vector<8x128xf32>
    %1567 = arith.addf %1562, %1566 : vector<8x128xf32>
    %c4_870 = arith.constant 4 : index
    %c0_871 = arith.constant 0 : index
    %c1_872 = arith.constant 1 : index
    %1568 = vector.load %arg8[%c4_870, %c0_871, %c1_872] : memref<12x8x256xf32, #tpu.memory_space<vmem>>, vector<1x8x128xf32>
    %1569 = vector.shape_cast %1568 : vector<1x8x128xf32> to vector<8x128xf32>
    %1570 = vector.broadcast %244 : f32 to vector<8x128xf32>
    %1571 = arith.mulf %1570, %1569 : vector<8x128xf32>
    %1572 = arith.addf %1567, %1571 : vector<8x128xf32>
    %c4_873 = arith.constant 4 : index
    %c0_874 = arith.constant 0 : index
    %c2_875 = arith.constant 2 : index
    %1573 = vector.load %arg8[%c4_873, %c0_874, %c2_875] : memref<12x8x256xf32, #tpu.memory_space<vmem>>, vector<1x8x128xf32>
    %1574 = vector.shape_cast %1573 : vector<1x8x128xf32> to vector<8x128xf32>
    %1575 = vector.broadcast %276 : f32 to vector<8x128xf32>
    %1576 = arith.mulf %1575, %1574 : vector<8x128xf32>
    %1577 = arith.addf %1572, %1576 : vector<8x128xf32>
    %c5_876 = arith.constant 5 : index
    %c0_877 = arith.constant 0 : index
    %c0_878 = arith.constant 0 : index
    %1578 = vector.load %arg8[%c5_876, %c0_877, %c0_878] : memref<12x8x256xf32, #tpu.memory_space<vmem>>, vector<1x8x128xf32>
    %1579 = vector.shape_cast %1578 : vector<1x8x128xf32> to vector<8x128xf32>
    %1580 = vector.broadcast %308 : f32 to vector<8x128xf32>
    %1581 = arith.mulf %1580, %1579 : vector<8x128xf32>
    %1582 = arith.addf %1577, %1581 : vector<8x128xf32>
    %c5_879 = arith.constant 5 : index
    %c0_880 = arith.constant 0 : index
    %c1_881 = arith.constant 1 : index
    %1583 = vector.load %arg8[%c5_879, %c0_880, %c1_881] : memref<12x8x256xf32, #tpu.memory_space<vmem>>, vector<1x8x128xf32>
    %1584 = vector.shape_cast %1583 : vector<1x8x128xf32> to vector<8x128xf32>
    %1585 = vector.broadcast %340 : f32 to vector<8x128xf32>
    %1586 = arith.mulf %1585, %1584 : vector<8x128xf32>
    %1587 = arith.addf %1582, %1586 : vector<8x128xf32>
    %c5_882 = arith.constant 5 : index
    %c0_883 = arith.constant 0 : index
    %c2_884 = arith.constant 2 : index
    %1588 = vector.load %arg8[%c5_882, %c0_883, %c2_884] : memref<12x8x256xf32, #tpu.memory_space<vmem>>, vector<1x8x128xf32>
    %1589 = vector.shape_cast %1588 : vector<1x8x128xf32> to vector<8x128xf32>
    %1590 = vector.broadcast %372 : f32 to vector<8x128xf32>
    %1591 = arith.mulf %1590, %1589 : vector<8x128xf32>
    %1592 = arith.addf %1587, %1591 : vector<8x128xf32>
    %c6_885 = arith.constant 6 : index
    %c0_886 = arith.constant 0 : index
    %c0_887 = arith.constant 0 : index
    %1593 = vector.load %arg8[%c6_885, %c0_886, %c0_887] : memref<12x8x256xf32, #tpu.memory_space<vmem>>, vector<1x8x128xf32>
    %1594 = vector.shape_cast %1593 : vector<1x8x128xf32> to vector<8x128xf32>
    %1595 = vector.broadcast %124 : f32 to vector<8x128xf32>
    %1596 = arith.mulf %1595, %1594 : vector<8x128xf32>
    %1597 = arith.addf %1592, %1596 : vector<8x128xf32>
    %c6_888 = arith.constant 6 : index
    %c0_889 = arith.constant 0 : index
    %c1_890 = arith.constant 1 : index
    %1598 = vector.load %arg8[%c6_888, %c0_889, %c1_890] : memref<12x8x256xf32, #tpu.memory_space<vmem>>, vector<1x8x128xf32>
    %1599 = vector.shape_cast %1598 : vector<1x8x128xf32> to vector<8x128xf32>
    %1600 = vector.broadcast %156 : f32 to vector<8x128xf32>
    %1601 = arith.mulf %1600, %1599 : vector<8x128xf32>
    %1602 = arith.addf %1597, %1601 : vector<8x128xf32>
    %c6_891 = arith.constant 6 : index
    %c0_892 = arith.constant 0 : index
    %c2_893 = arith.constant 2 : index
    %1603 = vector.load %arg8[%c6_891, %c0_892, %c2_893] : memref<12x8x256xf32, #tpu.memory_space<vmem>>, vector<1x8x128xf32>
    %1604 = vector.shape_cast %1603 : vector<1x8x128xf32> to vector<8x128xf32>
    %1605 = vector.broadcast %188 : f32 to vector<8x128xf32>
    %1606 = arith.mulf %1605, %1604 : vector<8x128xf32>
    %1607 = arith.addf %1602, %1606 : vector<8x128xf32>
    %c7_894 = arith.constant 7 : index
    %c0_895 = arith.constant 0 : index
    %c0_896 = arith.constant 0 : index
    %1608 = vector.load %arg8[%c7_894, %c0_895, %c0_896] : memref<12x8x256xf32, #tpu.memory_space<vmem>>, vector<1x8x128xf32>
    %1609 = vector.shape_cast %1608 : vector<1x8x128xf32> to vector<8x128xf32>
    %1610 = vector.broadcast %220 : f32 to vector<8x128xf32>
    %1611 = arith.mulf %1610, %1609 : vector<8x128xf32>
    %1612 = arith.addf %1607, %1611 : vector<8x128xf32>
    %c7_897 = arith.constant 7 : index
    %c0_898 = arith.constant 0 : index
    %c1_899 = arith.constant 1 : index
    %1613 = vector.load %arg8[%c7_897, %c0_898, %c1_899] : memref<12x8x256xf32, #tpu.memory_space<vmem>>, vector<1x8x128xf32>
    %1614 = vector.shape_cast %1613 : vector<1x8x128xf32> to vector<8x128xf32>
    %1615 = vector.broadcast %252 : f32 to vector<8x128xf32>
    %1616 = arith.mulf %1615, %1614 : vector<8x128xf32>
    %1617 = arith.addf %1612, %1616 : vector<8x128xf32>
    %c7_900 = arith.constant 7 : index
    %c0_901 = arith.constant 0 : index
    %c2_902 = arith.constant 2 : index
    %1618 = vector.load %arg8[%c7_900, %c0_901, %c2_902] : memref<12x8x256xf32, #tpu.memory_space<vmem>>, vector<1x8x128xf32>
    %1619 = vector.shape_cast %1618 : vector<1x8x128xf32> to vector<8x128xf32>
    %1620 = vector.broadcast %284 : f32 to vector<8x128xf32>
    %1621 = arith.mulf %1620, %1619 : vector<8x128xf32>
    %1622 = arith.addf %1617, %1621 : vector<8x128xf32>
    %c8_903 = arith.constant 8 : index
    %c0_904 = arith.constant 0 : index
    %c0_905 = arith.constant 0 : index
    %1623 = vector.load %arg8[%c8_903, %c0_904, %c0_905] : memref<12x8x256xf32, #tpu.memory_space<vmem>>, vector<1x8x128xf32>
    %1624 = vector.shape_cast %1623 : vector<1x8x128xf32> to vector<8x128xf32>
    %1625 = vector.broadcast %316 : f32 to vector<8x128xf32>
    %1626 = arith.mulf %1625, %1624 : vector<8x128xf32>
    %1627 = arith.addf %1622, %1626 : vector<8x128xf32>
    %c8_906 = arith.constant 8 : index
    %c0_907 = arith.constant 0 : index
    %c1_908 = arith.constant 1 : index
    %1628 = vector.load %arg8[%c8_906, %c0_907, %c1_908] : memref<12x8x256xf32, #tpu.memory_space<vmem>>, vector<1x8x128xf32>
    %1629 = vector.shape_cast %1628 : vector<1x8x128xf32> to vector<8x128xf32>
    %1630 = vector.broadcast %348 : f32 to vector<8x128xf32>
    %1631 = arith.mulf %1630, %1629 : vector<8x128xf32>
    %1632 = arith.addf %1627, %1631 : vector<8x128xf32>
    %c8_909 = arith.constant 8 : index
    %c0_910 = arith.constant 0 : index
    %c2_911 = arith.constant 2 : index
    %1633 = vector.load %arg8[%c8_909, %c0_910, %c2_911] : memref<12x8x256xf32, #tpu.memory_space<vmem>>, vector<1x8x128xf32>
    %1634 = vector.shape_cast %1633 : vector<1x8x128xf32> to vector<8x128xf32>
    %1635 = vector.broadcast %380 : f32 to vector<8x128xf32>
    %1636 = arith.mulf %1635, %1634 : vector<8x128xf32>
    %1637 = arith.addf %1632, %1636 : vector<8x128xf32>
    %c9_912 = arith.constant 9 : index
    %c0_913 = arith.constant 0 : index
    %c0_914 = arith.constant 0 : index
    %1638 = vector.load %arg8[%c9_912, %c0_913, %c0_914] : memref<12x8x256xf32, #tpu.memory_space<vmem>>, vector<1x8x128xf32>
    %1639 = vector.shape_cast %1638 : vector<1x8x128xf32> to vector<8x128xf32>
    %1640 = vector.broadcast %132 : f32 to vector<8x128xf32>
    %1641 = arith.mulf %1640, %1639 : vector<8x128xf32>
    %1642 = arith.addf %1637, %1641 : vector<8x128xf32>
    %c9_915 = arith.constant 9 : index
    %c0_916 = arith.constant 0 : index
    %c1_917 = arith.constant 1 : index
    %1643 = vector.load %arg8[%c9_915, %c0_916, %c1_917] : memref<12x8x256xf32, #tpu.memory_space<vmem>>, vector<1x8x128xf32>
    %1644 = vector.shape_cast %1643 : vector<1x8x128xf32> to vector<8x128xf32>
    %1645 = vector.broadcast %164 : f32 to vector<8x128xf32>
    %1646 = arith.mulf %1645, %1644 : vector<8x128xf32>
    %1647 = arith.addf %1642, %1646 : vector<8x128xf32>
    %c9_918 = arith.constant 9 : index
    %c0_919 = arith.constant 0 : index
    %c2_920 = arith.constant 2 : index
    %1648 = vector.load %arg8[%c9_918, %c0_919, %c2_920] : memref<12x8x256xf32, #tpu.memory_space<vmem>>, vector<1x8x128xf32>
    %1649 = vector.shape_cast %1648 : vector<1x8x128xf32> to vector<8x128xf32>
    %1650 = vector.broadcast %196 : f32 to vector<8x128xf32>
    %1651 = arith.mulf %1650, %1649 : vector<8x128xf32>
    %1652 = arith.addf %1647, %1651 : vector<8x128xf32>
    %c10_921 = arith.constant 10 : index
    %c0_922 = arith.constant 0 : index
    %c0_923 = arith.constant 0 : index
    %1653 = vector.load %arg8[%c10_921, %c0_922, %c0_923] : memref<12x8x256xf32, #tpu.memory_space<vmem>>, vector<1x8x128xf32>
    %1654 = vector.shape_cast %1653 : vector<1x8x128xf32> to vector<8x128xf32>
    %1655 = vector.broadcast %228 : f32 to vector<8x128xf32>
    %1656 = arith.mulf %1655, %1654 : vector<8x128xf32>
    %1657 = arith.addf %1652, %1656 : vector<8x128xf32>
    %c10_924 = arith.constant 10 : index
    %c0_925 = arith.constant 0 : index
    %c1_926 = arith.constant 1 : index
    %1658 = vector.load %arg8[%c10_924, %c0_925, %c1_926] : memref<12x8x256xf32, #tpu.memory_space<vmem>>, vector<1x8x128xf32>
    %1659 = vector.shape_cast %1658 : vector<1x8x128xf32> to vector<8x128xf32>
    %1660 = vector.broadcast %260 : f32 to vector<8x128xf32>
    %1661 = arith.mulf %1660, %1659 : vector<8x128xf32>
    %1662 = arith.addf %1657, %1661 : vector<8x128xf32>
    %c10_927 = arith.constant 10 : index
    %c0_928 = arith.constant 0 : index
    %c2_929 = arith.constant 2 : index
    %1663 = vector.load %arg8[%c10_927, %c0_928, %c2_929] : memref<12x8x256xf32, #tpu.memory_space<vmem>>, vector<1x8x128xf32>
    %1664 = vector.shape_cast %1663 : vector<1x8x128xf32> to vector<8x128xf32>
    %1665 = vector.broadcast %292 : f32 to vector<8x128xf32>
    %1666 = arith.mulf %1665, %1664 : vector<8x128xf32>
    %1667 = arith.addf %1662, %1666 : vector<8x128xf32>
    %c11_930 = arith.constant 11 : index
    %c0_931 = arith.constant 0 : index
    %c0_932 = arith.constant 0 : index
    %1668 = vector.load %arg8[%c11_930, %c0_931, %c0_932] : memref<12x8x256xf32, #tpu.memory_space<vmem>>, vector<1x8x128xf32>
    %1669 = vector.shape_cast %1668 : vector<1x8x128xf32> to vector<8x128xf32>
    %1670 = vector.broadcast %324 : f32 to vector<8x128xf32>
    %1671 = arith.mulf %1670, %1669 : vector<8x128xf32>
    %1672 = arith.addf %1667, %1671 : vector<8x128xf32>
    %c11_933 = arith.constant 11 : index
    %c0_934 = arith.constant 0 : index
    %c1_935 = arith.constant 1 : index
    %1673 = vector.load %arg8[%c11_933, %c0_934, %c1_935] : memref<12x8x256xf32, #tpu.memory_space<vmem>>, vector<1x8x128xf32>
    %1674 = vector.shape_cast %1673 : vector<1x8x128xf32> to vector<8x128xf32>
    %1675 = vector.broadcast %356 : f32 to vector<8x128xf32>
    %1676 = arith.mulf %1675, %1674 : vector<8x128xf32>
    %1677 = arith.addf %1672, %1676 : vector<8x128xf32>
    %c11_936 = arith.constant 11 : index
    %c0_937 = arith.constant 0 : index
    %c2_938 = arith.constant 2 : index
    %1678 = vector.load %arg8[%c11_936, %c0_937, %c2_938] : memref<12x8x256xf32, #tpu.memory_space<vmem>>, vector<1x8x128xf32>
    %1679 = vector.shape_cast %1678 : vector<1x8x128xf32> to vector<8x128xf32>
    %1680 = vector.broadcast %388 : f32 to vector<8x128xf32>
    %1681 = arith.mulf %1680, %1679 : vector<8x128xf32>
    %1682 = arith.addf %1677, %1681 : vector<8x128xf32>
    %c0_939 = arith.constant 0 : index
    %c6_940 = arith.constant 6 : index
    %c0_941 = arith.constant 0 : index
    %c0_942 = arith.constant 0 : index
    %1683 = vector.load %arg7[%c0_939, %c6_940, %c0_941, %c0_942] : memref<1x8x8x128xf32, #tpu.memory_space<vmem>>, vector<1x1x8x128xf32>
    %1684 = vector.shape_cast %1683 : vector<1x1x8x128xf32> to vector<8x128xf32>
    %1685 = vector.shape_cast %1682 : vector<8x128xf32> to vector<1x1x8x128xf32>
    tpu.vector_store %arg7[%c0_939, %c6_940, %c0_941, %c0_942], %1685 {strides = array<i32>} : memref<1x8x8x128xf32, #tpu.memory_space<vmem>>, vector<1x1x8x128xf32>,
    %1686 = vector.broadcast %397 : f32 to vector<8x128xf32>
    %c0_943 = arith.constant 0 : index
    %c0_944 = arith.constant 0 : index
    %c0_945 = arith.constant 0 : index
    %1687 = vector.load %arg8[%c0_943, %c0_944, %c0_945] : memref<12x8x256xf32, #tpu.memory_space<vmem>>, vector<1x8x128xf32>
    %1688 = vector.shape_cast %1687 : vector<1x8x128xf32> to vector<8x128xf32>
    %1689 = vector.broadcast %109 : f32 to vector<8x128xf32>
    %1690 = arith.mulf %1689, %1688 : vector<8x128xf32>
    %1691 = arith.addf %1686, %1690 : vector<8x128xf32>
    %c0_946 = arith.constant 0 : index
    %c0_947 = arith.constant 0 : index
    %c1_948 = arith.constant 1 : index
    %1692 = vector.load %arg8[%c0_946, %c0_947, %c1_948] : memref<12x8x256xf32, #tpu.memory_space<vmem>>, vector<1x8x128xf32>
    %1693 = vector.shape_cast %1692 : vector<1x8x128xf32> to vector<8x128xf32>
    %1694 = vector.broadcast %141 : f32 to vector<8x128xf32>
    %1695 = arith.mulf %1694, %1693 : vector<8x128xf32>
    %1696 = arith.addf %1691, %1695 : vector<8x128xf32>
    %c0_949 = arith.constant 0 : index
    %c0_950 = arith.constant 0 : index
    %c2_951 = arith.constant 2 : index
    %1697 = vector.load %arg8[%c0_949, %c0_950, %c2_951] : memref<12x8x256xf32, #tpu.memory_space<vmem>>, vector<1x8x128xf32>
    %1698 = vector.shape_cast %1697 : vector<1x8x128xf32> to vector<8x128xf32>
    %1699 = vector.broadcast %173 : f32 to vector<8x128xf32>
    %1700 = arith.mulf %1699, %1698 : vector<8x128xf32>
    %1701 = arith.addf %1696, %1700 : vector<8x128xf32>
    %c1_952 = arith.constant 1 : index
    %c0_953 = arith.constant 0 : index
    %c0_954 = arith.constant 0 : index
    %1702 = vector.load %arg8[%c1_952, %c0_953, %c0_954] : memref<12x8x256xf32, #tpu.memory_space<vmem>>, vector<1x8x128xf32>
    %1703 = vector.shape_cast %1702 : vector<1x8x128xf32> to vector<8x128xf32>
    %1704 = vector.broadcast %205 : f32 to vector<8x128xf32>
    %1705 = arith.mulf %1704, %1703 : vector<8x128xf32>
    %1706 = arith.addf %1701, %1705 : vector<8x128xf32>
    %c1_955 = arith.constant 1 : index
    %c0_956 = arith.constant 0 : index
    %c1_957 = arith.constant 1 : index
    %1707 = vector.load %arg8[%c1_955, %c0_956, %c1_957] : memref<12x8x256xf32, #tpu.memory_space<vmem>>, vector<1x8x128xf32>
    %1708 = vector.shape_cast %1707 : vector<1x8x128xf32> to vector<8x128xf32>
    %1709 = vector.broadcast %237 : f32 to vector<8x128xf32>
    %1710 = arith.mulf %1709, %1708 : vector<8x128xf32>
    %1711 = arith.addf %1706, %1710 : vector<8x128xf32>
    %c1_958 = arith.constant 1 : index
    %c0_959 = arith.constant 0 : index
    %c2_960 = arith.constant 2 : index
    %1712 = vector.load %arg8[%c1_958, %c0_959, %c2_960] : memref<12x8x256xf32, #tpu.memory_space<vmem>>, vector<1x8x128xf32>
    %1713 = vector.shape_cast %1712 : vector<1x8x128xf32> to vector<8x128xf32>
    %1714 = vector.broadcast %269 : f32 to vector<8x128xf32>
    %1715 = arith.mulf %1714, %1713 : vector<8x128xf32>
    %1716 = arith.addf %1711, %1715 : vector<8x128xf32>
    %c2_961 = arith.constant 2 : index
    %c0_962 = arith.constant 0 : index
    %c0_963 = arith.constant 0 : index
    %1717 = vector.load %arg8[%c2_961, %c0_962, %c0_963] : memref<12x8x256xf32, #tpu.memory_space<vmem>>, vector<1x8x128xf32>
    %1718 = vector.shape_cast %1717 : vector<1x8x128xf32> to vector<8x128xf32>
    %1719 = vector.broadcast %301 : f32 to vector<8x128xf32>
    %1720 = arith.mulf %1719, %1718 : vector<8x128xf32>
    %1721 = arith.addf %1716, %1720 : vector<8x128xf32>
    %c2_964 = arith.constant 2 : index
    %c0_965 = arith.constant 0 : index
    %c1_966 = arith.constant 1 : index
    %1722 = vector.load %arg8[%c2_964, %c0_965, %c1_966] : memref<12x8x256xf32, #tpu.memory_space<vmem>>, vector<1x8x128xf32>
    %1723 = vector.shape_cast %1722 : vector<1x8x128xf32> to vector<8x128xf32>
    %1724 = vector.broadcast %333 : f32 to vector<8x128xf32>
    %1725 = arith.mulf %1724, %1723 : vector<8x128xf32>
    %1726 = arith.addf %1721, %1725 : vector<8x128xf32>
    %c2_967 = arith.constant 2 : index
    %c0_968 = arith.constant 0 : index
    %c2_969 = arith.constant 2 : index
    %1727 = vector.load %arg8[%c2_967, %c0_968, %c2_969] : memref<12x8x256xf32, #tpu.memory_space<vmem>>, vector<1x8x128xf32>
    %1728 = vector.shape_cast %1727 : vector<1x8x128xf32> to vector<8x128xf32>
    %1729 = vector.broadcast %365 : f32 to vector<8x128xf32>
    %1730 = arith.mulf %1729, %1728 : vector<8x128xf32>
    %1731 = arith.addf %1726, %1730 : vector<8x128xf32>
    %c3_970 = arith.constant 3 : index
    %c0_971 = arith.constant 0 : index
    %c0_972 = arith.constant 0 : index
    %1732 = vector.load %arg8[%c3_970, %c0_971, %c0_972] : memref<12x8x256xf32, #tpu.memory_space<vmem>>, vector<1x8x128xf32>
    %1733 = vector.shape_cast %1732 : vector<1x8x128xf32> to vector<8x128xf32>
    %1734 = vector.broadcast %117 : f32 to vector<8x128xf32>
    %1735 = arith.mulf %1734, %1733 : vector<8x128xf32>
    %1736 = arith.addf %1731, %1735 : vector<8x128xf32>
    %c3_973 = arith.constant 3 : index
    %c0_974 = arith.constant 0 : index
    %c1_975 = arith.constant 1 : index
    %1737 = vector.load %arg8[%c3_973, %c0_974, %c1_975] : memref<12x8x256xf32, #tpu.memory_space<vmem>>, vector<1x8x128xf32>
    %1738 = vector.shape_cast %1737 : vector<1x8x128xf32> to vector<8x128xf32>
    %1739 = vector.broadcast %149 : f32 to vector<8x128xf32>
    %1740 = arith.mulf %1739, %1738 : vector<8x128xf32>
    %1741 = arith.addf %1736, %1740 : vector<8x128xf32>
    %c3_976 = arith.constant 3 : index
    %c0_977 = arith.constant 0 : index
    %c2_978 = arith.constant 2 : index
    %1742 = vector.load %arg8[%c3_976, %c0_977, %c2_978] : memref<12x8x256xf32, #tpu.memory_space<vmem>>, vector<1x8x128xf32>
    %1743 = vector.shape_cast %1742 : vector<1x8x128xf32> to vector<8x128xf32>
    %1744 = vector.broadcast %181 : f32 to vector<8x128xf32>
    %1745 = arith.mulf %1744, %1743 : vector<8x128xf32>
    %1746 = arith.addf %1741, %1745 : vector<8x128xf32>
    %c4_979 = arith.constant 4 : index
    %c0_980 = arith.constant 0 : index
    %c0_981 = arith.constant 0 : index
    %1747 = vector.load %arg8[%c4_979, %c0_980, %c0_981] : memref<12x8x256xf32, #tpu.memory_space<vmem>>, vector<1x8x128xf32>
    %1748 = vector.shape_cast %1747 : vector<1x8x128xf32> to vector<8x128xf32>
    %1749 = vector.broadcast %213 : f32 to vector<8x128xf32>
    %1750 = arith.mulf %1749, %1748 : vector<8x128xf32>
    %1751 = arith.addf %1746, %1750 : vector<8x128xf32>
    %c4_982 = arith.constant 4 : index
    %c0_983 = arith.constant 0 : index
    %c1_984 = arith.constant 1 : index
    %1752 = vector.load %arg8[%c4_982, %c0_983, %c1_984] : memref<12x8x256xf32, #tpu.memory_space<vmem>>, vector<1x8x128xf32>
    %1753 = vector.shape_cast %1752 : vector<1x8x128xf32> to vector<8x128xf32>
    %1754 = vector.broadcast %245 : f32 to vector<8x128xf32>
    %1755 = arith.mulf %1754, %1753 : vector<8x128xf32>
    %1756 = arith.addf %1751, %1755 : vector<8x128xf32>
    %c4_985 = arith.constant 4 : index
    %c0_986 = arith.constant 0 : index
    %c2_987 = arith.constant 2 : index
    %1757 = vector.load %arg8[%c4_985, %c0_986, %c2_987] : memref<12x8x256xf32, #tpu.memory_space<vmem>>, vector<1x8x128xf32>
    %1758 = vector.shape_cast %1757 : vector<1x8x128xf32> to vector<8x128xf32>
    %1759 = vector.broadcast %277 : f32 to vector<8x128xf32>
    %1760 = arith.mulf %1759, %1758 : vector<8x128xf32>
    %1761 = arith.addf %1756, %1760 : vector<8x128xf32>
    %c5_988 = arith.constant 5 : index
    %c0_989 = arith.constant 0 : index
    %c0_990 = arith.constant 0 : index
    %1762 = vector.load %arg8[%c5_988, %c0_989, %c0_990] : memref<12x8x256xf32, #tpu.memory_space<vmem>>, vector<1x8x128xf32>
    %1763 = vector.shape_cast %1762 : vector<1x8x128xf32> to vector<8x128xf32>
    %1764 = vector.broadcast %309 : f32 to vector<8x128xf32>
    %1765 = arith.mulf %1764, %1763 : vector<8x128xf32>
    %1766 = arith.addf %1761, %1765 : vector<8x128xf32>
    %c5_991 = arith.constant 5 : index
    %c0_992 = arith.constant 0 : index
    %c1_993 = arith.constant 1 : index
    %1767 = vector.load %arg8[%c5_991, %c0_992, %c1_993] : memref<12x8x256xf32, #tpu.memory_space<vmem>>, vector<1x8x128xf32>
    %1768 = vector.shape_cast %1767 : vector<1x8x128xf32> to vector<8x128xf32>
    %1769 = vector.broadcast %341 : f32 to vector<8x128xf32>
    %1770 = arith.mulf %1769, %1768 : vector<8x128xf32>
    %1771 = arith.addf %1766, %1770 : vector<8x128xf32>
    %c5_994 = arith.constant 5 : index
    %c0_995 = arith.constant 0 : index
    %c2_996 = arith.constant 2 : index
    %1772 = vector.load %arg8[%c5_994, %c0_995, %c2_996] : memref<12x8x256xf32, #tpu.memory_space<vmem>>, vector<1x8x128xf32>
    %1773 = vector.shape_cast %1772 : vector<1x8x128xf32> to vector<8x128xf32>
    %1774 = vector.broadcast %373 : f32 to vector<8x128xf32>
    %1775 = arith.mulf %1774, %1773 : vector<8x128xf32>
    %1776 = arith.addf %1771, %1775 : vector<8x128xf32>
    %c6_997 = arith.constant 6 : index
    %c0_998 = arith.constant 0 : index
    %c0_999 = arith.constant 0 : index
    %1777 = vector.load %arg8[%c6_997, %c0_998, %c0_999] : memref<12x8x256xf32, #tpu.memory_space<vmem>>, vector<1x8x128xf32>
    %1778 = vector.shape_cast %1777 : vector<1x8x128xf32> to vector<8x128xf32>
    %1779 = vector.broadcast %125 : f32 to vector<8x128xf32>
    %1780 = arith.mulf %1779, %1778 : vector<8x128xf32>
    %1781 = arith.addf %1776, %1780 : vector<8x128xf32>
    %c6_1000 = arith.constant 6 : index
    %c0_1001 = arith.constant 0 : index
    %c1_1002 = arith.constant 1 : index
    %1782 = vector.load %arg8[%c6_1000, %c0_1001, %c1_1002] : memref<12x8x256xf32, #tpu.memory_space<vmem>>, vector<1x8x128xf32>
    %1783 = vector.shape_cast %1782 : vector<1x8x128xf32> to vector<8x128xf32>
    %1784 = vector.broadcast %157 : f32 to vector<8x128xf32>
    %1785 = arith.mulf %1784, %1783 : vector<8x128xf32>
    %1786 = arith.addf %1781, %1785 : vector<8x128xf32>
    %c6_1003 = arith.constant 6 : index
    %c0_1004 = arith.constant 0 : index
    %c2_1005 = arith.constant 2 : index
    %1787 = vector.load %arg8[%c6_1003, %c0_1004, %c2_1005] : memref<12x8x256xf32, #tpu.memory_space<vmem>>, vector<1x8x128xf32>
    %1788 = vector.shape_cast %1787 : vector<1x8x128xf32> to vector<8x128xf32>
    %1789 = vector.broadcast %189 : f32 to vector<8x128xf32>
    %1790 = arith.mulf %1789, %1788 : vector<8x128xf32>
    %1791 = arith.addf %1786, %1790 : vector<8x128xf32>
    %c7_1006 = arith.constant 7 : index
    %c0_1007 = arith.constant 0 : index
    %c0_1008 = arith.constant 0 : index
    %1792 = vector.load %arg8[%c7_1006, %c0_1007, %c0_1008] : memref<12x8x256xf32, #tpu.memory_space<vmem>>, vector<1x8x128xf32>
    %1793 = vector.shape_cast %1792 : vector<1x8x128xf32> to vector<8x128xf32>
    %1794 = vector.broadcast %221 : f32 to vector<8x128xf32>
    %1795 = arith.mulf %1794, %1793 : vector<8x128xf32>
    %1796 = arith.addf %1791, %1795 : vector<8x128xf32>
    %c7_1009 = arith.constant 7 : index
    %c0_1010 = arith.constant 0 : index
    %c1_1011 = arith.constant 1 : index
    %1797 = vector.load %arg8[%c7_1009, %c0_1010, %c1_1011] : memref<12x8x256xf32, #tpu.memory_space<vmem>>, vector<1x8x128xf32>
    %1798 = vector.shape_cast %1797 : vector<1x8x128xf32> to vector<8x128xf32>
    %1799 = vector.broadcast %253 : f32 to vector<8x128xf32>
    %1800 = arith.mulf %1799, %1798 : vector<8x128xf32>
    %1801 = arith.addf %1796, %1800 : vector<8x128xf32>
    %c7_1012 = arith.constant 7 : index
    %c0_1013 = arith.constant 0 : index
    %c2_1014 = arith.constant 2 : index
    %1802 = vector.load %arg8[%c7_1012, %c0_1013, %c2_1014] : memref<12x8x256xf32, #tpu.memory_space<vmem>>, vector<1x8x128xf32>
    %1803 = vector.shape_cast %1802 : vector<1x8x128xf32> to vector<8x128xf32>
    %1804 = vector.broadcast %285 : f32 to vector<8x128xf32>
    %1805 = arith.mulf %1804, %1803 : vector<8x128xf32>
    %1806 = arith.addf %1801, %1805 : vector<8x128xf32>
    %c8_1015 = arith.constant 8 : index
    %c0_1016 = arith.constant 0 : index
    %c0_1017 = arith.constant 0 : index
    %1807 = vector.load %arg8[%c8_1015, %c0_1016, %c0_1017] : memref<12x8x256xf32, #tpu.memory_space<vmem>>, vector<1x8x128xf32>
    %1808 = vector.shape_cast %1807 : vector<1x8x128xf32> to vector<8x128xf32>
    %1809 = vector.broadcast %317 : f32 to vector<8x128xf32>
    %1810 = arith.mulf %1809, %1808 : vector<8x128xf32>
    %1811 = arith.addf %1806, %1810 : vector<8x128xf32>
    %c8_1018 = arith.constant 8 : index
    %c0_1019 = arith.constant 0 : index
    %c1_1020 = arith.constant 1 : index
    %1812 = vector.load %arg8[%c8_1018, %c0_1019, %c1_1020] : memref<12x8x256xf32, #tpu.memory_space<vmem>>, vector<1x8x128xf32>
    %1813 = vector.shape_cast %1812 : vector<1x8x128xf32> to vector<8x128xf32>
    %1814 = vector.broadcast %349 : f32 to vector<8x128xf32>
    %1815 = arith.mulf %1814, %1813 : vector<8x128xf32>
    %1816 = arith.addf %1811, %1815 : vector<8x128xf32>
    %c8_1021 = arith.constant 8 : index
    %c0_1022 = arith.constant 0 : index
    %c2_1023 = arith.constant 2 : index
    %1817 = vector.load %arg8[%c8_1021, %c0_1022, %c2_1023] : memref<12x8x256xf32, #tpu.memory_space<vmem>>, vector<1x8x128xf32>
    %1818 = vector.shape_cast %1817 : vector<1x8x128xf32> to vector<8x128xf32>
    %1819 = vector.broadcast %381 : f32 to vector<8x128xf32>
    %1820 = arith.mulf %1819, %1818 : vector<8x128xf32>
    %1821 = arith.addf %1816, %1820 : vector<8x128xf32>
    %c9_1024 = arith.constant 9 : index
    %c0_1025 = arith.constant 0 : index
    %c0_1026 = arith.constant 0 : index
    %1822 = vector.load %arg8[%c9_1024, %c0_1025, %c0_1026] : memref<12x8x256xf32, #tpu.memory_space<vmem>>, vector<1x8x128xf32>
    %1823 = vector.shape_cast %1822 : vector<1x8x128xf32> to vector<8x128xf32>
    %1824 = vector.broadcast %133 : f32 to vector<8x128xf32>
    %1825 = arith.mulf %1824, %1823 : vector<8x128xf32>
    %1826 = arith.addf %1821, %1825 : vector<8x128xf32>
    %c9_1027 = arith.constant 9 : index
    %c0_1028 = arith.constant 0 : index
    %c1_1029 = arith.constant 1 : index
    %1827 = vector.load %arg8[%c9_1027, %c0_1028, %c1_1029] : memref<12x8x256xf32, #tpu.memory_space<vmem>>, vector<1x8x128xf32>
    %1828 = vector.shape_cast %1827 : vector<1x8x128xf32> to vector<8x128xf32>
    %1829 = vector.broadcast %165 : f32 to vector<8x128xf32>
    %1830 = arith.mulf %1829, %1828 : vector<8x128xf32>
    %1831 = arith.addf %1826, %1830 : vector<8x128xf32>
    %c9_1030 = arith.constant 9 : index
    %c0_1031 = arith.constant 0 : index
    %c2_1032 = arith.constant 2 : index
    %1832 = vector.load %arg8[%c9_1030, %c0_1031, %c2_1032] : memref<12x8x256xf32, #tpu.memory_space<vmem>>, vector<1x8x128xf32>
    %1833 = vector.shape_cast %1832 : vector<1x8x128xf32> to vector<8x128xf32>
    %1834 = vector.broadcast %197 : f32 to vector<8x128xf32>
    %1835 = arith.mulf %1834, %1833 : vector<8x128xf32>
    %1836 = arith.addf %1831, %1835 : vector<8x128xf32>
    %c10_1033 = arith.constant 10 : index
    %c0_1034 = arith.constant 0 : index
    %c0_1035 = arith.constant 0 : index
    %1837 = vector.load %arg8[%c10_1033, %c0_1034, %c0_1035] : memref<12x8x256xf32, #tpu.memory_space<vmem>>, vector<1x8x128xf32>
    %1838 = vector.shape_cast %1837 : vector<1x8x128xf32> to vector<8x128xf32>
    %1839 = vector.broadcast %229 : f32 to vector<8x128xf32>
    %1840 = arith.mulf %1839, %1838 : vector<8x128xf32>
    %1841 = arith.addf %1836, %1840 : vector<8x128xf32>
    %c10_1036 = arith.constant 10 : index
    %c0_1037 = arith.constant 0 : index
    %c1_1038 = arith.constant 1 : index
    %1842 = vector.load %arg8[%c10_1036, %c0_1037, %c1_1038] : memref<12x8x256xf32, #tpu.memory_space<vmem>>, vector<1x8x128xf32>
    %1843 = vector.shape_cast %1842 : vector<1x8x128xf32> to vector<8x128xf32>
    %1844 = vector.broadcast %261 : f32 to vector<8x128xf32>
    %1845 = arith.mulf %1844, %1843 : vector<8x128xf32>
    %1846 = arith.addf %1841, %1845 : vector<8x128xf32>
    %c10_1039 = arith.constant 10 : index
    %c0_1040 = arith.constant 0 : index
    %c2_1041 = arith.constant 2 : index
    %1847 = vector.load %arg8[%c10_1039, %c0_1040, %c2_1041] : memref<12x8x256xf32, #tpu.memory_space<vmem>>, vector<1x8x128xf32>
    %1848 = vector.shape_cast %1847 : vector<1x8x128xf32> to vector<8x128xf32>
    %1849 = vector.broadcast %293 : f32 to vector<8x128xf32>
    %1850 = arith.mulf %1849, %1848 : vector<8x128xf32>
    %1851 = arith.addf %1846, %1850 : vector<8x128xf32>
    %c11_1042 = arith.constant 11 : index
    %c0_1043 = arith.constant 0 : index
    %c0_1044 = arith.constant 0 : index
    %1852 = vector.load %arg8[%c11_1042, %c0_1043, %c0_1044] : memref<12x8x256xf32, #tpu.memory_space<vmem>>, vector<1x8x128xf32>
    %1853 = vector.shape_cast %1852 : vector<1x8x128xf32> to vector<8x128xf32>
    %1854 = vector.broadcast %325 : f32 to vector<8x128xf32>
    %1855 = arith.mulf %1854, %1853 : vector<8x128xf32>
    %1856 = arith.addf %1851, %1855 : vector<8x128xf32>
    %c11_1045 = arith.constant 11 : index
    %c0_1046 = arith.constant 0 : index
    %c1_1047 = arith.constant 1 : index
    %1857 = vector.load %arg8[%c11_1045, %c0_1046, %c1_1047] : memref<12x8x256xf32, #tpu.memory_space<vmem>>, vector<1x8x128xf32>
    %1858 = vector.shape_cast %1857 : vector<1x8x128xf32> to vector<8x128xf32>
    %1859 = vector.broadcast %357 : f32 to vector<8x128xf32>
    %1860 = arith.mulf %1859, %1858 : vector<8x128xf32>
    %1861 = arith.addf %1856, %1860 : vector<8x128xf32>
    %c11_1048 = arith.constant 11 : index
    %c0_1049 = arith.constant 0 : index
    %c2_1050 = arith.constant 2 : index
    %1862 = vector.load %arg8[%c11_1048, %c0_1049, %c2_1050] : memref<12x8x256xf32, #tpu.memory_space<vmem>>, vector<1x8x128xf32>
    %1863 = vector.shape_cast %1862 : vector<1x8x128xf32> to vector<8x128xf32>
    %1864 = vector.broadcast %389 : f32 to vector<8x128xf32>
    %1865 = arith.mulf %1864, %1863 : vector<8x128xf32>
    %1866 = arith.addf %1861, %1865 : vector<8x128xf32>
    %c0_1051 = arith.constant 0 : index
    %c7_1052 = arith.constant 7 : index
    %c0_1053 = arith.constant 0 : index
    %c0_1054 = arith.constant 0 : index
    %1867 = vector.load %arg7[%c0_1051, %c7_1052, %c0_1053, %c0_1054] : memref<1x8x8x128xf32, #tpu.memory_space<vmem>>, vector<1x1x8x128xf32>
    %1868 = vector.shape_cast %1867 : vector<1x1x8x128xf32> to vector<8x128xf32>
    %1869 = vector.shape_cast %1866 : vector<8x128xf32> to vector<1x1x8x128xf32>
    tpu.vector_store %arg7[%c0_1051, %c7_1052, %c0_1053, %c0_1054], %1869 {strides = array<i32>} : memref<1x8x8x128xf32, #tpu.memory_space<vmem>>, vector<1x1x8x128xf32>,
    return
  }
  func.func @transform_0(%arg0: i32, %arg1: i32) -> (i32, i32, i32, i32) {
    %c0_i32 = arith.constant 0 : i32
    %c0_i32_0 = arith.constant 0 : i32
    %c0_i32_1 = arith.constant 0 : i32
    return %arg0, %c0_i32, %arg1, %c0_i32_0 : i32, i32, i32, i32
  }
  func.func @transform_1(%arg0: i32, %arg1: i32) -> (i32, i32, i32, i32, i32) {
    %c0_i32 = arith.constant 0 : i32
    %c0_i32_0 = arith.constant 0 : i32
    %c0_i32_1 = arith.constant 0 : i32
    %c0_i32_2 = arith.constant 0 : i32
    return %arg0, %arg1, %c0_i32, %c0_i32_0, %c0_i32_1 : i32, i32, i32, i32, i32
  }
  func.func @transform_2(%arg0: i32, %arg1: i32) -> (i32, i32, i32, i32, i32) {
    %c0_i32 = arith.constant 0 : i32
    %c0_i32_0 = arith.constant 0 : i32
    %c0_i32_1 = arith.constant 0 : i32
    %c0_i32_2 = arith.constant 0 : i32
    return %arg0, %arg1, %c0_i32, %c0_i32_0, %c0_i32_1 : i32, i32, i32, i32, i32
  }
  func.func @transform_3(%arg0: i32, %arg1: i32) -> i32 {
    %c0_i32 = arith.constant 0 : i32
    %c0_i32_0 = arith.constant 0 : i32
    return %c0_i32 : i32
  }
  func.func @transform_4(%arg0: i32, %arg1: i32) -> i32 {
    %c0_i32 = arith.constant 0 : i32
    %c0_i32_0 = arith.constant 0 : i32
    return %c0_i32 : i32
  }
  func.func @transform_5(%arg0: i32, %arg1: i32) -> (i32, i32, i32, i32) {
    %c0_i32 = arith.constant 0 : i32
    %c0_i32_0 = arith.constant 0 : i32
    %c0_i32_1 = arith.constant 0 : i32
    return %arg0, %c0_i32, %arg1, %c0_i32_0 : i32, i32, i32, i32
  }
}

</mosaic_0001>

<bundles_post_ra>
// kernel: _seqconv_impl.1
= control target key start
LH: loop header
LB: loop body
LE: loop exit
PB: predicated region body
PF: predicated region fallthrough
CT: control target
= control target key end

     0   :  { %s6434_s0 = inlined_call_operand.vmem [shape: f32[2,4,16,128], index: 0, kind: input, shape index: {}]   ;;  %s6435_s1 = inlined_call_operand.vmem [shape: f32[2,2,4,1,128], index: 1, kind: input, shape index: {}]   ;;  %s6436_s2 = inlined_call_operand.vmem [shape: f32[2,2,4,1,128], index: 2, kind: input, shape index: {}]   ;;  %s6437_s3 = inlined_call_operand.vmem [shape: f32[288], index: 3, kind: input, shape index: {}]   ;;  %s6438_s4 = inlined_call_operand.vmem [shape: f32[8], index: 4, kind: input, shape index: {}]   ;;  %s6439_s5 = inlined_call_operand.hbm [shape: f32[2,8,16,128], index: 5, kind: output, shape index: {}]  }
   0x1   :  { %6445 = sst [smem:[#allocation14_spill]] %s6434_s0 }
   0x2   :  { %6446 = sst [smem:[#allocation15_spill]] %s6437_s3 }
   0x3   :  { %6447 = sst [smem:[#allocation16_spill]] %s6438_s4 }
   0x4   :  { %10 = vsyncpa [#allocation6], 0 }
   0x5   :  { %11 = vsyncpa [#allocation8], 0 }
   0x6   :  { %12 = vsyncpa [#allocation5], 0 }
   0x7   :  { %14 = vsyncpa [#allocation5 + $0x1], 0  ;;  %s4376_s18 = smov 0   ;;  %s4378_s19 = smov 0  }
   0x8   :  { %s4380_s20 = smov 0   ;;  %s4382_s21 = smov 0  }
   0x9   :  { %s4384_s22 = smov 0   ;;  %s4386_s23 = smov 0  }
   0xa   :  { %s4388_s24 = smov 0   ;;  %s4390_s25 = smov 0  }
   0xb LB: > { %s3721_s26 = sadd.s32 4294967295, %s4335_s25   ;;  %s3722_s27 = sadd.s32 4294967294, %s4335_s25   ;;  %s4335_s25 = sphi %s4390_s25, %s20_s25   ;;  %s4331_s24 = sphi %s4388_s24, %s6470_s24   ;;  %s4327_s23 = sphi %s4386_s23, %s6469_s23   ;;  %s4323_s22 = sphi %s4384_s22, %s6468_s22   ;;  %s4319_s21 = sphi %s4382_s21, %s6467_s21   ;;  %s4315_s20 = sphi %s4380_s20, %s6466_s20   ;;  %s4311_s19 = sphi %s4378_s19, %s6465_s19   ;;  %s4307_s18 = sphi %s4376_s18, %s6464_s18  }
   0xc   : > { %s29_s28 = sadd.s32 1, %s4327_s23  ;;  %s32_s29 = sadd.s32 1, %s4331_s24 }
   0xd   : > { %p30_p0 = scmp.ge.s32.totalorder %s29_s28, 2  ;;  %s41_s30 = sadd.s32 1, %s4315_s20 }
   0xe   : > { %p48_p1 = scmp.ne.s32.totalorder %s4315_s20, %s4311_s19  ;;  %p49_p2 = scmp.eq.s32.totalorder %s4335_s25, 0 }
   0xf   : > { %s6472_s28 = smov (%p30_p0, %s29_s28), 0  ;;  %s6474_s29 = smov (!%p30_p0, %s32_s29), %s4331_s24 }
  0x10   : > { %s37_s6 = ssub.s32 %s4327_s23, %s6472_s28  ;;  %p4429_p3 = por %p49_p2, %p48_p1 }
  0x11   : > { %p34_p4 = scmp.ge.s32.totalorder %s6474_s29, 2  ;;  %p178_p5 = scmp.eq.s32.totalorder %s3721_s26, 3 }
  0x12   : > { %s6448_s7 = scalar_select %p4429_p3, 1, 0 }
  0x13   : > { %p183_p6 = scmp.ne.s32.totalorder %s4311_s19, %s4307_s18  ;;  %p184_p7 = scmp.eq.s32.totalorder %s3722_s27, 3 }
  0x14   : > { %s6476_s29 = smov (%p34_p4, %s6474_s29), 0  ;;  %p4437_p8 = por %p178_p5, %p48_p1 }
  0x15   : > { %6449 = sst [smem:[#allocation13_spill]] %s6476_s29  ;;  %p4441_p9 = por %p184_p7, %p183_p6 }
  0x16   : > { %s6450_s8 = scalar_select %p4437_p8, 1, 0 }
  0x17   : > { %s6451_s9 = scalar_select %p4441_p9, 1, 0 }
  0x18   : > { %s36_s10 = ssub.s32 %s4331_s24, %s6476_s29  ;;  %p3723_p10 = scmp.ge.s32.totalorder %s4335_s25, 1 }
  0x19   : > { %s38_s11 = sor.u32 %s37_s6, %s36_s10  ;;  %p191_p11 = scmp.lt.s32.totalorder %s4335_s25, 5 }
  0x1a   : > { %p39_p12 = scmp.eq.s32.totalorder %s38_s11, 0  ;;  %p4453_p0 = scmp.eq.s32.totalorder %s3721_s26, 0 }
  0x1b   : > { %p4449_p13 = pnand %p3723_p10, %p191_p11  ;;  %s6454_s3 = sld [smem:[#allocation15_spill]] }
  0x1c   : > { %s6453_s13 = scalar_select %p4453_p0, 1, 0 }
  0x1d   : > { %s6452_s12 = scalar_select %p4449_p13, 1, 0 }
  0x1e   : > { %s4458_s14 = scalar_select %p39_p12, %s4315_s20, %s41_s30  }
  0x1f   : > { %p4070_p1 = pneg %p4449_p13  ;;  %s6456_s4 = sld [smem:[#allocation16_spill]] }
  0x21   : > { %s204_s17 = sshll.u32 %s6454_s3, 4  ;;  %p4467_p2 = pnand %p4453_p0, %p4070_p1  ;;  %s205_s17 = int_to_ptr.vmem [resolvable:$true] %s204_s17 }
  0x22   : > { %s4203_s30 = scalar_lea.vmem %s205_s17, 48  ;;  %s4210_s11 = scalar_lea.vmem %s205_s17, 64 }
  0x23   : > { %p4204_p4 = scmp.ne.s32.totalorder %s205_s17, %s4203_s30  ;;  %p4205_p5 = pneg %p4467_p2 }
  0x24   : > { %p4211_p10 = scmp.lt.s32.totalorder %s205_s17, %s205_s17  ;;  %p4212_p11 = scmp.lt.s32.totalorder %s4210_s11, %s4203_s30 }
  0x25   : > { %s215_s10 = sshll.u32 %s6456_s4, 4  ;;  %p4206_p6 = pnand %p4205_p5, %p4204_p4  ;;  %s216_s10 = int_to_ptr.vmem [resolvable:$true] %s215_s10 }
  0x26   : > { %p4213_p12 = por %p4212_p11, %p4211_p10 }
  0x27   : > { %p4207_p7 = pneg %p4206_p6 }
  0x29   : > { %p4214_p1 = pnand %p4213_p12, %p4207_p7 }
  0x2b   : > { %4217 = shalt.err (!%p4214_p1)
}
  0x2c   : > { %s4337_s15 = smov [#allocation4]   ;;  %s4218_s16 = scalar_lea.vmem %s216_s10, 16 }
  0x2d   : > { %4073 = dma.vmem_to_smem (!%p4467_p2), %s205_s17, 48, %s4337_s15, [#allocation6]  }
  0x2e   : > { %p4219_p9 = scmp.ne.s32.totalorder %s216_s10, %s4218_s16  ;;  %p4226_p13 = scmp.lt.s32.totalorder %s216_s10, %s216_s10 }
  0x2f   : > { %p4227_p4 = scmp.lt.s32.totalorder %s4218_s16, %s4218_s16 }
  0x30   : > { %p4221_p8 = pnand %p4219_p9, %p4205_p5 }
  0x31   : > { %p4228_p6 = por %p4227_p4, %p4226_p13 }
  0x32   : > { %p4222_p0 = pneg %p4221_p8 }
  0x34   : > { %p4229_p3 = pnand %p4228_p6, %p4222_p0 }
  0x36   : > { %4232 = shalt.err (!%p4229_p3)
}
  0x37   : > { %s4338_s6 = smov [#allocation7]   ;;  %p3726_p7 = scmp.ge.s32.totalorder %s4335_s25, 4 }
  0x38   : > { %4076 = dma.vmem_to_smem (!%p4467_p2), %s216_s10, 16, %s4338_s6, [#allocation8]  }
  0x39   : > { %222 = sbr.rel (%p3726_p7) target bundleno = 76 (0x4c), region = 24  ;;  %p6457_p10 = scmp.ne.s32.totalorder (!%p3726_p7), %s6448_s7, 0 }
  0x40   : > { %225 = sbr.rel (!%p6457_p10) target bundleno = 76 (0x4c), region = 28  ;;  %s227_s17 = sand.u32 (%p6457_p10), 1, %s4315_s20  }
  0x41   : > { %s3728_s26 = sshll.u32 (%p6457_p10), %s4331_s24, 3  ;;  %s3727_s30 = sshll.u32 (%p6457_p10), %s227_s17, 5 }
  0x42   : > { %s231_s11 = sadd.s32 (%p6457_p10), %s4327_s23, %s3728_s26  ;;  %s6458_s0 = sld [smem:[#allocation14_spill]] (%p6457_p10) }
  0x43   : > { %s3729_s15 = sshll.u32 (%p6457_p10), %s231_s11, 3  ;;  %s229_s27 = scalar_lea.vmem (%p6457_p10), [#allocation3], %s3727_s30 }
  0x48   : > { %s233_s4 = scalar_lea.vmem %s6458_s0, %s3729_s15 }
  0x49   : > { %v267_v0 = vld [vmem:[%s233_s4] sm:$0xff]  ;;  %v269_v1 = vld [vmem:[%s233_s4 + $0x10] sm:$0xff] }
  0x4a   : > { %v271_v2 = vld [vmem:[%s233_s4 + $0x20] sm:$0xff]  ;;  %268 = vst [vmem:[%s229_s27] sm:$0xff] %v267_v0  ;;  %270 = vst [vmem:[%s229_s27 + $0x8] sm:$0xff] %v269_v1  ;;  %v273_v3 = vld [vmem:[%s233_s4 + $0x30] sm:$0xff] }
  0x4b   : > { %272 = vst [vmem:[%s229_s27 + $0x10] sm:$0xff] %v271_v2  ;;  %274 = vst [vmem:[%s229_s27 + $0x18] sm:$0xff] %v273_v3 }
  0x4c PF: > { %p6459_p3 = scmp.ne.s32.totalorder %s6452_s12, 0 }
  0x4d   : > { %s4498_s7 = sand.u32 (!%p6459_p3), 1, %s4311_s19   ;;  %p6460_p8 = scmp.ne.s32.totalorder (!%p6459_p3), %s6453_s13, 0 }
  0x4e   : > { %305 = sbr.rel (%p6459_p3) target bundleno = 1000 (0x3e8), region = 74  ;;  %s3731_s3 = sshll.u32 (!%p6459_p3), %s4498_s7, 5 }
  0x4f   : > { %s4501_s10 = scalar_lea.vmem (!%p6459_p3), [#allocation3], %s3731_s3 }
  0x55   : > { %4294 = dma.done.wait (%p6460_p8), [#allocation6], 48  }
  0x56   : > { %4296 = vsyncadd (%p6460_p8), [#allocation6], 4294967248 }
  0x57   : > { %4298 = dma.done.wait (%p6460_p8), [#allocation8], 16  }
  0x58   : > { %4300 = vsyncadd (%p6460_p8), [#allocation8], 4294967280 }
  0x59   : > { %322 = sfence }
  0x5a   : > { %v393_v4 = vld [vmem:[%s4501_s10] sm:$0x7f]  ;;  %s4512_s4 = sld [smem:[#allocation4 + $0x40]]  ;;  %v4339_v5 = vmov 0.0   ;;  %p360_p9 = scmp.lt.s32.totalorder %s4323_s22, 1  ;;  %v4525_v10 = vld [vmem:[%s4501_s10 + $0x8] sm:$0xff] }
  0x5b   : > { %376 = vst [vmem:[#allocation2 + $0x8] sm:$0xff] %v4339_v5  ;;  %v395_v6 = vrot.slane %v393_v4, 7  ;;  %p362_p13 = scmp.lt.s32.totalorder %s4319_s21, 1  ;;  %v4517_v7 = vld [vmem:[%s4501_s10] sm:$0xff]  ;;  %s4520_s12 = sld [smem:[#allocation4 + $0x20]]  ;;  %406 = vst [vmem:[#allocation2 + $0x40] sm:$0xff] %v4525_v10 }
  0x5c   : > { %v398_v8 = vld [vmem:[%s4501_s10 + $0x1] sm:$0x7f]  ;;  %390 = vst [vmem:[#allocation2 + $0x10] sm:$0xff] %v4517_v7  ;;  %v3741_v9 = vld [vmem:[%s4501_s10 + $0x8] sm:$0x7f]  ;;  %s361_s13 = scalar_select %p360_p9, %s4323_s22, 1 }
  0x5d   : > { %400 = vst [vmem:[#allocation2 + $0x20] sm:$0x7f] %v398_v8  ;;  %397 = vst [vmem:[#allocation2] sm:$0xfe] %v395_v6  ;;  %v413_v11 = vrot.slane %v3741_v9, 7  ;;  %s363_s6 = scalar_select %p362_p13, %s4319_s21, 1 }
  0x5e   : > { %v3742_v12 = vld [vmem:[%s4501_s10 + $0x9] sm:$0x7f]  ;;  %v3746_v13 = vld [vmem:[%s4501_s10 + $0x10] sm:$0x7f]  ;;  %v4539_v17 = vld [vmem:[%s4501_s10 + $0x18] sm:$0xff]  ;;  %s3736_s17 = sshll.u32 %s361_s13, 3 }
  0x5f   : > { %418 = vst [vmem:[#allocation2 + $0x50] sm:$0x7f] %v3742_v12  ;;  %v432_v14 = vrot.slane %v3746_v13, 7  ;;  %v4535_v15 = vld [vmem:[%s4501_s10 + $0x10] sm:$0xff]  ;;  %s4541_s26 = sld [smem:[#allocation4 + $0x80]]  ;;  %444 = vst [vmem:[#allocation2 + $0xa0] sm:$0xff] %v4539_v17 }
  0x60   : > { %v3747_v16 = vld [vmem:[%s4501_s10 + $0x11] sm:$0x7f]  ;;  %415 = vst [vmem:[#allocation2 + $0x30] sm:$0xfe] %v413_v11  ;;  %425 = vst [vmem:[#allocation2 + $0x70] sm:$0xff] %v4535_v15  ;;  %v775_v19 = vstv %s4512_s4  ;;  %s3735_s30 = sshll.u32 %s363_s6, 2 }
  0x61   : > { %437 = vst [vmem:[#allocation2 + $0x80] sm:$0x7f] %v3747_v16  ;;  %v3751_v18 = vld [vmem:[%s4501_s10 + $0x18] sm:$0x7f]  ;;  %s4547_s11 = sld [smem:[#allocation4 + $0xa0]]  ;;  %v777_v22 = vmul.f32 0.0, %v775_v19  ;;  %s366_s15 = sadd.s32 %s3736_s17, %s3735_s30  ;;  %v762_v23 = vstv %s4520_s12 }
  0x62   : > { %434 = vst [vmem:[#allocation2 + $0x60] sm:$0xfe] %v432_v14  ;;  %v451_v20 = vrot.slane %v3751_v18, 7  ;;  %v3752_v21 = vld [vmem:[%s4501_s10 + $0x19] sm:$0x7f]  ;;  %s4550_s16 = sld [smem:[#allocation4 + $0xe0]]  ;;  %s367_s13 = scalar_lea.vmem %s6435_s1, %s366_s15 }
  0x63   : > { %456 = vst [vmem:[#allocation2 + $0xb0] sm:$0x7f] %v3752_v21  ;;  %s4559_s4 = scalar_lea.vmem %s6436_s2, %s366_s15  ;;  %s4340_s10 = smov 126   ;;  %v391_v24 = vld [vmem:[%s367_s13] sm:$0x1]  ;;  %v764_v25 = vmul.f32 0.0, %v762_v23 }
  0x64   : > { %453 = vst [vmem:[#allocation2 + $0x90] sm:$0xfe] %v451_v20  ;;  %782 = vrot.lane.b32.xlu1 %v777_v22, %s4340_s10  ;;  %v401_v26 = vld [vmem:[%s4559_s4] sm:$0x1]  ;;  %392 = vst [vmem:[#allocation2] sm:$0x1] %v391_v24 }
  0x65   : > { %402 = vst [vmem:[#allocation2 + $0x27] sm:$0x1] %v401_v26  ;;  %v3740_v27 = vld [vmem:[%s367_s13 + $0x1] sm:$0x1]  ;;  %s4341_s12 = smov 127   ;;  %v793_v28 = vstv %s4541_s26  ;;  %s4009_s0 = sld [smem:[#allocation4 + $0x100]] }
  0x66   : > { %769 = vrot.lane.b32.xlu0 %v764_v25, %s4341_s12  ;;  %410 = vst [vmem:[#allocation2 + $0x30] sm:$0x1] %v3740_v27  ;;  %v3743_v29 = vld [vmem:[%s4559_s4 + $0x1] sm:$0x1]  ;;  %v795_v30 = vmul.f32 0.0, %v793_v28  ;;  %v794_v31 = vmul.f32 %v793_v28, %v4517_v7  ;;  %s3793_s29 = sld [smem:[#allocation4 + $0x28]] }
  0x67   : > { %v805_v32 = vstv %s4547_s11  ;;  %421 = vst [vmem:[#allocation2 + $0x57] sm:$0x1] %v3743_v29  ;;  %v3745_v33 = vld [vmem:[%s367_s13 + $0x2] sm:$0x1]  ;;  %v3750_v36 = vld [vmem:[%s367_s13 + $0x3] sm:$0x1] }
  0x68   : > { %429 = vst [vmem:[#allocation2 + $0x60] sm:$0x1] %v3745_v33  ;;  %v3748_v34 = vld [vmem:[%s4559_s4 + $0x2] sm:$0x1]  ;;  %800 = vrot.lane.b32.xlu1 %v795_v30, %s4341_s12  ;;  %v807_v35 = vmul.f32 0.0, %v805_v32  ;;  %v806_v37 = vmul.f32 %v805_v32, %v4517_v7  ;;  %v822_v38 = vstv %s4550_s16  ;;  %s3825_s6 = sld [smem:[#allocation4 + $0x48]] }
  0x69   : > { %440 = vst [vmem:[#allocation2 + $0x87] sm:$0x1] %v3748_v34  ;;  %448 = vst [vmem:[#allocation2 + $0x90] sm:$0x1] %v3750_v36  ;;  %v3753_v39 = vld [vmem:[%s4559_s4 + $0x3] sm:$0x1] }
  0x6a   : > { %798 = vrot.lane.b32.xlu0 %v794_v31, %s4341_s12  ;;  %459 = vst [vmem:[#allocation2 + $0xb7] sm:$0x1] %v3753_v39  ;;  %v824_v41 = vmul.f32 0.0, %v822_v38  ;;  %s3889_s17 = sld [smem:[#allocation4 + $0x88]]  ;;  %vm771_vm0 = vcmask 1039360   ;;  %vm784_vm1 = vcmask 1031168  }
  0x6b   : > { %v4574_v40 = vld [vmem:[#allocation2] sm:$0xff]  ;;  %v834_v46 = vstv %s4009_s0  ;;  %s3921_s26 = sld [smem:[#allocation4 + $0xa8]]  ;;  %p6461_p2 = scmp.ne.s32.totalorder %s6450_s8, 0 }
  0x6c   : > { %812 = vrot.lane.b32.xlu1 %v807_v35, %s4340_s10  ;;  %v763_v42 = vmul.f32 %v762_v23, %v4574_v40  ;;  %v4579_v43 = vld [vmem:[#allocation2 + $0x20] sm:$0xff]  ;;  %v776_v44 = vmul.f32 %v775_v19, %v4574_v40  ;;  %v836_v47 = vmul.f32 0.0, %v834_v46  ;;  %v851_v49 = vstv %s3793_s29  ;;  %s3985_s30 = sld [smem:[#allocation4 + $0xe8]] }
  0x6d   : > { %v823_v45 = vmul.f32 %v822_v38, %v4579_v43  ;;  %v835_v48 = vmul.f32 %v834_v46, %v4579_v43  ;;  %v4588_v50 = vld [vmem:[#allocation2 + $0x30] sm:$0xff]  ;;  %v853_v51 = vmul.f32 0.0, %v851_v49  ;;  %s4017_s11 = sld [smem:[#allocation4 + $0x108]] }
  0x6e   : > { %810 = vrot.lane.b32.xlu0 %v806_v37, %s4340_s10  ;;  %v852_v52 = vmul.f32 %v851_v49, %v4588_v50  ;;  %v863_v53 = vstv %s3825_s6  ;;  %s3801_s15 = sld [smem:[#allocation4 + $0x30]]  ;;  %v4602_v63 = vld [vmem:[#allocation2 + $0x50] sm:$0xff] }
  0x6f   : > { %v865_v54 = vmul.f32 0.0, %v863_v53  ;;  %v864_v55 = vmul.f32 %v863_v53, %v4588_v50  ;;  %s3833_s16 = sld [smem:[#allocation4 + $0x50]]  ;;  %v4610_v6 = vld [vmem:[#allocation2 + $0x60] sm:$0xff] }
  0x70   : > { %829 = vrot.lane.b32.xlu1 %v824_v41, %s4341_s12  ;;  %v880_v56 = vstv %s3889_s17  ;;  %s3897_s27 = sld [smem:[#allocation4 + $0x90]]  ;;  %v4624_v23 = vld [vmem:[#allocation2 + $0x80] sm:$0xff]  ;;  %v4632_v30 = vld [vmem:[#allocation2 + $0x90] sm:$0xff] }
  0x71   : > { %v882_v57 = vmul.f32 0.0, %v880_v56  ;;  %v881_v58 = vmul.f32 %v4525_v10, %v880_v56  ;;  %v892_v59 = vstv %s3921_s26  ;;  %s3929_s3 = sld [smem:[#allocation4 + $0xb0]] }
  0x72   : > { %767 = vrot.lane.b32.xlu0 %v763_v42, %s4341_s12  ;;  %v894_v60 = vmul.f32 0.0, %v892_v59  ;;  %v893_v61 = vmul.f32 %v4525_v10, %v892_v59  ;;  %v909_v62 = vstv %s3985_s30  ;;  %s3993_s13 = sld [smem:[#allocation4 + $0xf0]] }
  0x73   : > { %v911_v0 = vmul.f32 0.0, %v909_v62  ;;  %v910_v1 = vmul.f32 %v909_v62, %v4602_v63  ;;  %v921_v2 = vstv %s4017_s11  ;;  %s4025_s4 = sld [smem:[#allocation4 + $0x110]]  ;;  %s3786_s11 = sld [smem:[#allocation4 + $0x21]] }
  0x74   : > { %780 = vrot.lane.b32.xlu1 %v776_v44, %s4340_s10  ;;  %v923_v3 = vmul.f32 0.0, %v921_v2  ;;  %v922_v4 = vmul.f32 %v921_v2, %v4602_v63  ;;  %v938_v5 = vstv %s3801_s15  ;;  %s3809_s0 = sld [smem:[#allocation4 + $0x38]]  ;;  %s3818_s15 = sld [smem:[#allocation4 + $0x41]] }
  0x75   : > { %v940_v8 = vmul.f32 0.0, %v938_v5  ;;  %v939_v9 = vmul.f32 %v938_v5, %v4610_v6  ;;  %v950_v11 = vstv %s3833_s16  ;;  %s3841_s29 = sld [smem:[#allocation4 + $0x58]]  ;;  %s3882_s16 = sld [smem:[#allocation4 + $0x81]] }
  0x76   : > { %827 = vrot.lane.b32.xlu0 %v823_v45, %s4341_s12  ;;  %v952_v12 = vmul.f32 0.0, %v950_v11  ;;  %v951_v13 = vmul.f32 %v950_v11, %v4610_v6  ;;  %v967_v14 = vstv %s3897_s27  ;;  %s3905_s6 = sld [smem:[#allocation4 + $0x98]]  ;;  %v4646_v45 = vld [vmem:[#allocation2 + $0xb0] sm:$0xff]  ;;  %s3914_s27 = sld [smem:[#allocation4 + $0xa1]] }
  0x77   : > { %v969_v16 = vmul.f32 0.0, %v967_v14  ;;  %v968_v18 = vmul.f32 %v4535_v15, %v967_v14  ;;  %v979_v19 = vstv %s3929_s3  ;;  %s3937_s17 = sld [smem:[#allocation4 + $0xb8]]  ;;  %s3978_s3 = sld [smem:[#allocation4 + $0xe1]] }
  0x78   : > { %841 = vrot.lane.b32.xlu1 %v836_v47, %s4340_s10  ;;  %v981_v20 = vmul.f32 0.0, %v979_v19  ;;  %v980_v21 = vmul.f32 %v4535_v15, %v979_v19  ;;  %v996_v22 = vstv %s3993_s13  ;;  %s4001_s26 = sld [smem:[#allocation4 + $0xf8]]  ;;  %s4010_s13 = sld [smem:[#allocation4 + $0x101]] }
  0x79   : > { %v998_v24 = vmul.f32 0.0, %v996_v22  ;;  %v997_v25 = vmul.f32 %v996_v22, %v4624_v23  ;;  %v1008_v26 = vstv %s4025_s4  ;;  %s4033_s30 = sld [smem:[#allocation4 + $0x118]]  ;;  %s3794_s4 = sld [smem:[#allocation4 + $0x29]] }
  0x7a   : > { %839 = vrot.lane.b32.xlu0 %v835_v48, %s4340_s10  ;;  %v1010_v27 = vmul.f32 0.0, %v1008_v26  ;;  %v1009_v28 = vmul.f32 %v1008_v26, %v4624_v23  ;;  %v1025_v29 = vstv %s3809_s0  ;;  %s3826_s0 = sld [smem:[#allocation4 + $0x49]] }
  0x7b   : > { %v1027_v31 = vmul.f32 0.0, %v1025_v29  ;;  %v1026_v32 = vmul.f32 %v1025_v29, %v4632_v30  ;;  %v1037_v33 = vstv %s3841_s29  ;;  %s460_s29 = sld [smem:[#allocation4]] }
  0x7c   : > { %858 = vrot.lane.b32.xlu1 %v853_v51, %s4341_s12  ;;  %v1039_v34 = vmul.f32 0.0, %v1037_v33  ;;  %v1038_v35 = vmul.f32 %v1037_v33, %v4632_v30  ;;  %v1054_v36 = vstv %s3905_s6  ;;  %s3890_s6 = sld [smem:[#allocation4 + $0x89]] }
  0x7d   : > { %v1056_v37 = vmul.f32 0.0, %v1054_v36  ;;  %v1055_v38 = vmul.f32 %v4539_v17, %v1054_v36  ;;  %v1066_v39 = vstv %s3937_s17  ;;  %s748_s17 = sld [smem:[#allocation7]] }
  0x7e   : > { %856 = vrot.lane.b32.xlu0 %v852_v52, %s4341_s12  ;;  %v1068_v41 = vmul.f32 0.0, %v1066_v39  ;;  %v1067_v42 = vmul.f32 %v4539_v17, %v1066_v39  ;;  %v1083_v44 = vstv %s4001_s26  ;;  %v1114_v52 = vstv %s3786_s11  ;;  %s4675_s26 = sld [smem:[#allocation4 + $0xa9]] }
  0x7f   : > { %v1085_v46 = vmul.f32 0.0, %v1083_v44  ;;  %v1084_v47 = vmul.f32 %v1083_v44, %v4646_v45  ;;  %v1095_v48 = vstv %s4033_s30  ;;  %v1116_v53 = vmul.f32 0.0, %v1114_v52  ;;  %s4677_s30 = sld [smem:[#allocation4 + $0x60]]  ;;  %s4682_s11 = sld [smem:[#allocation4 + $0xe9]] }
  0x80   : > { %870 = vrot.lane.b32.xlu1 %v865_v54, %s4340_s10  ;;  %v1097_v49 = vmul.f32 0.0, %v1095_v48  ;;  %v1096_v51 = vmul.f32 %v1095_v48, %v4646_v45  ;;  %v1115_v54 = vmul.f32 %v1114_v52, %v4574_v40  ;;  %v1201_v11 = vstv %s3794_s4  ;;  %s4719_s4 = sld [smem:[#allocation4 + $0x68]] }
  0x81   : > { %v1202_v14 = vmul.f32 %v1201_v11, %v4588_v50 }
  0x82   : > { %868 = vrot.lane.b32.xlu0 %v864_v55, %s4340_s10  ;;  %v1126_v55 = vstv %s3818_s15  ;;  %s4688_s15 = sld [smem:[#allocation4 + $0xc0]] }
  0x83   : > { %v1128_v56 = vmul.f32 0.0, %v1126_v55 }
  0x84   : > { %887 = vrot.lane.b32.xlu1 %v882_v57, %s4341_s12  ;;  %v1127_v57 = vmul.f32 %v1126_v55, %v4574_v40 }
  0x85   : > { %v789_v36 = vstv %s4677_s30  ;;  %s4751_s30 = sld [smem:[#allocation4 + $0x111]] }
  0x86   : > { %885 = vrot.lane.b32.xlu0 %v881_v58, %s4341_s12  ;;  %v1143_v58 = vstv %s3882_s16  ;;  %s4691_s16 = sld [smem:[#allocation4 + $0x109]]  ;;  %v790_v44 = vmul.f32 %v789_v36, %v4517_v7 }
  0x87   : > { %v1145_v59 = vmul.f32 0.0, %v1143_v58 }
  0x88   : > { %899 = vrot.lane.b32.xlu1 %v894_v60, %s4340_s10  ;;  %v1144_v60 = vmul.f32 %v1143_v58, %v4517_v7  ;;  %v818_v52 = vstv %s4688_s15  ;;  %s4764_s15 = sld [smem:[#allocation4 + $0x70]] }
  0x8a   : > { %897 = vrot.lane.b32.xlu0 %v893_v61, %s4340_s10  ;;  %v1155_v61 = vstv %s3914_s27  ;;  %s4699_s27 = sld [smem:[#allocation4 + $0x31]] }
  0x8b   : > { %v1157_v62 = vmul.f32 0.0, %v1155_v61 }
  0x8c   : > { %916 = vrot.lane.b32.xlu1 %v911_v0, %s4341_s12  ;;  %v1156_v0 = vmul.f32 %v1155_v61, %v4517_v7 }
  0x8e   : > { %914 = vrot.lane.b32.xlu0 %v910_v1, %s4341_s12  ;;  %v1172_v1 = vstv %s3978_s3  ;;  %s4703_s3 = sld [smem:[#allocation4 + $0x8]] }
  0x8f   : > { %v1174_v2 = vmul.f32 0.0, %v1172_v1 }
  0x90   : > { %928 = vrot.lane.b32.xlu1 %v923_v3, %s4340_s10  ;;  %v1173_v3 = vmul.f32 %v1172_v1, %v4579_v43 }
  0x92   : > { %926 = vrot.lane.b32.xlu0 %v922_v4, %s4340_s10  ;;  %v1184_v4 = vstv %s4010_s13  ;;  %s4710_s13 = sld [smem:[#allocation4 + $0x51]] }
  0x93   : > { %v1186_v5 = vmul.f32 0.0, %v1184_v4 }
  0x94   : > { %945 = vrot.lane.b32.xlu1 %v940_v8, %s4341_s12 }
  0x96   : > { %943 = vrot.lane.b32.xlu0 %v939_v9, %s4341_s12  ;;  %v1185_v9 = vmul.f32 %v1184_v4, %v4579_v43 }
  0x98   : > { %957 = vrot.lane.b32.xlu1 %v952_v12, %s4340_s10 }
  0x9a   : > { %955 = vrot.lane.b32.xlu0 %v951_v13, %s4340_s10  ;;  %v1203_v13 = vmul.f32 0.0, %v1201_v11 }
  0x9c   : > { %974 = vrot.lane.b32.xlu1 %v969_v16, %s4341_s12  ;;  %v1213_v16 = vstv %s3826_s0  ;;  %s4721_s0 = sld [smem:[#allocation4 + $0x91]] }
  0x9d   : > { %v1214_v22 = vmul.f32 %v1213_v16, %v4588_v50 }
  0x9e   : > { %972 = vrot.lane.b32.xlu0 %v968_v18, %s4341_s12 }
  0xa0   : > { %986 = vrot.lane.b32.xlu1 %v981_v20, %s4340_s10  ;;  %v758_v20 = vstv %s460_s29  ;;  %s4729_s29 = sld [smem:[#allocation4 + $0xb1]] }
  0xa1   : > { %v759_v26 = vmul.f32 %v758_v20, %v4574_v40 }
  0xa2   : > { %984 = vrot.lane.b32.xlu0 %v980_v21, %s4340_s10  ;;  %v1215_v21 = vmul.f32 0.0, %v1213_v16 }
  0xa4   : > { %1003 = vrot.lane.b32.xlu1 %v998_v24, %s4341_s12  ;;  %v1230_v24 = vstv %s3890_s6  ;;  %s4733_s6 = sld [smem:[#allocation4 + $0xc8]] }
  0xa5   : > { %v1232_v29 = vmul.f32 0.0, %v1230_v24 }
  0xa6   : > { %1001 = vrot.lane.b32.xlu0 %v997_v25, %s4341_s12 }
  0xa8   : > { %1015 = vrot.lane.b32.xlu1 %v1010_v27, %s4340_s10 }
  0xaa   : > { %1013 = vrot.lane.b32.xlu0 %v1009_v28, %s4340_s10  ;;  %v756_v28 = vstv %s748_s17  ;;  %s4740_s17 = sld [smem:[#allocation4 + $0xf1]] }
  0xac   : > { %1032 = vrot.lane.b32.xlu1 %v1027_v31, %s4341_s12  ;;  %v1231_v31 = vmul.f32 %v4525_v10, %v1230_v24 }
  0xae   : > { %1030 = vrot.lane.b32.xlu0 %v1026_v32, %s4341_s12  ;;  %v1242_v32 = vstv %s4675_s26  ;;  %s4749_s26 = sld [smem:[#allocation4 + $0x10]] }
  0xaf   : > { %v1243_v39 = vmul.f32 %v4525_v10, %v1242_v32 }
  0xb0   : > { %1044 = vrot.lane.b32.xlu1 %v1039_v34, %s4340_s10  ;;  %v760_v34 = vadd.f32 %v759_v26, %v756_v28 }
  0xb2   : > { %1042 = vrot.lane.b32.xlu0 %v1038_v35, %s4340_s10 }
  0xb4   : > { %1061 = vrot.lane.b32.xlu1 %v1056_v37, %s4341_s12 }
  0xb6   : > { %1059 = vrot.lane.b32.xlu0 %v1055_v38, %s4341_s12  ;;  %v1244_v38 = vmul.f32 0.0, %v1242_v32 }
  0xb8   : > { %1073 = vrot.lane.b32.xlu1 %v1068_v41, %s4340_s10  ;;  %v1259_v41 = vstv %s4682_s11  ;;  %s4759_s11 = sld [smem:[#allocation4 + $0x39]] }
  0xba   : > { %1071 = vrot.lane.b32.xlu0 %v1067_v42, %s4340_s10 }
  0xbc   : > { %1090 = vrot.lane.b32.xlu1 %v1085_v46, %s4341_s12 }
  0xbe   : > { %1088 = vrot.lane.b32.xlu0 %v1084_v47, %s4341_s12 }
  0xc0   : > { %1102 = vrot.lane.b32.xlu1 %v1097_v49, %s4340_s10 }
  0xc2   : > { %1100 = vrot.lane.b32.xlu0 %v1096_v51, %s4340_s10  ;;  %v1261_v51 = vmul.f32 0.0, %v1259_v41 }
  0xc4   : > { %1121 = vrot.lane.b32.xlu1 %v1116_v53, %s4341_s12  ;;  %v1260_v53 = vmul.f32 %v1259_v41, %v4602_v63 }
  0xc6   : > { %1119 = vrot.lane.b32.xlu0 %v1115_v54, %s4341_s12  ;;  %v1271_v54 = vstv %s4691_s16  ;;  %s4770_s16 = sld [smem:[#allocation4 + $0x59]] }
  0xc8   : > { %1133 = vrot.lane.b32.xlu1 %v1128_v56, %s4340_s10 }
  0xca   : > { %1131 = vrot.lane.b32.xlu0 %v1127_v57, %s4340_s10 }
  0xcc   : > { %1150 = vrot.lane.b32.xlu1 %v1145_v59, %s4341_s12  ;;  %v819_v59 = vmul.f32 %v818_v52, %v4579_v43 }
  0xce   : > { %1148 = vrot.lane.b32.xlu0 %v1144_v60, %s4341_s12  ;;  %v1273_v60 = vmul.f32 0.0, %v1271_v54 }
  0xd0   : > { %1162 = vrot.lane.b32.xlu1 %v1157_v62, %s4340_s10  ;;  %v1272_v62 = vmul.f32 %v1271_v54, %v4602_v63 }
  0xd2   : > { %1160 = vrot.lane.b32.xlu0 %v1156_v0, %s4340_s10  ;;  %v1288_v0 = vstv %s4699_s27  ;;  %s4779_s27 = sld [smem:[#allocation4 + $0x99]] }
  0xd3   : > { %v1289_v11 = vmul.f32 %v1288_v0, %v4610_v6 }
  0xd4   : > { %1179 = vrot.lane.b32.xlu1 %v1174_v2, %s4341_s12 }
  0xd6   : > { %1177 = vrot.lane.b32.xlu0 %v1173_v3, %s4341_s12  ;;  %v783_v8 = vpop.permute.xlu1 %782  ;;  %v847_v3 = vstv %s4703_s3  ;;  %s4783_s3 = sld [smem:[#allocation4 + $0xd0]] }
  0xd8   : > { %v770_v12 = vpop.permute.xlu0 %769  ;;  %1191 = vrot.lane.b32.xlu1 %v1186_v5, %s4340_s10 }
  0xda   : > { %1189 = vrot.lane.b32.xlu0 %v1185_v9, %s4340_s10  ;;  %v801_v18 = vpop.permute.xlu1 %800 }
  0xdc   : > { %v799_v19 = vpop.permute.xlu0 %798  ;;  %1208 = vrot.lane.b32.xlu1 %v1203_v13, %s4341_s12 }
  0xdd   : > { %v802_v56 = vsel %vm771_vm0, %v799_v19, %v801_v18 }
  0xde   : > { %1206 = vrot.lane.b32.xlu0 %v1202_v14, %s4341_s12  ;;  %v813_v25 = vpop.permute.xlu1 %812  ;;  %v848_v14 = vmul.f32 %v847_v3, %v4588_v50 }
  0xe0   : > { %v811_v27 = vpop.permute.xlu0 %810  ;;  %1220 = vrot.lane.b32.xlu1 %v1215_v21, %s4340_s10 }
  0xe1   : > { %v814_v61 = vsel %vm784_vm1, %v811_v27, %v813_v25  ;;  %v1317_v25 = vstv %s4721_s0  ;;  %s4802_s0 = sld [smem:[#allocation4 + $0x18]] }
  0xe2   : > { %1218 = vrot.lane.b32.xlu0 %v1214_v22, %s4340_s10  ;;  %v830_v33 = vpop.permute.xlu1 %829  ;;  %v876_v22 = vstv %s4719_s4  ;;  %v1319_v32 = vmul.f32 0.0, %v1317_v25  ;;  %s4797_s4 = sld [smem:[#allocation4 + $0xf9]] }
  0xe4   : > { %v768_v35 = vpop.permute.xlu0 %767  ;;  %1237 = vrot.lane.b32.xlu1 %v1232_v29, %s4341_s12 }
  0xe5   : > { %v772_v37 = vsel %vm771_vm0, %v768_v35, %v770_v12  ;;  %v1300_v12 = vstv %s4710_s13  ;;  %v1329_v35 = vstv %s4729_s29  ;;  %s4789_s13 = sld [smem:[#allocation4 + $0xb9]] }
  0xe6   : > { %1235 = vrot.lane.b32.xlu0 %v1231_v31, %s4341_s12  ;;  %v774_v42 = vadd.f32 %v772_v37, %v760_v34  ;;  %v781_v46 = vpop.permute.xlu1 %780  ;;  %v1302_v21 = vmul.f32 0.0, %v1300_v12  ;;  %v1301_v24 = vmul.f32 %v1300_v12, %v4610_v6  ;;  %v877_v31 = vmul.f32 %v4525_v10, %v876_v22  ;;  %s4807_s29 = sld [smem:[#allocation4 + $0x119]] }
  0xe7   : > { %v785_v47 = vsel %vm784_vm1, %v781_v46, %v783_v8  ;;  %v1290_v8 = vmul.f32 0.0, %v1288_v0  ;;  %v1318_v34 = vmul.f32 %v4535_v15, %v1317_v25  ;;  %v1331_v41 = vmul.f32 0.0, %v1329_v35 }
  0xe8   : > { %v828_v48 = vpop.permute.xlu0 %827  ;;  %v787_v49 = vadd.f32 %v785_v47, %v774_v42  ;;  %1249 = vrot.lane.b32.xlu1 %v1244_v38, %s4340_s10  ;;  %v1346_v46 = vstv %s4740_s17  ;;  %v1404_v25 = vstv %s4779_s27  ;;  %s4820_s17 = sld [smem:[#allocation4 + $0x78]]  ;;  %s4860_s27 = sld [smem:[#allocation4 + $0x1]] }
  0xe9   : > { %v831_v9 = vsel %vm771_vm0, %v828_v48, %v830_v33  ;;  %v1348_v54 = vmul.f32 0.0, %v1346_v46 }
  0xea   : > { %1247 = vrot.lane.b32.xlu0 %v1243_v39, %s4340_s10  ;;  %v791_v7 = vadd.f32 %v790_v44, %v787_v49  ;;  %v842_v55 = vpop.permute.xlu1 %841  ;;  %v905_v39 = vstv %s4733_s6  ;;  %v1330_v44 = vmul.f32 %v4535_v15, %v1329_v35  ;;  %s4815_s6 = sld [smem:[#allocation4 + $0x22]] }
  0xeb   : > { %v906_v49 = vmul.f32 %v905_v39, %v4602_v63 }
  0xec   : > { %v840_v57 = vpop.permute.xlu0 %839  ;;  %v804_v58 = vadd.f32 %v802_v56, %v791_v7  ;;  %1266 = vrot.lane.b32.xlu1 %v1261_v51, %s4341_s12  ;;  %v1347_v7 = vmul.f32 %v1346_v46, %v4624_v23  ;;  %v1358_v56 = vstv %s4751_s30  ;;  %s4833_s30 = sld [smem:[#allocation4 + $0x82]] }
  0xed   : > { %v843_v18 = vsel %vm784_vm1, %v840_v57, %v842_v55  ;;  %v934_v55 = vstv %s4749_s26  ;;  %s4825_s26 = sld [smem:[#allocation4 + $0x42]] }
  0xee   : > { %1264 = vrot.lane.b32.xlu0 %v1260_v53, %s4341_s12  ;;  %v816_v1 = vadd.f32 %v814_v61, %v804_v58  ;;  %v859_v2 = vpop.permute.xlu1 %858  ;;  %v935_v61 = vmul.f32 %v934_v55, %v4610_v6 }
  0xf0   : > { %v857_v4 = vpop.permute.xlu0 %856  ;;  %v820_v5 = vadd.f32 %v819_v59, %v816_v1  ;;  %1278 = vrot.lane.b32.xlu1 %v1273_v60, %s4340_s10  ;;  %v1359_v1 = vmul.f32 %v1358_v56, %v4624_v23 }
  0xf1   : > { %v860_v27 = vsel %vm771_vm0, %v857_v4, %v859_v2  ;;  %v1375_v2 = vstv %s4759_s11  ;;  %s4840_s11 = sld [smem:[#allocation4 + $0xd8]] }
  0xf2   : > { %1276 = vrot.lane.b32.xlu0 %v1272_v62, %s4340_s10  ;;  %v833_v13 = vadd.f32 %v831_v9, %v820_v5  ;;  %v871_v16 = vpop.permute.xlu1 %870  ;;  %v1360_v62 = vmul.f32 0.0, %v1358_v56  ;;  %v1377_v9 = vmul.f32 0.0, %v1375_v2  ;;  %v1376_v12 = vmul.f32 %v1375_v2, %v4632_v30 }
  0xf3   : > { %v1477_v2 = vstv %s4825_s26 }
  0xf4   : > { %v869_v19 = vpop.permute.xlu0 %868  ;;  %v845_v20 = vadd.f32 %v843_v18, %v833_v13  ;;  %1295 = vrot.lane.b32.xlu1 %v1290_v8, %s4341_s12  ;;  %v1387_v13 = vstv %s4770_s16  ;;  %s4853_s16 = sld [smem:[#allocation4 + $0xe2]] }
  0xf5   : > { %v872_v33 = vsel %vm784_vm1, %v869_v19, %v871_v16 }
  0xf6   : > { %1293 = vrot.lane.b32.xlu0 %v1289_v11, %s4341_s12  ;;  %v849_v50 = vadd.f32 %v848_v14, %v845_v20  ;;  %v888_v26 = vpop.permute.xlu1 %887  ;;  %v963_v11 = vstv %s4764_s15  ;;  %s4845_s15 = sld [smem:[#allocation4 + $0xa2]] }
  0xf7   : > { %v964_v19 = vmul.f32 %v4535_v15, %v963_v11  ;;  %v1406_v15 = vmul.f32 0.0, %v1404_v25 }
  0xf8   : > { %v886_v28 = vpop.permute.xlu0 %885  ;;  %v862_v29 = vadd.f32 %v860_v27, %v849_v50  ;;  %1307 = vrot.lane.b32.xlu1 %v1302_v21, %s4340_s10  ;;  %v1389_v21 = vmul.f32 0.0, %v1387_v13 }
  0xf9   : > { %v889_v42 = vsel %vm771_vm0, %v886_v28, %v888_v26 }
  0xfa   : > { %1305 = vrot.lane.b32.xlu0 %v1301_v24, %s4340_s10  ;;  %v874_v36 = vadd.f32 %v872_v33, %v862_v29  ;;  %v900_v37 = vpop.permute.xlu1 %899  ;;  %v1388_v24 = vmul.f32 %v1387_v13, %v4632_v30  ;;  %v992_v29 = vstv %s4783_s3  ;;  %s4865_s3 = sld [smem:[#allocation4 + $0x102]] }
  0xfc   : > { %v898_v38 = vpop.permute.xlu0 %897  ;;  %v878_v10 = vadd.f32 %v877_v31, %v874_v36  ;;  %1324 = vrot.lane.b32.xlu1 %v1319_v32, %s4341_s12  ;;  %v1405_v31 = vmul.f32 %v4539_v17, %v1404_v25  ;;  %v1416_v32 = vstv %s4789_s13  ;;  %v993_v36 = vmul.f32 %v992_v29, %v4624_v23  ;;  %v4870_v29 = vld [vmem:[#allocation2 + $0x8] sm:$0xff]  ;;  %s4873_s13 = sld [smem:[#allocation7 + $0x1]] }
  0xfd   : > { %v901_v51 = vsel %vm784_vm1, %v898_v38, %v900_v37  ;;  %v1418_v38 = vmul.f32 0.0, %v1416_v32  ;;  %v1506_v25 = vstv %s4845_s15  ;;  %s4926_s15 = sld [smem:[#allocation4 + $0xea]] }
  0xfe   : > { %1322 = vrot.lane.b32.xlu0 %v1318_v34, %s4341_s12  ;;  %v891_v47 = vadd.f32 %v889_v42, %v878_v10  ;;  %v917_v48 = vpop.permute.xlu1 %916  ;;  %v1417_v10 = vmul.f32 %v4539_v17, %v1416_v32 }
 0x100   : > { %v915_v52 = vpop.permute.xlu0 %914  ;;  %v903_v53 = vadd.f32 %v901_v51, %v891_v47  ;;  %1336 = vrot.lane.b32.xlu1 %v1331_v41, %s4340_s10  ;;  %v1433_v41 = vstv %s4797_s4  ;;  %v1445_v51 = vstv %s4807_s29  ;;  %s4878_s4 = sld [smem:[#allocation4 + $0x2a]]  ;;  %s3734_s29 = sshll.u32 %s4498_s7, 6 }
 0x101   : > { %v918_v58 = vsel %vm771_vm0, %v915_v52, %v917_v48  ;;  %v1435_v23 = vmul.f32 0.0, %v1433_v41  ;;  %v1021_v48 = vstv %s4802_s0  ;;  %v1447_v56 = vmul.f32 0.0, %v1445_v51  ;;  %s4886_s0 = sld [smem:[#allocation4 + $0x61]]  ;;  %s4906_s26 = scalar_lea.vmem [#allocation9], %s3734_s29 }
 0x102   : > { %1334 = vrot.lane.b32.xlu0 %v1330_v44, %s4340_s10  ;;  %v907_v57 = vadd.f32 %v906_v49, %v903_v53  ;;  %v929_v63 = vpop.permute.xlu1 %928  ;;  %v1434_v49 = vmul.f32 %v1433_v41, %v4646_v45  ;;  %s4977_s29 = sld [smem:[#allocation4 + $0xc9]] }
 0x104   : > { %v927_v59 = vpop.permute.xlu0 %926  ;;  %v920_v60 = vadd.f32 %v918_v58, %v907_v57  ;;  %1353 = vrot.lane.b32.xlu1 %v1348_v54, %s4341_s12  ;;  %v1465_v58 = vstv %s4815_s6  ;;  %s4892_s6 = sld [smem:[#allocation4 + $0x4a]] }
 0x105   : > { %v930_v0 = vsel %vm784_vm1, %v927_v59, %v929_v63  ;;  %v1446_v63 = vmul.f32 %v1445_v51, %v4646_v45 }
 0x106   : > { %1351 = vrot.lane.b32.xlu0 %v1347_v7, %s4341_s12  ;;  %v932_v3 = vadd.f32 %v930_v0, %v920_v60  ;;  %v946_v4 = vpop.permute.xlu1 %945  ;;  %v1022_v7 = vmul.f32 %v1021_v48, %v4632_v30  ;;  %v4835_v60 = vld [vmem:[#allocation2] sm:$0xff]  ;;  %v1467_v0 = vmul.f32 0.0, %v1465_v58 }
 0x107   : > { %v1478_v13 = vmul.f32 %v1477_v2, %v4835_v60 }
 0x108   : > { %v944_v5 = vpop.permute.xlu0 %943  ;;  %v936_v8 = vadd.f32 %v935_v61, %v932_v3  ;;  %1365 = vrot.lane.b32.xlu1 %v1360_v62, %s4340_s10  ;;  %v1466_v3 = vmul.f32 %v1465_v58, %v4835_v60  ;;  %v1139_v58 = vstv %s4886_s0  ;;  %s4969_s0 = sld [smem:[#allocation4 + $0x92]] }
 0x109   : > { %v947_v6 = vsel %vm771_vm0, %v944_v5, %v946_v4 }
 0x10a   : > { %1363 = vrot.lane.b32.xlu0 %v1359_v1, %s4340_s10  ;;  %v949_v14 = vadd.f32 %v947_v6, %v936_v8  ;;  %v958_v16 = vpop.permute.xlu1 %957  ;;  %v1050_v1 = vstv %s4820_s17  ;;  %v1479_v6 = vmul.f32 0.0, %v1477_v2  ;;  %s4902_s17 = sld [smem:[#allocation4 + $0x8a]] }
 0x10c   : > { %v956_v18 = vpop.permute.xlu0 %955  ;;  %1382 = vrot.lane.b32.xlu1 %v1377_v9, %s4341_s12  ;;  %v1051_v9 = vmul.f32 %v4539_v17, %v1050_v1  ;;  %v4159_v1 = vld [vmem:[#allocation2 + $0x10] sm:$0xff] }
 0x10d   : > { %v959_v20 = vsel %vm784_vm1, %v956_v18, %v958_v16  ;;  %v4855_v18 = vld [vmem:[#allocation2 + $0x10] sm:$0xff]  ;;  %v1140_v2 = vmul.f32 %v4159_v1, %v1139_v58 }
 0x10e   : > { %v961_v22 = vadd.f32 %v959_v20, %v949_v14  ;;  %1380 = vrot.lane.b32.xlu0 %v1376_v12, %s4341_s12  ;;  %v975_v50 = vpop.permute.xlu1 %974  ;;  %v1494_v14 = vstv %s4833_s30  ;;  %s4913_s30 = sld [smem:[#allocation4 + $0xc1]] }
 0x110   : > { %v973_v26 = vpop.permute.xlu0 %972  ;;  %v965_v27 = vadd.f32 %v964_v19, %v961_v22  ;;  %1394 = vrot.lane.b32.xlu1 %v1389_v21, %s4340_s10  ;;  %v1496_v21 = vmul.f32 0.0, %v1494_v14  ;;  %v1079_v22 = vstv %s4840_s11  ;;  %s4918_s11 = sld [smem:[#allocation4 + $0xaa]] }
 0x111   : > { %v976_v28 = vsel %vm771_vm0, %v973_v26, %v975_v50 }
 0x112   : > { %1392 = vrot.lane.b32.xlu0 %v1388_v24, %s4340_s10  ;;  %v987_v33 = vpop.permute.xlu1 %986  ;;  %v978_v34 = vadd.f32 %v976_v28, %v965_v27  ;;  %v1495_v24 = vmul.f32 %v1494_v14, %v4855_v18  ;;  %v1080_v28 = vmul.f32 %v1079_v22, %v4646_v45 }
 0x114   : > { %v985_v35 = vpop.permute.xlu0 %984  ;;  %1411 = vrot.lane.b32.xlu1 %v1406_v15, %s4341_s12 }
 0x115   : > { %v988_v37 = vsel %vm784_vm1, %v985_v35, %v987_v33  ;;  %v1507_v33 = vmul.f32 %v1506_v25, %v4855_v18  ;;  %v4880_v35 = vld [vmem:[#allocation2 + $0x20] sm:$0xff] }
 0x116   : > { %v990_v39 = vadd.f32 %v988_v37, %v978_v34  ;;  %1409 = vrot.lane.b32.xlu0 %v1405_v31, %s4341_s12  ;;  %v1004_v42 = vpop.permute.xlu1 %1003  ;;  %v1508_v31 = vmul.f32 %v4870_v29, %v1506_v25  ;;  %v1523_v34 = vstv %s4853_s16  ;;  %s4934_s16 = sld [smem:[#allocation4 + $0x9]] }
 0x117   : > { %v1524_v41 = vmul.f32 %v1523_v34, %v4880_v35 }
 0x118   : > { %v1002_v44 = vpop.permute.xlu0 %1001  ;;  %v994_v46 = vadd.f32 %v993_v36, %v990_v39  ;;  %1423 = vrot.lane.b32.xlu1 %v1418_v38, %s4340_s10  ;;  %v1525_v39 = vmul.f32 %v4870_v29, %v1523_v34 }
 0x119   : > { %v1005_v47 = vsel %vm771_vm0, %v1002_v44, %v1004_v42  ;;  %v1535_v42 = vstv %s4865_s3  ;;  %s4948_s3 = sld [smem:[#allocation4 + $0x32]] }
 0x11a   : > { %1421 = vrot.lane.b32.xlu0 %v1417_v10, %s4340_s10  ;;  %v1016_v52 = vpop.permute.xlu1 %1015  ;;  %v1007_v53 = vadd.f32 %v1005_v47, %v994_v46  ;;  %v1110_v10 = vstv %s4860_s27  ;;  %v1537_v51 = vmul.f32 %v4870_v29, %v1535_v42  ;;  %s4939_s27 = sld [smem:[#allocation4 + $0x10a]] }
 0x11c   : > { %v1014_v54 = vpop.permute.xlu0 %1013  ;;  %1440 = vrot.lane.b32.xlu1 %v1435_v23, %s4341_s12  ;;  %v1111_v23 = vmul.f32 %v1110_v10, %v4574_v40 }
 0x11d   : > { %v1017_v55 = vsel %vm784_vm1, %v1014_v54, %v1016_v52  ;;  %v1552_v54 = vstv %s4878_s4  ;;  %s4961_s4 = sld [smem:[#allocation4 + $0x52]] }
 0x11e   : > { %v1019_v57 = vadd.f32 %v1017_v55, %v1007_v53  ;;  %1438 = vrot.lane.b32.xlu0 %v1434_v49, %s4341_s12  ;;  %v1033_v59 = vpop.permute.xlu1 %1032  ;;  %v1108_v49 = vstv %s4873_s13  ;;  %v1536_v53 = vmul.f32 %v1535_v42, %v4880_v35  ;;  %v4904_v55 = vld [vmem:[#allocation2 + $0x30] sm:$0xff]  ;;  %s4956_s13 = sld [smem:[#allocation4 + $0x69]] }
 0x11f   : > { %v1112_v40 = vadd.f32 %v1111_v23, %v1108_v49  ;;  %v4160_v42 = vld [vmem:[#allocation2 + $0x30] sm:$0xff]  ;;  %v1639_v49 = vstv %s4948_s3  ;;  %s5032_s3 = sld [smem:[#allocation4 + $0x9a]] }
 0x120   : > { %v1031_v61 = vpop.permute.xlu0 %1030  ;;  %v1023_v30 = vadd.f32 %v1022_v7, %v1019_v57  ;;  %1452 = vrot.lane.b32.xlu1 %v1447_v56, %s4340_s10 }
 0x121   : > { %v1034_v62 = vsel %vm771_vm0, %v1031_v61, %v1033_v59  ;;  %v1553_v59 = vmul.f32 %v1552_v54, %v4904_v55  ;;  %v1564_v61 = vstv %s4892_s6  ;;  %s4982_s6 = sld [smem:[#allocation4 + $0xb2]] }
 0x122   : > { %1450 = vrot.lane.b32.xlu0 %v1446_v63, %s4340_s10  ;;  %v1045_v4 = vpop.permute.xlu1 %1044  ;;  %v1036_v5 = vadd.f32 %v1034_v62, %v1023_v30  ;;  %v1554_v63 = vmul.f32 %v4870_v29, %v1552_v54 }
 0x124   : > { %v1043_v8 = vpop.permute.xlu0 %1042  ;;  %1472 = vrot.lane.b32.xlu1 %v1467_v0, %s4341_s12 }
 0x125   : > { %v1046_v11 = vsel %vm784_vm1, %v1043_v8, %v1045_v4  ;;  %v1566_v4 = vmul.f32 %v4870_v29, %v1564_v61  ;;  %v1565_v8 = vmul.f32 %v1564_v61, %v4904_v55 }
 0x126   : > { %v1048_v12 = vadd.f32 %v1046_v11, %v1036_v5  ;;  %1470 = vrot.lane.b32.xlu0 %v1466_v3, %s4341_s12  ;;  %v1062_v16 = vpop.permute.xlu1 %1061 }
 0x128   : > { %v1060_v19 = vpop.permute.xlu0 %1059  ;;  %v1052_v17 = vadd.f32 %v1051_v9, %v1048_v12  ;;  %1484 = vrot.lane.b32.xlu1 %v1479_v6, %s4340_s10  ;;  %v1581_v9 = vstv %s4902_s17  ;;  %v4928_v6 = vld [vmem:[#allocation2 + $0x40] sm:$0xff]  ;;  %s4990_s17 = sld [smem:[#allocation4 + $0xf2]] }
 0x129   : > { %v1063_v20 = vsel %vm771_vm0, %v1060_v19, %v1062_v16  ;;  %v1583_v16 = vmul.f32 %v4870_v29, %v1581_v9  ;;  %v1168_v19 = vstv %s4913_s30  ;;  %s4998_s30 = sld [smem:[#allocation4 + $0x11]] }
 0x12a   : > { %1482 = vrot.lane.b32.xlu0 %v1478_v13, %s4340_s10  ;;  %v1074_v50 = vpop.permute.xlu1 %1073  ;;  %v1065_v26 = vadd.f32 %v1063_v20, %v1052_v17  ;;  %v1582_v17 = vmul.f32 %v1581_v9, %v4928_v6  ;;  %v1593_v20 = vstv %s4918_s11  ;;  %v1169_v25 = vmul.f32 %v1168_v19, %v4579_v43  ;;  %s5003_s11 = sld [smem:[#allocation4 + $0x112]] }
 0x12b   : > { %v1680_v19 = vstv %s4982_s6  ;;  %s5066_s6 = sld [smem:[#allocation4 + $0x11a]] }
 0x12c   : > { %v1072_v27 = vpop.permute.xlu0 %1071  ;;  %1501 = vrot.lane.b32.xlu1 %v1496_v21, %s4341_s12 }
 0x12d   : > { %v1075_v15 = vsel %vm784_vm1, %v1072_v27, %v1074_v50 }
 0x12e   : > { %v1077_v32 = vadd.f32 %v1075_v15, %v1065_v26  ;;  %1499 = vrot.lane.b32.xlu0 %v1495_v24, %s4341_s12  ;;  %v1091_v45 = vpop.permute.xlu1 %1090  ;;  %v1595_v26 = vmul.f32 %v4870_v29, %v1593_v20  ;;  %v1610_v15 = vstv %s4926_s15  ;;  %s5011_s15 = sld [smem:[#allocation4 + $0x3a]] }
 0x130   : > { %v1089_v36 = vpop.permute.xlu0 %1088  ;;  %v1081_v37 = vadd.f32 %v1080_v28, %v1077_v32  ;;  %1513 = vrot.lane.b32.xlu1 %v1508_v31, %s4340_s10  ;;  %v1594_v28 = vmul.f32 %v1593_v20, %v4928_v6  ;;  %v4950_v32 = vld [vmem:[#allocation2 + $0x50] sm:$0xff] }
 0x131   : > { %v1092_v38 = vsel %vm771_vm0, %v1089_v36, %v1091_v45  ;;  %v1612_v45 = vmul.f32 %v4870_v29, %v1610_v15  ;;  %v1197_v36 = vstv %s4934_s16  ;;  %s5019_s16 = sld [smem:[#allocation4 + $0x71]] }
 0x132   : > { %1511 = vrot.lane.b32.xlu0 %v1507_v33, %s4340_s10  ;;  %v1103_v44 = vpop.permute.xlu1 %1102  ;;  %v1094_v46 = vadd.f32 %v1092_v38, %v1081_v37  ;;  %v1611_v37 = vmul.f32 %v1610_v15, %v4950_v32  ;;  %v1622_v38 = vstv %s4939_s27  ;;  %s5024_s27 = sld [smem:[#allocation4 + $0x5a]] }
 0x134   : > { %v1101_v47 = vpop.permute.xlu0 %1100  ;;  %1530 = vrot.lane.b32.xlu1 %v1525_v39, %s4341_s12 }
 0x135   : > { %v1104_v48 = vsel %vm784_vm1, %v1101_v47, %v1103_v44  ;;  %v1198_v44 = vmul.f32 %v4160_v42, %v1197_v36  ;;  %v1624_v47 = vmul.f32 %v4870_v29, %v1622_v38  ;;  %v1284_v36 = vstv %s4998_s30  ;;  %v4163_v42 = vld [vmem:[#allocation2 + $0x60] sm:$0xff]  ;;  %s5082_s30 = sld [smem:[#allocation4 + $0x79]] }
 0x136   : > { %v1106_v52 = vadd.f32 %v1104_v48, %v1094_v46  ;;  %1528 = vrot.lane.b32.xlu0 %v1524_v41, %s4341_s12  ;;  %v1122_v7 = vpop.permute.xlu1 %1121  ;;  %v1623_v48 = vmul.f32 %v1622_v38, %v4950_v32  ;;  %v1709_v38 = vstv %s5003_s11  ;;  %s5087_s11 = sld [smem:[#allocation4 + $0x43]] }
 0x138   : > { %1107 = vst [vmem:[%s4906_s26] sm:$0xff] %v1106_v52  ;;  %v1120_v56 = vpop.permute.xlu0 %1119  ;;  %1542 = vrot.lane.b32.xlu1 %v1537_v51, %s4340_s10  ;;  %v4971_v52 = vld [vmem:[#allocation2 + $0x60] sm:$0xff] }
 0x139   : > { %v1123_v57 = vsel %vm771_vm0, %v1120_v56, %v1122_v7  ;;  %v1226_v56 = vstv %s4956_s13  ;;  %s5040_s13 = sld [smem:[#allocation4 + $0xd1]] }
 0x13a   : > { %1540 = vrot.lane.b32.xlu0 %v1536_v53, %s4340_s10  ;;  %v1134_v30 = vpop.permute.xlu1 %1133  ;;  %v1125_v62 = vadd.f32 %v1123_v57, %v1112_v40  ;;  %v1641_v40 = vmul.f32 %v4870_v29, %v1639_v49  ;;  %v1640_v57 = vmul.f32 %v1639_v49, %v4971_v52  ;;  %v1726_v49 = vstv %s5011_s15  ;;  %s5095_s15 = sld [smem:[#allocation4 + $0x83]] }
 0x13c   : > { %v1132_v0 = vpop.permute.xlu0 %1131  ;;  %1559 = vrot.lane.b32.xlu1 %v1554_v63, %s4341_s12  ;;  %v1651_v63 = vstv %s4961_s4  ;;  %s5045_s4 = sld [smem:[#allocation4 + $0xba]] }
 0x13d   : > { %v1135_v3 = vsel %vm784_vm1, %v1132_v0, %v1134_v30  ;;  %v4161_v30 = vld [vmem:[#allocation2 + $0x40] sm:$0xff]  ;;  %v1653_v1 = vmul.f32 %v4870_v29, %v1651_v63 }
 0x13e   : > { %v1137_v5 = vadd.f32 %v1135_v3, %v1125_v62  ;;  %1557 = vrot.lane.b32.xlu0 %v1553_v59, %s4341_s12  ;;  %v1151_v11 = vpop.permute.xlu1 %1150  ;;  %v1227_v62 = vmul.f32 %v4161_v30, %v1226_v56  ;;  %v1652_v3 = vmul.f32 %v1651_v63, %v4971_v52  ;;  %v1728_v56 = vmul.f32 %v4870_v29, %v1726_v49 }
 0x140   : > { %v1141_v12 = vadd.f32 %v1140_v2, %v1137_v5  ;;  %v1149_v13 = vpop.permute.xlu0 %1148  ;;  %1571 = vrot.lane.b32.xlu1 %v1566_v4, %s4340_s10  ;;  %v1668_v4 = vstv %s4969_s0  ;;  %s5053_s0 = sld [smem:[#allocation4 + $0xfa]] }
 0x141   : > { %v1152_v14 = vsel %vm771_vm0, %v1149_v13, %v1151_v11  ;;  %v1670_v13 = vmul.f32 %v4870_v29, %v1668_v4 }
 0x142   : > { %1569 = vrot.lane.b32.xlu0 %v1565_v8, %s4340_s10  ;;  %v1163_v21 = vpop.permute.xlu1 %1162  ;;  %v1154_v22 = vadd.f32 %v1152_v14, %v1141_v12  ;;  %v4992_v8 = vld [vmem:[#allocation2 + $0x70] sm:$0xff]  ;;  %v1255_v14 = vstv %s4977_s29  ;;  %s5061_s29 = sld [smem:[#allocation4 + $0x19]] }
 0x144   : > { %v1161_v24 = vpop.permute.xlu0 %1160  ;;  %1588 = vrot.lane.b32.xlu1 %v1583_v16, %s4341_s12  ;;  %v1669_v16 = vmul.f32 %v1668_v4, %v4992_v8 }
 0x145   : > { %v1164_v50 = vsel %vm784_vm1, %v1161_v24, %v1163_v21 }
 0x146   : > { %v1166_v27 = vadd.f32 %v1164_v50, %v1154_v22  ;;  %1586 = vrot.lane.b32.xlu0 %v1582_v17, %s4341_s12  ;;  %v1180_v31 = vpop.permute.xlu1 %1179  ;;  %v4162_v22 = vld [vmem:[#allocation2 + $0x50] sm:$0xff]  ;;  %v1682_v50 = vmul.f32 %v4870_v29, %v1680_v19 }
 0x147   : > { %v1256_v24 = vmul.f32 %v4162_v22, %v1255_v14 }
 0x148   : > { %v1170_v43 = vadd.f32 %v1169_v25, %v1166_v27  ;;  %v1178_v33 = vpop.permute.xlu0 %1177  ;;  %1600 = vrot.lane.b32.xlu1 %v1595_v26, %s4340_s10  ;;  %v1681_v27 = vmul.f32 %v1680_v19, %v4992_v8  ;;  %v1342_v19 = vstv %s5040_s13  ;;  %s5120_s13 = sld [smem:[#allocation4 + $0x2]] }
 0x149   : > { %v1181_v34 = vsel %vm771_vm0, %v1178_v33, %v1180_v31  ;;  %v5013_v31 = vld [vmem:[#allocation2 + $0x80] sm:$0xff] }
 0x14a   : > { %1598 = vrot.lane.b32.xlu0 %v1594_v28, %s4340_s10  ;;  %v1192_v39 = vpop.permute.xlu1 %1191  ;;  %v1183_v10 = vadd.f32 %v1181_v34, %v1170_v43  ;;  %v1697_v28 = vstv %s4990_s17  ;;  %s5074_s17 = sld [smem:[#allocation4 + $0x23]] }
 0x14c   : > { %v1190_v41 = vpop.permute.xlu0 %1189  ;;  %1617 = vrot.lane.b32.xlu1 %v1612_v45, %s4341_s12  ;;  %v1699_v45 = vmul.f32 %v4870_v29, %v1697_v28 }
 0x14d   : > { %v1193_v46 = vsel %vm784_vm1, %v1190_v41, %v1192_v39 }
 0x14e   : > { %v1195_v23 = vadd.f32 %v1193_v46, %v1183_v10  ;;  %1615 = vrot.lane.b32.xlu0 %v1611_v37, %s4341_s12  ;;  %v1209_v51 = vpop.permute.xlu1 %1208  ;;  %v1698_v37 = vmul.f32 %v1697_v28, %v5013_v31 }
 0x150   : > { %v1199_v53 = vadd.f32 %v1198_v44, %v1195_v23  ;;  %v1207_v54 = vpop.permute.xlu0 %1206  ;;  %1629 = vrot.lane.b32.xlu1 %v1624_v47, %s4340_s10  ;;  %v1285_v44 = vmul.f32 %v4163_v42, %v1284_v36  ;;  %v1711_v47 = vmul.f32 %v4870_v29, %v1709_v38 }
 0x151   : > { %v1210_v7 = vsel %vm771_vm0, %v1207_v54, %v1209_v51 }
 0x152   : > { %1627 = vrot.lane.b32.xlu0 %v1623_v48, %s4340_s10  ;;  %v1221_v58 = vpop.permute.xlu1 %1220  ;;  %v1212_v59 = vadd.f32 %v1210_v7, %v1199_v53  ;;  %v1710_v48 = vmul.f32 %v1709_v38, %v5013_v31  ;;  %v5034_v53 = vld [vmem:[#allocation2 + $0x90] sm:$0xff] }
 0x153   : > { %v1727_v63 = vmul.f32 %v1726_v49, %v5034_v53 }
 0x154   : > { %v1219_v61 = vpop.permute.xlu0 %1218  ;;  %1646 = vrot.lane.b32.xlu1 %v1641_v40, %s4341_s12 }
 0x155   : > { %v1222_v0 = vsel %vm784_vm1, %v1219_v61, %v1221_v58  ;;  %v1738_v58 = vstv %s5024_s27  ;;  %s5106_s27 = sld [smem:[#allocation4 + $0xa3]] }
 0x156   : > { %v1224_v2 = vadd.f32 %v1222_v0, %v1212_v59  ;;  %1644 = vrot.lane.b32.xlu0 %v1640_v57, %s4341_s12  ;;  %v1238_v5 = vpop.permute.xlu1 %1237  ;;  %v1313_v57 = vstv %s5019_s16  ;;  %v1739_v4 = vmul.f32 %v1738_v58, %v5034_v53  ;;  %s5101_s16 = sld [smem:[#allocation4 + $0xd9]] }
 0x158   : > { %v1228_v9 = vadd.f32 %v1227_v62, %v1224_v2  ;;  %v1236_v11 = vpop.permute.xlu0 %1235  ;;  %1658 = vrot.lane.b32.xlu1 %v1653_v1, %s4340_s10  ;;  %v4164_v62 = vld [vmem:[#allocation2 + $0x70] sm:$0xff]  ;;  %v1740_v2 = vmul.f32 %v4870_v29, %v1738_v58 }
 0x159   : > { %v1239_v12 = vsel %vm771_vm0, %v1236_v11, %v1238_v5  ;;  %v1314_v0 = vmul.f32 %v4164_v62, %v1313_v57  ;;  %v1755_v5 = vstv %s5032_s3  ;;  %v5055_v11 = vld [vmem:[#allocation2 + $0xa0] sm:$0xff]  ;;  %s5114_s3 = sld [smem:[#allocation4 + $0xe3]] }
 0x15a   : > { %1656 = vrot.lane.b32.xlu0 %v1652_v3, %s4340_s10  ;;  %v1250_v17 = vpop.permute.xlu1 %1249  ;;  %v1241_v20 = vadd.f32 %v1239_v12, %v1228_v9 }
 0x15c   : > { %v1248_v21 = vpop.permute.xlu0 %1247  ;;  %1675 = vrot.lane.b32.xlu1 %v1670_v13, %s4341_s12 }
 0x15d   : > { %v1251_v25 = vsel %vm784_vm1, %v1248_v21, %v1250_v17  ;;  %v1756_v17 = vmul.f32 %v1755_v5, %v5055_v11 }
 0x15e   : > { %v1253_v26 = vadd.f32 %v1251_v25, %v1241_v20  ;;  %1673 = vrot.lane.b32.xlu0 %v1669_v16, %s4341_s12  ;;  %v1267_v15 = vpop.permute.xlu1 %1266  ;;  %v1757_v16 = vmul.f32 %v4870_v29, %v1755_v5  ;;  %v1767_v20 = vstv %s5045_s4  ;;  %v4165_v25 = vld [vmem:[#allocation2 + $0x80] sm:$0xff]  ;;  %s5125_s4 = sld [smem:[#allocation4 + $0x103]] }
 0x160   : > { %v1257_v43 = vadd.f32 %v1256_v24, %v1253_v26  ;;  %v1265_v33 = vpop.permute.xlu0 %1264  ;;  %1687 = vrot.lane.b32.xlu1 %v1682_v50, %s4340_s10  ;;  %v1343_v50 = vmul.f32 %v4165_v25, %v1342_v19 }
 0x161   : > { %v1268_v34 = vsel %vm771_vm0, %v1265_v33, %v1267_v15  ;;  %v1768_v15 = vmul.f32 %v1767_v20, %v5055_v11 }
 0x162   : > { %1685 = vrot.lane.b32.xlu0 %v1681_v27, %s4340_s10  ;;  %v1279_v39 = vpop.permute.xlu1 %1278  ;;  %v1270_v10 = vadd.f32 %v1268_v34, %v1257_v43  ;;  %v1769_v27 = vmul.f32 %v4870_v29, %v1767_v20  ;;  %v1784_v43 = vstv %s5053_s0  ;;  %v5076_v34 = vld [vmem:[#allocation2 + $0xb0] sm:$0xff]  ;;  %s5130_s0 = sld [smem:[#allocation7 + $0x2]] }
 0x163   : > { %v1786_v38 = vmul.f32 %v4870_v29, %v1784_v43 }
 0x164   : > { %v1277_v41 = vpop.permute.xlu0 %1276  ;;  %1704 = vrot.lane.b32.xlu1 %v1699_v45, %s4341_s12 }
 0x165   : > { %v1280_v46 = vsel %vm784_vm1, %v1277_v41, %v1279_v39  ;;  %v1371_v39 = vstv %s5061_s29  ;;  %v1796_v41 = vstv %s5066_s6  ;;  %s5135_s29 = sld [smem:[#allocation4 + $0x2b]]  ;;  %s5141_s6 = sld [smem:[#allocation4 + $0x62]] }
 0x166   : > { %v1282_v23 = vadd.f32 %v1280_v46, %v1270_v10  ;;  %1702 = vrot.lane.b32.xlu0 %v1698_v37, %s4341_s12  ;;  %v1296_v51 = vpop.permute.xlu1 %1295  ;;  %v1785_v10 = vmul.f32 %v1784_v43, %v5076_v34  ;;  %v1798_v49 = vmul.f32 %v4870_v29, %v1796_v41 }
 0x168   : > { %v1286_v54 = vadd.f32 %v1285_v44, %v1282_v23  ;;  %v1294_v7 = vpop.permute.xlu0 %1293  ;;  %1716 = vrot.lane.b32.xlu1 %v1711_v47, %s4340_s10  ;;  %v4166_v47 = vld [vmem:[#allocation2 + $0x90] sm:$0xff] }
 0x169   : > { %v1297_v40 = vsel %vm771_vm0, %v1294_v7, %v1296_v51  ;;  %v1372_v23 = vmul.f32 %v4166_v47, %v1371_v39  ;;  %v1816_v7 = vstv %s5074_s17  ;;  %s5146_s17 = sld [smem:[#allocation4 + $0x4b]] }
 0x16a   : > { %1714 = vrot.lane.b32.xlu0 %v1710_v48, %s4340_s10  ;;  %v1308_v59 = vpop.permute.xlu1 %1307  ;;  %v1299_v61 = vadd.f32 %v1297_v40, %v1286_v54  ;;  %v1797_v54 = vmul.f32 %v1796_v41, %v5076_v34  ;;  %v1818_v58 = vmul.f32 %v4870_v29, %v1816_v7 }
 0x16c   : > { %v1306_v30 = vpop.permute.xlu0 %1305  ;;  %1733 = vrot.lane.b32.xlu1 %v1728_v56, %s4341_s12 }
 0x16d   : > { %v1309_v1 = vsel %vm784_vm1, %v1306_v30, %v1308_v59  ;;  %v1400_v59 = vstv %s5082_s30  ;;  %v1828_v30 = vstv %s5087_s11  ;;  %s5156_s30 = sld [smem:[#allocation4 + $0x8b]]  ;;  %s5163_s11 = sld [smem:[#allocation4 + $0xc2]] }
 0x16e   : > { %v1311_v3 = vadd.f32 %v1309_v1, %v1299_v61  ;;  %1731 = vrot.lane.b32.xlu0 %v1727_v63, %s4341_s12  ;;  %v1325_v9 = vpop.permute.xlu1 %1324  ;;  %v1817_v61 = vmul.f32 %v1816_v7, %v4835_v60  ;;  %v1830_v5 = vmul.f32 %v4870_v29, %v1828_v30 }
 0x170   : > { %v1315_v12 = vadd.f32 %v1314_v0, %v1311_v3  ;;  %v1323_v13 = vpop.permute.xlu0 %1322  ;;  %1745 = vrot.lane.b32.xlu1 %v1740_v2, %s4340_s10  ;;  %v4167_v2 = vld [vmem:[#allocation2 + $0xa0] sm:$0xff] }
 0x171   : > { %v1326_v14 = vsel %vm771_vm0, %v1323_v13, %v1325_v9  ;;  %v1401_v3 = vmul.f32 %v4167_v2, %v1400_v59  ;;  %v1845_v13 = vstv %s5095_s15  ;;  %s5168_s15 = sld [smem:[#allocation4 + $0xab]] }
 0x172   : > { %1743 = vrot.lane.b32.xlu0 %v1739_v4, %s4340_s10  ;;  %v1337_v21 = vpop.permute.xlu1 %1336  ;;  %v1328_v22 = vadd.f32 %v1326_v14, %v1315_v12  ;;  %v1829_v12 = vmul.f32 %v1828_v30, %v4835_v60  ;;  %v1847_v20 = vmul.f32 %v4870_v29, %v1845_v13  ;;  %v1490_v30 = vstv %s5141_s6  ;;  %s5223_s6 = sld [smem:[#allocation4 + $0xca]] }
 0x174   : > { %v1335_v24 = vpop.permute.xlu0 %1334  ;;  %1762 = vrot.lane.b32.xlu1 %v1757_v16, %s4341_s12 }
 0x175   : > { %v1338_v26 = vsel %vm784_vm1, %v1335_v24, %v1337_v21  ;;  %v1429_v21 = vstv %s5101_s16  ;;  %v1857_v24 = vstv %s5106_s27  ;;  %s5177_s16 = sld [smem:[#allocation4 + $0xeb]]  ;;  %s5183_s27 = sld [smem:[#allocation4 + $0xa]] }
 0x176   : > { %v1340_v28 = vadd.f32 %v1338_v26, %v1328_v22  ;;  %1760 = vrot.lane.b32.xlu0 %v1756_v17, %s4341_s12  ;;  %v1354_v33 = vpop.permute.xlu1 %1353  ;;  %v1846_v22 = vmul.f32 %v1845_v13, %v4855_v18  ;;  %v1859_v43 = vmul.f32 %v4870_v29, %v1857_v24 }
 0x178   : > { %v1344_v45 = vadd.f32 %v1343_v50, %v1340_v28  ;;  %v1352_v36 = vpop.permute.xlu0 %1351  ;;  %1774 = vrot.lane.b32.xlu1 %v1769_v27, %s4340_s10  ;;  %v4168_v27 = vld [vmem:[#allocation2 + $0xb0] sm:$0xff] }
 0x179   : > { %v1355_v37 = vsel %vm771_vm0, %v1352_v36, %v1354_v33  ;;  %v1430_v28 = vmul.f32 %v4168_v27, %v1429_v21  ;;  %v1874_v36 = vstv %s5114_s3  ;;  %v1519_v21 = vstv %s5163_s11  ;;  %s5188_s3 = sld [smem:[#allocation4 + $0x10b]]  ;;  %s5243_s11 = sld [smem:[#allocation4 + $0x12]] }
 0x17a   : > { %1772 = vrot.lane.b32.xlu0 %v1768_v15, %s4340_s10  ;;  %v1366_v42 = vpop.permute.xlu1 %1365  ;;  %v1357_v44 = vadd.f32 %v1355_v37, %v1344_v45  ;;  %v1858_v45 = vmul.f32 %v1857_v24, %v4855_v18  ;;  %v1876_v41 = vmul.f32 %v4870_v29, %v1874_v36  ;;  %v1944_v24 = vstv %s5168_s15  ;;  %s5248_s15 = sld [smem:[#allocation4 + $0x113]] }
 0x17b   : > { %v1520_v27 = vmul.f32 %v1519_v21, %v4880_v35 }
 0x17c   : > { %v1364_v46 = vpop.permute.xlu0 %1363  ;;  %1791 = vrot.lane.b32.xlu1 %v1786_v38, %s4341_s12 }
 0x17d   : > { %v1367_v48 = vsel %vm784_vm1, %v1364_v46, %v1366_v42  ;;  %v1461_v42 = vstv %s5120_s13  ;;  %v1886_v46 = vstv %s5125_s4  ;;  %s5197_s13 = sld [smem:[#allocation4 + $0x33]]  ;;  %s5203_s4 = sld [smem:[#allocation4 + $0x6a]] }
 0x17e   : > { %v1369_v51 = vadd.f32 %v1367_v48, %v1357_v44  ;;  %1789 = vrot.lane.b32.xlu0 %v1785_v10, %s4341_s12  ;;  %v1383_v40 = vpop.permute.xlu1 %1382  ;;  %v1875_v44 = vmul.f32 %v1874_v36, %v4880_v35  ;;  %v1888_v7 = vmul.f32 %v4870_v29, %v1886_v46 }
 0x180   : > { %v1373_v56 = vadd.f32 %v1372_v23, %v1369_v51  ;;  %v1381_v57 = vpop.permute.xlu0 %1380  ;;  %1803 = vrot.lane.b32.xlu1 %v1798_v49, %s4340_s10  ;;  %v1462_v49 = vmul.f32 %v1461_v42, %v4835_v60  ;;  %v1973_v42 = vstv %s5188_s3  ;;  %s5268_s3 = sld [smem:[#allocation4 + $0x5b]] }
 0x181   : > { %v1384_v63 = vsel %vm771_vm0, %v1381_v57, %v1383_v40  ;;  %v1903_v57 = vstv %s5135_s29  ;;  %s5217_s29 = sld [smem:[#allocation4 + $0x93]] }
 0x182   : > { %1801 = vrot.lane.b32.xlu0 %v1797_v54, %s4340_s10  ;;  %v1395_v62 = vpop.permute.xlu1 %1394  ;;  %v1386_v0 = vadd.f32 %v1384_v63, %v1373_v56  ;;  %v1459_v54 = vstv %s5130_s0  ;;  %v1887_v56 = vmul.f32 %v1886_v46, %v4880_v35  ;;  %s5208_s0 = sld [smem:[#allocation4 + $0x53]] }
 0x183   : > { %v1463_v60 = vadd.f32 %v1462_v49, %v1459_v54  ;;  %v1975_v49 = vmul.f32 %v4870_v29, %v1973_v42  ;;  %v1974_v54 = vmul.f32 %v1973_v42, %v4950_v32 }
 0x184   : > { %v1393_v1 = vpop.permute.xlu0 %1392  ;;  %1823 = vrot.lane.b32.xlu1 %v1818_v58, %s4341_s12 }
 0x185   : > { %v1396_v4 = vsel %vm784_vm1, %v1393_v1, %v1395_v62  ;;  %v1904_v62 = vmul.f32 %v1903_v57, %v4904_v55 }
 0x186   : > { %v1398_v9 = vadd.f32 %v1396_v4, %v1386_v0  ;;  %1821 = vrot.lane.b32.xlu0 %v1817_v61, %s4341_s12  ;;  %v1412_v14 = vpop.permute.xlu1 %1411  ;;  %v1905_v61 = vmul.f32 %v4870_v29, %v1903_v57  ;;  %v1915_v0 = vstv %s5146_s17  ;;  %v1491_v4 = vmul.f32 %v1490_v30, %v4855_v18  ;;  %s5228_s17 = sld [smem:[#allocation4 + $0xb3]] }
 0x187   : > { %v1916_v13 = vmul.f32 %v1915_v0, %v4904_v55 }
 0x188   : > { %v1402_v16 = vadd.f32 %v1401_v3, %v1398_v9  ;;  %v1410_v19 = vpop.permute.xlu0 %1409  ;;  %1835 = vrot.lane.b32.xlu1 %v1830_v5, %s4340_s10  ;;  %v1917_v9 = vmul.f32 %v4870_v29, %v1915_v0 }
 0x189   : > { %v1413_v17 = vsel %vm771_vm0, %v1410_v19, %v1412_v14  ;;  %v1932_v14 = vstv %s5156_s30  ;;  %s5237_s30 = sld [smem:[#allocation4 + $0xf3]] }
 0x18a   : > { %1833 = vrot.lane.b32.xlu0 %v1829_v12, %s4340_s10  ;;  %v1424_v25 = vpop.permute.xlu1 %1423  ;;  %v1415_v50 = vadd.f32 %v1413_v17, %v1402_v16 }
 0x18c   : > { %v1422_v26 = vpop.permute.xlu0 %1421  ;;  %1852 = vrot.lane.b32.xlu1 %v1847_v20, %s4341_s12  ;;  %v1934_v20 = vmul.f32 %v4870_v29, %v1932_v14 }
 0x18d   : > { %v1425_v15 = vsel %vm784_vm1, %v1422_v26, %v1424_v25 }
 0x18e   : > { %v1427_v33 = vadd.f32 %v1425_v15, %v1415_v50  ;;  %1850 = vrot.lane.b32.xlu0 %v1846_v22, %s4341_s12  ;;  %v1441_v37 = vpop.permute.xlu1 %1440  ;;  %v1933_v22 = vmul.f32 %v1932_v14, %v4928_v6  ;;  %v1946_v15 = vmul.f32 %v4870_v29, %v1944_v24 }
 0x190   : > { %v1431_v38 = vadd.f32 %v1430_v28, %v1427_v33  ;;  %v1439_v39 = vpop.permute.xlu0 %1438  ;;  %1864 = vrot.lane.b32.xlu1 %v1859_v43, %s4340_s10  ;;  %v1945_v33 = vmul.f32 %v1944_v24, %v4928_v6 }
 0x191   : > { %v1442_v10 = vsel %vm771_vm0, %v1439_v39, %v1441_v37 }
 0x192   : > { %1862 = vrot.lane.b32.xlu0 %v1858_v45, %s4340_s10  ;;  %v1453_v47 = vpop.permute.xlu1 %1452  ;;  %v1444_v23 = vadd.f32 %v1442_v10, %v1431_v38  ;;  %v1961_v45 = vstv %s5177_s16  ;;  %v1548_v10 = vstv %s5183_s27  ;;  %s5257_s16 = sld [smem:[#allocation4 + $0x3b]]  ;;  %s5263_s27 = sld [smem:[#allocation4 + $0x72]] }
 0x193   : > { %v1963_v39 = vmul.f32 %v4870_v29, %v1961_v45 }
 0x194   : > { %v1451_v48 = vpop.permute.xlu0 %1450  ;;  %1881 = vrot.lane.b32.xlu1 %v1876_v41, %s4341_s12  ;;  %v1962_v41 = vmul.f32 %v1961_v45, %v4950_v32  ;;  %v1635_v45 = vstv %s5243_s11  ;;  %s5325_s11 = sld [smem:[#allocation4 + $0x7a]] }
 0x195   : > { %v1454_v51 = vsel %vm784_vm1, %v1451_v48, %v1453_v47 }
 0x196   : > { %v1456_v40 = vadd.f32 %v1454_v51, %v1444_v23  ;;  %1879 = vrot.lane.b32.xlu0 %v1875_v44, %s4341_s12  ;;  %v1473_v63 = vpop.permute.xlu1 %1472  ;;  %v1549_v23 = vmul.f32 %v1548_v10, %v4904_v55  ;;  %v1636_v10 = vmul.f32 %v1635_v45, %v4971_v52 }
 0x198   : > { %4048 = vst [vmem:[%s4906_s26 + $0x8] sm:$0xff] %v1456_v40  ;;  %v1471_v58 = vpop.permute.xlu0 %1470  ;;  %1893 = vrot.lane.b32.xlu1 %v1888_v7, %s4340_s10  ;;  %v1990_v7 = vstv %s5197_s13  ;;  %s5277_s13 = sld [smem:[#allocation4 + $0x9b]] }
 0x199   : > { %v1474_v59 = vsel %vm771_vm0, %v1471_v58, %v1473_v63  ;;  %v1992_v63 = vmul.f32 %v4870_v29, %v1990_v7  ;;  %v1991_v58 = vmul.f32 %v1990_v7, %v4971_v52 }
 0x19a   : > { %1891 = vrot.lane.b32.xlu0 %v1887_v56, %s4340_s10  ;;  %v1485_v1 = vpop.permute.xlu1 %1484  ;;  %v1476_v2 = vadd.f32 %v1474_v59, %v1463_v60  ;;  %v1577_v60 = vstv %s5203_s4  ;;  %v2002_v59 = vstv %s5208_s0  ;;  %s5283_s4 = sld [smem:[#allocation4 + $0xd2]]  ;;  %s5288_s0 = sld [smem:[#allocation4 + $0xbb]] }
 0x19b   : > { %v1578_v0 = vmul.f32 %v1577_v60, %v4928_v6 }
 0x19c   : > { %v1483_v3 = vpop.permute.xlu0 %1482  ;;  %1910 = vrot.lane.b32.xlu1 %v1905_v61, %s4341_s12 }
 0x19d   : > { %v1486_v5 = vsel %vm784_vm1, %v1483_v3, %v1485_v1 }
 0x19e   : > { %v1488_v12 = vadd.f32 %v1486_v5, %v1476_v2  ;;  %1908 = vrot.lane.b32.xlu0 %v1904_v62, %s4341_s12  ;;  %v1502_v16 = vpop.permute.xlu1 %1501  ;;  %v2004_v2 = vmul.f32 %v4870_v29, %v2002_v59  ;;  %v2019_v5 = vstv %s5217_s29  ;;  %s5297_s29 = sld [smem:[#allocation4 + $0xfb]] }
 0x19f   : > { %v2021_v14 = vmul.f32 %v4870_v29, %v2019_v5 }
 0x1a0   : > { %v1492_v19 = vadd.f32 %v1491_v4, %v1488_v12  ;;  %v1500_v17 = vpop.permute.xlu0 %1499  ;;  %1922 = vrot.lane.b32.xlu1 %v1917_v9, %s4340_s10  ;;  %v2003_v4 = vmul.f32 %v2002_v59, %v4971_v52 }
 0x1a1   : > { %v1503_v18 = vsel %vm771_vm0, %v1500_v17, %v1502_v16  ;;  %v1606_v16 = vstv %s5223_s6  ;;  %v2031_v17 = vstv %s5228_s17  ;;  %s5303_s6 = sld [smem:[#allocation4 + $0x1a]]  ;;  %s5308_s17 = sld [smem:[#allocation4 + $0x11b]] }
 0x1a2   : > { %1920 = vrot.lane.b32.xlu0 %v1916_v13, %s4340_s10  ;;  %v1514_v25 = vpop.permute.xlu1 %1513  ;;  %v1505_v50 = vadd.f32 %v1503_v18, %v1492_v19  ;;  %v2020_v19 = vmul.f32 %v2019_v5, %v4992_v8  ;;  %v2118_v5 = vstv %s5288_s0  ;;  %s5374_s0 = sld [smem:[#allocation4 + $0x104]] }
 0x1a4   : > { %v1512_v26 = vpop.permute.xlu0 %1511  ;;  %1939 = vrot.lane.b32.xlu1 %v1934_v20, %s4341_s12 }
 0x1a5   : > { %v1515_v28 = vsel %vm784_vm1, %v1512_v26, %v1514_v25  ;;  %v2033_v25 = vmul.f32 %v4870_v29, %v2031_v17  ;;  %v2032_v26 = vmul.f32 %v2031_v17, %v4992_v8  ;;  %v2119_v17 = vmul.f32 %v2118_v5, %v5055_v11 }
 0x1a6   : > { %v1517_v43 = vadd.f32 %v1515_v28, %v1505_v50  ;;  %1937 = vrot.lane.b32.xlu0 %v1933_v22, %s4341_s12  ;;  %v1531_v36 = vpop.permute.xlu1 %1530  ;;  %v1607_v22 = vmul.f32 %v1606_v16, %v4950_v32 }
 0x1a8   : > { %v1521_v37 = vadd.f32 %v1520_v27, %v1517_v43  ;;  %v1529_v38 = vpop.permute.xlu0 %1528  ;;  %1951 = vrot.lane.b32.xlu1 %v1946_v15, %s4340_s10  ;;  %v2048_v27 = vstv %s5237_s30  ;;  %s5319_s30 = sld [smem:[#allocation4 + $0x24]] }
 0x1a9   : > { %v1532_v35 = vsel %vm771_vm0, %v1529_v38, %v1531_v36  ;;  %v2049_v36 = vmul.f32 %v2048_v27, %v5013_v31 }
 0x1aa   : > { %1949 = vrot.lane.b32.xlu0 %v1945_v33, %s4340_s10  ;;  %v1543_v44 = vpop.permute.xlu1 %1542  ;;  %v1534_v46 = vadd.f32 %v1532_v35, %v1521_v37  ;;  %v2050_v33 = vmul.f32 %v4870_v29, %v2048_v27  ;;  %v2060_v37 = vstv %s5248_s15  ;;  %s5330_s15 = sld [smem:[#allocation4 + $0x44]] }
 0x1ab   : > { %v2062_v42 = vmul.f32 %v4870_v29, %v2060_v37 }
 0x1ac   : > { %v1541_v47 = vpop.permute.xlu0 %1540  ;;  %1968 = vrot.lane.b32.xlu1 %v1963_v39, %s4341_s12 }
 0x1ad   : > { %v1544_v48 = vsel %vm784_vm1, %v1541_v47, %v1543_v44  ;;  %v2077_v47 = vstv %s5257_s16  ;;  %s5339_s16 = sld [smem:[#allocation4 + $0x84]] }
 0x1ae   : > { %v1546_v51 = vadd.f32 %v1544_v48, %v1534_v46  ;;  %1966 = vrot.lane.b32.xlu0 %v1962_v41, %s4341_s12  ;;  %v1560_v40 = vpop.permute.xlu1 %1559  ;;  %v2061_v46 = vmul.f32 %v2060_v37, %v5013_v31  ;;  %v2078_v7 = vmul.f32 %v2077_v47, %v5034_v53  ;;  %v2167_v37 = vstv %s5319_s30  ;;  %s5398_s30 = sld [smem:[#allocation4 + $0x4c]] }
 0x1b0   : > { %v1550_v56 = vadd.f32 %v1549_v23, %v1546_v51  ;;  %v1558_v57 = vpop.permute.xlu0 %1557  ;;  %1980 = vrot.lane.b32.xlu1 %v1975_v49, %s4340_s10  ;;  %v2079_v51 = vmul.f32 %v4870_v29, %v2077_v47 }
 0x1b1   : > { %v1561_v55 = vsel %vm771_vm0, %v1558_v57, %v1560_v40  ;;  %v2089_v40 = vstv %s5268_s3  ;;  %s5352_s3 = sld [smem:[#allocation4 + $0xa4]] }
 0x1b2   : > { %1978 = vrot.lane.b32.xlu0 %v1974_v54, %s4340_s10  ;;  %v1572_v61 = vpop.permute.xlu1 %1571  ;;  %v1563_v30 = vadd.f32 %v1561_v55, %v1550_v56  ;;  %v1664_v54 = vstv %s5263_s27  ;;  %s5347_s27 = sld [smem:[#allocation4 + $0xda]] }
 0x1b4   : > { %v1570_v62 = vpop.permute.xlu0 %1569  ;;  %1997 = vrot.lane.b32.xlu1 %v1992_v63, %s4341_s12  ;;  %v1665_v63 = vmul.f32 %v1664_v54, %v4992_v8 }
 0x1b5   : > { %v1573_v1 = vsel %vm784_vm1, %v1570_v62, %v1572_v61  ;;  %v2090_v61 = vmul.f32 %v2089_v40, %v5034_v53 }
 0x1b6   : > { %v1575_v3 = vadd.f32 %v1573_v1, %v1563_v30  ;;  %1995 = vrot.lane.b32.xlu0 %v1991_v58, %s4341_s12  ;;  %v1589_v9 = vpop.permute.xlu1 %1588  ;;  %v2091_v58 = vmul.f32 %v4870_v29, %v2089_v40  ;;  %v2106_v30 = vstv %s5277_s13  ;;  %v2196_v40 = vstv %s5339_s16  ;;  %s5361_s13 = sld [smem:[#allocation4 + $0xe4]] }
 0x1b7   : > { %s5421_s16 = sld [smem:[#allocation4 + $0xac]] }
 0x1b8   : > { %v1579_v12 = vadd.f32 %v1578_v0, %v1575_v3  ;;  %v1587_v13 = vpop.permute.xlu0 %1586  ;;  %2009 = vrot.lane.b32.xlu1 %v2004_v2, %s4340_s10  ;;  %v2108_v2 = vmul.f32 %v4870_v29, %v2106_v30  ;;  %v1693_v3 = vstv %s5283_s4  ;;  %v5313_v29 = vld [vmem:[#allocation2 + $0x8] sm:$0xff]  ;;  %s5369_s4 = sld [smem:[#allocation4 + $0x3]] }
 0x1b9   : > { %v1590_v6 = vsel %vm771_vm0, %v1587_v13, %v1589_v9  ;;  %v2120_v16 = vmul.f32 %v5313_v29, %v2118_v5 }
 0x1ba   : > { %2007 = vrot.lane.b32.xlu0 %v2003_v4, %s4340_s10  ;;  %v1601_v18 = vpop.permute.xlu1 %1600  ;;  %v1592_v20 = vadd.f32 %v1590_v6, %v1579_v12  ;;  %v2107_v4 = vmul.f32 %v2106_v30, %v5055_v11  ;;  %v1694_v6 = vmul.f32 %v1693_v3, %v5013_v31 }
 0x1bc   : > { %v1599_v21 = vpop.permute.xlu0 %1598  ;;  %2026 = vrot.lane.b32.xlu1 %v2021_v14, %s4341_s12  ;;  %v2225_v5 = vstv %s5361_s13  ;;  %s5442_s13 = sld [smem:[#allocation4 + $0x10c]] }
 0x1bd   : > { %v1602_v24 = vsel %vm784_vm1, %v1599_v21, %v1601_v18  ;;  %v2135_v18 = vstv %s5297_s29  ;;  %s5380_s29 = sld [smem:[#allocation7 + $0x3]] }
 0x1be   : > { %v1604_v50 = vadd.f32 %v1602_v24, %v1592_v20  ;;  %2024 = vrot.lane.b32.xlu0 %v2020_v19, %s4341_s12  ;;  %v1618_v28 = vpop.permute.xlu1 %1617  ;;  %v2137_v24 = vmul.f32 %v5313_v29, %v2135_v18 }
 0x1c0   : > { %v1608_v15 = vadd.f32 %v1607_v22, %v1604_v50  ;;  %v1616_v43 = vpop.permute.xlu0 %1615  ;;  %2038 = vrot.lane.b32.xlu1 %v2033_v25, %s4340_s10  ;;  %v1722_v25 = vstv %s5303_s6  ;;  %v2136_v50 = vmul.f32 %v2135_v18, %v5076_v34  ;;  %s5385_s6 = sld [smem:[#allocation4 + $0x2c]] }
 0x1c1   : > { %v1619_v32 = vsel %vm771_vm0, %v1616_v43, %v1618_v28  ;;  %v1723_v43 = vmul.f32 %v1722_v25, %v5034_v53 }
 0x1c2   : > { %2036 = vrot.lane.b32.xlu0 %v2032_v26, %s4340_s10  ;;  %v1630_v38 = vpop.permute.xlu1 %1629  ;;  %v1621_v35 = vadd.f32 %v1619_v32, %v1608_v15  ;;  %v2147_v26 = vstv %s5308_s17  ;;  %s5393_s17 = sld [smem:[#allocation4 + $0x63]] }
 0x1c3   : > { %v1810_v25 = vstv %s5380_s29  ;;  %s5463_s29 = sld [smem:[#allocation4 + $0x54]] }
 0x1c4   : > { %v1628_v39 = vpop.permute.xlu0 %1627  ;;  %2055 = vrot.lane.b32.xlu1 %v2050_v33, %s4341_s12  ;;  %v2149_v33 = vmul.f32 %v5313_v29, %v2147_v26 }
 0x1c5   : > { %v1631_v41 = vsel %vm784_vm1, %v1628_v39, %v1630_v38 }
 0x1c6   : > { %v1633_v44 = vadd.f32 %v1631_v41, %v1621_v35  ;;  %2053 = vrot.lane.b32.xlu0 %v2049_v36, %s4341_s12  ;;  %v1647_v23 = vpop.permute.xlu1 %1646  ;;  %v2148_v36 = vmul.f32 %v2147_v26, %v5076_v34  ;;  %v5341_v35 = vld [vmem:[#allocation2] sm:$0xff]  ;;  %v2169_v41 = vmul.f32 %v5313_v29, %v2167_v37 }
 0x1c8   : > { %v1637_v48 = vadd.f32 %v1636_v10, %v1633_v44  ;;  %v1645_v49 = vpop.permute.xlu0 %1644  ;;  %2067 = vrot.lane.b32.xlu1 %v2062_v42, %s4340_s10  ;;  %v1751_v42 = vstv %s5325_s11  ;;  %v2168_v44 = vmul.f32 %v2167_v37, %v5341_v35  ;;  %s5407_s11 = sld [smem:[#allocation4 + $0x8c]]  ;;  %v1841_v37 = vstv %s5393_s17  ;;  %s5479_s17 = sld [smem:[#allocation4 + $0xcb]] }
 0x1c9   : > { %v1648_v52 = vsel %vm771_vm0, %v1645_v49, %v1647_v23  ;;  %v1752_v49 = vmul.f32 %v1751_v42, %v5055_v11  ;;  %v4171_v42 = vld [vmem:[#allocation2 + $0x10] sm:$0xff] }
 0x1ca   : > { %2065 = vrot.lane.b32.xlu0 %v2061_v46, %s4340_s10  ;;  %v1659_v56 = vpop.permute.xlu1 %1658  ;;  %v1650_v57 = vadd.f32 %v1648_v52, %v1637_v48  ;;  %v2179_v46 = vstv %s5330_s15  ;;  %s5416_s15 = sld [smem:[#allocation4 + $0xc3]] }
 0x1cc   : > { %v1657_v55 = vpop.permute.xlu0 %1656  ;;  %2084 = vrot.lane.b32.xlu1 %v2079_v51, %s4341_s12  ;;  %v2181_v51 = vmul.f32 %v5313_v29, %v2179_v46 }
 0x1cd   : > { %v1660_v60 = vsel %vm784_vm1, %v1657_v55, %v1659_v56 }
 0x1ce   : > { %v1662_v59 = vadd.f32 %v1660_v60, %v1650_v57  ;;  %2082 = vrot.lane.b32.xlu0 %v2078_v7, %s4341_s12  ;;  %v1676_v62 = vpop.permute.xlu1 %1675  ;;  %v2180_v7 = vmul.f32 %v2179_v46, %v5341_v35  ;;  %v5363_v57 = vld [vmem:[#allocation2 + $0x10] sm:$0xff]  ;;  %v2198_v60 = vmul.f32 %v5313_v29, %v2196_v40 }
 0x1d0   : > { %v1666_v0 = vadd.f32 %v1665_v63, %v1662_v59  ;;  %v1674_v1 = vpop.permute.xlu0 %1673  ;;  %2096 = vrot.lane.b32.xlu1 %v2091_v58, %s4340_s10  ;;  %v1780_v58 = vstv %s5347_s27  ;;  %v2197_v59 = vmul.f32 %v2196_v40, %v5363_v57  ;;  %s5429_s27 = sld [smem:[#allocation4 + $0xec]] }
 0x1d1   : > { %v1677_v8 = vsel %vm771_vm0, %v1674_v1, %v1676_v62  ;;  %v1781_v1 = vmul.f32 %v1780_v58, %v5076_v34  ;;  %v5387_v34 = vld [vmem:[#allocation2 + $0x20] sm:$0xff] }
 0x1d2   : > { %2094 = vrot.lane.b32.xlu0 %v2090_v61, %s4340_s10  ;;  %v1688_v9 = vpop.permute.xlu1 %1687  ;;  %v1679_v12 = vadd.f32 %v1677_v8, %v1666_v0  ;;  %v2208_v61 = vstv %s5352_s3  ;;  %s5437_s3 = sld [smem:[#allocation4 + $0xb]] }
 0x1d4   : > { %v1686_v13 = vpop.permute.xlu0 %1685  ;;  %2113 = vrot.lane.b32.xlu1 %v2108_v2, %s4341_s12  ;;  %v2210_v2 = vmul.f32 %v5313_v29, %v2208_v61 }
 0x1d5   : > { %v1689_v14 = vsel %vm784_vm1, %v1686_v13, %v1688_v9 }
 0x1d6   : > { %v1691_v19 = vadd.f32 %v1689_v14, %v1679_v12  ;;  %2111 = vrot.lane.b32.xlu0 %v2107_v4, %s4341_s12  ;;  %v1705_v20 = vpop.permute.xlu1 %1704  ;;  %v2209_v4 = vmul.f32 %v2208_v61, %v5363_v57  ;;  %v2227_v14 = vmul.f32 %v5313_v29, %v2225_v5  ;;  %v4172_v61 = vld [vmem:[#allocation2 + $0x20] sm:$0xff] }
 0x1d8   : > { %v1695_v31 = vadd.f32 %v1694_v6, %v1691_v19  ;;  %v1703_v21 = vpop.permute.xlu0 %1702  ;;  %2125 = vrot.lane.b32.xlu1 %v2120_v16, %s4340_s10  ;;  %v1812_v16 = vstv %s5369_s4  ;;  %v2226_v19 = vmul.f32 %v2225_v5, %v5387_v34  ;;  %s5450_s4 = sld [smem:[#allocation4 + $0x34]] }
 0x1d9   : > { %v1706_v22 = vsel %vm771_vm0, %v1703_v21, %v1705_v20  ;;  %v4170_v21 = vld [vmem:[#allocation2] sm:$0xff] }
 0x1da   : > { %2123 = vrot.lane.b32.xlu0 %v2119_v17, %s4340_s10  ;;  %v1717_v27 = vpop.permute.xlu1 %1716  ;;  %v1708_v28 = vadd.f32 %v1706_v22, %v1695_v31  ;;  %v2237_v17 = vstv %s5374_s0  ;;  %v1813_v22 = vmul.f32 %v4170_v21, %v1812_v16  ;;  %s5458_s0 = sld [smem:[#allocation4 + $0x6b]]  ;;  %v2324_v16 = vstv %s5442_s13  ;;  %s5526_s13 = sld [smem:[#allocation4 + $0x5c]] }
 0x1dc   : > { %v1715_v15 = vpop.permute.xlu0 %1714  ;;  %2142 = vrot.lane.b32.xlu1 %v2137_v24, %s4341_s12 }
 0x1dd   : > { %v1718_v32 = vsel %vm784_vm1, %v1715_v15, %v1717_v27  ;;  %v2238_v27 = vmul.f32 %v2237_v17, %v5387_v34 }
 0x1de   : > { %v1720_v45 = vadd.f32 %v1718_v32, %v1708_v28  ;;  %2140 = vrot.lane.b32.xlu0 %v2136_v50, %s4341_s12  ;;  %v1734_v38 = vpop.permute.xlu1 %1733  ;;  %v2239_v50 = vmul.f32 %v5313_v29, %v2237_v17  ;;  %v2254_v28 = vstv %s5385_s6  ;;  %v1814_v32 = vadd.f32 %v1813_v22, %v1810_v25  ;;  %s5471_s6 = sld [smem:[#allocation4 + $0x94]] }
 0x1df   : > { %v2326_v22 = vmul.f32 %v5313_v29, %v2324_v16 }
 0x1e0   : > { %v1724_v53 = vadd.f32 %v1723_v43, %v1720_v45  ;;  %v1732_v39 = vpop.permute.xlu0 %1731  ;;  %2154 = vrot.lane.b32.xlu1 %v2149_v33, %s4340_s10  ;;  %v5409_v43 = vld [vmem:[#allocation2 + $0x30] sm:$0xff] }
 0x1e1   : > { %v1735_v10 = vsel %vm771_vm0, %v1732_v39, %v1734_v38  ;;  %v2255_v38 = vmul.f32 %v2254_v28, %v5409_v43 }
 0x1e2   : > { %2152 = vrot.lane.b32.xlu0 %v2148_v36, %s4340_s10  ;;  %v1746_v47 = vpop.permute.xlu1 %1745  ;;  %v1737_v23 = vadd.f32 %v1735_v10, %v1724_v53  ;;  %v2256_v36 = vmul.f32 %v5313_v29, %v2254_v28  ;;  %v2266_v53 = vstv %s5398_s30  ;;  %s5484_s30 = sld [smem:[#allocation4 + $0xb4]] }
 0x1e4   : > { %v1744_v48 = vpop.permute.xlu0 %1743  ;;  %2174 = vrot.lane.b32.xlu1 %v2169_v41, %s4341_s12 }
 0x1e5   : > { %v1747_v52 = vsel %vm784_vm1, %v1744_v48, %v1746_v47  ;;  %v2268_v47 = vmul.f32 %v5313_v29, %v2266_v53  ;;  %v2267_v48 = vmul.f32 %v2266_v53, %v5409_v43 }
 0x1e6   : > { %v1749_v54 = vadd.f32 %v1747_v52, %v1737_v23  ;;  %2172 = vrot.lane.b32.xlu0 %v2168_v44, %s4341_s12  ;;  %v1763_v56 = vpop.permute.xlu1 %1762  ;;  %v1842_v44 = vmul.f32 %v4171_v42, %v1841_v37  ;;  %v2353_v37 = vstv %s5463_s29  ;;  %s5547_s29 = sld [smem:[#allocation4 + $0xbc]] }
 0x1e8   : > { %v1753_v11 = vadd.f32 %v1752_v49, %v1749_v54  ;;  %v1761_v55 = vpop.permute.xlu0 %1760  ;;  %2186 = vrot.lane.b32.xlu1 %v2181_v51, %s4340_s10  ;;  %v2283_v49 = vstv %s5407_s11  ;;  %v5431_v51 = vld [vmem:[#allocation2 + $0x40] sm:$0xff]  ;;  %s5492_s11 = sld [smem:[#allocation4 + $0xf4]] }
 0x1e9   : > { %v1764_v63 = vsel %vm771_vm0, %v1761_v55, %v1763_v56  ;;  %v2285_v56 = vmul.f32 %v5313_v29, %v2283_v49  ;;  %v2284_v55 = vmul.f32 %v2283_v49, %v5431_v51  ;;  %v5494_v49 = vld [vmem:[#allocation2 + $0x70] sm:$0xff] }
 0x1ea   : > { %2184 = vrot.lane.b32.xlu0 %v2180_v7, %s4340_s10  ;;  %v1775_v30 = vpop.permute.xlu1 %1774  ;;  %v1766_v62 = vadd.f32 %v1764_v63, %v1753_v11  ;;  %v1870_v11 = vstv %s5416_s15  ;;  %v2295_v63 = vstv %s5421_s16  ;;  %s5500_s15 = sld [smem:[#allocation4 + $0x13]]  ;;  %s5505_s16 = sld [smem:[#allocation4 + $0x114]] }
 0x1ec   : > { %v1773_v0 = vpop.permute.xlu0 %1772  ;;  %2203 = vrot.lane.b32.xlu1 %v2198_v60, %s4341_s12 }
 0x1ed   : > { %v1776_v8 = vsel %vm784_vm1, %v1773_v0, %v1775_v30  ;;  %v1871_v30 = vmul.f32 %v4172_v61, %v1870_v11  ;;  %v2297_v0 = vmul.f32 %v5313_v29, %v2295_v63 }
 0x1ee   : > { %v1778_v3 = vadd.f32 %v1776_v8, %v1766_v62  ;;  %2201 = vrot.lane.b32.xlu0 %v2197_v59, %s4341_s12  ;;  %v1792_v9 = vpop.permute.xlu1 %1791  ;;  %v2296_v8 = vmul.f32 %v2295_v63, %v5431_v51 }
 0x1f0   : > { %v1782_v12 = vadd.f32 %v1781_v1, %v1778_v3  ;;  %v1790_v13 = vpop.permute.xlu0 %1789  ;;  %2215 = vrot.lane.b32.xlu1 %v2210_v2, %s4340_s10  ;;  %v2312_v2 = vstv %s5429_s27  ;;  %s5513_s27 = sld [smem:[#allocation4 + $0x3c]] }
 0x1f1   : > { %v1793_v6 = vsel %vm771_vm0, %v1790_v13, %v1792_v9  ;;  %v2314_v13 = vmul.f32 %v5313_v29, %v2312_v2 }
 0x1f2   : > { %2213 = vrot.lane.b32.xlu0 %v2209_v4, %s4340_s10  ;;  %v1804_v18 = vpop.permute.xlu1 %1803  ;;  %v1795_v20 = vadd.f32 %v1793_v6, %v1782_v12  ;;  %v5452_v4 = vld [vmem:[#allocation2 + $0x50] sm:$0xff]  ;;  %v1899_v6 = vstv %s5437_s3  ;;  %s5521_s3 = sld [smem:[#allocation4 + $0x73]] }
 0x1f3   : > { %v2325_v25 = vmul.f32 %v2324_v16, %v5452_v4  ;;  %v2411_v16 = vstv %s5505_s16  ;;  %s5589_s16 = sld [smem:[#allocation4 + $0x45]] }
 0x1f4   : > { %v1802_v31 = vpop.permute.xlu0 %1801  ;;  %2232 = vrot.lane.b32.xlu1 %v2227_v14, %s4341_s12  ;;  %v2313_v14 = vmul.f32 %v2312_v2, %v5452_v4 }
 0x1f5   : > { %v1805_v24 = vsel %vm784_vm1, %v1802_v31, %v1804_v18 }
 0x1f6   : > { %v1807_v26 = vadd.f32 %v1805_v24, %v1795_v20  ;;  %2230 = vrot.lane.b32.xlu0 %v2226_v19, %s4341_s12  ;;  %v1824_v15 = vpop.permute.xlu1 %1823  ;;  %v4173_v20 = vld [vmem:[#allocation2 + $0x30] sm:$0xff] }
 0x1f7   : > { %v1900_v31 = vmul.f32 %v4173_v20, %v1899_v6  ;;  %v1986_v6 = vstv %s5500_s15  ;;  %v4176_v20 = vld [vmem:[#allocation2 + $0x60] sm:$0xff]  ;;  %s5584_s15 = sld [smem:[#allocation4 + $0x7b]] }
 0x1f8   : > { %4049 = vst [vmem:[%s4906_s26 + $0x10] sm:$0xff] %v1807_v26  ;;  %v1822_v33 = vpop.permute.xlu0 %1821  ;;  %2244 = vrot.lane.b32.xlu1 %v2239_v50, %s4340_s10  ;;  %v2341_v50 = vstv %s5450_s4  ;;  %s5534_s4 = sld [smem:[#allocation4 + $0x9c]] }
 0x1f9   : > { %v1825_v45 = vsel %vm771_vm0, %v1822_v33, %v1824_v15  ;;  %v2343_v33 = vmul.f32 %v5313_v29, %v2341_v50 }
 0x1fa   : > { %2242 = vrot.lane.b32.xlu0 %v2238_v27, %s4340_s10  ;;  %v1836_v39 = vpop.permute.xlu1 %1835  ;;  %v1827_v10 = vadd.f32 %v1825_v45, %v1814_v32  ;;  %v5473_v27 = vld [vmem:[#allocation2 + $0x60] sm:$0xff]  ;;  %v1928_v45 = vstv %s5458_s0  ;;  %s5542_s0 = sld [smem:[#allocation4 + $0xd3]] }
 0x1fc   : > { %v1834_v41 = vpop.permute.xlu0 %1833  ;;  %2261 = vrot.lane.b32.xlu1 %v2256_v36, %s4341_s12  ;;  %v2342_v36 = vmul.f32 %v2341_v50, %v5473_v27  ;;  %v2428_v50 = vstv %s5513_s27  ;;  %s5597_s27 = sld [smem:[#allocation4 + $0x85]] }
 0x1fd   : > { %v1837_v46 = vsel %vm784_vm1, %v1834_v41, %v1836_v39 }
 0x1fe   : > { %v1839_v23 = vadd.f32 %v1837_v46, %v1827_v10  ;;  %2259 = vrot.lane.b32.xlu0 %v2255_v38, %s4341_s12  ;;  %v1853_v52 = vpop.permute.xlu1 %1852  ;;  %v4174_v10 = vld [vmem:[#allocation2 + $0x40] sm:$0xff] }
 0x1ff   : > { %v1929_v41 = vmul.f32 %v4174_v10, %v1928_v45  ;;  %v2430_v45 = vmul.f32 %v5313_v29, %v2428_v50 }
 0x200   : > { %v1843_v54 = vadd.f32 %v1842_v44, %v1839_v23  ;;  %v1851_v7 = vpop.permute.xlu0 %1850  ;;  %2273 = vrot.lane.b32.xlu1 %v2268_v47, %s4340_s10  ;;  %v2355_v44 = vmul.f32 %v5313_v29, %v2353_v37  ;;  %v2354_v47 = vmul.f32 %v2353_v37, %v5473_v27  ;;  %v2370_v23 = vstv %s5471_s6  ;;  %s5555_s6 = sld [smem:[#allocation4 + $0xfc]] }
 0x201   : > { %v1854_v40 = vsel %vm771_vm0, %v1851_v7, %v1853_v52  ;;  %v2371_v11 = vmul.f32 %v2370_v23, %v5494_v49 }
 0x202   : > { %2271 = vrot.lane.b32.xlu0 %v2267_v48, %s4340_s10  ;;  %v1865_v60 = vpop.permute.xlu1 %1864  ;;  %v1856_v58 = vadd.f32 %v1854_v40, %v1843_v54  ;;  %v2372_v40 = vmul.f32 %v5313_v29, %v2370_v23 }
 0x204   : > { %v1863_v59 = vpop.permute.xlu0 %1862  ;;  %2290 = vrot.lane.b32.xlu1 %v2285_v56, %s4341_s12  ;;  %v1957_v56 = vstv %s5479_s17  ;;  %s5563_s17 = sld [smem:[#allocation4 + $0x1b]] }
 0x205   : > { %v1866_v62 = vsel %vm784_vm1, %v1863_v59, %v1865_v60  ;;  %v4175_v59 = vld [vmem:[#allocation2 + $0x50] sm:$0xff] }
 0x206   : > { %v1868_v1 = vadd.f32 %v1866_v62, %v1856_v58  ;;  %2288 = vrot.lane.b32.xlu0 %v2284_v55, %s4341_s12  ;;  %v1882_v3 = vpop.permute.xlu1 %1881  ;;  %v2382_v55 = vstv %s5484_s30  ;;  %v1958_v61 = vmul.f32 %v4175_v59, %v1957_v56  ;;  %s5568_s30 = sld [smem:[#allocation4 + $0x11c]] }
 0x207   : > { %v2384_v62 = vmul.f32 %v5313_v29, %v2382_v55 }
 0x208   : > { %v1872_v5 = vadd.f32 %v1871_v30, %v1868_v1  ;;  %v1880_v9 = vpop.permute.xlu0 %1879  ;;  %2302 = vrot.lane.b32.xlu1 %v2297_v0, %s4340_s10  ;;  %v2383_v1 = vmul.f32 %v2382_v55, %v5494_v49  ;;  %v2044_v55 = vstv %s5542_s0  ;;  %s5622_s0 = sld [smem:[#allocation4 + $0x4]] }
 0x209   : > { %v1883_v12 = vsel %vm771_vm0, %v1880_v9, %v1882_v3  ;;  %v5515_v3 = vld [vmem:[#allocation2 + $0x80] sm:$0xff] }
 0x20a   : > { %2300 = vrot.lane.b32.xlu0 %v2296_v8, %s4340_s10  ;;  %v1894_v19 = vpop.permute.xlu1 %1893  ;;  %v1885_v17 = vadd.f32 %v1883_v12, %v1872_v5  ;;  %v2399_v8 = vstv %s5492_s11  ;;  %s5576_s11 = sld [smem:[#allocation4 + $0x25]] }
 0x20c   : > { %v1892_v18 = vpop.permute.xlu0 %1891  ;;  %2319 = vrot.lane.b32.xlu1 %v2314_v13, %s4341_s12  ;;  %v2401_v13 = vmul.f32 %v5313_v29, %v2399_v8 }
 0x20d   : > { %v1895_v21 = vsel %vm784_vm1, %v1892_v18, %v1894_v19 }
 0x20e   : > { %v1897_v24 = vadd.f32 %v1895_v21, %v1885_v17  ;;  %2317 = vrot.lane.b32.xlu0 %v2313_v14, %s4341_s12  ;;  %v1911_v26 = vpop.permute.xlu1 %1910  ;;  %v2400_v14 = vmul.f32 %v2399_v8, %v5515_v3 }
 0x210   : > { %v1901_v28 = vadd.f32 %v1900_v31, %v1897_v24  ;;  %v1909_v15 = vpop.permute.xlu0 %1908  ;;  %2331 = vrot.lane.b32.xlu1 %v2326_v22, %s4340_s10  ;;  %v1987_v31 = vmul.f32 %v4176_v20, %v1986_v6  ;;  %v2413_v22 = vmul.f32 %v5313_v29, %v2411_v16 }
 0x211   : > { %v1912_v32 = vsel %vm771_vm0, %v1909_v15, %v1911_v26 }
 0x212   : > { %2329 = vrot.lane.b32.xlu0 %v2325_v25, %s4340_s10  ;;  %v1923_v38 = vpop.permute.xlu1 %1922  ;;  %v1914_v53 = vadd.f32 %v1912_v32, %v1901_v28  ;;  %v2412_v25 = vmul.f32 %v2411_v16, %v5515_v3  ;;  %v5536_v28 = vld [vmem:[#allocation2 + $0x90] sm:$0xff] }
 0x213   : > { %v2429_v37 = vmul.f32 %v2428_v50, %v5536_v28 }
 0x214   : > { %v1921_v39 = vpop.permute.xlu0 %1920  ;;  %2348 = vrot.lane.b32.xlu1 %v2343_v33, %s4341_s12 }
 0x215   : > { %v1924_v42 = vsel %vm784_vm1, %v1921_v39, %v1923_v38  ;;  %v2440_v38 = vstv %s5526_s13  ;;  %s5608_s13 = sld [smem:[#allocation4 + $0xa5]] }
 0x216   : > { %v1926_v46 = vadd.f32 %v1924_v42, %v1914_v53  ;;  %2346 = vrot.lane.b32.xlu0 %v2342_v36, %s4341_s12  ;;  %v1940_v48 = vpop.permute.xlu1 %1939  ;;  %v2015_v36 = vstv %s5521_s3  ;;  %v2441_v23 = vmul.f32 %v2440_v38, %v5536_v28  ;;  %s5603_s3 = sld [smem:[#allocation4 + $0xdb]] }
 0x218   : > { %v1930_v52 = vadd.f32 %v1929_v41, %v1926_v46  ;;  %v1938_v54 = vpop.permute.xlu0 %1937  ;;  %2360 = vrot.lane.b32.xlu1 %v2355_v44, %s4340_s10  ;;  %v4177_v41 = vld [vmem:[#allocation2 + $0x70] sm:$0xff]  ;;  %v2442_v46 = vmul.f32 %v5313_v29, %v2440_v38 }
 0x219   : > { %v1941_v7 = vsel %vm771_vm0, %v1938_v54, %v1940_v48  ;;  %v2016_v42 = vmul.f32 %v4177_v41, %v2015_v36  ;;  %v2457_v48 = vstv %s5534_s4  ;;  %v5557_v54 = vld [vmem:[#allocation2 + $0xa0] sm:$0xff]  ;;  %s5616_s4 = sld [smem:[#allocation4 + $0xe5]] }
 0x21a   : > { %2358 = vrot.lane.b32.xlu0 %v2354_v47, %s4340_s10  ;;  %v1952_v63 = vpop.permute.xlu1 %1951  ;;  %v1943_v60 = vadd.f32 %v1941_v7, %v1930_v52 }
 0x21c   : > { %v1950_v58 = vpop.permute.xlu0 %1949  ;;  %2377 = vrot.lane.b32.xlu1 %v2372_v40, %s4341_s12 }
 0x21d   : > { %v1953_v30 = vsel %vm784_vm1, %v1950_v58, %v1952_v63  ;;  %v2458_v63 = vmul.f32 %v2457_v48, %v5557_v54 }
 0x21e   : > { %v1955_v0 = vadd.f32 %v1953_v30, %v1943_v60  ;;  %2375 = vrot.lane.b32.xlu0 %v2371_v11, %s4341_s12  ;;  %v1969_v2 = vpop.permute.xlu1 %1968  ;;  %v2459_v11 = vmul.f32 %v5313_v29, %v2457_v48  ;;  %v2469_v60 = vstv %s5547_s29  ;;  %v4178_v30 = vld [vmem:[#allocation2 + $0x80] sm:$0xff]  ;;  %s5627_s29 = sld [smem:[#allocation4 + $0x105]] }
 0x220   : > { %v1959_v5 = vadd.f32 %v1958_v61, %v1955_v0  ;;  %v1967_v9 = vpop.permute.xlu0 %1966  ;;  %2389 = vrot.lane.b32.xlu1 %v2384_v62, %s4340_s10  ;;  %v2045_v62 = vmul.f32 %v4178_v30, %v2044_v55 }
 0x221   : > { %v1970_v12 = vsel %vm771_vm0, %v1967_v9, %v1969_v2  ;;  %v2470_v2 = vmul.f32 %v2469_v60, %v5557_v54 }
 0x222   : > { %2387 = vrot.lane.b32.xlu0 %v2383_v1, %s4340_s10  ;;  %v1981_v19 = vpop.permute.xlu1 %1980  ;;  %v1972_v17 = vadd.f32 %v1970_v12, %v1959_v5  ;;  %v2471_v1 = vmul.f32 %v5313_v29, %v2469_v60  ;;  %v2486_v5 = vstv %s5555_s6  ;;  %v5578_v12 = vld [vmem:[#allocation2 + $0xb0] sm:$0xff]  ;;  %s5632_s6 = sld [smem:[#allocation7 + $0x4]] }
 0x223   : > { %v2488_v16 = vmul.f32 %v5313_v29, %v2486_v5 }
 0x224   : > { %v1979_v18 = vpop.permute.xlu0 %1978  ;;  %2406 = vrot.lane.b32.xlu1 %v2401_v13, %s4341_s12 }
 0x225   : > { %v1982_v21 = vsel %vm784_vm1, %v1979_v18, %v1981_v19  ;;  %v2073_v19 = vstv %s5563_s17  ;;  %v2498_v18 = vstv %s5568_s30  ;;  %s5637_s17 = sld [smem:[#allocation4 + $0x2d]]  ;;  %s5643_s30 = sld [smem:[#allocation4 + $0x64]] }
 0x226   : > { %v1984_v24 = vadd.f32 %v1982_v21, %v1972_v17  ;;  %2404 = vrot.lane.b32.xlu0 %v2400_v14, %s4341_s12  ;;  %v1998_v26 = vpop.permute.xlu1 %1997  ;;  %v2487_v17 = vmul.f32 %v2486_v5, %v5578_v12  ;;  %v2500_v50 = vmul.f32 %v5313_v29, %v2498_v18 }
 0x228   : > { %v1988_v15 = vadd.f32 %v1987_v31, %v1984_v24  ;;  %v1996_v32 = vpop.permute.xlu0 %1995  ;;  %2418 = vrot.lane.b32.xlu1 %v2413_v22, %s4340_s10  ;;  %v4179_v22 = vld [vmem:[#allocation2 + $0x90] sm:$0xff] }
 0x229   : > { %v1999_v33 = vsel %vm771_vm0, %v1996_v32, %v1998_v26  ;;  %v2074_v24 = vmul.f32 %v4179_v22, %v2073_v19  ;;  %v2518_v32 = vstv %s5576_s11  ;;  %s5648_s11 = sld [smem:[#allocation4 + $0x4d]] }
 0x22a   : > { %2416 = vrot.lane.b32.xlu0 %v2412_v25, %s4340_s10  ;;  %v2010_v53 = vpop.permute.xlu1 %2009  ;;  %v2001_v39 = vadd.f32 %v1999_v33, %v1988_v15  ;;  %v2499_v15 = vmul.f32 %v2498_v18, %v5578_v12  ;;  %v2520_v38 = vmul.f32 %v5313_v29, %v2518_v32 }
 0x22c   : > { %v2008_v10 = vpop.permute.xlu0 %2007  ;;  %2435 = vrot.lane.b32.xlu1 %v2430_v45, %s4341_s12 }
 0x22d   : > { %v2011_v44 = vsel %vm784_vm1, %v2008_v10, %v2010_v53  ;;  %v2102_v53 = vstv %s5584_s15  ;;  %v2530_v10 = vstv %s5589_s16  ;;  %s5658_s15 = sld [smem:[#allocation4 + $0x8d]]  ;;  %s5665_s16 = sld [smem:[#allocation4 + $0xc4]] }
 0x22e   : > { %v2013_v47 = vadd.f32 %v2011_v44, %v2001_v39  ;;  %2433 = vrot.lane.b32.xlu0 %v2429_v37, %s4341_s12  ;;  %v2027_v52 = vpop.permute.xlu1 %2026  ;;  %v2519_v39 = vmul.f32 %v2518_v32, %v5341_v35  ;;  %v2532_v48 = vmul.f32 %v5313_v29, %v2530_v10 }
 0x230   : > { %v2017_v7 = vadd.f32 %v2016_v42, %v2013_v47  ;;  %v2025_v40 = vpop.permute.xlu0 %2024  ;;  %2447 = vrot.lane.b32.xlu1 %v2442_v46, %s4340_s10  ;;  %v4180_v46 = vld [vmem:[#allocation2 + $0xa0] sm:$0xff] }
 0x231   : > { %v2028_v56 = vsel %vm771_vm0, %v2025_v40, %v2027_v52  ;;  %v2103_v47 = vmul.f32 %v4180_v46, %v2102_v53  ;;  %v2547_v40 = vstv %s5597_s27  ;;  %s5670_s27 = sld [smem:[#allocation4 + $0xad]] }
 0x232   : > { %2445 = vrot.lane.b32.xlu0 %v2441_v23, %s4340_s10  ;;  %v2039_v58 = vpop.permute.xlu1 %2038  ;;  %v2030_v59 = vadd.f32 %v2028_v56, %v2017_v7  ;;  %v2531_v7 = vmul.f32 %v2530_v10, %v5341_v35  ;;  %v2549_v60 = vmul.f32 %v5313_v29, %v2547_v40  ;;  %v2192_v10 = vstv %s5643_s30  ;;  %s5725_s30 = sld [smem:[#allocation4 + $0xcc]] }
 0x234   : > { %v2037_v61 = vpop.permute.xlu0 %2036  ;;  %2464 = vrot.lane.b32.xlu1 %v2459_v11, %s4341_s12 }
 0x235   : > { %v2040_v0 = vsel %vm784_vm1, %v2037_v61, %v2039_v58  ;;  %v2131_v58 = vstv %s5603_s3  ;;  %v2559_v61 = vstv %s5608_s13  ;;  %s5679_s3 = sld [smem:[#allocation4 + $0xed]]  ;;  %s5685_s13 = sld [smem:[#allocation4 + $0xc]] }
 0x236   : > { %v2042_v8 = vadd.f32 %v2040_v0, %v2030_v59  ;;  %2462 = vrot.lane.b32.xlu0 %v2458_v63, %s4341_s12  ;;  %v2056_v9 = vpop.permute.xlu1 %2055  ;;  %v2548_v59 = vmul.f32 %v2547_v40, %v5363_v57  ;;  %v2561_v5 = vmul.f32 %v5313_v29, %v2559_v61 }
 0x238   : > { %v2046_v13 = vadd.f32 %v2045_v62, %v2042_v8  ;;  %v2054_v6 = vpop.permute.xlu0 %2053  ;;  %2476 = vrot.lane.b32.xlu1 %v2471_v1, %s4340_s10  ;;  %v4181_v1 = vld [vmem:[#allocation2 + $0xb0] sm:$0xff] }
 0x239   : > { %v2057_v14 = vsel %vm771_vm0, %v2054_v6, %v2056_v9  ;;  %v2132_v8 = vmul.f32 %v4181_v1, %v2131_v58  ;;  %v2576_v6 = vstv %s5616_s4  ;;  %v2221_v58 = vstv %s5665_s16  ;;  %s5690_s4 = sld [smem:[#allocation4 + $0x10d]]  ;;  %s5745_s16 = sld [smem:[#allocation4 + $0x14]] }
 0x23a   : > { %2474 = vrot.lane.b32.xlu0 %v2470_v2, %s4340_s10  ;;  %v2068_v20 = vpop.permute.xlu1 %2067  ;;  %v2059_v31 = vadd.f32 %v2057_v14, %v2046_v13  ;;  %v2560_v13 = vmul.f32 %v2559_v61, %v5363_v57  ;;  %v2578_v18 = vmul.f32 %v5313_v29, %v2576_v6  ;;  %v2646_v61 = vstv %s5670_s27  ;;  %s5750_s27 = sld [smem:[#allocation4 + $0x115]] }
 0x23b   : > { %v2222_v1 = vmul.f32 %v2221_v58, %v5387_v34 }
 0x23c   : > { %v2066_v21 = vpop.permute.xlu0 %2065  ;;  %2493 = vrot.lane.b32.xlu1 %v2488_v16, %s4341_s12 }
 0x23d   : > { %v2069_v25 = vsel %vm784_vm1, %v2066_v21, %v2068_v20  ;;  %v2163_v20 = vstv %s5622_s0  ;;  %v2588_v21 = vstv %s5627_s29  ;;  %s5699_s0 = sld [smem:[#allocation4 + $0x35]]  ;;  %s5705_s29 = sld [smem:[#allocation4 + $0x6c]] }
 0x23e   : > { %v2071_v26 = vadd.f32 %v2069_v25, %v2059_v31  ;;  %2491 = vrot.lane.b32.xlu0 %v2487_v17, %s4341_s12  ;;  %v2085_v33 = vpop.permute.xlu1 %2084  ;;  %v2577_v31 = vmul.f32 %v2576_v6, %v5387_v34  ;;  %v2590_v32 = vmul.f32 %v5313_v29, %v2588_v21 }
 0x240   : > { %v2075_v45 = vadd.f32 %v2074_v24, %v2071_v26  ;;  %v2083_v36 = vpop.permute.xlu0 %2082  ;;  %2505 = vrot.lane.b32.xlu1 %v2500_v50, %s4340_s10  ;;  %v2164_v50 = vmul.f32 %v2163_v20, %v5341_v35  ;;  %v2675_v20 = vstv %s5690_s4  ;;  %s5772_s4 = sld [smem:[#allocation4 + $0x5d]] }
 0x241   : > { %v2086_v37 = vsel %vm771_vm0, %v2083_v36, %v2085_v33  ;;  %v2605_v36 = vstv %s5637_s17  ;;  %s5719_s17 = sld [smem:[#allocation4 + $0x95]] }
 0x242   : > { %2503 = vrot.lane.b32.xlu0 %v2499_v15, %s4340_s10  ;;  %v2097_v41 = vpop.permute.xlu1 %2096  ;;  %v2088_v42 = vadd.f32 %v2086_v37, %v2075_v45  ;;  %v2161_v15 = vstv %s5632_s6  ;;  %v2589_v45 = vmul.f32 %v2588_v21, %v5387_v34  ;;  %s5710_s6 = sld [smem:[#allocation4 + $0x55]] }
 0x243   : > { %v2165_v35 = vadd.f32 %v2164_v50, %v2161_v15  ;;  %v2677_v50 = vmul.f32 %v5313_v29, %v2675_v20  ;;  %v2676_v15 = vmul.f32 %v2675_v20, %v5452_v4 }
 0x244   : > { %v2095_v44 = vpop.permute.xlu0 %2094  ;;  %2525 = vrot.lane.b32.xlu1 %v2520_v38, %s4341_s12 }
 0x245   : > { %v2098_v23 = vsel %vm784_vm1, %v2095_v44, %v2097_v41  ;;  %v2606_v41 = vmul.f32 %v2605_v36, %v5409_v43 }
 0x246   : > { %v2100_v52 = vadd.f32 %v2098_v23, %v2088_v42  ;;  %2523 = vrot.lane.b32.xlu0 %v2519_v39, %s4341_s12  ;;  %v2114_v56 = vpop.permute.xlu1 %2113  ;;  %v2607_v39 = vmul.f32 %v5313_v29, %v2605_v36  ;;  %v2617_v42 = vstv %s5648_s11  ;;  %v2193_v23 = vmul.f32 %v2192_v10, %v5363_v57  ;;  %s5730_s11 = sld [smem:[#allocation4 + $0xb5]] }
 0x247   : > { %v2618_v40 = vmul.f32 %v2617_v42, %v5409_v43 }
 0x248   : > { %v2104_v11 = vadd.f32 %v2103_v47, %v2100_v52  ;;  %v2112_v55 = vpop.permute.xlu0 %2111  ;;  %2537 = vrot.lane.b32.xlu1 %v2532_v48, %s4340_s10  ;;  %v2619_v52 = vmul.f32 %v5313_v29, %v2617_v42 }
 0x249   : > { %v2115_v63 = vsel %vm771_vm0, %v2112_v55, %v2114_v56  ;;  %v2634_v56 = vstv %s5658_s15  ;;  %s5739_s15 = sld [smem:[#allocation4 + $0xf5]] }
 0x24a   : > { %2535 = vrot.lane.b32.xlu0 %v2531_v7, %s4340_s10  ;;  %v2126_v30 = vpop.permute.xlu1 %2125  ;;  %v2117_v62 = vadd.f32 %v2115_v63, %v2104_v11 }
 0x24c   : > { %v2124_v0 = vpop.permute.xlu0 %2123  ;;  %2554 = vrot.lane.b32.xlu1 %v2549_v60, %s4341_s12  ;;  %v2636_v60 = vmul.f32 %v5313_v29, %v2634_v56 }
 0x24d   : > { %v2127_v2 = vsel %vm784_vm1, %v2124_v0, %v2126_v30 }
 0x24e   : > { %v2129_v9 = vadd.f32 %v2127_v2, %v2117_v62  ;;  %2552 = vrot.lane.b32.xlu0 %v2548_v59, %s4341_s12  ;;  %v2143_v14 = vpop.permute.xlu1 %2142  ;;  %v2635_v59 = vmul.f32 %v2634_v56, %v5431_v51  ;;  %v2648_v2 = vmul.f32 %v5313_v29, %v2646_v61 }
 0x250   : > { %v2133_v16 = vadd.f32 %v2132_v8, %v2129_v9  ;;  %v2141_v19 = vpop.permute.xlu0 %2140  ;;  %2566 = vrot.lane.b32.xlu1 %v2561_v5, %s4340_s10  ;;  %v2647_v9 = vmul.f32 %v2646_v61, %v5431_v51 }
 0x251   : > { %v2144_v17 = vsel %vm771_vm0, %v2141_v19, %v2143_v14 }
 0x252   : > { %2564 = vrot.lane.b32.xlu0 %v2560_v13, %s4340_s10  ;;  %v2155_v22 = vpop.permute.xlu1 %2154  ;;  %v2146_v24 = vadd.f32 %v2144_v17, %v2133_v16  ;;  %v2663_v13 = vstv %s5679_s3  ;;  %v2250_v17 = vstv %s5685_s13  ;;  %s5761_s3 = sld [smem:[#allocation4 + $0x3d]]  ;;  %s5767_s13 = sld [smem:[#allocation4 + $0x74]] }
 0x253   : > { %v2665_v19 = vmul.f32 %v5313_v29, %v2663_v13 }
 0x254   : > { %v2153_v25 = vpop.permute.xlu0 %2152  ;;  %2583 = vrot.lane.b32.xlu1 %v2578_v18, %s4341_s12  ;;  %v2664_v18 = vmul.f32 %v2663_v13, %v5452_v4  ;;  %v2337_v13 = vstv %s5745_s16  ;;  %s5827_s16 = sld [smem:[#allocation4 + $0x7c]] }
 0x255   : > { %v2156_v26 = vsel %vm784_vm1, %v2153_v25, %v2155_v22 }
 0x256   : > { %v2158_v33 = vadd.f32 %v2156_v26, %v2146_v24  ;;  %2581 = vrot.lane.b32.xlu0 %v2577_v31, %s4341_s12  ;;  %v2175_v37 = vpop.permute.xlu1 %2174  ;;  %v2251_v24 = vmul.f32 %v2250_v17, %v5409_v43  ;;  %v2338_v17 = vmul.f32 %v2337_v13, %v5473_v27 }
 0x258   : > { %4050 = vst [vmem:[%s4906_s26 + $0x18] sm:$0xff] %v2158_v33  ;;  %v2173_v38 = vpop.permute.xlu0 %2172  ;;  %2595 = vrot.lane.b32.xlu1 %v2590_v32, %s4340_s10  ;;  %v2692_v32 = vstv %s5699_s0  ;;  %s5781_s0 = sld [smem:[#allocation4 + $0x9d]] }
 0x259   : > { %v2176_v53 = vsel %vm771_vm0, %v2173_v38, %v2175_v37  ;;  %v2694_v37 = vmul.f32 %v5313_v29, %v2692_v32  ;;  %v2693_v38 = vmul.f32 %v2692_v32, %v5473_v27 }
 0x25a   : > { %2593 = vrot.lane.b32.xlu0 %v2589_v45, %s4340_s10  ;;  %v2187_v44 = vpop.permute.xlu1 %2186  ;;  %v2178_v46 = vadd.f32 %v2176_v53, %v2165_v35  ;;  %v2279_v35 = vstv %s5705_s29  ;;  %v2704_v53 = vstv %s5710_s6  ;;  %s5787_s29 = sld [smem:[#allocation4 + $0xd4]]  ;;  %s5792_s6 = sld [smem:[#allocation4 + $0xbd]] }
 0x25b   : > { %v2280_v42 = vmul.f32 %v2279_v35, %v5431_v51 }
 0x25c   : > { %v2185_v47 = vpop.permute.xlu0 %2184  ;;  %2612 = vrot.lane.b32.xlu1 %v2607_v39, %s4341_s12 }
 0x25d   : > { %v2188_v48 = vsel %vm784_vm1, %v2185_v47, %v2187_v44 }
 0x25e   : > { %v2190_v7 = vadd.f32 %v2188_v48, %v2178_v46  ;;  %2610 = vrot.lane.b32.xlu0 %v2606_v41, %s4341_s12  ;;  %v2204_v11 = vpop.permute.xlu1 %2203  ;;  %v2706_v46 = vmul.f32 %v5313_v29, %v2704_v53  ;;  %v2721_v48 = vstv %s5719_s17  ;;  %s5801_s17 = sld [smem:[#allocation4 + $0xfd]] }
 0x25f   : > { %v2723_v56 = vmul.f32 %v5313_v29, %v2721_v48  ;;  %v5755_v29 = vld [vmem:[#allocation2 + $0x8] sm:$0xff] }
 0x260   : > { %v2194_v55 = vadd.f32 %v2193_v23, %v2190_v7  ;;  %v2202_v63 = vpop.permute.xlu0 %2201  ;;  %2624 = vrot.lane.b32.xlu1 %v2619_v52, %s4340_s10  ;;  %v2705_v23 = vmul.f32 %v2704_v53, %v5473_v27 }
 0x261   : > { %v2205_v57 = vsel %vm771_vm0, %v2202_v63, %v2204_v11  ;;  %v2308_v11 = vstv %s5725_s30  ;;  %v2733_v63 = vstv %s5730_s11  ;;  %s5807_s30 = sld [smem:[#allocation4 + $0x1c]]  ;;  %s5812_s11 = sld [smem:[#allocation4 + $0x11d]] }
 0x262   : > { %2622 = vrot.lane.b32.xlu0 %v2618_v40, %s4340_s10  ;;  %v2216_v30 = vpop.permute.xlu1 %2215  ;;  %v2207_v62 = vadd.f32 %v2205_v57, %v2194_v55  ;;  %v2722_v55 = vmul.f32 %v2721_v48, %v5494_v49  ;;  %v2820_v48 = vstv %s5792_s6  ;;  %s5876_s6 = sld [smem:[#allocation4 + $0x106]] }
 0x264   : > { %v2214_v0 = vpop.permute.xlu0 %2213  ;;  %2641 = vrot.lane.b32.xlu1 %v2636_v60, %s4341_s12 }
 0x265   : > { %v2217_v8 = vsel %vm784_vm1, %v2214_v0, %v2216_v30  ;;  %v2735_v30 = vmul.f32 %v5755_v29, %v2733_v63  ;;  %v2734_v0 = vmul.f32 %v2733_v63, %v5494_v49  ;;  %v2821_v63 = vmul.f32 %v2820_v48, %v5557_v54 }
 0x266   : > { %v2219_v5 = vadd.f32 %v2217_v8, %v2207_v62  ;;  %2639 = vrot.lane.b32.xlu0 %v2635_v59, %s4341_s12  ;;  %v2233_v6 = vpop.permute.xlu1 %2232  ;;  %v2309_v59 = vmul.f32 %v2308_v11, %v5452_v4  ;;  %v2822_v11 = vmul.f32 %v5755_v29, %v2820_v48 }
 0x268   : > { %v2223_v14 = vadd.f32 %v2222_v1, %v2219_v5  ;;  %v2231_v16 = vpop.permute.xlu0 %2230  ;;  %2653 = vrot.lane.b32.xlu1 %v2648_v2, %s4340_s10  ;;  %v2750_v1 = vstv %s5739_s15  ;;  %s5821_s15 = sld [smem:[#allocation4 + $0x26]] }
 0x269   : > { %v2234_v34 = vsel %vm771_vm0, %v2231_v16, %v2233_v6  ;;  %v2751_v6 = vmul.f32 %v2750_v1, %v5515_v3 }
 0x26a   : > { %2651 = vrot.lane.b32.xlu0 %v2647_v9, %s4340_s10  ;;  %v2245_v31 = vpop.permute.xlu1 %2244  ;;  %v2236_v21 = vadd.f32 %v2234_v34, %v2223_v14  ;;  %v2752_v9 = vmul.f32 %v5755_v29, %v2750_v1  ;;  %v2762_v14 = vstv %s5750_s27  ;;  %s5832_s27 = sld [smem:[#allocation4 + $0x46]] }
 0x26b   : > { %v2764_v20 = vmul.f32 %v5755_v29, %v2762_v14 }
 0x26c   : > { %v2243_v22 = vpop.permute.xlu0 %2242  ;;  %2670 = vrot.lane.b32.xlu1 %v2665_v19, %s4341_s12 }
 0x26d   : > { %v2246_v25 = vsel %vm784_vm1, %v2243_v22, %v2245_v31  ;;  %v2779_v22 = vstv %s5761_s3  ;;  %s5841_s3 = sld [smem:[#allocation4 + $0x86]] }
 0x26e   : > { %v2248_v26 = vadd.f32 %v2246_v25, %v2236_v21  ;;  %2668 = vrot.lane.b32.xlu0 %v2664_v18, %s4341_s12  ;;  %v2262_v33 = vpop.permute.xlu1 %2261  ;;  %v2763_v21 = vmul.f32 %v2762_v14, %v5515_v3  ;;  %v2780_v32 = vmul.f32 %v2779_v22, %v5536_v28  ;;  %v2869_v14 = vstv %s5821_s15  ;;  %s5900_s15 = sld [smem:[#allocation4 + $0x4e]] }
 0x270   : > { %v2252_v45 = vadd.f32 %v2251_v24, %v2248_v26  ;;  %v2260_v36 = vpop.permute.xlu0 %2259  ;;  %2682 = vrot.lane.b32.xlu1 %v2677_v50, %s4340_s10  ;;  %v2781_v26 = vmul.f32 %v5755_v29, %v2779_v22 }
 0x271   : > { %v2263_v43 = vsel %vm771_vm0, %v2260_v36, %v2262_v33  ;;  %v2791_v33 = vstv %s5772_s4  ;;  %s5854_s4 = sld [smem:[#allocation4 + $0xa6]] }
 0x272   : > { %2680 = vrot.lane.b32.xlu0 %v2676_v15, %s4340_s10  ;;  %v2274_v39 = vpop.permute.xlu1 %2273  ;;  %v2265_v10 = vadd.f32 %v2263_v43, %v2252_v45  ;;  %v2366_v15 = vstv %s5767_s13  ;;  %s5849_s13 = sld [smem:[#allocation4 + $0xdc]] }
 0x274   : > { %v2272_v41 = vpop.permute.xlu0 %2271  ;;  %2699 = vrot.lane.b32.xlu1 %v2694_v37, %s4341_s12  ;;  %v2367_v37 = vmul.f32 %v2366_v15, %v5494_v49 }
 0x275   : > { %v2275_v44 = vsel %vm784_vm1, %v2272_v41, %v2274_v39  ;;  %v2792_v39 = vmul.f32 %v2791_v33, %v5536_v28 }
 0x276   : > { %v2277_v47 = vadd.f32 %v2275_v44, %v2265_v10  ;;  %2697 = vrot.lane.b32.xlu0 %v2693_v38, %s4341_s12  ;;  %v2291_v52 = vpop.permute.xlu1 %2290  ;;  %v2793_v38 = vmul.f32 %v5755_v29, %v2791_v33  ;;  %v2808_v10 = vstv %s5781_s0  ;;  %v2898_v33 = vstv %s5841_s3  ;;  %s5863_s0 = sld [smem:[#allocation4 + $0xe6]] }
 0x277   : > { %s5923_s3 = sld [smem:[#allocation4 + $0xae]] }
 0x278   : > { %v2281_v7 = vadd.f32 %v2280_v42, %v2277_v47  ;;  %v2289_v40 = vpop.permute.xlu0 %2288  ;;  %2711 = vrot.lane.b32.xlu1 %v2706_v46, %s4340_s10  ;;  %v2810_v46 = vmul.f32 %v5755_v29, %v2808_v10  ;;  %v2395_v47 = vstv %s5787_s29  ;;  %s5871_s29 = sld [smem:[#allocation4 + $0x5]] }
 0x279   : > { %v2292_v51 = vsel %vm771_vm0, %v2289_v40, %v2291_v52 }
 0x27a   : > { %2709 = vrot.lane.b32.xlu0 %v2705_v23, %s4340_s10  ;;  %v2303_v57 = vpop.permute.xlu1 %2302  ;;  %v2294_v60 = vadd.f32 %v2292_v51, %v2281_v7  ;;  %v2809_v23 = vmul.f32 %v2808_v10, %v5557_v54  ;;  %v2396_v51 = vmul.f32 %v2395_v47, %v5515_v3 }
 0x27c   : > { %v2301_v58 = vpop.permute.xlu0 %2300  ;;  %2728 = vrot.lane.b32.xlu1 %v2723_v56, %s4341_s12  ;;  %v2927_v48 = vstv %s5863_s0  ;;  %s5944_s0 = sld [smem:[#allocation4 + $0x10e]] }
 0x27d   : > { %v2304_v61 = vsel %vm784_vm1, %v2301_v58, %v2303_v57  ;;  %v2837_v57 = vstv %s5801_s17  ;;  %s5882_s17 = sld [smem:[#allocation7 + $0x5]] }
 0x27e   : > { %v2306_v62 = vadd.f32 %v2304_v61, %v2294_v60  ;;  %2726 = vrot.lane.b32.xlu0 %v2722_v55, %s4341_s12  ;;  %v2320_v8 = vpop.permute.xlu1 %2319  ;;  %v2839_v61 = vmul.f32 %v5755_v29, %v2837_v57 }
 0x280   : > { %v2310_v4 = vadd.f32 %v2309_v59, %v2306_v62  ;;  %v2318_v2 = vpop.permute.xlu0 %2317  ;;  %2740 = vrot.lane.b32.xlu1 %v2735_v30, %s4340_s10  ;;  %v2424_v30 = vstv %s5807_s30  ;;  %v2838_v62 = vmul.f32 %v2837_v57, %v5578_v12  ;;  %s5887_s30 = sld [smem:[#allocation4 + $0x2e]] }
 0x281   : > { %v2321_v5 = vsel %vm771_vm0, %v2318_v2, %v2320_v8  ;;  %v2425_v2 = vmul.f32 %v2424_v30, %v5536_v28 }
 0x282   : > { %2738 = vrot.lane.b32.xlu0 %v2734_v0, %s4340_s10  ;;  %v2332_v16 = vpop.permute.xlu1 %2331  ;;  %v2323_v34 = vadd.f32 %v2321_v5, %v2310_v4  ;;  %v2849_v0 = vstv %s5812_s11  ;;  %s5895_s11 = sld [smem:[#allocation4 + $0x65]] }
 0x283   : > { %v2512_v30 = vstv %s5882_s17  ;;  %s5965_s17 = sld [smem:[#allocation4 + $0x56]] }
 0x284   : > { %v2330_v19 = vpop.permute.xlu0 %2329  ;;  %2757 = vrot.lane.b32.xlu1 %v2752_v9, %s4341_s12  ;;  %v2851_v9 = vmul.f32 %v5755_v29, %v2849_v0 }
 0x285   : > { %v2333_v18 = vsel %vm784_vm1, %v2330_v19, %v2332_v16 }
 0x286   : > { %v2335_v31 = vadd.f32 %v2333_v18, %v2323_v34  ;;  %2755 = vrot.lane.b32.xlu0 %v2751_v6, %s4341_s12  ;;  %v2349_v24 = vpop.permute.xlu1 %2348  ;;  %v2850_v6 = vmul.f32 %v2849_v0, %v5578_v12  ;;  %v5843_v34 = vld [vmem:[#allocation2] sm:$0xff]  ;;  %v2871_v18 = vmul.f32 %v5755_v29, %v2869_v14 }
 0x288   : > { %v2339_v25 = vadd.f32 %v2338_v17, %v2335_v31  ;;  %v2347_v50 = vpop.permute.xlu0 %2346  ;;  %2769 = vrot.lane.b32.xlu1 %v2764_v20, %s4340_s10  ;;  %v2453_v20 = vstv %s5827_s16  ;;  %v2870_v31 = vmul.f32 %v2869_v14, %v5843_v34  ;;  %s5909_s16 = sld [smem:[#allocation4 + $0x8e]]  ;;  %v2543_v14 = vstv %s5895_s11  ;;  %s5981_s11 = sld [smem:[#allocation4 + $0xcd]] }
 0x289   : > { %v2350_v27 = vsel %vm771_vm0, %v2347_v50, %v2349_v24  ;;  %v2454_v50 = vmul.f32 %v2453_v20, %v5557_v54  ;;  %v4184_v20 = vld [vmem:[#allocation2 + $0x10] sm:$0xff] }
 0x28a   : > { %2767 = vrot.lane.b32.xlu0 %v2763_v21, %s4340_s10  ;;  %v2361_v45 = vpop.permute.xlu1 %2360  ;;  %v2352_v36 = vadd.f32 %v2350_v27, %v2339_v25  ;;  %v2881_v21 = vstv %s5832_s27  ;;  %s5918_s27 = sld [smem:[#allocation4 + $0xc5]] }
 0x28c   : > { %v2359_v43 = vpop.permute.xlu0 %2358  ;;  %2786 = vrot.lane.b32.xlu1 %v2781_v26, %s4341_s12  ;;  %v2883_v26 = vmul.f32 %v5755_v29, %v2881_v21 }
 0x28d   : > { %v2362_v35 = vsel %vm784_vm1, %v2359_v43, %v2361_v45 }
 0x28e   : > { %v2364_v53 = vadd.f32 %v2362_v35, %v2352_v36  ;;  %2784 = vrot.lane.b32.xlu0 %v2780_v32, %s4341_s12  ;;  %v2378_v41 = vpop.permute.xlu1 %2377  ;;  %v2882_v32 = vmul.f32 %v2881_v21, %v5843_v34  ;;  %v5865_v36 = vld [vmem:[#allocation2 + $0x10] sm:$0xff]  ;;  %v2900_v35 = vmul.f32 %v5755_v29, %v2898_v33 }
 0x290   : > { %v2368_v42 = vadd.f32 %v2367_v37, %v2364_v53  ;;  %v2376_v44 = vpop.permute.xlu0 %2375  ;;  %2798 = vrot.lane.b32.xlu1 %v2793_v38, %s4340_s10  ;;  %v2482_v38 = vstv %s5849_s13  ;;  %v2899_v53 = vmul.f32 %v2898_v33, %v5865_v36  ;;  %s5931_s13 = sld [smem:[#allocation4 + $0xee]] }
 0x291   : > { %v2379_v49 = vsel %vm771_vm0, %v2376_v44, %v2378_v41  ;;  %v2483_v44 = vmul.f32 %v2482_v38, %v5578_v12  ;;  %v5889_v12 = vld [vmem:[#allocation2 + $0x20] sm:$0xff] }
 0x292   : > { %2796 = vrot.lane.b32.xlu0 %v2792_v39, %s4340_s10  ;;  %v2390_v52 = vpop.permute.xlu1 %2389  ;;  %v2381_v7 = vadd.f32 %v2379_v49, %v2368_v42  ;;  %v2910_v39 = vstv %s5854_s4  ;;  %s5939_s4 = sld [smem:[#allocation4 + $0xd]] }
 0x294   : > { %v2388_v40 = vpop.permute.xlu0 %2387  ;;  %2815 = vrot.lane.b32.xlu1 %v2810_v46, %s4341_s12  ;;  %v2912_v46 = vmul.f32 %v5755_v29, %v2910_v39 }
 0x295   : > { %v2391_v56 = vsel %vm784_vm1, %v2388_v40, %v2390_v52 }
 0x296   : > { %v2393_v55 = vadd.f32 %v2391_v56, %v2381_v7  ;;  %2813 = vrot.lane.b32.xlu0 %v2809_v23, %s4341_s12  ;;  %v2407_v60 = vpop.permute.xlu1 %2406  ;;  %v2911_v23 = vmul.f32 %v2910_v39, %v5865_v36  ;;  %v2929_v56 = vmul.f32 %v5755_v29, %v2927_v48  ;;  %v4185_v39 = vld [vmem:[#allocation2 + $0x20] sm:$0xff] }
 0x298   : > { %v2397_v58 = vadd.f32 %v2396_v51, %v2393_v55  ;;  %v2405_v59 = vpop.permute.xlu0 %2404  ;;  %2827 = vrot.lane.b32.xlu1 %v2822_v11, %s4340_s10  ;;  %v2514_v11 = vstv %s5871_s29  ;;  %v2928_v55 = vmul.f32 %v2927_v48, %v5889_v12  ;;  %s5952_s29 = sld [smem:[#allocation4 + $0x36]] }
 0x299   : > { %v2408_v3 = vsel %vm771_vm0, %v2405_v59, %v2407_v60  ;;  %v4183_v59 = vld [vmem:[#allocation2] sm:$0xff] }
 0x29a   : > { %2825 = vrot.lane.b32.xlu0 %v2821_v63, %s4340_s10  ;;  %v2419_v1 = vpop.permute.xlu1 %2418  ;;  %v2410_v8 = vadd.f32 %v2408_v3, %v2397_v58  ;;  %v2939_v63 = vstv %s5876_s6  ;;  %v2515_v3 = vmul.f32 %v4183_v59, %v2514_v11  ;;  %s5960_s6 = sld [smem:[#allocation4 + $0x6d]]  ;;  %v3026_v11 = vstv %s5944_s0 }
 0x29b   : > { %s6026_s0 = sld [smem:[#allocation4 + $0x75]] }
 0x29c   : > { %v2417_v4 = vpop.permute.xlu0 %2416  ;;  %2844 = vrot.lane.b32.xlu1 %v2839_v61, %s4341_s12 }
 0x29d   : > { %v2420_v5 = vsel %vm784_vm1, %v2417_v4, %v2419_v1  ;;  %v2940_v1 = vmul.f32 %v2939_v63, %v5889_v12 }
 0x29e   : > { %v2422_v13 = vadd.f32 %v2420_v5, %v2410_v8  ;;  %2842 = vrot.lane.b32.xlu0 %v2838_v62, %s4341_s12  ;;  %v2436_v16 = vpop.permute.xlu1 %2435  ;;  %v2941_v62 = vmul.f32 %v5755_v29, %v2939_v63  ;;  %v2956_v8 = vstv %s5887_s30  ;;  %v2516_v5 = vadd.f32 %v2515_v3, %v2512_v30  ;;  %s5973_s30 = sld [smem:[#allocation4 + $0x96]] }
 0x29f   : > { %v3028_v3 = vmul.f32 %v5755_v29, %v3026_v11 }
 0x2a0   : > { %v2426_v28 = vadd.f32 %v2425_v2, %v2422_v13  ;;  %v2434_v19 = vpop.permute.xlu0 %2433  ;;  %2856 = vrot.lane.b32.xlu1 %v2851_v9, %s4340_s10  ;;  %v5911_v2 = vld [vmem:[#allocation2 + $0x30] sm:$0xff] }
 0x2a1   : > { %v2437_v17 = vsel %vm771_vm0, %v2434_v19, %v2436_v16  ;;  %v2957_v16 = vmul.f32 %v2956_v8, %v5911_v2 }
 0x2a2   : > { %2854 = vrot.lane.b32.xlu0 %v2850_v6, %s4340_s10  ;;  %v2448_v22 = vpop.permute.xlu1 %2447  ;;  %v2439_v24 = vadd.f32 %v2437_v17, %v2426_v28  ;;  %v2958_v6 = vmul.f32 %v5755_v29, %v2956_v8  ;;  %v2968_v28 = vstv %s5900_s15  ;;  %s5986_s15 = sld [smem:[#allocation4 + $0x27]] }
 0x2a4   : > { %v2446_v25 = vpop.permute.xlu0 %2445  ;;  %2876 = vrot.lane.b32.xlu1 %v2871_v18, %s4341_s12 }
 0x2a5   : > { %v2449_v27 = vsel %vm784_vm1, %v2446_v25, %v2448_v22  ;;  %v2970_v22 = vmul.f32 %v5755_v29, %v2968_v28  ;;  %v2969_v25 = vmul.f32 %v2968_v28, %v5911_v2 }
 0x2a6   : > { %v2451_v15 = vadd.f32 %v2449_v27, %v2439_v24  ;;  %2874 = vrot.lane.b32.xlu0 %v2870_v31, %s4341_s12  ;;  %v2465_v45 = vpop.permute.xlu1 %2464  ;;  %v2544_v31 = vmul.f32 %v4184_v20, %v2543_v14  ;;  %v3055_v14 = vstv %s5965_s17  ;;  %s6045_s17 = sld [smem:[#allocation4 + $0xd5]] }
 0x2a8   : > { %v2455_v54 = vadd.f32 %v2454_v50, %v2451_v15  ;;  %v2463_v43 = vpop.permute.xlu0 %2462  ;;  %2888 = vrot.lane.b32.xlu1 %v2883_v26, %s4340_s10  ;;  %v2985_v50 = vstv %s5909_s16  ;;  %v5933_v26 = vld [vmem:[#allocation2 + $0x40] sm:$0xff]  ;;  %s5988_s16 = sld [smem:[#allocation4 + $0xb6]] }
 0x2a9   : > { %v2466_v37 = vsel %vm771_vm0, %v2463_v43, %v2465_v45  ;;  %v2987_v45 = vmul.f32 %v5755_v29, %v2985_v50  ;;  %v2986_v43 = vmul.f32 %v2985_v50, %v5933_v26  ;;  %v5998_v50 = vld [vmem:[#allocation2 + $0x70] sm:$0xff] }
 0x2aa   : > { %2886 = vrot.lane.b32.xlu0 %v2882_v32, %s4340_s10  ;;  %v2477_v10 = vpop.permute.xlu1 %2476  ;;  %v2468_v41 = vadd.f32 %v2466_v37, %v2455_v54  ;;  %v2572_v54 = vstv %s5918_s27  ;;  %v2997_v37 = vstv %s5923_s3  ;;  %s5996_s27 = sld [smem:[#allocation4 + $0x47]]  ;;  %s6004_s3 = sld [smem:[#allocation4 + $0x15]] }
 0x2ac   : > { %v2475_v42 = vpop.permute.xlu0 %2474  ;;  %2905 = vrot.lane.b32.xlu1 %v2900_v35, %s4341_s12 }
 0x2ad   : > { %v2478_v49 = vsel %vm784_vm1, %v2475_v42, %v2477_v10  ;;  %v2573_v10 = vmul.f32 %v4185_v39, %v2572_v54  ;;  %v2999_v42 = vmul.f32 %v5755_v29, %v2997_v37  ;;  %v4188_v39 = vld [vmem:[#allocation2 + $0x50] sm:$0xff] }
 0x2ae   : > { %v2480_v47 = vadd.f32 %v2478_v49, %v2468_v41  ;;  %2903 = vrot.lane.b32.xlu0 %v2899_v53, %s4341_s12  ;;  %v2494_v52 = vpop.permute.xlu1 %2493  ;;  %v2998_v49 = vmul.f32 %v2997_v37, %v5933_v26 }
 0x2b0   : > { %v2484_v7 = vadd.f32 %v2483_v44, %v2480_v47  ;;  %v2492_v40 = vpop.permute.xlu0 %2491  ;;  %2917 = vrot.lane.b32.xlu1 %v2912_v46, %s4340_s10  ;;  %v3014_v46 = vstv %s5931_s13  ;;  %s6009_s13 = sld [smem:[#allocation4 + $0x87]] }
 0x2b1   : > { %v2495_v51 = vsel %vm771_vm0, %v2492_v40, %v2494_v52  ;;  %v3016_v40 = vmul.f32 %v5755_v29, %v3014_v46 }
 0x2b2   : > { %2915 = vrot.lane.b32.xlu0 %v2911_v23, %s4340_s10  ;;  %v2506_v57 = vpop.permute.xlu1 %2505  ;;  %v2497_v60 = vadd.f32 %v2495_v51, %v2484_v7  ;;  %v5954_v23 = vld [vmem:[#allocation2 + $0x50] sm:$0xff]  ;;  %v2601_v51 = vstv %s5939_s4  ;;  %s6020_s4 = sld [smem:[#allocation4 + $0xa7]] }
 0x2b3   : > { %v3027_v30 = vmul.f32 %v3026_v11, %v5954_v23 }
 0x2b4   : > { %v2504_v58 = vpop.permute.xlu0 %2503  ;;  %2934 = vrot.lane.b32.xlu1 %v2929_v56, %s4341_s12  ;;  %v3015_v56 = vmul.f32 %v3014_v46, %v5954_v23  ;;  %v3232_v46 = vstv %s5996_s27  ;;  %s6069_s27 = sld [smem:[#allocation4 + $0x8f]] }
 0x2b5   : > { %v2507_v61 = vsel %vm784_vm1, %v2504_v58, %v2506_v57 }
 0x2b6   : > { %v2509_v0 = vadd.f32 %v2507_v61, %v2497_v60  ;;  %2932 = vrot.lane.b32.xlu0 %v2928_v55, %s4341_s12  ;;  %v2526_v4 = vpop.permute.xlu1 %2525  ;;  %v4186_v60 = vld [vmem:[#allocation2 + $0x30] sm:$0xff]  ;;  %v3249_v11 = vstv %s6009_s13  ;;  %s6083_s13 = sld [smem:[#allocation4 + $0x7d]] }
 0x2b7   : > { %v2602_v58 = vmul.f32 %v4186_v60, %v2601_v51  ;;  %v2688_v51 = vstv %s6004_s3  ;;  %v4189_v60 = vld [vmem:[#allocation2 + $0x60] sm:$0xff]  ;;  %s6077_s3 = sld [smem:[#allocation4 + $0xaf]] }
 0x2b8   : > { %4051 = vst [vmem:[%s4906_s26 + $0x20] sm:$0xff] %v2509_v0  ;;  %v2524_v9 = vpop.permute.xlu0 %2523  ;;  %2946 = vrot.lane.b32.xlu1 %v2941_v62, %s4340_s10  ;;  %v3043_v62 = vstv %s5952_s29  ;;  %s6031_s29 = sld [smem:[#allocation4 + $0xe7]] }
 0x2b9   : > { %v2527_v13 = vsel %vm771_vm0, %v2524_v9, %v2526_v4  ;;  %v3045_v9 = vmul.f32 %v5755_v29, %v3043_v62 }
 0x2ba   : > { %2944 = vrot.lane.b32.xlu0 %v2940_v1, %s4340_s10  ;;  %v2538_v19 = vpop.permute.xlu1 %2537  ;;  %v2529_v17 = vadd.f32 %v2527_v13, %v2516_v5  ;;  %v5975_v1 = vld [vmem:[#allocation2 + $0x60] sm:$0xff]  ;;  %v2630_v13 = vstv %s5960_s6  ;;  %s6039_s6 = sld [smem:[#allocation4 + $0x107]] }
 0x2bc   : > { %v2536_v18 = vpop.permute.xlu0 %2535  ;;  %2963 = vrot.lane.b32.xlu1 %v2958_v6, %s4341_s12  ;;  %v3044_v6 = vmul.f32 %v3043_v62, %v5975_v1  ;;  %v3261_v62 = vstv %s6020_s4  ;;  %s6088_s4 = sld [smem:[#allocation4 + $0xef]] }
 0x2bd   : > { %v2539_v21 = vsel %vm784_vm1, %v2536_v18, %v2538_v19 }
 0x2be   : > { %v2541_v24 = vadd.f32 %v2539_v21, %v2529_v17  ;;  %2961 = vrot.lane.b32.xlu0 %v2957_v16, %s4341_s12  ;;  %v2555_v27 = vpop.permute.xlu1 %2554  ;;  %v4187_v17 = vld [vmem:[#allocation2 + $0x40] sm:$0xff] }
 0x2bf   : > { %v2631_v18 = vmul.f32 %v4187_v17, %v2630_v13  ;;  %v2717_v13 = vstv %s6026_s0  ;;  %v4190_v17 = vld [vmem:[#allocation2 + $0x70] sm:$0xff]  ;;  %s6096_s0 = sld [smem:[#allocation4 + $0x10f]] }
 0x2c0   : > { %v2545_v15 = vadd.f32 %v2544_v31, %v2541_v24  ;;  %v2553_v32 = vpop.permute.xlu0 %2552  ;;  %2975 = vrot.lane.b32.xlu1 %v2970_v22, %s4340_s10  ;;  %v3057_v31 = vmul.f32 %v5755_v29, %v3055_v14  ;;  %v3056_v22 = vmul.f32 %v3055_v14, %v5975_v1  ;;  %v3072_v24 = vstv %s5973_s30  ;;  %s6050_s30 = sld [smem:[#allocation4 + $0x2f]] }
 0x2c1   : > { %v2556_v33 = vsel %vm771_vm0, %v2553_v32, %v2555_v27  ;;  %v3073_v54 = vmul.f32 %v3072_v24, %v5998_v50  ;;  %v3278_v14 = vstv %s6031_s29  ;;  %s6102_s29 = sld [smem:[#allocation4 + $0xdd]] }
 0x2c2   : > { %2973 = vrot.lane.b32.xlu0 %v2969_v25, %s4340_s10  ;;  %v2567_v35 = vpop.permute.xlu1 %2566  ;;  %v2558_v38 = vadd.f32 %v2556_v33, %v2545_v15  ;;  %v3074_v33 = vmul.f32 %v5755_v29, %v3072_v24  ;;  %v3290_v24 = vstv %s6039_s6  ;;  %s6107_s6 = sld [smem:[#allocation4 + $0x37]] }
 0x2c4   : > { %v2565_v53 = vpop.permute.xlu0 %2564  ;;  %2992 = vrot.lane.b32.xlu1 %v2987_v45, %s4341_s12  ;;  %v2659_v45 = vstv %s5981_s11  ;;  %s6058_s11 = sld [smem:[#allocation4 + $0x4f]] }
 0x2c5   : > { %v2568_v41 = vsel %vm784_vm1, %v2565_v53, %v2567_v35  ;;  %v3084_v35 = vstv %s5988_s16  ;;  %s6177_s16 = sld [smem:[#allocation4 + $0x116]] }
 0x2c6   : > { %v2570_v44 = vadd.f32 %v2568_v41, %v2558_v38  ;;  %2990 = vrot.lane.b32.xlu0 %v2986_v43, %s4341_s12  ;;  %v2584_v47 = vpop.permute.xlu1 %2583  ;;  %v3220_v43 = vstv %s5986_s15  ;;  %s6064_s15 = sld [smem:[#allocation4 + $0x1d]] }
 0x2c8   : > { %v2574_v48 = vadd.f32 %v2573_v10, %v2570_v44  ;;  %v2582_v52 = vpop.permute.xlu0 %2581  ;;  %3004 = vrot.lane.b32.xlu1 %v2999_v42, %s4340_s10  ;;  %v2660_v10 = vmul.f32 %v4188_v39, %v2659_v45  ;;  %v3221_v42 = vmul.f32 %v3220_v43, %v5843_v34  ;;  %v2746_v45 = vstv %s6045_s17  ;;  %v4191_v39 = vld [vmem:[#allocation2 + $0x80] sm:$0xff]  ;;  %s6115_s17 = sld [smem:[#allocation4 + $0x57]] }
 0x2c9   : > { %v2585_v7 = vsel %vm771_vm0, %v2582_v52, %v2584_v47 }
 0x2ca   : > { %3002 = vrot.lane.b32.xlu0 %v2998_v49, %s4340_s10  ;;  %v2596_v55 = vpop.permute.xlu1 %2595  ;;  %v2587_v63 = vadd.f32 %v2585_v7, %v2574_v48  ;;  %v3085_v49 = vmul.f32 %v3084_v35, %v5998_v50 }
 0x2cc   : > { %v2594_v57 = vpop.permute.xlu0 %2593  ;;  %3021 = vrot.lane.b32.xlu1 %v3016_v40, %s4341_s12  ;;  %v3233_v40 = vmul.f32 %v3232_v46, %v5843_v34 }
 0x2cd   : > { %v2597_v59 = vsel %vm784_vm1, %v2594_v57, %v2596_v55 }
 0x2ce   : > { %v2599_v61 = vadd.f32 %v2597_v59, %v2587_v63  ;;  %3019 = vrot.lane.b32.xlu0 %v3015_v56, %s4341_s12  ;;  %v2613_v0 = vpop.permute.xlu1 %2612  ;;  %v3222_v56 = vmul.f32 %v5755_v29, %v3220_v43  ;;  %v3307_v43 = vstv %s6050_s30  ;;  %s6121_s30 = sld [smem:[#allocation4 + $0x6]] }
 0x2d0   : > { %v2603_v8 = vadd.f32 %v2602_v58, %v2599_v61  ;;  %v2611_v4 = vpop.permute.xlu0 %2610  ;;  %3033 = vrot.lane.b32.xlu1 %v3028_v3, %s4340_s10  ;;  %v2689_v58 = vmul.f32 %v4189_v60, %v2688_v51  ;;  %v3250_v3 = vmul.f32 %v3249_v11, %v5865_v36  ;;  %v2775_v51 = vstv %s6064_s15  ;;  %v4192_v60 = vld [vmem:[#allocation2 + $0x90] sm:$0xff]  ;;  %s6131_s15 = sld [smem:[#allocation7 + $0x6]] }
 0x2d1   : > { %v2614_v5 = vsel %vm771_vm0, %v2611_v4, %v2613_v0 }
 0x2d2   : > { %3031 = vrot.lane.b32.xlu0 %v3027_v30, %s4340_s10  ;;  %v2625_v16 = vpop.permute.xlu1 %2624  ;;  %v2616_v28 = vadd.f32 %v2614_v5, %v2603_v8  ;;  %v3234_v30 = vmul.f32 %v5755_v29, %v3232_v46  ;;  %v3319_v46 = vstv %s6058_s11  ;;  %s6126_s11 = sld [smem:[#allocation4 + $0x97]] }
 0x2d4   : > { %v2623_v19 = vpop.permute.xlu0 %2622  ;;  %3050 = vrot.lane.b32.xlu1 %v3045_v9, %s4341_s12  ;;  %v3262_v9 = vmul.f32 %v3261_v62, %v5865_v36 }
 0x2d5   : > { %v2626_v20 = vsel %vm784_vm1, %v2623_v19, %v2625_v16 }
 0x2d6   : > { %v2628_v21 = vadd.f32 %v2626_v20, %v2616_v28  ;;  %3048 = vrot.lane.b32.xlu0 %v3044_v6, %s4341_s12  ;;  %v2642_v25 = vpop.permute.xlu1 %2641  ;;  %v3251_v6 = vmul.f32 %v5755_v29, %v3249_v11  ;;  %v3336_v11 = vstv %s6069_s27  ;;  %s6140_s27 = sld [smem:[#allocation4 + $0x66]] }
 0x2d8   : > { %v2632_v27 = vadd.f32 %v2631_v18, %v2628_v21  ;;  %v2640_v15 = vpop.permute.xlu0 %2639  ;;  %3062 = vrot.lane.b32.xlu1 %v3057_v31, %s4340_s10  ;;  %v2718_v18 = vmul.f32 %v4190_v17, %v2717_v13  ;;  %v3279_v31 = vmul.f32 %v3278_v14, %v5889_v12  ;;  %v2804_v13 = vstv %s6083_s13  ;;  %v4193_v17 = vld [vmem:[#allocation2 + $0xa0] sm:$0xff]  ;;  %s6154_s13 = sld [smem:[#allocation4 + $0xf6]] }
 0x2d9   : > { %v2643_v32 = vsel %vm771_vm0, %v2640_v15, %v2642_v25 }
 0x2da   : > { %3060 = vrot.lane.b32.xlu0 %v3056_v22, %s4340_s10  ;;  %v2654_v37 = vpop.permute.xlu1 %2653  ;;  %v2645_v38 = vadd.f32 %v2643_v32, %v2632_v27  ;;  %v3263_v22 = vmul.f32 %v5755_v29, %v3261_v62  ;;  %v3348_v62 = vstv %s6077_s3  ;;  %s6145_s3 = sld [smem:[#allocation4 + $0xb7]] }
 0x2dc   : > { %v2652_v53 = vpop.permute.xlu0 %2651  ;;  %3079 = vrot.lane.b32.xlu1 %v3074_v33, %s4341_s12  ;;  %v3291_v33 = vmul.f32 %v3290_v24, %v5889_v12 }
 0x2dd   : > { %v2655_v41 = vsel %vm784_vm1, %v2652_v53, %v2654_v37 }
 0x2de   : > { %v2657_v44 = vadd.f32 %v2655_v41, %v2645_v38  ;;  %3077 = vrot.lane.b32.xlu0 %v3073_v54, %s4341_s12  ;;  %v2671_v47 = vpop.permute.xlu1 %2670  ;;  %v3280_v54 = vmul.f32 %v5755_v29, %v3278_v14  ;;  %v3365_v14 = vstv %s6088_s4  ;;  %s6163_s4 = sld [smem:[#allocation4 + $0xc6]] }
 0x2e0   : > { %v2661_v48 = vadd.f32 %v2660_v10, %v2657_v44  ;;  %v2669_v52 = vpop.permute.xlu0 %2668  ;;  %3225 = vrot.lane.b32.xlu1 %v3221_v42, %s4341_s12  ;;  %v2747_v10 = vmul.f32 %v4191_v39, %v2746_v45  ;;  %v3308_v42 = vmul.f32 %v3307_v43, %v5911_v2  ;;  %v2833_v45 = vstv %s6102_s29  ;;  %v4194_v39 = vld [vmem:[#allocation2 + $0xb0] sm:$0xff]  ;;  %s6185_s29 = sld [smem:[#allocation4 + $0xe]] }
 0x2e1   : > { %v2672_v7 = vsel %vm771_vm0, %v2669_v52, %v2671_v47 }
 0x2e2   : > { %3089 = vrot.lane.b32.xlu0 %v3085_v49, %s4340_s10  ;;  %v2683_v55 = vpop.permute.xlu1 %2682  ;;  %v2674_v63 = vadd.f32 %v2672_v7, %v2661_v48  ;;  %v3292_v49 = vmul.f32 %v5755_v29, %v3290_v24  ;;  %v3377_v24 = vstv %s6096_s0  ;;  %s6168_s0 = sld [smem:[#allocation4 + $0xf7]] }
 0x2e4   : > { %v2681_v57 = vpop.permute.xlu0 %2680  ;;  %3237 = vrot.lane.b32.xlu1 %v3233_v40, %s4340_s10  ;;  %v3320_v40 = vmul.f32 %v3319_v46, %v5911_v2 }
 0x2e5   : > { %v2684_v59 = vsel %vm784_vm1, %v2681_v57, %v2683_v55 }
 0x2e6   : > { %v2686_v61 = vadd.f32 %v2684_v59, %v2674_v63  ;;  %3227 = vrot.lane.b32.xlu0 %v3222_v56, %s4341_s12  ;;  %v2700_v0 = vpop.permute.xlu1 %2699  ;;  %v3309_v56 = vmul.f32 %v5755_v29, %v3307_v43  ;;  %v3394_v43 = vstv %s6107_s6  ;;  %s6190_s6 = sld [smem:[#allocation4 + $0x117]] }
 0x2e8   : > { %v2690_v8 = vadd.f32 %v2689_v58, %v2686_v61  ;;  %v2698_v4 = vpop.permute.xlu0 %2697  ;;  %3254 = vrot.lane.b32.xlu1 %v3250_v3, %s4341_s12  ;;  %v2776_v58 = vmul.f32 %v4192_v60, %v2775_v51  ;;  %v3337_v3 = vmul.f32 %v3336_v11, %v5933_v26  ;;  %v2865_v51 = vstv %s6121_s30  ;;  %s6207_s30 = sld [smem:[#allocation4 + $0x6e]] }
 0x2e9   : > { %v2701_v5 = vsel %vm771_vm0, %v2698_v4, %v2700_v0  ;;  %v2866_v60 = vmul.f32 %v2865_v51, %v5843_v34 }
 0x2ea   : > { %3239 = vrot.lane.b32.xlu0 %v3234_v30, %s4340_s10  ;;  %v2712_v16 = vpop.permute.xlu1 %2711  ;;  %v2703_v28 = vadd.f32 %v2701_v5, %v2690_v8  ;;  %v3321_v30 = vmul.f32 %v5755_v29, %v3319_v46  ;;  %v3406_v46 = vstv %s6115_s17  ;;  %s6201_s17 = sld [smem:[#allocation4 + $0x3e]] }
 0x2ec   : > { %v2710_v19 = vpop.permute.xlu0 %2709  ;;  %3266 = vrot.lane.b32.xlu1 %v3262_v9, %s4340_s10  ;;  %v3349_v9 = vmul.f32 %v3348_v62, %v5933_v26 }
 0x2ed   : > { %v2713_v20 = vsel %vm784_vm1, %v2710_v19, %v2712_v16 }
 0x2ee   : > { %v2715_v21 = vadd.f32 %v2713_v20, %v2703_v28  ;;  %3256 = vrot.lane.b32.xlu0 %v3251_v6, %s4341_s12  ;;  %v2729_v25 = vpop.permute.xlu1 %2728  ;;  %v3338_v6 = vmul.f32 %v5755_v29, %v3336_v11  ;;  %v3423_v11 = vstv %s6126_s11  ;;  %s6212_s11 = sld [smem:[#allocation4 + $0x3f]] }
 0x2f0   : > { %v2719_v27 = vadd.f32 %v2718_v18, %v2715_v21  ;;  %v2727_v15 = vpop.permute.xlu0 %2726  ;;  %3283 = vrot.lane.b32.xlu1 %v3279_v31, %s4341_s12  ;;  %v2805_v18 = vmul.f32 %v4193_v17, %v2804_v13  ;;  %v3366_v31 = vmul.f32 %v3365_v14, %v5954_v23  ;;  %v3435_v13 = vstv %s6145_s3  ;;  %s6234_s3 = sld [smem:[#allocation4 + $0x5f]] }
 0x2f1   : > { %v2730_v32 = vsel %vm771_vm0, %v2727_v15, %v2729_v25 }
 0x2f2   : > { %3268 = vrot.lane.b32.xlu0 %v3263_v22, %s4340_s10  ;;  %v2741_v37 = vpop.permute.xlu1 %2740  ;;  %v2732_v38 = vadd.f32 %v2730_v32, %v2719_v27  ;;  %v3350_v22 = vmul.f32 %v5755_v29, %v3348_v62 }
 0x2f4   : > { %v2739_v53 = vpop.permute.xlu0 %2738  ;;  %3295 = vrot.lane.b32.xlu1 %v3291_v33, %s4340_s10  ;;  %v3378_v33 = vmul.f32 %v3377_v24, %v5954_v23 }
 0x2f5   : > { %v2742_v41 = vsel %vm784_vm1, %v2739_v53, %v2741_v37 }
 0x2f6   : > { %v2744_v44 = vadd.f32 %v2742_v41, %v2732_v38  ;;  %3285 = vrot.lane.b32.xlu0 %v3280_v54, %s4341_s12  ;;  %v2758_v47 = vpop.permute.xlu1 %2757  ;;  %v3367_v54 = vmul.f32 %v5755_v29, %v3365_v14 }
 0x2f8   : > { %v2748_v48 = vadd.f32 %v2747_v10, %v2744_v44  ;;  %v2756_v52 = vpop.permute.xlu0 %2755  ;;  %3312 = vrot.lane.b32.xlu1 %v3308_v42, %s4341_s12  ;;  %v2834_v10 = vmul.f32 %v4194_v39, %v2833_v45  ;;  %v3395_v42 = vmul.f32 %v3394_v43, %v5975_v1 }
 0x2f9   : > { %v2759_v7 = vsel %vm771_vm0, %v2756_v52, %v2758_v47 }
 0x2fa   : > { %3297 = vrot.lane.b32.xlu0 %v3292_v49, %s4340_s10  ;;  %v2770_v55 = vpop.permute.xlu1 %2769  ;;  %v2761_v63 = vadd.f32 %v2759_v7, %v2748_v48  ;;  %v3379_v49 = vmul.f32 %v5755_v29, %v3377_v24 }
 0x2fc   : > { %v2768_v57 = vpop.permute.xlu0 %2767  ;;  %3324 = vrot.lane.b32.xlu1 %v3320_v40, %s4340_s10  ;;  %v3407_v40 = vmul.f32 %v3406_v46, %v5975_v1 }
 0x2fd   : > { %v2771_v59 = vsel %vm784_vm1, %v2768_v57, %v2770_v55 }
 0x2fe   : > { %v2773_v61 = vadd.f32 %v2771_v59, %v2761_v63  ;;  %3314 = vrot.lane.b32.xlu0 %v3309_v56, %s4341_s12  ;;  %v2787_v0 = vpop.permute.xlu1 %2786  ;;  %v3396_v56 = vmul.f32 %v5755_v29, %v3394_v43  ;;  %v2863_v59 = vstv %s6131_s15  ;;  %s6221_s15 = sld [smem:[#allocation4 + $0x5e]] }
 0x300   : > { %v2777_v8 = vadd.f32 %v2776_v58, %v2773_v61  ;;  %v2785_v4 = vpop.permute.xlu0 %2784  ;;  %3341 = vrot.lane.b32.xlu1 %v3337_v3, %s4341_s12  ;;  %v3424_v3 = vmul.f32 %v3423_v11, %v5998_v50 }
 0x301   : > { %v2788_v5 = vsel %vm771_vm0, %v2785_v4, %v2787_v0  ;;  %v2867_v0 = vadd.f32 %v2866_v60, %v2863_v59  ;;  %v3086_v4 = vmul.f32 %v5755_v29, %v3084_v35  ;;  %v3437_v35 = vmul.f32 %v5755_v29, %v3435_v13 }
 0x302   : > { %3326 = vrot.lane.b32.xlu0 %v3321_v30, %s4340_s10  ;;  %v2799_v16 = vpop.permute.xlu1 %2798  ;;  %v2790_v28 = vadd.f32 %v2788_v5, %v2777_v8  ;;  %v3408_v30 = vmul.f32 %v5755_v29, %v3406_v46  ;;  %v2894_v5 = vstv %s6140_s27  ;;  %v2952_v46 = vstv %s6185_s29  ;;  %s6229_s27 = sld [smem:[#allocation4 + $0xce]] }
 0x303   : > { %v2953_v51 = vmul.f32 %v2952_v46, %v5911_v2  ;;  %s6271_s29 = sld [smem:[#allocation4 + $0x76]] }
 0x304   : > { %v2797_v19 = vpop.permute.xlu0 %2796  ;;  %3353 = vrot.lane.b32.xlu1 %v3349_v9, %s4340_s10  ;;  %v3425_v9 = vmul.f32 %v5755_v29, %v3423_v11 }
 0x305   : > { %v2800_v20 = vsel %vm784_vm1, %v2797_v19, %v2799_v16 }
 0x306   : > { %v2802_v21 = vadd.f32 %v2800_v20, %v2790_v28  ;;  %3343 = vrot.lane.b32.xlu0 %v3338_v6, %s4341_s12  ;;  %v2816_v25 = vpop.permute.xlu1 %2815  ;;  %v2895_v28 = vmul.f32 %v2894_v5, %v5865_v36  ;;  %v3101_v20 = vstv %s6154_s13  ;;  %s6243_s13 = sld [smem:[#allocation4 + $0x9e]] }
 0x308   : > { %v2806_v27 = vadd.f32 %v2805_v18, %v2802_v21  ;;  %v2814_v15 = vpop.permute.xlu0 %2813  ;;  %3370 = vrot.lane.b32.xlu1 %v3366_v31, %s4341_s12  ;;  %v3436_v18 = vmul.f32 %v3435_v13, %v5998_v50  ;;  %v6179_v21 = vld [vmem:[#allocation2 + $0x80] sm:$0xff] }
 0x309   : > { %v2817_v32 = vsel %vm771_vm0, %v2814_v15, %v2816_v25  ;;  %v3103_v25 = vmul.f32 %v5755_v29, %v3101_v20  ;;  %v6195_v29 = vld [vmem:[#allocation2 + $0x8] sm:$0xff] }
 0x30a   : > { %3355 = vrot.lane.b32.xlu0 %v3350_v22, %s4340_s10  ;;  %v2828_v37 = vpop.permute.xlu1 %2827  ;;  %v2819_v38 = vadd.f32 %v2817_v32, %v2806_v27  ;;  %v2923_v27 = vstv %s6163_s4  ;;  %v3102_v32 = vmul.f32 %v3101_v20, %v6179_v21  ;;  %s6249_s4 = sld [smem:[#allocation4 + $0x16]] }
 0x30b   : > { %v2924_v43 = vmul.f32 %v2923_v27, %v5889_v12 }
 0x30c   : > { %v2826_v53 = vpop.permute.xlu0 %2825  ;;  %3382 = vrot.lane.b32.xlu1 %v3378_v33, %s4340_s10  ;;  %v3452_v33 = vstv %s6168_s0  ;;  %s6254_s0 = sld [smem:[#allocation4 + $0x9f]] }
 0x30d   : > { %v2829_v41 = vsel %vm784_vm1, %v2826_v53, %v2828_v37  ;;  %v3453_v39 = vmul.f32 %v3452_v33, %v6179_v21 }
 0x30e   : > { %v2831_v44 = vadd.f32 %v2829_v41, %v2819_v38  ;;  %3372 = vrot.lane.b32.xlu0 %v3367_v54, %s4341_s12  ;;  %v2845_v47 = vpop.permute.xlu1 %2844  ;;  %v3454_v38 = vmul.f32 %v6195_v29, %v3452_v33 }
 0x310   : > { %v2835_v48 = vadd.f32 %v2834_v10, %v2831_v44  ;;  %v2843_v52 = vpop.permute.xlu0 %2842  ;;  %3399 = vrot.lane.b32.xlu1 %v3395_v42, %s4341_s12  ;;  %v3113_v10 = vstv %s6177_s16  ;;  %s6263_s16 = sld [smem:[#allocation4 + $0xbe]] }
 0x311   : > { %v2846_v7 = vsel %vm771_vm0, %v2843_v52, %v2845_v47  ;;  %v3464_v52 = vstv %s6190_s6  ;;  %s6276_s6 = sld [smem:[#allocation4 + $0xbf]] }
 0x312   : > { %3384 = vrot.lane.b32.xlu0 %v3379_v49, %s4340_s10  ;;  %v2857_v55 = vpop.permute.xlu1 %2856  ;;  %v2848_v63 = vadd.f32 %v2846_v7, %v2835_v48  ;;  %v3115_v49 = vmul.f32 %v6195_v29, %v3113_v10  ;;  %v3114_v48 = vmul.f32 %v3113_v10, %v6179_v21  ;;  %v3466_v11 = vmul.f32 %v6195_v29, %v3464_v52 }
 0x314   : > { %v2855_v57 = vpop.permute.xlu0 %2854  ;;  %3411 = vrot.lane.b32.xlu1 %v3407_v40, %s4340_s10 }
 0x315   : > { %v2858_v58 = vsel %vm784_vm1, %v2855_v57, %v2857_v55  ;;  %v3130_v57 = vstv %s6201_s17  ;;  %s6285_s17 = sld [smem:[#allocation4 + $0xfe]] }
 0x316   : > { %v2860_v61 = vadd.f32 %v2858_v58, %v2848_v63  ;;  %3401 = vrot.lane.b32.xlu0 %v3396_v56, %s4341_s12  ;;  %v2877_v62 = vpop.permute.xlu1 %2876  ;;  %v3465_v63 = vmul.f32 %v3464_v52, %v6179_v21  ;;  %v6223_v58 = vld [vmem:[#allocation2 + $0x90] sm:$0xff] }
 0x318   : > { %4052 = vst [vmem:[%s4906_s26 + $0x28] sm:$0xff] %v2860_v61  ;;  %v2875_v34 = vpop.permute.xlu0 %2874  ;;  %3428 = vrot.lane.b32.xlu1 %v3424_v3, %s4341_s12  ;;  %v3132_v61 = vmul.f32 %v6195_v29, %v3130_v57 }
 0x319   : > { %v2878_v8 = vsel %vm771_vm0, %v2875_v34, %v2877_v62  ;;  %v3481_v34 = vstv %s6212_s11  ;;  %s4039_s11 = sld [smem:[#allocation4 + $0x11e]] }
 0x31a   : > { %3413 = vrot.lane.b32.xlu0 %v3408_v30, %s4340_s10  ;;  %v2889_v6 = vpop.permute.xlu1 %2888  ;;  %v2880_v14 = vadd.f32 %v2878_v8, %v2867_v0  ;;  %v2981_v30 = vstv %s6207_s30  ;;  %v3131_v0 = vmul.f32 %v3130_v57, %v6223_v58  ;;  %v3483_v13 = vmul.f32 %v6195_v29, %v3481_v34  ;;  %s4008_s30 = sld [smem:[#allocation4 + $0xff]] }
 0x31b   : > { %v2982_v5 = vmul.f32 %v2981_v30, %v5933_v26 }
 0x31c   : > { %v2887_v16 = vpop.permute.xlu0 %2886  ;;  %3091 = vrot.lane.b32.xlu1 %v3086_v4, %s4340_s10 }
 0x31d   : > { %v2890_v19 = vsel %vm784_vm1, %v2887_v16, %v2889_v6  ;;  %v3142_v16 = vstv %s6221_s15  ;;  %s4040_s15 = sld [smem:[#allocation4 + $0x11f]] }
 0x31e   : > { %v2892_v17 = vadd.f32 %v2890_v19, %v2880_v14  ;;  %3430 = vrot.lane.b32.xlu0 %v3425_v9, %s4341_s12  ;;  %v2906_v31 = vpop.permute.xlu1 %2905  ;;  %v3482_v14 = vmul.f32 %v3481_v34, %v6223_v58  ;;  %v3188_v34 = vstv %s6285_s17  ;;  %s3968_s17 = sld [smem:[#allocation4 + $0xd7]] }
 0x320   : > { %v2896_v36 = vadd.f32 %v2895_v28, %v2892_v17  ;;  %v2904_v22 = vpop.permute.xlu0 %2903  ;;  %3442 = vrot.lane.b32.xlu1 %v3437_v35, %s4340_s10  ;;  %v3144_v17 = vmul.f32 %v6195_v29, %v3142_v16 }
 0x321   : > { %v2907_v24 = vsel %vm771_vm0, %v2904_v22, %v2906_v31  ;;  %v3143_v31 = vmul.f32 %v3142_v16, %v6223_v58 }
 0x322   : > { %v2909_v15 = vadd.f32 %v2907_v24, %v2896_v36  ;;  %3440 = vrot.lane.b32.xlu0 %v3436_v18, %s4340_s10  ;;  %v2918_v45 = vpop.permute.xlu1 %2917  ;;  %v3010_v18 = vstv %s6229_s27  ;;  %v3493_v36 = vstv %s6234_s3  ;;  %s3760_s27 = sld [smem:[#allocation4 + $0x7]] }
 0x323   : > { %v3494_v33 = vmul.f32 %v3493_v36, %v6223_v58  ;;  %s4047_s3 = sld [smem:[#allocation7 + $0x7]] }
 0x324   : > { %v2916_v54 = vpop.permute.xlu0 %2915  ;;  %3108 = vrot.lane.b32.xlu1 %v3103_v25, %s4341_s12  ;;  %v3011_v25 = vmul.f32 %v3010_v18, %v5954_v23  ;;  %v3200_v18 = vstv %s4039_s11  ;;  %s3784_s11 = sld [smem:[#allocation4 + $0x1f]] }
 0x325   : > { %v2919_v37 = vsel %vm784_vm1, %v2916_v54, %v2918_v45  ;;  %v3159_v45 = vstv %s6243_s13  ;;  %s3952_s13 = sld [smem:[#allocation4 + $0xc7]] }
 0x326   : > { %v2921_v53 = vadd.f32 %v2919_v37, %v2909_v15  ;;  %3106 = vrot.lane.b32.xlu0 %v3102_v32, %s4341_s12  ;;  %v2935_v41 = vpop.permute.xlu1 %2934  ;;  %v3495_v15 = vmul.f32 %v6195_v29, %v3493_v36  ;;  %v3202_v36 = vmul.f32 %v6195_v29, %v3200_v18 }
 0x328   : > { %v2925_v12 = vadd.f32 %v2924_v43, %v2921_v53  ;;  %v2933_v42 = vpop.permute.xlu0 %2932  ;;  %3459 = vrot.lane.b32.xlu1 %v3454_v38, %s4341_s12  ;;  %v6265_v43 = vld [vmem:[#allocation2 + $0xa0] sm:$0xff]  ;;  %v3161_v53 = vmul.f32 %v6195_v29, %v3159_v45 }
 0x329   : > { %v2936_v44 = vsel %vm771_vm0, %v2933_v42, %v2935_v41  ;;  %v3160_v41 = vmul.f32 %v3159_v45, %v6265_v43 }
 0x32a   : > { %v2938_v47 = vadd.f32 %v2936_v44, %v2925_v12  ;;  %3457 = vrot.lane.b32.xlu0 %v3453_v39, %s4341_s12  ;;  %v2947_v7 = vpop.permute.xlu1 %2946  ;;  %v3039_v39 = vstv %s6249_s4  ;;  %v3510_v12 = vstv %s6254_s0  ;;  %s3864_s4 = sld [smem:[#allocation4 + $0x6f]] }
 0x32b   : > { %v3511_v52 = vmul.f32 %v3510_v12, %v6265_v43  ;;  %s3960_s0 = sld [smem:[#allocation4 + $0xcf]] }
 0x32c   : > { %v2945_v40 = vpop.permute.xlu0 %2944  ;;  %3120 = vrot.lane.b32.xlu1 %v3115_v49, %s4340_s10  ;;  %v3040_v49 = vmul.f32 %v3039_v39, %v5975_v1  ;;  %v3214_v39 = vstv %s4047_s3  ;;  %s3975_s3 = sld [smem:[#allocation4 + $0xde]] }
 0x32d   : > { %v2948_v56 = vsel %vm784_vm1, %v2945_v40, %v2947_v7  ;;  %v3171_v7 = vstv %s6263_s16  ;;  %s3776_s16 = sld [smem:[#allocation4 + $0x17]] }
 0x32e   : > { %v2950_v55 = vadd.f32 %v2948_v56, %v2938_v47  ;;  %3118 = vrot.lane.b32.xlu0 %v3114_v48, %s4340_s10  ;;  %v2964_v60 = vpop.permute.xlu1 %2963  ;;  %v3512_v47 = vmul.f32 %v6195_v29, %v3510_v12  ;;  %v3172_v57 = vmul.f32 %v3171_v7, %v6265_v43 }
 0x330   : > { %v2954_v2 = vadd.f32 %v2953_v51, %v2950_v55  ;;  %v2962_v59 = vpop.permute.xlu0 %2961  ;;  %3471 = vrot.lane.b32.xlu1 %v3466_v11, %s4340_s10  ;;  %v3173_v11 = vmul.f32 %v6195_v29, %v3171_v7  ;;  %v3068_v55 = vstv %s6271_s29  ;;  %v4197_v7 = vld [vmem:[#allocation2 + $0x10] sm:$0xff]  ;;  %s3872_s29 = sld [smem:[#allocation4 + $0x77]] }
 0x331   : > { %v2965_v3 = vsel %vm771_vm0, %v2962_v59, %v2964_v60  ;;  %v3522_v60 = vstv %s6276_s6  ;;  %s3967_s6 = sld [smem:[#allocation4 + $0xd6]] }
 0x332   : > { %v2967_v62 = vadd.f32 %v2965_v3, %v2954_v2  ;;  %3469 = vrot.lane.b32.xlu0 %v3465_v63, %s4340_s10  ;;  %v2976_v8 = vpop.permute.xlu1 %2975  ;;  %v3069_v3 = vmul.f32 %v3068_v55, %v5998_v50  ;;  %v3524_v30 = vmul.f32 %v6195_v29, %v3522_v60 }
 0x334   : > { %v2974_v4 = vpop.permute.xlu0 %2973  ;;  %3137 = vrot.lane.b32.xlu1 %v3132_v61, %s4341_s12 }
 0x335   : > { %v2977_v9 = vsel %vm784_vm1, %v2974_v4, %v2976_v8  ;;  %v6301_v4 = vld [vmem:[#allocation2 + $0xb0] sm:$0xff] }
 0x336   : > { %v2979_v6 = vadd.f32 %v2977_v9, %v2967_v62  ;;  %3135 = vrot.lane.b32.xlu0 %v3131_v0, %s4341_s12  ;;  %v2993_v28 = vpop.permute.xlu1 %2992  ;;  %v3523_v0 = vmul.f32 %v3522_v60, %v6265_v43  ;;  %v3189_v16 = vmul.f32 %v3188_v34, %v6301_v4 }
 0x338   : > { %v2983_v19 = vadd.f32 %v2982_v5, %v2979_v6  ;;  %v2991_v35 = vpop.permute.xlu0 %2990  ;;  %3488 = vrot.lane.b32.xlu1 %v3483_v13, %s4341_s12  ;;  %v3190_v6 = vmul.f32 %v6195_v29, %v3188_v34 }
 0x339   : > { %v2994_v26 = vsel %vm771_vm0, %v2991_v35, %v2993_v28  ;;  %v3539_v28 = vstv %s4008_s30  ;;  %s3783_s30 = sld [smem:[#allocation4 + $0x1e]] }
 0x33a   : > { %v2996_v20 = vadd.f32 %v2994_v26, %v2983_v19  ;;  %3486 = vrot.lane.b32.xlu0 %v3482_v14, %s4341_s12  ;;  %v3005_v22 = vpop.permute.xlu1 %3004  ;;  %v3541_v26 = vmul.f32 %v6195_v29, %v3539_v28 }
 0x33c   : > { %v3003_v24 = vpop.permute.xlu0 %3002  ;;  %3149 = vrot.lane.b32.xlu1 %v3144_v17, %s4340_s10  ;;  %v3540_v17 = vmul.f32 %v3539_v28, %v6301_v4 }
 0x33d   : > { %v3006_v27 = vsel %vm784_vm1, %v3003_v24, %v3005_v22  ;;  %v3201_v22 = vmul.f32 %v3200_v18, %v6301_v4  ;;  %v3551_v24 = vstv %s4040_s15  ;;  %s3879_s15 = sld [smem:[#allocation4 + $0x7e]] }
 0x33e   : > { %v3008_v32 = vadd.f32 %v3006_v27, %v2996_v20  ;;  %3147 = vrot.lane.b32.xlu0 %v3143_v31, %s4340_s10  ;;  %v3022_v54 = vpop.permute.xlu1 %3021 }
 0x340   : > { %v3012_v23 = vadd.f32 %v3011_v25, %v3008_v32  ;;  %v3020_v37 = vpop.permute.xlu0 %3019  ;;  %3500 = vrot.lane.b32.xlu1 %v3495_v15, %s4340_s10  ;;  %v3553_v15 = vmul.f32 %v6195_v29, %v3551_v24  ;;  %v3552_v32 = vmul.f32 %v3551_v24, %v6301_v4 }
 0x341   : > { %v3023_v38 = vsel %vm771_vm0, %v3020_v37, %v3022_v54  ;;  %v3216_v54 = vstv %s3760_s27  ;;  %s3880_s27 = sld [smem:[#allocation4 + $0x7f]] }
 0x342   : > { %v3025_v10 = vadd.f32 %v3023_v38, %v3012_v23  ;;  %3498 = vrot.lane.b32.xlu0 %v3494_v33, %s4340_s10  ;;  %v3034_v42 = vpop.permute.xlu1 %3033  ;;  %v4196_v38 = vld [vmem:[#allocation2] sm:$0xff] }
 0x344   : > { %v3032_v44 = vpop.permute.xlu0 %3031  ;;  %3166 = vrot.lane.b32.xlu1 %v3161_v53, %s4341_s12  ;;  %v3217_v53 = vmul.f32 %v4196_v38, %v3216_v54 }
 0x345   : > { %v3035_v46 = vsel %vm784_vm1, %v3032_v44, %v3034_v42 }
 0x346   : > { %v3037_v48 = vadd.f32 %v3035_v46, %v3025_v10  ;;  %3164 = vrot.lane.b32.xlu0 %v3160_v41, %s4341_s12  ;;  %v3051_v40 = vpop.permute.xlu1 %3050  ;;  %v3218_v41 = vadd.f32 %v3217_v53, %v3214_v39 }
 0x348   : > { %v3041_v51 = vadd.f32 %v3040_v49, %v3037_v48  ;;  %v3049_v56 = vpop.permute.xlu0 %3048  ;;  %3517 = vrot.lane.b32.xlu1 %v3512_v47, %s4341_s12 }
 0x349   : > { %v3052_v1 = vsel %vm771_vm0, %v3049_v56, %v3051_v40 }
 0x34a   : > { %v3054_v63 = vadd.f32 %v3052_v1, %v3041_v51  ;;  %3515 = vrot.lane.b32.xlu0 %v3511_v52, %s4341_s12  ;;  %v3063_v2 = vpop.permute.xlu1 %3062 }
 0x34c   : > { %v3061_v59 = vpop.permute.xlu0 %3060  ;;  %3178 = vrot.lane.b32.xlu1 %v3173_v11, %s4340_s10 }
 0x34d   : > { %v3064_v61 = vsel %vm784_vm1, %v3061_v59, %v3063_v2 }
 0x34e   : > { %v3066_v62 = vadd.f32 %v3064_v61, %v3054_v63  ;;  %3176 = vrot.lane.b32.xlu0 %v3172_v57, %s4340_s10  ;;  %v3080_v8 = vpop.permute.xlu1 %3079  ;;  %v3274_v57 = vstv %s3952_s13  ;;  %v4198_v61 = vld [vmem:[#allocation2 + $0x20] sm:$0xff]  ;;  %s4056_s13 = sshll.u32 %s4323_s22, 4 }
 0x350   : > { %v3070_v5 = vadd.f32 %v3069_v3, %v3066_v62  ;;  %v3078_v9 = vpop.permute.xlu0 %3077  ;;  %3529 = vrot.lane.b32.xlu1 %v3524_v30, %s4340_s10  ;;  %v3275_v30 = vmul.f32 %v4198_v61, %v3274_v57  ;;  %v4202_v57 = vld [vmem:[#allocation2 + $0x60] sm:$0xff] }
 0x351   : > { %v3081_v13 = vsel %vm771_vm0, %v3078_v9, %v3080_v8 }
 0x352   : > { %v6306_v14 = vadd.f32 %v3081_v13, %v3070_v5  ;;  %3527 = vrot.lane.b32.xlu0 %v3523_v0, %s4340_s10  ;;  %v3226_v19 = vpop.permute.xlu1 %3225 }
 0x354   : > { %v6310_v35 = vpop.permute.xlu0 %3089  ;;  %3195 = vrot.lane.b32.xlu1 %v3190_v6, %s4341_s12 }
 0x356   : > { %3193 = vrot.lane.b32.xlu0 %v3189_v16, %s4341_s12  ;;  %v3238_v20 = vpop.permute.xlu1 %3237 }
 0x358   : > { %v3228_v31 = vpop.permute.xlu0 %3227  ;;  %3546 = vrot.lane.b32.xlu1 %v3541_v26, %s4341_s12  ;;  %v4199_v26 = vld [vmem:[#allocation2 + $0x30] sm:$0xff] }
 0x359   : > { %v3229_v12 = vsel %vm771_vm0, %v3226_v19, %v3228_v31 }
 0x35a   : > { %3544 = vrot.lane.b32.xlu0 %v3540_v17, %s4341_s12  ;;  %v3255_v25 = vpop.permute.xlu1 %3254  ;;  %s3856_s12 = sld [smem:[#allocation4 + $0x67]]  ;;  %v3231_v47 = vadd.f32 %v3229_v12, %v3218_v41 }
 0x35c   : > { %v3240_v27 = vpop.permute.xlu0 %3239  ;;  %3207 = vrot.lane.b32.xlu1 %v3202_v36, %s4340_s10 }
 0x35d   : > { %v3241_v49 = vsel %vm784_vm1, %v3238_v20, %v3240_v27 }
 0x35e   : > { %3205 = vrot.lane.b32.xlu0 %v3201_v22, %s4340_s10  ;;  %v3267_v33 = vpop.permute.xlu1 %3266  ;;  %v3243_v52 = vadd.f32 %v3241_v49, %v3231_v47  ;;  %v4201_v47 = vld [vmem:[#allocation2 + $0x50] sm:$0xff] }
 0x360   : > { %v3257_v45 = vpop.permute.xlu0 %3256  ;;  %3558 = vrot.lane.b32.xlu1 %v3553_v15, %s4340_s10  ;;  %v3245_v46 = vstv %s3856_s12  ;;  %s3976_s12 = sld [smem:[#allocation4 + $0xdf]] }
 0x361   : > { %v3246_v40 = vmul.f32 %v4197_v7, %v3245_v46  ;;  %v3258_v55 = vsel %vm771_vm0, %v3255_v25, %v3257_v45  ;;  %v3332_v25 = vstv %s3864_s4  ;;  %v4200_v45 = vld [vmem:[#allocation2 + $0x40] sm:$0xff]  ;;  %s3580_s4 = sshll.u32 %s4906_s26, 4  ;;  %s6372_s4 = int_to_ptr.vmem [resolvable:$true] %s3580_s4 }
 0x362   : > { %3556 = vrot.lane.b32.xlu0 %v3552_v32, %s4340_s10  ;;  %v3284_v23 = vpop.permute.xlu1 %3283  ;;  %s3768_s10 = sld [smem:[#allocation4 + $0xf]]  ;;  %v3333_v54 = vmul.f32 %v4200_v45, %v3332_v25  ;;  %v3126_v45 = vstv %s3783_s30 }
 0x363   : > { %v3247_v1 = vadd.f32 %v3246_v40, %v3243_v52 }
 0x364   : > { %v3269_v37 = vpop.permute.xlu0 %3268 }
 0x365   : > { %v3270_v63 = vsel %vm784_vm1, %v3267_v33, %v3269_v37  ;;  %v3260_v2 = vadd.f32 %v3258_v55, %v3247_v1 }
 0x366   : > { %v3296_v10 = vpop.permute.xlu1 %3295 }
 0x367   : > { %v3272_v3 = vadd.f32 %v3270_v63, %v3260_v2 }
 0x368   : > { %v3286_v29 = vpop.permute.xlu0 %3285  ;;  %v3303_v6 = vstv %s3768_s10  ;;  %s3577_s10 = sadd.s32 %s4319_s21, %s4056_s13 }
 0x369   : > { %v3276_v34 = vadd.f32 %v3275_v30, %v3272_v3  ;;  %v3287_v8 = vsel %vm771_vm0, %v3284_v23, %v3286_v29  ;;  %v3304_v17 = vmul.f32 %v4199_v26, %v3303_v6  ;;  %s4057_s22 = sshll.u32 %s3577_s10, 7 }
 0x36a   : > { %v3313_v42 = vpop.permute.xlu1 %3312 }
 0x36b   : > { %v3289_v16 = vadd.f32 %v3287_v8, %v3276_v34  ;;  %v3419_v34 = vstv %s3872_s29  ;;  %s3566_s29 = scalar_lea.sflag [#allocation5], %s4498_s7 }
 0x36c   : > { %v3298_v44 = vpop.permute.xlu0 %3297 }
 0x36d   : > { %v3299_v13 = vsel %vm784_vm1, %v3296_v10, %v3298_v44 }
 0x36e   : > { %v3325_v48 = vpop.permute.xlu1 %3324  ;;  %v3301_v19 = vadd.f32 %v3299_v13, %v3289_v16  ;;  %v3420_v13 = vmul.f32 %v3419_v34, %v5998_v50  ;;  %v3097_v16 = vstv %s3967_s6  ;;  %s4233_s6 = scalar_lea.vmem %s6372_s4, 1024 }
 0x36f   : > { %p4234_p0 = scmp.ne.s32.totalorder %s6372_s4, %s4233_s6 }
 0x370   : > { %v3315_v51 = vpop.permute.xlu0 %3314  ;;  %v3305_v31 = vadd.f32 %v3304_v17, %v3301_v19 }
 0x371   : > { %v3316_v22 = vsel %vm771_vm0, %v3313_v42, %v3315_v51  ;;  %v3361_v42 = vstv %s3960_s0  ;;  %p4235_p5 = pnand %p4234_p0, %p6461_p2 }
 0x372   : > { %v3342_v56 = vpop.permute.xlu1 %3341  ;;  %v3318_v15 = vadd.f32 %v3316_v22, %v3305_v31 }
 0x373   : > { %p4236_p11 = pneg %p4235_p5 }
 0x374   : > { %v3327_v11 = vpop.permute.xlu0 %3326 }
 0x375   : > { %v3328_v24 = vsel %vm784_vm1, %v3325_v48, %v3327_v11  ;;  %v3362_v48 = vmul.f32 %v4201_v47, %v3361_v42 }
 0x376   : > { %v3354_v60 = vpop.permute.xlu1 %3353  ;;  %v3330_v33 = vadd.f32 %v3328_v24, %v3318_v15 }
 0x378   : > { %v3344_v59 = vpop.permute.xlu0 %3343  ;;  %v3334_v39 = vadd.f32 %v3333_v54, %v3330_v33 }
 0x379   : > { %v3345_v10 = vsel %vm771_vm0, %v3342_v56, %v3344_v59  ;;  %v3390_v56 = vstv %s3776_s16  ;;  %s6379_s16 = scalar_lea.hbm %s6439_s5, %s4057_s22 }
 0x37a   : > { %v3371_v62 = vpop.permute.xlu1 %3370  ;;  %v3347_v44 = vadd.f32 %v3345_v10, %v3334_v39  ;;  %v3127_v10 = vmul.f32 %v3126_v45, %v6223_v58 }
 0x37c   : > { %v3356_v0 = vpop.permute.xlu0 %3355 }
 0x37d   : > { %v3357_v12 = vsel %vm784_vm1, %v3354_v60, %v3356_v0  ;;  %v3391_v60 = vmul.f32 %v4202_v57, %v3390_v56 }
 0x37e   : > { %v3383_v5 = vpop.permute.xlu1 %3382  ;;  %v3359_v46 = vadd.f32 %v3357_v12, %v3347_v44 }
 0x380   : > { %v3373_v9 = vpop.permute.xlu0 %3372 }
 0x382   : > { %v3400_v28 = vpop.permute.xlu1 %3399 }
 0x384   : > { %v3385_v18 = vpop.permute.xlu0 %3384 }
 0x385   : > { %v3386_v51 = vsel %vm784_vm1, %v3383_v5, %v3385_v18  ;;  %v3098_v18 = vmul.f32 %v3097_v16, %v6179_v21  ;;  %v3535_v16 = vstv %s3976_s12 }
 0x386   : > { %v3412_v20 = vpop.permute.xlu1 %3411 }
 0x388   : > { %v3402_v36 = vpop.permute.xlu0 %3401 }
 0x389   : > { %v3403_v61 = vsel %vm771_vm0, %v3400_v28, %v3402_v36 }
 0x38a   : > { %v3429_v27 = vpop.permute.xlu1 %3428 }
 0x38c   : > { %v3414_v32 = vpop.permute.xlu0 %3413 }
 0x38e   : > { %v3092_v23 = vpop.permute.xlu1 %3091 }
 0x38f   : > { %v3093_v37 = vsel %vm784_vm1, %v6310_v35, %v3092_v23  ;;  %v3363_v35 = vadd.f32 %v3362_v48, %v3359_v46  ;;  %v3155_v48 = vstv %s3879_s15 }
 0x390   : > { %v3431_v38 = vpop.permute.xlu0 %3430  ;;  %v3095_v53 = vadd.f32 %v3093_v37, %v6306_v14  ;;  %v3374_v14 = vsel %vm771_vm0, %v3371_v62, %v3373_v9  ;;  %v3415_v62 = vsel %vm784_vm1, %v3412_v20, %v3414_v32  ;;  %v3448_v20 = vstv %s3968_s17  ;;  %s4342_s17 = smov [#allocation9]  }
 0x391   : > { %v3376_v11 = vadd.f32 %v3374_v14, %v3363_v35  ;;  %v3432_v28 = vsel %vm771_vm0, %v3429_v27, %v3431_v38  ;;  %v3449_v32 = vmul.f32 %v3448_v20, %v6179_v21  ;;  %v3156_v56 = vmul.f32 %v3155_v48, %v6265_v43  ;;  %s4237_s30 = sshll.u32 %s4342_s17, 4  ;;  %s4238_s30 = int_to_ptr.vmem [resolvable:$false] %s4237_s30 }
 0x392   : > { %v3443_v29 = vpop.permute.xlu1 %3442  ;;  %v3099_v15 = vadd.f32 %v3098_v18, %v3095_v53  ;;  %v3536_v18 = vmul.f32 %v3535_v16, %v6301_v4  ;;  %p4240_p12 = scmp.lt.s32.totalorder %s6372_s4, %s4238_s30 }
 0x393   : > { %v3388_v63 = vadd.f32 %v3386_v51, %v3376_v11  ;;  %v3506_v11 = vstv %s3880_s27 }
 0x394   : > { %v3441_v41 = vpop.permute.xlu0 %3440 }
 0x395   : > { %v3392_v3 = vadd.f32 %v3391_v60, %v3388_v63  ;;  %v3444_v31 = vsel %vm784_vm1, %v3441_v41, %v3443_v29  ;;  %v3477_v41 = vstv %s3784_s11  ;;  %s4239_s11 = scalar_lea.vmem %s4238_s30, 2048 }
 0x396   : > { %v3109_v49 = vpop.permute.xlu1 %3108  ;;  %v3478_v46 = vmul.f32 %v3477_v41, %v6223_v58  ;;  %p4241_p1 = scmp.lt.s32.totalorder %s4239_s11, %s4233_s6 }
 0x397   : > { %v3405_v8 = vadd.f32 %v3403_v61, %v3392_v3 }
 0x398   : > { %v3107_v52 = vpop.permute.xlu0 %3106  ;;  %p4242_p4 = por %p4241_p1, %p4240_p12 }
 0x399   : > { %v3417_v9 = vadd.f32 %v3415_v62, %v3405_v8  ;;  %v3110_v25 = vsel %vm771_vm0, %v3107_v52, %v3109_v49 }
 0x39a   : > { %v3460_v7 = vpop.permute.xlu1 %3459  ;;  %v3112_v27 = vadd.f32 %v3110_v25, %v3099_v15  ;;  %p4243_p6 = pnand %p4242_p4, %p4236_p11 }
 0x39b   : > { %v3421_v26 = vadd.f32 %v3420_v13, %v3417_v9 }
 0x39c   : > { %v3458_v40 = vpop.permute.xlu0 %3457 }
 0x39d   : > { %v3434_v22 = vadd.f32 %v3432_v28, %v3421_v26  ;;  %v3461_v37 = vsel %vm771_vm0, %v3458_v40, %v3460_v7 }
 0x39e   : > { %v3121_v1 = vpop.permute.xlu1 %3120 }
 0x39f   : > { %v3446_v50 = vadd.f32 %v3444_v31, %v3434_v22 }
 0x3a0   : > { %v3119_v55 = vpop.permute.xlu0 %3118 }
 0x3a1   : > { %v3122_v33 = vsel %vm784_vm1, %v3119_v55, %v3121_v1  ;;  %v3450_v38 = vadd.f32 %v3449_v32, %v3446_v50 }
 0x3a2   : > { %v3472_v2 = vpop.permute.xlu1 %3471  ;;  %v3124_v39 = vadd.f32 %v3122_v33, %v3112_v27 }
 0x3a3   : > { %v3463_v53 = vadd.f32 %v3461_v37, %v3450_v38 }
 0x3a4   : > { %v3470_v59 = vpop.permute.xlu0 %3469  ;;  %v3128_v49 = vadd.f32 %v3127_v10, %v3124_v39 }
 0x3a5   : > { %v3473_v29 = vsel %vm784_vm1, %v3470_v59, %v3472_v2  ;;  %v3507_v59 = vmul.f32 %v3506_v11, %v6265_v43 }
 0x3a6   : > { %v3138_v30 = vpop.permute.xlu1 %3137  ;;  %v3475_v44 = vadd.f32 %v3473_v29, %v3463_v53 }
 0x3a8   : > { %v3136_v0 = vpop.permute.xlu0 %3135  ;;  %v3479_v14 = vadd.f32 %v3478_v46, %v3475_v44 }
 0x3a9   : > { %v3139_v42 = vsel %vm771_vm0, %v3136_v0, %v3138_v30  ;;  %v3184_v30 = vstv %s3975_s3 }
 0x3aa   : > { %v3489_v5 = vpop.permute.xlu1 %3488  ;;  %v3141_v7 = vadd.f32 %v3139_v42, %v3128_v49  ;;  %v3185_v9 = vmul.f32 %v3184_v30, %v6301_v4 }
 0x3ac   : > { %v3487_v6 = vpop.permute.xlu0 %3486 }
 0x3ad   : > { %v3490_v40 = vsel %vm771_vm0, %v3487_v6, %v3489_v5 }
 0x3ae   : > { %v3150_v19 = vpop.permute.xlu1 %3149  ;;  %v3492_v63 = vadd.f32 %v3490_v40, %v3479_v14 }
 0x3b0   : > { %v3148_v17 = vpop.permute.xlu0 %3147 }
 0x3b1   : > { %v3151_v47 = vsel %vm784_vm1, %v3148_v17, %v3150_v19 }
 0x3b2   : > { %v3501_v36 = vpop.permute.xlu1 %3500  ;;  %v3153_v51 = vadd.f32 %v3151_v47, %v3141_v7 }
 0x3b4   : > { %v3499_v24 = vpop.permute.xlu0 %3498  ;;  %v3157_v2 = vadd.f32 %v3156_v56, %v3153_v51 }
 0x3b5   : > { %v3502_v1 = vsel %vm784_vm1, %v3499_v24, %v3501_v36 }
 0x3b6   : > { %v3167_v54 = vpop.permute.xlu1 %3166  ;;  %v3504_v60 = vadd.f32 %v3502_v1, %v3492_v63 }
 0x3b8   : > { %v3165_v23 = vpop.permute.xlu0 %3164  ;;  %v3508_v8 = vadd.f32 %v3507_v59, %v3504_v60 }
 0x3b9   : > { %v3168_v57 = vsel %vm771_vm0, %v3165_v23, %v3167_v54 }
 0x3ba   : > { %v3518_v12 = vpop.permute.xlu1 %3517  ;;  %v3170_v0 = vadd.f32 %v3168_v57, %v3157_v2 }
 0x3bc   : > { %v3516_v21 = vpop.permute.xlu0 %3515 }
 0x3bd   : > { %v3519_v34 = vsel %vm771_vm0, %v3516_v21, %v3518_v12 }
 0x3be   : > { %v3179_v52 = vpop.permute.xlu1 %3178  ;;  %v3521_v19 = vadd.f32 %v3519_v34, %v3508_v8 }
 0x3c0   : > { %v3177_v35 = vpop.permute.xlu0 %3176 }
 0x3c1   : > { %v3180_v3 = vsel %vm784_vm1, %v3177_v35, %v3179_v52 }
 0x3c2   : > { %v3530_v55 = vpop.permute.xlu1 %3529  ;;  %v3182_v5 = vadd.f32 %v3180_v3, %v3170_v0 }
 0x3c4   : > { %v3528_v58 = vpop.permute.xlu0 %3527  ;;  %v3186_v28 = vadd.f32 %v3185_v9, %v3182_v5 }
 0x3c5   : > { %v3531_v13 = vsel %vm784_vm1, %v3528_v58, %v3530_v55 }
 0x3c6   : > { %v3196_v61 = vpop.permute.xlu1 %3195  ;;  %v3533_v17 = vadd.f32 %v3531_v13, %v3521_v19 }
 0x3c8   : > { %v3194_v62 = vpop.permute.xlu0 %3193  ;;  %v3537_v25 = vadd.f32 %v3536_v18, %v3533_v17 }
 0x3c9   : > { %v3197_v26 = vsel %vm771_vm0, %v3194_v62, %v3196_v61 }
 0x3ca   : > { %v3547_v6 = vpop.permute.xlu1 %3546  ;;  %v3199_v20 = vadd.f32 %v3197_v26, %v3186_v28 }
 0x3cc   : > { %v3545_v43 = vpop.permute.xlu0 %3544 }
 0x3cd   : > { %v3548_v22 = vsel %vm771_vm0, %v3545_v43, %v3547_v6 }
 0x3ce   : > { %v3208_v31 = vpop.permute.xlu1 %3207  ;;  %v3550_v4 = vadd.f32 %v3548_v22, %v3537_v25 }
 0x3d0   : > { %v3206_v36 = vpop.permute.xlu0 %3205 }
 0x3d1   : > { %v3209_v24 = vsel %vm784_vm1, %v3206_v36, %v3208_v31 }
 0x3d2   : > { %v3211_v50 = vadd.f32 %v3209_v24, %v3199_v20  ;;  %v3559_v15 = vpop.permute.xlu1 %3558 }
 0x3d4   : > { %4053 = vst [vmem:[%s4906_s26 + $0x30] sm:$0xff] %v3211_v50  ;;  %v3557_v32 = vpop.permute.xlu0 %3556 }
 0x3d5   : > { %v3560_v33 = vsel %vm784_vm1, %v3557_v32, %v3559_v15 }
 0x3d6   : > { %v3562_v45 = vadd.f32 %v3560_v33, %v3550_v4 }
 0x3d8   : > { %4054 = vst [vmem:[%s4906_s26 + $0x38] sm:$0xff] %v3562_v45 }
 0x3d9   : > { %4246 = shalt.err (!%p4243_p6)
}
 0x3da   : > { %s4247_s26 = scalar_lea.hbm %s6379_s16, 1024  ;;  %s4251_s3 = scalar_lea.hbm %s6439_s5, 4096 }
 0x3db   : > { %p4248_p7 = scmp.ne.s32.totalorder %s6379_s16, %s4247_s26  ;;  %p4252_p8 = scmp.lt.u32.totalorder %s6379_s16, %s6439_s5 }
 0x3dc   : > { %p4253_p9 = scmp.lt.u32.totalorder %s4251_s3, %s4247_s26  ;;  %p4255_p0 = scmp.lt.u32.totalorder %s4247_s26, %s6379_s16 }
 0x3dd   : > { %p4249_p10 = pnand %p4248_p7, %p6461_p2 }
 0x3de   : > { %p4254_p13 = por %p4253_p9, %p4252_p8 }
 0x3df   : > { %p4250_p3 = pneg %p4249_p10 }
 0x3e0   : > { %p4256_p5 = por %p4255_p0, %p4254_p13 }
 0x3e2   : > { %p4257_p11 = pnand %p4256_p5, %p4250_p3 }
 0x3e4   : > { %4260 = shalt.err (!%p4257_p11)
}
 0x3e5   : > { %s4343_s10 = smov 128   ;;  %s4344_s22 = smov 256  }
 0x3e6   : > { %s4345_s21 = smov 8  }
 0x3e7   : > { %4068 = dma.vmem_to_hbm [thread:$0]  (%p6461_p2), %s6372_s4, 1024, %s6379_s16, %s3566_s29, %s4343_s10, %s4344_s22, %s4345_s21  }
 0x3e8 PF: > { %p4085_p12 = scmp.ge.s32.totalorder %s4335_s25, 2  ;;  %s3595_s0 = sand.u32 1, %s4307_s18  }
 0x3e9   : > { %p6462_p1 = scmp.ne.s32.totalorder %s6451_s9, 0  ;;  %s3596_s6 = scalar_lea.sflag [#allocation5], %s3595_s0 }
 0x3eb   : > { %p4078_p4 = pnand %p4085_p12, %p6462_p1 }
 0x3ed   : > { %4302 = dma.done.wait (!%p4078_p4), %s3596_s6, 1024  }
 0x3ee   : > { %4304 = vsyncadd (!%p4078_p4), %s3596_s6, 4294966272  ;;  %s20_s25 = sadd.s32 1, %s4335_s25   ;;  %s6463_s8 = sld [smem:[#allocation13_spill]] }
 0x3ef   : > { %p17_p6 = scmp.ge.s32.totalorder %s20_s25, 6   ;;  %s6464_s18 = smov %s4311_s19 }
 0x3f0   : > { %s6465_s19 = smov %s4315_s20  ;;  %s6466_s20 = smov %s4458_s14 }
 0x3f1   : > { %s6467_s21 = smov %s4327_s23  ;;  %s6468_s22 = smov %s4331_s24 }
 0x3f2   : > { %s6469_s23 = smov %s6472_s28  ;;  %19 = sbr.rel (!%p17_p6) target bundleno = 11 (0xb), region = 160 }
 0x3f4   : > { %s6470_s24 = smov %s6463_s8 }
 0x3f9   :  { %3601 = vsyncpa [#allocation5], 1 }
 0x3fa   :  { %3603 = vsyncpa [#allocation5 + $0x1], 1 }
 0x3fb   :  { %3604 = vsyncpa [#allocation6], 1 }
 0x3fc   :  { %3606 = vsyncpa [#allocation6 + $0x1], 1 }
 0x3fd   :  { %3607 = vsyncpa [#allocation8], 1 }

</bundles_post_ra>
